<compile_context>
chip_gen: v6e
topology: v6e:2x2x1
jax: 0.10.0
libtpu: 0.0.40
codegen_flags: <defaults>
</compile_context>

<pallas_src>
import numpy as np
import jax
import jax.numpy as jnp
from jax.experimental import pallas as pl
from jax.experimental.pallas import tpu as pltpu

D_MODEL = 256
N_HEADS = 2
HEAD_DIM = D_MODEL // N_HEADS
N_MEL = 80
MEL_PAD = 128            # lane-dense mel projection width (sliced to 80 outside)
NUM_EMB = 83
FFT_BLOCKS = 4
DP_FILTER = 256
MAX_DUR = 8              # per-phoneme duration clip -> static max mel length
VMEM_LIMIT = 32 * 1024 * 1024

_FFT_ORDER = ("wqkv", "bqkv", "wo", "bo", "g1", "be1",
              "w1", "b1", "w2", "b2", "g2", "be2")
_DP_ORDER = ("w1a", "w1b", "w1c", "b1", "g1", "be1",
             "w2a", "w2b", "w2c", "b2", "g2", "be2", "wl", "bl")


# ----------------------------------------------------------------------------
# in-kernel helpers
# ----------------------------------------------------------------------------
def _layernorm(x, g, b, eps=1e-5):
    # single-pass statistics: E[x] and E[x^2] issued together
    mu = jnp.mean(x, axis=-1, keepdims=True)
    ex2 = jnp.mean(x * x, axis=-1, keepdims=True)
    var = ex2 - mu * mu
    return (x - mu) * jax.lax.rsqrt(var + eps) * g + b


def _fft_layer(x, key_bias,
               wqkv, bqkv, wo, bo, g1, be1, w1, b1, w2, b2, g2, be2, attn):
    """One FFT block on a single-batch (T, D) f32 activation block.

    `attn` is a (T, D) f32 VMEM scratch; each head's p@v is written directly
    into its lane slice (bounds attention live ranges to one score tile).
    The attention scale is pre-folded into the Q columns of wqkv.
    """
    D = x.shape[-1]
    hd = D // N_HEADS

    xb = x.astype(jnp.bfloat16)
    # fused Q/K/V projection: one wide N=3D MXU push
    qkv = jnp.dot(xb, wqkv[0], preferred_element_type=jnp.float32) + bqkv[0]

    for h in range(N_HEADS):                               # static, 2 heads
        c0 = h * hd
        qh = qkv[:, c0:c0 + hd].astype(jnp.bfloat16)
        kh = qkv[:, D + c0:D + c0 + hd].astype(jnp.bfloat16)
        vh = qkv[:, 2 * D + c0:2 * D + c0 + hd].astype(jnp.bfloat16)
        # q @ k^T without an explicit transpose
        s = jax.lax.dot_general(qh, kh, (((1,), (1,)), ((), ())),
                                preferred_element_type=jnp.float32)
        if key_bias is not None:                           # mask padded keys
            s = s + key_bias
        s = s - jnp.max(s, axis=-1, keepdims=True)
        p = jnp.exp(s)
        p = p * pl.reciprocal(jnp.sum(p, axis=-1, keepdims=True), approx=True)
        attn[:, c0:c0 + hd] = jnp.dot(p.astype(jnp.bfloat16), vh,
                                      preferred_element_type=jnp.float32)

    att = jnp.dot(attn[...].astype(jnp.bfloat16), wo[0],
                  preferred_element_type=jnp.float32) + bo[0]
    x1 = _layernorm(x + att, g1[0], be1[0])

    # cast ReLU output to bf16 once; only the bf16 copy stays live
    h1 = jnp.maximum(jnp.dot(x1.astype(jnp.bfloat16), w1[0],
                             preferred_element_type=jnp.float32) + b1[0],
                     0.0).astype(jnp.bfloat16)
    ffn = jnp.dot(h1, w2[0], preferred_element_type=jnp.float32) + b2[0]
    return _layernorm(x1 + ffn, g2[0], be2[0])


# ----------------------------------------------------------------------------
# fused multi-layer FFT stack kernels (encoder / mel decoder), grid = (B, L)
# ----------------------------------------------------------------------------
def _encoder_kernel(x_ref, pe_ref,
                    wqkv, bqkv, wo, bo, g1, be1, w1, b1, w2, b2, g2, be2,
                    o_ref, act, attn):
    l = pl.program_id(1)

    @pl.when(l == 0)
    def _():                                   # fused PE1 add
        act[...] = x_ref[...] + pe_ref[...]

    y = _fft_layer(act[...], None,
                   wqkv, bqkv, wo, bo, g1, be1, w1, b1, w2, b2, g2, be2, attn)
    act[...] = y

    @pl.when(l == pl.num_programs(1) - 1)
    def _():                                   # fused PE2 add on the way out
        o_ref[...] = (y + pe_ref[...]).astype(o_ref.dtype)


def _decoder_kernel(x_ref, bias_ref, wm_ref, bm_ref,
                    wqkv, bqkv, wo, bo, g1, be1, w1, b1, w2, b2, g2, be2,
                    o_ref, act, attn):
    l = pl.program_id(1)

    @pl.when(l == 0)
    def _():
        act[...] = x_ref[...]

    y = _fft_layer(act[...], bias_ref[0],
                   wqkv, bqkv, wo, bo, g1, be1, w1, b1, w2, b2, g2, be2, attn)
    act[...] = y

    @pl.when(l == pl.num_programs(1) - 1)
    def _():                                   # fused mel projection, lane-dense (128)
        o_ref[...] = (jnp.dot(y.astype(jnp.bfloat16), wm_ref[...],
                              preferred_element_type=jnp.float32)
                      + bm_ref[...]).astype(o_ref.dtype)


def _stack_specs(stack):
    specs = []
    for name in _FFT_ORDER:
        _, d0, d1 = stack[name].shape
        specs.append(pl.BlockSpec((1, d0, d1), lambda b, l: (l, 0, 0)))
    return specs


def encoder_stack(x2d, pe, stack, *, B, T):
    D = x2d.shape[-1]
    L = stack["wqkv"].shape[0]
    in_specs = [pl.BlockSpec((T, D), lambda b, l: (b, 0)),     # per-batch block
                pl.BlockSpec((T, D), lambda b, l: (0, 0))] + _stack_specs(stack)
    return pl.pallas_call(
        _encoder_kernel,
        out_shape=jax.ShapeDtypeStruct((B * T, D), jnp.float32),
        grid=(B, L),
        in_specs=in_specs,
        out_specs=pl.BlockSpec((T, D), lambda b, l: (b, 0)),
        scratch_shapes=[pltpu.VMEM((T, D), jnp.float32),       # resident activation
                        pltpu.VMEM((T, D), jnp.float32)],      # attention heads
        compiler_params=pltpu.CompilerParams(
            dimension_semantics=("parallel", "arbitrary"),
            vmem_limit_bytes=VMEM_LIMIT),
    )(x2d, pe, *[stack[k] for k in _FFT_ORDER])


def decoder_stack(x2d, key_bias, stack, wmel, bmel, *, B, T):
    D = x2d.shape[-1]
    L = stack["wqkv"].shape[0]
    in_specs = [pl.BlockSpec((T, D), lambda b, l: (b, 0)),
                pl.BlockSpec((1, 1, T), lambda b, l: (b, 0, 0)),
                pl.BlockSpec(wmel.shape, lambda b, l: (0, 0)),
                pl.BlockSpec(bmel.shape, lambda b, l: (0, 0))] + _stack_specs(stack)
    return pl.pallas_call(
        _decoder_kernel,
        out_shape=jax.ShapeDtypeStruct((B * T, MEL_PAD), jnp.float32),
        grid=(B, L),
        in_specs=in_specs,
        out_specs=pl.BlockSpec((T, MEL_PAD), lambda b, l: (b, 0)),
        scratch_shapes=[pltpu.VMEM((T, D), jnp.float32),
                        pltpu.VMEM((T, D), jnp.float32)],
        compiler_params=pltpu.CompilerParams(
            dimension_semantics=("parallel", "arbitrary"),
            vmem_limit_bytes=VMEM_LIMIT),
    )(x2d, key_bias, wmel, bmel, *[stack[k] for k in _FFT_ORDER])


# ----------------------------------------------------------------------------
# duration predictor: conv1d(k=3)->ReLU->LN x2 -> scalar head, grid = (B,)
# ----------------------------------------------------------------------------
def _shift_rows(v, direction):
    """direction=+1: out[t]=v[t-1], out[0]=0.  direction=-1: out[t]=v[t+1], out[T-1]=0."""
    T = v.shape[0]
    shift = 1 if direction > 0 else T - 1            # XLU sublane rotation
    rolled = pltpu.roll(v, shift=shift, axis=0)
    t = jax.lax.broadcasted_iota(jnp.int32, v.shape, 0)
    keep = (t > 0) if direction > 0 else (t < T - 1)  # zero the wrapped row
    return jnp.where(keep, rolled, 0.0)


def _dur_pred_kernel(x_ref,
                     w1a, w1b, w1c, b1, g1, be1,
                     w2a, w2b, w2c, b2, g2, be2,
                     wl, bl, o_ref):
    x = x_ref[...]                                    # (T, D) f32, one batch element

    def conv3(v, wa, wb, wc, bb):
        prev = _shift_rows(v, +1).astype(jnp.bfloat16)
        nxt = _shift_rows(v, -1).astype(jnp.bfloat16)
        acc = jnp.dot(prev, wa[...], preferred_element_type=jnp.float32)
        acc = acc + jnp.dot(v.astype(jnp.bfloat16), wb[...],
                            preferred_element_type=jnp.float32)
        acc = acc + jnp.dot(nxt, wc[...], preferred_element_type=jnp.float32)
        return acc + bb[...]

    h = _layernorm(jnp.maximum(conv3(x, w1a, w1b, w1c, b1), 0.0),
                   g1[...], be1[...])
    h2 = _layernorm(jnp.maximum(conv3(h, w2a, w2b, w2c, b2), 0.0),
                    g2[...], be2[...])

    # Linear(filt -> 1) as a VPU reduction (avoids an N=1 MXU push),
    # broadcast into a lane-dense 128-wide output slab.
    d = jnp.sum(h2 * wl[...], axis=-1, keepdims=True) + bl[...]      # (T, 1)
    o_ref[...] = jnp.broadcast_to(d, o_ref.shape)


def duration_predictor(x2d, p, *, B, T):
    D = x2d.shape[-1]
    in_specs = ([pl.BlockSpec((T, D), lambda b: (b, 0))] +
                [pl.BlockSpec(p[name].shape, lambda b: (0, 0)) for name in _DP_ORDER])
    return pl.pallas_call(
        _dur_pred_kernel,
        out_shape=jax.ShapeDtypeStruct((B * T, 128), jnp.float32),
        grid=(B,),
        in_specs=in_specs,
        out_specs=pl.BlockSpec((T, 128), lambda b: (b, 0)),
        compiler_params=pltpu.CompilerParams(
            dimension_semantics=("parallel",),
            vmem_limit_bytes=VMEM_LIMIT),
    )(x2d, *[p[k] for k in _DP_ORDER])


# ----------------------------------------------------------------------------
# parameter initialization (deterministic, synthetic)
# ----------------------------------------------------------------------------
def _w(key, shape, scale=0.02, dtype=jnp.bfloat16):
    return (jax.random.normal(key, shape, jnp.float32) * scale).astype(dtype)


def init_fft_stack(key, n_layers, d_model, hid):
    ks = jax.random.split(key, 4)
    # fold the 1/sqrt(head_dim) attention scale into the Q projection columns
    # (offline weight transform; bqkv is zero so its Q part needs no scaling)
    att_scale = 1.0 / float(np.sqrt(d_model // N_HEADS))
    wqkv = jax.random.normal(ks[0], (n_layers, d_model, 3 * d_model), jnp.float32) * 0.02
    wqkv = wqkv.at[:, :, :d_model].multiply(att_scale)
    return dict(
        wqkv=wqkv.astype(jnp.bfloat16),
        bqkv=jnp.zeros((n_layers, 1, 3 * d_model), jnp.float32),
        wo=_w(ks[1], (n_layers, d_model, d_model)),
        bo=jnp.zeros((n_layers, 1, d_model), jnp.float32),
        g1=jnp.ones((n_layers, 1, d_model), jnp.float32),
        be1=jnp.zeros((n_layers, 1, d_model), jnp.float32),
        w1=_w(ks[2], (n_layers, d_model, hid)),
        b1=jnp.zeros((n_layers, 1, hid), jnp.float32),
        w2=_w(ks[3], (n_layers, hid, d_model)),
        b2=jnp.zeros((n_layers, 1, d_model), jnp.float32),
        g2=jnp.ones((n_layers, 1, d_model), jnp.float32),
        be2=jnp.zeros((n_layers, 1, d_model), jnp.float32),
    )


def init_duration_predictor(key, d_model, filt):
    ks = jax.random.split(key, 7)
    return dict(
        w1a=_w(ks[0], (d_model, filt)), w1b=_w(ks[1], (d_model, filt)),
        w1c=_w(ks[2], (d_model, filt)),
        b1=jnp.zeros((1, filt), jnp.float32),
        g1=jnp.ones((1, filt), jnp.float32), be1=jnp.zeros((1, filt), jnp.float32),
        w2a=_w(ks[3], (filt, filt)), w2b=_w(ks[4], (filt, filt)),
        w2c=_w(ks[5], (filt, filt)),
        b2=jnp.zeros((1, filt), jnp.float32),
        g2=jnp.ones((1, filt), jnp.float32), be2=jnp.zeros((1, filt), jnp.float32),
        wl=(jax.random.normal(ks[6], (1, filt), jnp.float32) * 0.02),
        bl=jnp.full((1, 1), 0.7, jnp.float32),   # -> durations ~2 at init
    )


def sinusoidal_pe(T, d_model):
    pos = np.arange(T)[:, None].astype(np.float32)
    i = np.arange(d_model)[None, :].astype(np.float32)
    angle = pos / np.power(10000.0, (2.0 * (i // 2)) / d_model)
    pe = np.zeros((T, d_model), np.float32)
    pe[:, 0::2] = np.sin(angle[:, 0::2])
    pe[:, 1::2] = np.cos(angle[:, 1::2])
    return jnp.asarray(pe)


def init_params(key):
    ks = jax.random.split(key, 5)
    params = {}
    params["embedding"] = jax.random.normal(ks[0], (NUM_EMB, D_MODEL), jnp.float32) * 0.02
    params["encoder"] = init_fft_stack(ks[1], FFT_BLOCKS, D_MODEL, 2048)
    params["mel_decoder"] = init_fft_stack(ks[2], FFT_BLOCKS, D_MODEL, 256)
    params["dur_pred"] = init_duration_predictor(ks[3], D_MODEL, DP_FILTER)
    wmel = jax.random.normal(ks[4], (D_MODEL, N_MEL), jnp.float32) * 0.02
    params["mel_w"] = jnp.pad(wmel, ((0, 0), (0, MEL_PAD - N_MEL))).astype(jnp.bfloat16)
    params["mel_b"] = jnp.zeros((1, MEL_PAD), jnp.float32)
    return params


# ----------------------------------------------------------------------------
# full forward pass (inference mode, fully on-device / jittable)
# ----------------------------------------------------------------------------
def fastspeech2_forward(phoneme, params):
    B, T = phoneme.shape
    D = D_MODEL

    # embedding lookup (gather) - plain JAX glue
    emb = jnp.take(params["embedding"], phoneme, axis=0)           # (B, T, D)
    x2d = emb.reshape(B * T, D)
    pe = sinusoidal_pe(T, D)                                       # (T, D), passed once

    # encoder: PE1 + 4 FFT blocks + PE2, one fused pallas_call (grid = (B, L))
    att2d = encoder_stack(x2d, pe, params["encoder"], B=B, T=T)

    # variance adaptor: duration prediction (Pallas) + on-device length regulation
    log_d = duration_predictor(att2d, params["dur_pred"], B=B, T=T)[:, 0]
    log_d = log_d.reshape(B, T)
    dur = jnp.clip(jnp.round(jnp.exp(log_d)), 1.0, MAX_DUR).astype(jnp.int32)
    cum = jnp.cumsum(dur, axis=1)                                  # (B, T)
    max_mel = T * MAX_DUR                                          # static bound
    frames = jnp.arange(max_mel)
    idx = jnp.sum((frames[None, :, None] >= cum[:, None, :]).astype(jnp.int32), axis=-1)
    idx = jnp.clip(idx, 0, T - 1)                                  # (B, max_mel)
    valid = frames[None, :] < cum[:, -1:]                          # (B, max_mel) bool
    att3 = att2d.reshape(B, T, D)
    expanded = jnp.take_along_axis(att3, idx[:, :, None], axis=1)
    expanded = expanded * valid[:, :, None].astype(jnp.float32)

    # additive key-mask bias so padded mel frames get no attention weight
    key_bias = ((valid.astype(jnp.float32) - 1.0) * 1e9).reshape(B, 1, max_mel)

    # mel decoder: 4 FFT blocks + fused Linear(256->80, lane-padded to 128)
    mel128 = decoder_stack(expanded.reshape(B * max_mel, D), key_bias,
                           params["mel_decoder"], params["mel_w"], params["mel_b"],
                           B=B, T=max_mel)
    mel = mel128.reshape(B, max_mel, MEL_PAD)[:, :, :N_MEL]
    return jnp.transpose(mel, (0, 2, 1))                           # (B, 80, max_mel)


if __name__ == "__main__":
    key = jax.random.PRNGKey(0)
    pkey, dkey = jax.random.split(key)
    params = init_params(pkey)

    B, T = 2, 8
    phoneme = jax.random.randint(dkey, (B, T), 0, NUM_EMB, dtype=jnp.int32)

    fwd = jax.jit(fastspeech2_forward)
    mel = fwd(phoneme, params)
    mel = jax.block_until_ready(mel)

    assert mel.shape == (B, N_MEL, T * MAX_DUR), mel.shape
    assert bool(jnp.all(jnp.isfinite(mel)))
    print("KERNEL_OK")
</pallas_src>

<mosaic_0001>
module attributes {stable_mosaic.version = 11 : i64} {
  func.func @_dur_pred_kernel(%arg0: i32, %arg1: memref<8x256xf32, #tpu.memory_space<vmem>>, %arg2: memref<256x256xbf16, #tpu.memory_space<vmem>>, %arg3: memref<256x256xbf16, #tpu.memory_space<vmem>>, %arg4: memref<256x256xbf16, #tpu.memory_space<vmem>>, %arg5: memref<1x256xf32, #tpu.memory_space<vmem>>, %arg6: memref<1x256xf32, #tpu.memory_space<vmem>>, %arg7: memref<1x256xf32, #tpu.memory_space<vmem>>, %arg8: memref<256x256xbf16, #tpu.memory_space<vmem>>, %arg9: memref<256x256xbf16, #tpu.memory_space<vmem>>, %arg10: memref<256x256xbf16, #tpu.memory_space<vmem>>, %arg11: memref<1x256xf32, #tpu.memory_space<vmem>>, %arg12: memref<1x256xf32, #tpu.memory_space<vmem>>, %arg13: memref<1x256xf32, #tpu.memory_space<vmem>>, %arg14: memref<1x256xf32, #tpu.memory_space<vmem>>, %arg15: memref<1x1xf32, #tpu.memory_space<vmem>>, %arg16: memref<8x128xf32, #tpu.memory_space<vmem>>) attributes {dimension_semantics = [#tpu.dimension_semantics<parallel>], iteration_bounds = array<i64: 2>, scalar_prefetch = 0 : i64, scratch_operands = 0 : i64, tpu.core_type = #tpu.core_type<tc>, window_params = [{transform_indices = @transform_0, window_bounds = array<i64: 8, 256>}, {pipeline_mode = #tpu.pipeline_mode<synchronous>, transform_indices = @transform_1, window_bounds = array<i64: 256, 256>}, {pipeline_mode = #tpu.pipeline_mode<synchronous>, transform_indices = @transform_2, window_bounds = array<i64: 256, 256>}, {pipeline_mode = #tpu.pipeline_mode<synchronous>, transform_indices = @transform_3, window_bounds = array<i64: 256, 256>}, {pipeline_mode = #tpu.pipeline_mode<synchronous>, transform_indices = @transform_4, window_bounds = array<i64: 1, 256>}, {pipeline_mode = #tpu.pipeline_mode<synchronous>, transform_indices = @transform_5, window_bounds = array<i64: 1, 256>}, {pipeline_mode = #tpu.pipeline_mode<synchronous>, transform_indices = @transform_6, window_bounds = array<i64: 1, 256>}, {pipeline_mode = #tpu.pipeline_mode<synchronous>, transform_indices = @transform_7, window_bounds = array<i64: 256, 256>}, {pipeline_mode = #tpu.pipeline_mode<synchronous>, transform_indices = @transform_8, window_bounds = array<i64: 256, 256>}, {pipeline_mode = #tpu.pipeline_mode<synchronous>, transform_indices = @transform_9, window_bounds = array<i64: 256, 256>}, {pipeline_mode = #tpu.pipeline_mode<synchronous>, transform_indices = @transform_10, window_bounds = array<i64: 1, 256>}, {pipeline_mode = #tpu.pipeline_mode<synchronous>, transform_indices = @transform_11, window_bounds = array<i64: 1, 256>}, {pipeline_mode = #tpu.pipeline_mode<synchronous>, transform_indices = @transform_12, window_bounds = array<i64: 1, 256>}, {pipeline_mode = #tpu.pipeline_mode<synchronous>, transform_indices = @transform_13, window_bounds = array<i64: 1, 256>}, {pipeline_mode = #tpu.pipeline_mode<synchronous>, transform_indices = @transform_14, window_bounds = array<i64: 1, 1>}, {transform_indices = @transform_15, window_bounds = array<i64: 8, 128>}]} {
    %c0 = arith.constant 0 : index
    %c0_0 = arith.constant 0 : index
    %0 = vector.load %arg1[%c0, %c0_0] : memref<8x256xf32, #tpu.memory_space<vmem>>, vector<8x256xf32>
    %c1_i32 = arith.constant 1 : i32
    %1 = tpu.dynamic_rotate %0 by %c1_i32 dim 0 : vector<8x256xf32>, i32 -> vector<8x256xf32>
    %2 = tpu.iota {dimensions = array<i32: 0>} : vector<8x256xi32>
    %c0_i32 = arith.constant 0 : i32
    %3 = vector.broadcast %c0_i32 : i32 to vector<8x256xi32>
    %4 = arith.cmpi sgt, %2, %3 : vector<8x256xi32>
    %cst = arith.constant 0.000000e+00 : f32
    %5 = vector.broadcast %cst : f32 to vector<8x256xf32>
    %6 = arith.select %4, %1, %5 : vector<8x256xi1>, vector<8x256xf32>
    %7 = arith.truncf %6 : vector<8x256xf32> to vector<8x256xbf16>
    %c7_i32 = arith.constant 7 : i32
    %8 = tpu.dynamic_rotate %0 by %c7_i32 dim 0 : vector<8x256xf32>, i32 -> vector<8x256xf32>
    %9 = tpu.iota {dimensions = array<i32: 0>} : vector<8x256xi32>
    %c7_i32_1 = arith.constant 7 : i32
    %10 = vector.broadcast %c7_i32_1 : i32 to vector<8x256xi32>
    %11 = arith.cmpi slt, %9, %10 : vector<8x256xi32>
    %cst_2 = arith.constant 0.000000e+00 : f32
    %12 = vector.broadcast %cst_2 : f32 to vector<8x256xf32>
    %13 = arith.select %11, %8, %12 : vector<8x256xi1>, vector<8x256xf32>
    %14 = arith.truncf %13 : vector<8x256xf32> to vector<8x256xbf16>
    %c0_3 = arith.constant 0 : index
    %c0_4 = arith.constant 0 : index
    %15 = vector.load %arg2[%c0_3, %c0_4] : memref<256x256xbf16, #tpu.memory_space<vmem>>, vector<256x256xbf16>
    %cst_5 = arith.constant dense<0.000000e+00> : vector<8x256xf32>
    %16 = tpu.matmul %7, %15, %cst_5 {dimension_numbers = #tpu.dot_dimension_numbers<[1], [0], [0], [1], [0, 0, 1, 1], [], []>} : vector<8x256xbf16>, vector<256x256xbf16>, vector<8x256xf32> -> vector<8x256xf32>
    %17 = arith.truncf %0 : vector<8x256xf32> to vector<8x256xbf16>
    %c0_6 = arith.constant 0 : index
    %c0_7 = arith.constant 0 : index
    %18 = vector.load %arg3[%c0_6, %c0_7] : memref<256x256xbf16, #tpu.memory_space<vmem>>, vector<256x256xbf16>
    %cst_8 = arith.constant dense<0.000000e+00> : vector<8x256xf32>
    %19 = tpu.matmul %17, %18, %cst_8 {dimension_numbers = #tpu.dot_dimension_numbers<[1], [0], [0], [1], [0, 0, 1, 1], [], []>} : vector<8x256xbf16>, vector<256x256xbf16>, vector<8x256xf32> -> vector<8x256xf32>
    %20 = arith.addf %16, %19 : vector<8x256xf32>
    %c0_9 = arith.constant 0 : index
    %c0_10 = arith.constant 0 : index
    %21 = vector.load %arg4[%c0_9, %c0_10] : memref<256x256xbf16, #tpu.memory_space<vmem>>, vector<256x256xbf16>
    %cst_11 = arith.constant dense<0.000000e+00> : vector<8x256xf32>
    %22 = tpu.matmul %14, %21, %cst_11 {dimension_numbers = #tpu.dot_dimension_numbers<[1], [0], [0], [1], [0, 0, 1, 1], [], []>} : vector<8x256xbf16>, vector<256x256xbf16>, vector<8x256xf32> -> vector<8x256xf32>
    %23 = arith.addf %20, %22 : vector<8x256xf32>
    %c0_12 = arith.constant 0 : index
    %c0_13 = arith.constant 0 : index
    %24 = vector.load %arg5[%c0_12, %c0_13] : memref<1x256xf32, #tpu.memory_space<vmem>>, vector<1x256xf32>
    %25 = vector.broadcast %24 : vector<1x256xf32> to vector<8x256xf32>
    %26 = arith.addf %23, %25 : vector<8x256xf32>
    %cst_14 = arith.constant 0.000000e+00 : f32
    %27 = vector.broadcast %cst_14 : f32 to vector<8x256xf32>
    %28 = arith.maximumf %26, %27 : vector<8x256xf32>
    %c0_15 = arith.constant 0 : index
    %c0_16 = arith.constant 0 : index
    %29 = vector.load %arg6[%c0_15, %c0_16] : memref<1x256xf32, #tpu.memory_space<vmem>>, vector<1x256xf32>
    %c0_17 = arith.constant 0 : index
    %c0_18 = arith.constant 0 : index
    %30 = vector.load %arg7[%c0_17, %c0_18] : memref<1x256xf32, #tpu.memory_space<vmem>>, vector<1x256xf32>
    %cst_19 = arith.constant dense<0.000000e+00> : vector<8xf32>
    %31 = vector.multi_reduction <add>, %28, %cst_19 [1] : vector<8x256xf32> to vector<8xf32>
    %32 = vector.shape_cast %31 : vector<8xf32> to vector<8x1xf32>
    %cst_20 = arith.constant 2.560000e+02 : f32
    %33 = vector.broadcast %cst_20 : f32 to vector<8x1xf32>
    %34 = arith.divf %32, %33 : vector<8x1xf32>
    %35 = arith.mulf %28, %28 : vector<8x256xf32>
    %cst_21 = arith.constant dense<0.000000e+00> : vector<8xf32>
    %36 = vector.multi_reduction <add>, %35, %cst_21 [1] : vector<8x256xf32> to vector<8xf32>
    %37 = vector.shape_cast %36 : vector<8xf32> to vector<8x1xf32>
    %cst_22 = arith.constant 2.560000e+02 : f32
    %38 = vector.broadcast %cst_22 : f32 to vector<8x1xf32>
    %39 = arith.divf %37, %38 : vector<8x1xf32>
    %40 = arith.mulf %34, %34 : vector<8x1xf32>
    %41 = arith.subf %39, %40 : vector<8x1xf32>
    %42 = vector.broadcast %34 : vector<8x1xf32> to vector<8x256xf32>
    %43 = arith.subf %28, %42 : vector<8x256xf32>
    %cst_23 = arith.constant 9.99999974E-6 : f32
    %44 = vector.broadcast %cst_23 : f32 to vector<8x1xf32>
    %45 = arith.addf %41, %44 : vector<8x1xf32>
    %46 = math.rsqrt %45 : vector<8x1xf32>
    %47 = vector.broadcast %46 : vector<8x1xf32> to vector<8x256xf32>
    %48 = arith.mulf %43, %47 : vector<8x256xf32>
    %49 = vector.broadcast %29 : vector<1x256xf32> to vector<8x256xf32>
    %50 = arith.mulf %48, %49 : vector<8x256xf32>
    %51 = vector.broadcast %30 : vector<1x256xf32> to vector<8x256xf32>
    %52 = arith.addf %50, %51 : vector<8x256xf32>
    %c1_i32_24 = arith.constant 1 : i32
    %53 = tpu.dynamic_rotate %52 by %c1_i32_24 dim 0 : vector<8x256xf32>, i32 -> vector<8x256xf32>
    %54 = tpu.iota {dimensions = array<i32: 0>} : vector<8x256xi32>
    %c0_i32_25 = arith.constant 0 : i32
    %55 = vector.broadcast %c0_i32_25 : i32 to vector<8x256xi32>
    %56 = arith.cmpi sgt, %54, %55 : vector<8x256xi32>
    %cst_26 = arith.constant 0.000000e+00 : f32
    %57 = vector.broadcast %cst_26 : f32 to vector<8x256xf32>
    %58 = arith.select %56, %53, %57 : vector<8x256xi1>, vector<8x256xf32>
    %59 = arith.truncf %58 : vector<8x256xf32> to vector<8x256xbf16>
    %c7_i32_27 = arith.constant 7 : i32
    %60 = tpu.dynamic_rotate %52 by %c7_i32_27 dim 0 : vector<8x256xf32>, i32 -> vector<8x256xf32>
    %61 = tpu.iota {dimensions = array<i32: 0>} : vector<8x256xi32>
    %c7_i32_28 = arith.constant 7 : i32
    %62 = vector.broadcast %c7_i32_28 : i32 to vector<8x256xi32>
    %63 = arith.cmpi slt, %61, %62 : vector<8x256xi32>
    %cst_29 = arith.constant 0.000000e+00 : f32
    %64 = vector.broadcast %cst_29 : f32 to vector<8x256xf32>
    %65 = arith.select %63, %60, %64 : vector<8x256xi1>, vector<8x256xf32>
    %66 = arith.truncf %65 : vector<8x256xf32> to vector<8x256xbf16>
    %c0_30 = arith.constant 0 : index
    %c0_31 = arith.constant 0 : index
    %67 = vector.load %arg8[%c0_30, %c0_31] : memref<256x256xbf16, #tpu.memory_space<vmem>>, vector<256x256xbf16>
    %cst_32 = arith.constant dense<0.000000e+00> : vector<8x256xf32>
    %68 = tpu.matmul %59, %67, %cst_32 {dimension_numbers = #tpu.dot_dimension_numbers<[1], [0], [0], [1], [0, 0, 1, 1], [], []>} : vector<8x256xbf16>, vector<256x256xbf16>, vector<8x256xf32> -> vector<8x256xf32>
    %69 = arith.truncf %52 : vector<8x256xf32> to vector<8x256xbf16>
    %c0_33 = arith.constant 0 : index
    %c0_34 = arith.constant 0 : index
    %70 = vector.load %arg9[%c0_33, %c0_34] : memref<256x256xbf16, #tpu.memory_space<vmem>>, vector<256x256xbf16>
    %cst_35 = arith.constant dense<0.000000e+00> : vector<8x256xf32>
    %71 = tpu.matmul %69, %70, %cst_35 {dimension_numbers = #tpu.dot_dimension_numbers<[1], [0], [0], [1], [0, 0, 1, 1], [], []>} : vector<8x256xbf16>, vector<256x256xbf16>, vector<8x256xf32> -> vector<8x256xf32>
    %72 = arith.addf %68, %71 : vector<8x256xf32>
    %c0_36 = arith.constant 0 : index
    %c0_37 = arith.constant 0 : index
    %73 = vector.load %arg10[%c0_36, %c0_37] : memref<256x256xbf16, #tpu.memory_space<vmem>>, vector<256x256xbf16>
    %cst_38 = arith.constant dense<0.000000e+00> : vector<8x256xf32>
    %74 = tpu.matmul %66, %73, %cst_38 {dimension_numbers = #tpu.dot_dimension_numbers<[1], [0], [0], [1], [0, 0, 1, 1], [], []>} : vector<8x256xbf16>, vector<256x256xbf16>, vector<8x256xf32> -> vector<8x256xf32>
    %75 = arith.addf %72, %74 : vector<8x256xf32>
    %c0_39 = arith.constant 0 : index
    %c0_40 = arith.constant 0 : index
    %76 = vector.load %arg11[%c0_39, %c0_40] : memref<1x256xf32, #tpu.memory_space<vmem>>, vector<1x256xf32>
    %77 = vector.broadcast %76 : vector<1x256xf32> to vector<8x256xf32>
    %78 = arith.addf %75, %77 : vector<8x256xf32>
    %cst_41 = arith.constant 0.000000e+00 : f32
    %79 = vector.broadcast %cst_41 : f32 to vector<8x256xf32>
    %80 = arith.maximumf %78, %79 : vector<8x256xf32>
    %c0_42 = arith.constant 0 : index
    %c0_43 = arith.constant 0 : index
    %81 = vector.load %arg12[%c0_42, %c0_43] : memref<1x256xf32, #tpu.memory_space<vmem>>, vector<1x256xf32>
    %c0_44 = arith.constant 0 : index
    %c0_45 = arith.constant 0 : index
    %82 = vector.load %arg13[%c0_44, %c0_45] : memref<1x256xf32, #tpu.memory_space<vmem>>, vector<1x256xf32>
    %cst_46 = arith.constant dense<0.000000e+00> : vector<8xf32>
    %83 = vector.multi_reduction <add>, %80, %cst_46 [1] : vector<8x256xf32> to vector<8xf32>
    %84 = vector.shape_cast %83 : vector<8xf32> to vector<8x1xf32>
    %cst_47 = arith.constant 2.560000e+02 : f32
    %85 = vector.broadcast %cst_47 : f32 to vector<8x1xf32>
    %86 = arith.divf %84, %85 : vector<8x1xf32>
    %87 = arith.mulf %80, %80 : vector<8x256xf32>
    %cst_48 = arith.constant dense<0.000000e+00> : vector<8xf32>
    %88 = vector.multi_reduction <add>, %87, %cst_48 [1] : vector<8x256xf32> to vector<8xf32>
    %89 = vector.shape_cast %88 : vector<8xf32> to vector<8x1xf32>
    %cst_49 = arith.constant 2.560000e+02 : f32
    %90 = vector.broadcast %cst_49 : f32 to vector<8x1xf32>
    %91 = arith.divf %89, %90 : vector<8x1xf32>
    %92 = arith.mulf %86, %86 : vector<8x1xf32>
    %93 = arith.subf %91, %92 : vector<8x1xf32>
    %94 = vector.broadcast %86 : vector<8x1xf32> to vector<8x256xf32>
    %95 = arith.subf %80, %94 : vector<8x256xf32>
    %cst_50 = arith.constant 9.99999974E-6 : f32
    %96 = vector.broadcast %cst_50 : f32 to vector<8x1xf32>
    %97 = arith.addf %93, %96 : vector<8x1xf32>
    %98 = math.rsqrt %97 : vector<8x1xf32>
    %99 = vector.broadcast %98 : vector<8x1xf32> to vector<8x256xf32>
    %100 = arith.mulf %95, %99 : vector<8x256xf32>
    %101 = vector.broadcast %81 : vector<1x256xf32> to vector<8x256xf32>
    %102 = arith.mulf %100, %101 : vector<8x256xf32>
    %103 = vector.broadcast %82 : vector<1x256xf32> to vector<8x256xf32>
    %104 = arith.addf %102, %103 : vector<8x256xf32>
    %c0_51 = arith.constant 0 : index
    %c0_52 = arith.constant 0 : index
    %105 = vector.load %arg14[%c0_51, %c0_52] : memref<1x256xf32, #tpu.memory_space<vmem>>, vector<1x256xf32>
    %106 = vector.broadcast %105 : vector<1x256xf32> to vector<8x256xf32>
    %107 = arith.mulf %104, %106 : vector<8x256xf32>
    %cst_53 = arith.constant dense<0.000000e+00> : vector<8xf32>
    %108 = vector.multi_reduction <add>, %107, %cst_53 [1] : vector<8x256xf32> to vector<8xf32>
    %109 = vector.shape_cast %108 : vector<8xf32> to vector<8x1xf32>
    %c0_54 = arith.constant 0 : index
    %c0_55 = arith.constant 0 : index
    %110 = vector.load %arg15[%c0_54, %c0_55] : memref<1x1xf32, #tpu.memory_space<vmem>>, vector<1x1xf32>
    %111 = vector.broadcast %110 : vector<1x1xf32> to vector<8x1xf32>
    %112 = arith.addf %109, %111 : vector<8x1xf32>
    %113 = vector.shape_cast %112 : vector<8x1xf32> to vector<8x1xf32>
    %114 = vector.broadcast %113 : vector<8x1xf32> to vector<8x128xf32>
    %c0_56 = arith.constant 0 : index
    %c0_57 = arith.constant 0 : index
    %115 = vector.load %arg16[%c0_56, %c0_57] : memref<8x128xf32, #tpu.memory_space<vmem>>, vector<8x128xf32>
    tpu.vector_store %arg16[%c0_56, %c0_57], %114 {strides = array<i32>} : memref<8x128xf32, #tpu.memory_space<vmem>>, vector<8x128xf32>,
    return
  }
  func.func @transform_0(%arg0: i32) -> (i32, i32) {
    %c0_i32 = arith.constant 0 : i32
    %c0_i32_0 = arith.constant 0 : i32
    return %arg0, %c0_i32 : i32, i32
  }
  func.func @transform_1(%arg0: i32) -> (i32, i32) {
    %c0_i32 = arith.constant 0 : i32
    %c0_i32_0 = arith.constant 0 : i32
    %c0_i32_1 = arith.constant 0 : i32
    return %c0_i32, %c0_i32_0 : i32, i32
  }
  func.func @transform_2(%arg0: i32) -> (i32, i32) {
    %c0_i32 = arith.constant 0 : i32
    %c0_i32_0 = arith.constant 0 : i32
    %c0_i32_1 = arith.constant 0 : i32
    return %c0_i32, %c0_i32_0 : i32, i32
  }
  func.func @transform_3(%arg0: i32) -> (i32, i32) {
    %c0_i32 = arith.constant 0 : i32
    %c0_i32_0 = arith.constant 0 : i32
    %c0_i32_1 = arith.constant 0 : i32
    return %c0_i32, %c0_i32_0 : i32, i32
  }
  func.func @transform_4(%arg0: i32) -> (i32, i32) {
    %c0_i32 = arith.constant 0 : i32
    %c0_i32_0 = arith.constant 0 : i32
    %c0_i32_1 = arith.constant 0 : i32
    return %c0_i32, %c0_i32_0 : i32, i32
  }
  func.func @transform_5(%arg0: i32) -> (i32, i32) {
    %c0_i32 = arith.constant 0 : i32
    %c0_i32_0 = arith.constant 0 : i32
    %c0_i32_1 = arith.constant 0 : i32
    return %c0_i32, %c0_i32_0 : i32, i32
  }
  func.func @transform_6(%arg0: i32) -> (i32, i32) {
    %c0_i32 = arith.constant 0 : i32
    %c0_i32_0 = arith.constant 0 : i32
    %c0_i32_1 = arith.constant 0 : i32
    return %c0_i32, %c0_i32_0 : i32, i32
  }
  func.func @transform_7(%arg0: i32) -> (i32, i32) {
    %c0_i32 = arith.constant 0 : i32
    %c0_i32_0 = arith.constant 0 : i32
    %c0_i32_1 = arith.constant 0 : i32
    return %c0_i32, %c0_i32_0 : i32, i32
  }
  func.func @transform_8(%arg0: i32) -> (i32, i32) {
    %c0_i32 = arith.constant 0 : i32
    %c0_i32_0 = arith.constant 0 : i32
    %c0_i32_1 = arith.constant 0 : i32
    return %c0_i32, %c0_i32_0 : i32, i32
  }
  func.func @transform_9(%arg0: i32) -> (i32, i32) {
    %c0_i32 = arith.constant 0 : i32
    %c0_i32_0 = arith.constant 0 : i32
    %c0_i32_1 = arith.constant 0 : i32
    return %c0_i32, %c0_i32_0 : i32, i32
  }
  func.func @transform_10(%arg0: i32) -> (i32, i32) {
    %c0_i32 = arith.constant 0 : i32
    %c0_i32_0 = arith.constant 0 : i32
    %c0_i32_1 = arith.constant 0 : i32
    return %c0_i32, %c0_i32_0 : i32, i32
  }
  func.func @transform_11(%arg0: i32) -> (i32, i32) {
    %c0_i32 = arith.constant 0 : i32
    %c0_i32_0 = arith.constant 0 : i32
    %c0_i32_1 = arith.constant 0 : i32
    return %c0_i32, %c0_i32_0 : i32, i32
  }
  func.func @transform_12(%arg0: i32) -> (i32, i32) {
    %c0_i32 = arith.constant 0 : i32
    %c0_i32_0 = arith.constant 0 : i32
    %c0_i32_1 = arith.constant 0 : i32
    return %c0_i32, %c0_i32_0 : i32, i32
  }
  func.func @transform_13(%arg0: i32) -> (i32, i32) {
    %c0_i32 = arith.constant 0 : i32
    %c0_i32_0 = arith.constant 0 : i32
    %c0_i32_1 = arith.constant 0 : i32
    return %c0_i32, %c0_i32_0 : i32, i32
  }
  func.func @transform_14(%arg0: i32) -> (i32, i32) {
    %c0_i32 = arith.constant 0 : i32
    %c0_i32_0 = arith.constant 0 : i32
    %c0_i32_1 = arith.constant 0 : i32
    return %c0_i32, %c0_i32_0 : i32, i32
  }
  func.func @transform_15(%arg0: i32) -> (i32, i32) {
    %c0_i32 = arith.constant 0 : i32
    %c0_i32_0 = arith.constant 0 : i32
    return %arg0, %c0_i32 : i32, i32
  }
}

module attributes {stable_mosaic.version = 11 : i64} {
  func.func @_encoder_kernel(%arg0: i32, %arg1: i32, %arg2: memref<8x256xf32, #tpu.memory_space<vmem>>, %arg3: memref<8x256xf32, #tpu.memory_space<vmem>>, %arg4: memref<1x256x768xbf16, #tpu.memory_space<vmem>>, %arg5: memref<1x1x768xf32, #tpu.memory_space<vmem>>, %arg6: memref<1x256x256xbf16, #tpu.memory_space<vmem>>, %arg7: memref<1x1x256xf32, #tpu.memory_space<vmem>>, %arg8: memref<1x1x256xf32, #tpu.memory_space<vmem>>, %arg9: memref<1x1x256xf32, #tpu.memory_space<vmem>>, %arg10: memref<1x256x2048xbf16, #tpu.memory_space<vmem>>, %arg11: memref<1x1x2048xf32, #tpu.memory_space<vmem>>, %arg12: memref<1x2048x256xbf16, #tpu.memory_space<vmem>>, %arg13: memref<1x1x256xf32, #tpu.memory_space<vmem>>, %arg14: memref<1x1x256xf32, #tpu.memory_space<vmem>>, %arg15: memref<1x1x256xf32, #tpu.memory_space<vmem>>, %arg16: memref<8x256xf32, #tpu.memory_space<vmem>>, %arg17: memref<8x256xf32, #tpu.memory_space<vmem>>, %arg18: memref<8x256xf32, #tpu.memory_space<vmem>>) attributes {dimension_semantics = [#tpu.dimension_semantics<parallel>, #tpu.dimension_semantics<arbitrary>], iteration_bounds = array<i64: 2, 4>, scalar_prefetch = 0 : i64, scratch_operands = 2 : i64, tpu.core_type = #tpu.core_type<tc>, window_params = [{transform_indices = @transform_0, window_bounds = array<i64: 8, 256>}, {pipeline_mode = #tpu.pipeline_mode<synchronous>, transform_indices = @transform_1, window_bounds = array<i64: 8, 256>}, {transform_indices = @transform_2, window_bounds = array<i64: 1, 256, 768>}, {transform_indices = @transform_3, window_bounds = array<i64: 1, 1, 768>}, {transform_indices = @transform_4, window_bounds = array<i64: 1, 256, 256>}, {transform_indices = @transform_5, window_bounds = array<i64: 1, 1, 256>}, {transform_indices = @transform_6, window_bounds = array<i64: 1, 1, 256>}, {transform_indices = @transform_7, window_bounds = array<i64: 1, 1, 256>}, {transform_indices = @transform_8, window_bounds = array<i64: 1, 256, 2048>}, {transform_indices = @transform_9, window_bounds = array<i64: 1, 1, 2048>}, {transform_indices = @transform_10, window_bounds = array<i64: 1, 2048, 256>}, {transform_indices = @transform_11, window_bounds = array<i64: 1, 1, 256>}, {transform_indices = @transform_12, window_bounds = array<i64: 1, 1, 256>}, {transform_indices = @transform_13, window_bounds = array<i64: 1, 1, 256>}, {transform_indices = @transform_14, window_bounds = array<i64: 8, 256>}]} {
    %c0_i32 = arith.constant 0 : i32
    %0 = arith.cmpi eq, %arg1, %c0_i32 : i32
    %1 = arith.extui %0 : i1 to i32
    %c0_i32_0 = arith.constant 0 : i32
    %2 = arith.cmpi ne, %1, %c0_i32_0 : i32
    scf.if %2 {
      %c0_68 = arith.constant 0 : index
      %c0_69 = arith.constant 0 : index
      %137 = vector.load %arg2[%c0_68, %c0_69] : memref<8x256xf32, #tpu.memory_space<vmem>>, vector<8x256xf32>
      %c0_70 = arith.constant 0 : index
      %c0_71 = arith.constant 0 : index
      %138 = vector.load %arg3[%c0_70, %c0_71] : memref<8x256xf32, #tpu.memory_space<vmem>>, vector<8x256xf32>
      %139 = arith.addf %137, %138 : vector<8x256xf32>
      %c0_72 = arith.constant 0 : index
      %c0_73 = arith.constant 0 : index
      %140 = vector.load %arg17[%c0_72, %c0_73] : memref<8x256xf32, #tpu.memory_space<vmem>>, vector<8x256xf32>
      tpu.vector_store %arg17[%c0_72, %c0_73], %139 {strides = array<i32>} : memref<8x256xf32, #tpu.memory_space<vmem>>, vector<8x256xf32>,
    } else {
    }
    %c0 = arith.constant 0 : index
    %c0_1 = arith.constant 0 : index
    %3 = vector.load %arg17[%c0, %c0_1] : memref<8x256xf32, #tpu.memory_space<vmem>>, vector<8x256xf32>
    %4 = arith.truncf %3 : vector<8x256xf32> to vector<8x256xbf16>
    %c0_2 = arith.constant 0 : index
    %c0_3 = arith.constant 0 : index
    %c0_4 = arith.constant 0 : index
    %5 = vector.load %arg4[%c0_2, %c0_3, %c0_4] : memref<1x256x768xbf16, #tpu.memory_space<vmem>>, vector<1x256x768xbf16>
    %6 = vector.shape_cast %5 : vector<1x256x768xbf16> to vector<256x768xbf16>
    %cst = arith.constant dense<0.000000e+00> : vector<8x768xf32>
    %7 = tpu.matmul %4, %6, %cst {dimension_numbers = #tpu.dot_dimension_numbers<[1], [0], [0], [1], [0, 0, 1, 1], [], []>} : vector<8x256xbf16>, vector<256x768xbf16>, vector<8x768xf32> -> vector<8x768xf32>
    %c0_5 = arith.constant 0 : index
    %c0_6 = arith.constant 0 : index
    %c0_7 = arith.constant 0 : index
    %8 = vector.load %arg5[%c0_5, %c0_6, %c0_7] : memref<1x1x768xf32, #tpu.memory_space<vmem>>, vector<1x1x768xf32>
    %9 = vector.shape_cast %8 : vector<1x1x768xf32> to vector<1x768xf32>
    %10 = vector.broadcast %9 : vector<1x768xf32> to vector<8x768xf32>
    %11 = arith.addf %7, %10 : vector<8x768xf32>
    %12 = vector.extract_strided_slice %11 {offsets = [0, 0], sizes = [8, 128], strides = [1, 1]} : vector<8x768xf32> to vector<8x128xf32>
    %13 = arith.truncf %12 : vector<8x128xf32> to vector<8x128xbf16>
    %14 = vector.extract_strided_slice %11 {offsets = [0, 256], sizes = [8, 128], strides = [1, 1]} : vector<8x768xf32> to vector<8x128xf32>
    %15 = arith.truncf %14 : vector<8x128xf32> to vector<8x128xbf16>
    %16 = vector.extract_strided_slice %11 {offsets = [0, 512], sizes = [8, 128], strides = [1, 1]} : vector<8x768xf32> to vector<8x128xf32>
    %17 = arith.truncf %16 : vector<8x128xf32> to vector<8x128xbf16>
    %cst_8 = arith.constant dense<0.000000e+00> : vector<8x8xf32>
    %18 = tpu.matmul %13, %15, %cst_8 {dimension_numbers = #tpu.dot_dimension_numbers<[1], [1], [0], [0], [0, 0, 1, 0], [], []>} : vector<8x128xbf16>, vector<8x128xbf16>, vector<8x8xf32> -> vector<8x8xf32>
    %cst_9 = arith.constant dense<0xFF800000> : vector<8xf32>
    %19 = vector.multi_reduction <maximumf>, %18, %cst_9 [1] : vector<8x8xf32> to vector<8xf32>
    %20 = vector.shape_cast %19 : vector<8xf32> to vector<8x1xf32>
    %21 = vector.broadcast %20 : vector<8x1xf32> to vector<8x8xf32>
    %22 = arith.subf %18, %21 : vector<8x8xf32>
    %23 = math.exp %22 : vector<8x8xf32>
    %cst_10 = arith.constant dense<0.000000e+00> : vector<8xf32>
    %24 = vector.multi_reduction <add>, %23, %cst_10 [1] : vector<8x8xf32> to vector<8xf32>
    %25 = vector.shape_cast %24 : vector<8xf32> to vector<8x1xf32>
    %26 = tpu.reciprocal %25 {approx = true} : vector<8x1xf32> -> vector<8x1xf32>
    %27 = vector.broadcast %26 : vector<8x1xf32> to vector<8x8xf32>
    %28 = arith.mulf %23, %27 : vector<8x8xf32>
    %29 = arith.truncf %28 : vector<8x8xf32> to vector<8x8xbf16>
    %cst_11 = arith.constant dense<0.000000e+00> : vector<8x128xf32>
    %30 = tpu.matmul %29, %17, %cst_11 {dimension_numbers = #tpu.dot_dimension_numbers<[1], [0], [0], [1], [0, 0, 1, 1], [], []>} : vector<8x8xbf16>, vector<8x128xbf16>, vector<8x128xf32> -> vector<8x128xf32>
    %c0_12 = arith.constant 0 : index
    %c0_13 = arith.constant 0 : index
    %31 = vector.load %arg18[%c0_12, %c0_13] : memref<8x256xf32, #tpu.memory_space<vmem>>, vector<8x128xf32>
    tpu.vector_store %arg18[%c0_12, %c0_13], %30 {strides = array<i32>} : memref<8x256xf32, #tpu.memory_space<vmem>>, vector<8x128xf32>,
    %32 = vector.extract_strided_slice %11 {offsets = [0, 128], sizes = [8, 128], strides = [1, 1]} : vector<8x768xf32> to vector<8x128xf32>
    %33 = arith.truncf %32 : vector<8x128xf32> to vector<8x128xbf16>
    %34 = vector.extract_strided_slice %11 {offsets = [0, 384], sizes = [8, 128], strides = [1, 1]} : vector<8x768xf32> to vector<8x128xf32>
    %35 = arith.truncf %34 : vector<8x128xf32> to vector<8x128xbf16>
    %36 = vector.extract_strided_slice %11 {offsets = [0, 640], sizes = [8, 128], strides = [1, 1]} : vector<8x768xf32> to vector<8x128xf32>
    %37 = arith.truncf %36 : vector<8x128xf32> to vector<8x128xbf16>
    %cst_14 = arith.constant dense<0.000000e+00> : vector<8x8xf32>
    %38 = tpu.matmul %33, %35, %cst_14 {dimension_numbers = #tpu.dot_dimension_numbers<[1], [1], [0], [0], [0, 0, 1, 0], [], []>} : vector<8x128xbf16>, vector<8x128xbf16>, vector<8x8xf32> -> vector<8x8xf32>
    %cst_15 = arith.constant dense<0xFF800000> : vector<8xf32>
    %39 = vector.multi_reduction <maximumf>, %38, %cst_15 [1] : vector<8x8xf32> to vector<8xf32>
    %40 = vector.shape_cast %39 : vector<8xf32> to vector<8x1xf32>
    %41 = vector.broadcast %40 : vector<8x1xf32> to vector<8x8xf32>
    %42 = arith.subf %38, %41 : vector<8x8xf32>
    %43 = math.exp %42 : vector<8x8xf32>
    %cst_16 = arith.constant dense<0.000000e+00> : vector<8xf32>
    %44 = vector.multi_reduction <add>, %43, %cst_16 [1] : vector<8x8xf32> to vector<8xf32>
    %45 = vector.shape_cast %44 : vector<8xf32> to vector<8x1xf32>
    %46 = tpu.reciprocal %45 {approx = true} : vector<8x1xf32> -> vector<8x1xf32>
    %47 = vector.broadcast %46 : vector<8x1xf32> to vector<8x8xf32>
    %48 = arith.mulf %43, %47 : vector<8x8xf32>
    %49 = arith.truncf %48 : vector<8x8xf32> to vector<8x8xbf16>
    %cst_17 = arith.constant dense<0.000000e+00> : vector<8x128xf32>
    %50 = tpu.matmul %49, %37, %cst_17 {dimension_numbers = #tpu.dot_dimension_numbers<[1], [0], [0], [1], [0, 0, 1, 1], [], []>} : vector<8x8xbf16>, vector<8x128xbf16>, vector<8x128xf32> -> vector<8x128xf32>
    %c0_18 = arith.constant 0 : index
    %c128 = arith.constant 128 : index
    %51 = vector.load %arg18[%c0_18, %c128] : memref<8x256xf32, #tpu.memory_space<vmem>>, vector<8x128xf32>
    tpu.vector_store %arg18[%c0_18, %c128], %50 {strides = array<i32>} : memref<8x256xf32, #tpu.memory_space<vmem>>, vector<8x128xf32>,
    %c0_19 = arith.constant 0 : index
    %c0_20 = arith.constant 0 : index
    %52 = vector.load %arg18[%c0_19, %c0_20] : memref<8x256xf32, #tpu.memory_space<vmem>>, vector<8x256xf32>
    %53 = arith.truncf %52 : vector<8x256xf32> to vector<8x256xbf16>
    %c0_21 = arith.constant 0 : index
    %c0_22 = arith.constant 0 : index
    %c0_23 = arith.constant 0 : index
    %54 = vector.load %arg6[%c0_21, %c0_22, %c0_23] : memref<1x256x256xbf16, #tpu.memory_space<vmem>>, vector<1x256x256xbf16>
    %55 = vector.shape_cast %54 : vector<1x256x256xbf16> to vector<256x256xbf16>
    %cst_24 = arith.constant dense<0.000000e+00> : vector<8x256xf32>
    %56 = tpu.matmul %53, %55, %cst_24 {dimension_numbers = #tpu.dot_dimension_numbers<[1], [0], [0], [1], [0, 0, 1, 1], [], []>} : vector<8x256xbf16>, vector<256x256xbf16>, vector<8x256xf32> -> vector<8x256xf32>
    %c0_25 = arith.constant 0 : index
    %c0_26 = arith.constant 0 : index
    %c0_27 = arith.constant 0 : index
    %57 = vector.load %arg7[%c0_25, %c0_26, %c0_27] : memref<1x1x256xf32, #tpu.memory_space<vmem>>, vector<1x1x256xf32>
    %58 = vector.shape_cast %57 : vector<1x1x256xf32> to vector<1x256xf32>
    %59 = vector.broadcast %58 : vector<1x256xf32> to vector<8x256xf32>
    %60 = arith.addf %56, %59 : vector<8x256xf32>
    %61 = arith.addf %3, %60 : vector<8x256xf32>
    %c0_28 = arith.constant 0 : index
    %c0_29 = arith.constant 0 : index
    %c0_30 = arith.constant 0 : index
    %62 = vector.load %arg8[%c0_28, %c0_29, %c0_30] : memref<1x1x256xf32, #tpu.memory_space<vmem>>, vector<1x1x256xf32>
    %63 = vector.shape_cast %62 : vector<1x1x256xf32> to vector<1x256xf32>
    %c0_31 = arith.constant 0 : index
    %c0_32 = arith.constant 0 : index
    %c0_33 = arith.constant 0 : index
    %64 = vector.load %arg9[%c0_31, %c0_32, %c0_33] : memref<1x1x256xf32, #tpu.memory_space<vmem>>, vector<1x1x256xf32>
    %65 = vector.shape_cast %64 : vector<1x1x256xf32> to vector<1x256xf32>
    %cst_34 = arith.constant dense<0.000000e+00> : vector<8xf32>
    %66 = vector.multi_reduction <add>, %61, %cst_34 [1] : vector<8x256xf32> to vector<8xf32>
    %67 = vector.shape_cast %66 : vector<8xf32> to vector<8x1xf32>
    %cst_35 = arith.constant 2.560000e+02 : f32
    %68 = vector.broadcast %cst_35 : f32 to vector<8x1xf32>
    %69 = arith.divf %67, %68 : vector<8x1xf32>
    %70 = arith.mulf %61, %61 : vector<8x256xf32>
    %cst_36 = arith.constant dense<0.000000e+00> : vector<8xf32>
    %71 = vector.multi_reduction <add>, %70, %cst_36 [1] : vector<8x256xf32> to vector<8xf32>
    %72 = vector.shape_cast %71 : vector<8xf32> to vector<8x1xf32>
    %cst_37 = arith.constant 2.560000e+02 : f32
    %73 = vector.broadcast %cst_37 : f32 to vector<8x1xf32>
    %74 = arith.divf %72, %73 : vector<8x1xf32>
    %75 = arith.mulf %69, %69 : vector<8x1xf32>
    %76 = arith.subf %74, %75 : vector<8x1xf32>
    %77 = vector.broadcast %69 : vector<8x1xf32> to vector<8x256xf32>
    %78 = arith.subf %61, %77 : vector<8x256xf32>
    %cst_38 = arith.constant 9.99999974E-6 : f32
    %79 = vector.broadcast %cst_38 : f32 to vector<8x1xf32>
    %80 = arith.addf %76, %79 : vector<8x1xf32>
    %81 = math.rsqrt %80 : vector<8x1xf32>
    %82 = vector.broadcast %81 : vector<8x1xf32> to vector<8x256xf32>
    %83 = arith.mulf %78, %82 : vector<8x256xf32>
    %84 = vector.broadcast %63 : vector<1x256xf32> to vector<8x256xf32>
    %85 = arith.mulf %83, %84 : vector<8x256xf32>
    %86 = vector.broadcast %65 : vector<1x256xf32> to vector<8x256xf32>
    %87 = arith.addf %85, %86 : vector<8x256xf32>
    %88 = arith.truncf %87 : vector<8x256xf32> to vector<8x256xbf16>
    %c0_39 = arith.constant 0 : index
    %c0_40 = arith.constant 0 : index
    %c0_41 = arith.constant 0 : index
    %89 = vector.load %arg10[%c0_39, %c0_40, %c0_41] : memref<1x256x2048xbf16, #tpu.memory_space<vmem>>, vector<1x256x2048xbf16>
    %90 = vector.shape_cast %89 : vector<1x256x2048xbf16> to vector<256x2048xbf16>
    %cst_42 = arith.constant dense<0.000000e+00> : vector<8x2048xf32>
    %91 = tpu.matmul %88, %90, %cst_42 {dimension_numbers = #tpu.dot_dimension_numbers<[1], [0], [0], [1], [0, 0, 1, 1], [], []>} : vector<8x256xbf16>, vector<256x2048xbf16>, vector<8x2048xf32> -> vector<8x2048xf32>
    %c0_43 = arith.constant 0 : index
    %c0_44 = arith.constant 0 : index
    %c0_45 = arith.constant 0 : index
    %92 = vector.load %arg11[%c0_43, %c0_44, %c0_45] : memref<1x1x2048xf32, #tpu.memory_space<vmem>>, vector<1x1x2048xf32>
    %93 = vector.shape_cast %92 : vector<1x1x2048xf32> to vector<1x2048xf32>
    %94 = vector.broadcast %93 : vector<1x2048xf32> to vector<8x2048xf32>
    %95 = arith.addf %91, %94 : vector<8x2048xf32>
    %cst_46 = arith.constant 0.000000e+00 : f32
    %96 = vector.broadcast %cst_46 : f32 to vector<8x2048xf32>
    %97 = arith.maximumf %95, %96 : vector<8x2048xf32>
    %98 = arith.truncf %97 : vector<8x2048xf32> to vector<8x2048xbf16>
    %c0_47 = arith.constant 0 : index
    %c0_48 = arith.constant 0 : index
    %c0_49 = arith.constant 0 : index
    %99 = vector.load %arg12[%c0_47, %c0_48, %c0_49] : memref<1x2048x256xbf16, #tpu.memory_space<vmem>>, vector<1x2048x256xbf16>
    %100 = vector.shape_cast %99 : vector<1x2048x256xbf16> to vector<2048x256xbf16>
    %cst_50 = arith.constant dense<0.000000e+00> : vector<8x256xf32>
    %101 = tpu.matmul %98, %100, %cst_50 {dimension_numbers = #tpu.dot_dimension_numbers<[1], [0], [0], [1], [0, 0, 1, 1], [], []>} : vector<8x2048xbf16>, vector<2048x256xbf16>, vector<8x256xf32> -> vector<8x256xf32>
    %c0_51 = arith.constant 0 : index
    %c0_52 = arith.constant 0 : index
    %c0_53 = arith.constant 0 : index
    %102 = vector.load %arg13[%c0_51, %c0_52, %c0_53] : memref<1x1x256xf32, #tpu.memory_space<vmem>>, vector<1x1x256xf32>
    %103 = vector.shape_cast %102 : vector<1x1x256xf32> to vector<1x256xf32>
    %104 = vector.broadcast %103 : vector<1x256xf32> to vector<8x256xf32>
    %105 = arith.addf %101, %104 : vector<8x256xf32>
    %106 = arith.addf %87, %105 : vector<8x256xf32>
    %c0_54 = arith.constant 0 : index
    %c0_55 = arith.constant 0 : index
    %c0_56 = arith.constant 0 : index
    %107 = vector.load %arg14[%c0_54, %c0_55, %c0_56] : memref<1x1x256xf32, #tpu.memory_space<vmem>>, vector<1x1x256xf32>
    %108 = vector.shape_cast %107 : vector<1x1x256xf32> to vector<1x256xf32>
    %c0_57 = arith.constant 0 : index
    %c0_58 = arith.constant 0 : index
    %c0_59 = arith.constant 0 : index
    %109 = vector.load %arg15[%c0_57, %c0_58, %c0_59] : memref<1x1x256xf32, #tpu.memory_space<vmem>>, vector<1x1x256xf32>
    %110 = vector.shape_cast %109 : vector<1x1x256xf32> to vector<1x256xf32>
    %cst_60 = arith.constant dense<0.000000e+00> : vector<8xf32>
    %111 = vector.multi_reduction <add>, %106, %cst_60 [1] : vector<8x256xf32> to vector<8xf32>
    %112 = vector.shape_cast %111 : vector<8xf32> to vector<8x1xf32>
    %cst_61 = arith.constant 2.560000e+02 : f32
    %113 = vector.broadcast %cst_61 : f32 to vector<8x1xf32>
    %114 = arith.divf %112, %113 : vector<8x1xf32>
    %115 = arith.mulf %106, %106 : vector<8x256xf32>
    %cst_62 = arith.constant dense<0.000000e+00> : vector<8xf32>
    %116 = vector.multi_reduction <add>, %115, %cst_62 [1] : vector<8x256xf32> to vector<8xf32>
    %117 = vector.shape_cast %116 : vector<8xf32> to vector<8x1xf32>
    %cst_63 = arith.constant 2.560000e+02 : f32
    %118 = vector.broadcast %cst_63 : f32 to vector<8x1xf32>
    %119 = arith.divf %117, %118 : vector<8x1xf32>
    %120 = arith.mulf %114, %114 : vector<8x1xf32>
    %121 = arith.subf %119, %120 : vector<8x1xf32>
    %122 = vector.broadcast %114 : vector<8x1xf32> to vector<8x256xf32>
    %123 = arith.subf %106, %122 : vector<8x256xf32>
    %cst_64 = arith.constant 9.99999974E-6 : f32
    %124 = vector.broadcast %cst_64 : f32 to vector<8x1xf32>
    %125 = arith.addf %121, %124 : vector<8x1xf32>
    %126 = math.rsqrt %125 : vector<8x1xf32>
    %127 = vector.broadcast %126 : vector<8x1xf32> to vector<8x256xf32>
    %128 = arith.mulf %123, %127 : vector<8x256xf32>
    %129 = vector.broadcast %108 : vector<1x256xf32> to vector<8x256xf32>
    %130 = arith.mulf %128, %129 : vector<8x256xf32>
    %131 = vector.broadcast %110 : vector<1x256xf32> to vector<8x256xf32>
    %132 = arith.addf %130, %131 : vector<8x256xf32>
    %c0_65 = arith.constant 0 : index
    %c0_66 = arith.constant 0 : index
    %133 = vector.load %arg17[%c0_65, %c0_66] : memref<8x256xf32, #tpu.memory_space<vmem>>, vector<8x256xf32>
    tpu.vector_store %arg17[%c0_65, %c0_66], %132 {strides = array<i32>} : memref<8x256xf32, #tpu.memory_space<vmem>>, vector<8x256xf32>,
    %c3_i32 = arith.constant 3 : i32
    %134 = arith.cmpi eq, %arg1, %c3_i32 : i32
    %135 = arith.extui %134 : i1 to i32
    %c0_i32_67 = arith.constant 0 : i32
    %136 = arith.cmpi ne, %135, %c0_i32_67 : i32
    scf.if %136 {
      %c0_68 = arith.constant 0 : index
      %c0_69 = arith.constant 0 : index
      %137 = vector.load %arg3[%c0_68, %c0_69] : memref<8x256xf32, #tpu.memory_space<vmem>>, vector<8x256xf32>
      %138 = arith.addf %132, %137 : vector<8x256xf32>
      %c0_70 = arith.constant 0 : index
      %c0_71 = arith.constant 0 : index
      %139 = vector.load %arg16[%c0_70, %c0_71] : memref<8x256xf32, #tpu.memory_space<vmem>>, vector<8x256xf32>
      tpu.vector_store %arg16[%c0_70, %c0_71], %138 {strides = array<i32>} : memref<8x256xf32, #tpu.memory_space<vmem>>, vector<8x256xf32>,
    } else {
    }
    return
  }
  func.func @transform_0(%arg0: i32, %arg1: i32) -> (i32, i32) {
    %c0_i32 = arith.constant 0 : i32
    %c0_i32_0 = arith.constant 0 : i32
    return %arg0, %c0_i32 : i32, i32
  }
  func.func @transform_1(%arg0: i32, %arg1: i32) -> (i32, i32) {
    %c0_i32 = arith.constant 0 : i32
    %c0_i32_0 = arith.constant 0 : i32
    %c0_i32_1 = arith.constant 0 : i32
    return %c0_i32, %c0_i32_0 : i32, i32
  }
  func.func @transform_2(%arg0: i32, %arg1: i32) -> (i32, i32, i32) {
    %c0_i32 = arith.constant 0 : i32
    %c0_i32_0 = arith.constant 0 : i32
    %c0_i32_1 = arith.constant 0 : i32
    return %arg1, %c0_i32, %c0_i32_0 : i32, i32, i32
  }
  func.func @transform_3(%arg0: i32, %arg1: i32) -> (i32, i32, i32) {
    %c0_i32 = arith.constant 0 : i32
    %c0_i32_0 = arith.constant 0 : i32
    %c0_i32_1 = arith.constant 0 : i32
    return %arg1, %c0_i32, %c0_i32_0 : i32, i32, i32
  }
  func.func @transform_4(%arg0: i32, %arg1: i32) -> (i32, i32, i32) {
    %c0_i32 = arith.constant 0 : i32
    %c0_i32_0 = arith.constant 0 : i32
    %c0_i32_1 = arith.constant 0 : i32
    return %arg1, %c0_i32, %c0_i32_0 : i32, i32, i32
  }
  func.func @transform_5(%arg0: i32, %arg1: i32) -> (i32, i32, i32) {
    %c0_i32 = arith.constant 0 : i32
    %c0_i32_0 = arith.constant 0 : i32
    %c0_i32_1 = arith.constant 0 : i32
    return %arg1, %c0_i32, %c0_i32_0 : i32, i32, i32
  }
  func.func @transform_6(%arg0: i32, %arg1: i32) -> (i32, i32, i32) {
    %c0_i32 = arith.constant 0 : i32
    %c0_i32_0 = arith.constant 0 : i32
    %c0_i32_1 = arith.constant 0 : i32
    return %arg1, %c0_i32, %c0_i32_0 : i32, i32, i32
  }
  func.func @transform_7(%arg0: i32, %arg1: i32) -> (i32, i32, i32) {
    %c0_i32 = arith.constant 0 : i32
    %c0_i32_0 = arith.constant 0 : i32
    %c0_i32_1 = arith.constant 0 : i32
    return %arg1, %c0_i32, %c0_i32_0 : i32, i32, i32
  }
  func.func @transform_8(%arg0: i32, %arg1: i32) -> (i32, i32, i32) {
    %c0_i32 = arith.constant 0 : i32
    %c0_i32_0 = arith.constant 0 : i32
    %c0_i32_1 = arith.constant 0 : i32
    return %arg1, %c0_i32, %c0_i32_0 : i32, i32, i32
  }
  func.func @transform_9(%arg0: i32, %arg1: i32) -> (i32, i32, i32) {
    %c0_i32 = arith.constant 0 : i32
    %c0_i32_0 = arith.constant 0 : i32
    %c0_i32_1 = arith.constant 0 : i32
    return %arg1, %c0_i32, %c0_i32_0 : i32, i32, i32
  }
  func.func @transform_10(%arg0: i32, %arg1: i32) -> (i32, i32, i32) {
    %c0_i32 = arith.constant 0 : i32
    %c0_i32_0 = arith.constant 0 : i32
    %c0_i32_1 = arith.constant 0 : i32
    return %arg1, %c0_i32, %c0_i32_0 : i32, i32, i32
  }
  func.func @transform_11(%arg0: i32, %arg1: i32) -> (i32, i32, i32) {
    %c0_i32 = arith.constant 0 : i32
    %c0_i32_0 = arith.constant 0 : i32
    %c0_i32_1 = arith.constant 0 : i32
    return %arg1, %c0_i32, %c0_i32_0 : i32, i32, i32
  }
  func.func @transform_12(%arg0: i32, %arg1: i32) -> (i32, i32, i32) {
    %c0_i32 = arith.constant 0 : i32
    %c0_i32_0 = arith.constant 0 : i32
    %c0_i32_1 = arith.constant 0 : i32
    return %arg1, %c0_i32, %c0_i32_0 : i32, i32, i32
  }
  func.func @transform_13(%arg0: i32, %arg1: i32) -> (i32, i32, i32) {
    %c0_i32 = arith.constant 0 : i32
    %c0_i32_0 = arith.constant 0 : i32
    %c0_i32_1 = arith.constant 0 : i32
    return %arg1, %c0_i32, %c0_i32_0 : i32, i32, i32
  }
  func.func @transform_14(%arg0: i32, %arg1: i32) -> (i32, i32) {
    %c0_i32 = arith.constant 0 : i32
    %c0_i32_0 = arith.constant 0 : i32
    return %arg0, %c0_i32 : i32, i32
  }
}

module attributes {stable_mosaic.version = 11 : i64} {
  func.func @_decoder_kernel(%arg0: i32, %arg1: i32, %arg2: memref<64x256xf32, #tpu.memory_space<vmem>>, %arg3: memref<1x1x64xf32, #tpu.memory_space<vmem>>, %arg4: memref<256x128xbf16, #tpu.memory_space<vmem>>, %arg5: memref<1x128xf32, #tpu.memory_space<vmem>>, %arg6: memref<1x256x768xbf16, #tpu.memory_space<vmem>>, %arg7: memref<1x1x768xf32, #tpu.memory_space<vmem>>, %arg8: memref<1x256x256xbf16, #tpu.memory_space<vmem>>, %arg9: memref<1x1x256xf32, #tpu.memory_space<vmem>>, %arg10: memref<1x1x256xf32, #tpu.memory_space<vmem>>, %arg11: memref<1x1x256xf32, #tpu.memory_space<vmem>>, %arg12: memref<1x256x256xbf16, #tpu.memory_space<vmem>>, %arg13: memref<1x1x256xf32, #tpu.memory_space<vmem>>, %arg14: memref<1x256x256xbf16, #tpu.memory_space<vmem>>, %arg15: memref<1x1x256xf32, #tpu.memory_space<vmem>>, %arg16: memref<1x1x256xf32, #tpu.memory_space<vmem>>, %arg17: memref<1x1x256xf32, #tpu.memory_space<vmem>>, %arg18: memref<64x128xf32, #tpu.memory_space<vmem>>, %arg19: memref<64x256xf32, #tpu.memory_space<vmem>>, %arg20: memref<64x256xf32, #tpu.memory_space<vmem>>) attributes {dimension_semantics = [#tpu.dimension_semantics<parallel>, #tpu.dimension_semantics<arbitrary>], iteration_bounds = array<i64: 2, 4>, scalar_prefetch = 0 : i64, scratch_operands = 2 : i64, tpu.core_type = #tpu.core_type<tc>, window_params = [{transform_indices = @transform_0, window_bounds = array<i64: 64, 256>}, {transform_indices = @transform_1, window_bounds = array<i64: 1, 1, 64>}, {pipeline_mode = #tpu.pipeline_mode<synchronous>, transform_indices = @transform_2, window_bounds = array<i64: 256, 128>}, {pipeline_mode = #tpu.pipeline_mode<synchronous>, transform_indices = @transform_3, window_bounds = array<i64: 1, 128>}, {transform_indices = @transform_4, window_bounds = array<i64: 1, 256, 768>}, {transform_indices = @transform_5, window_bounds = array<i64: 1, 1, 768>}, {transform_indices = @transform_6, window_bounds = array<i64: 1, 256, 256>}, {transform_indices = @transform_7, window_bounds = array<i64: 1, 1, 256>}, {transform_indices = @transform_8, window_bounds = array<i64: 1, 1, 256>}, {transform_indices = @transform_9, window_bounds = array<i64: 1, 1, 256>}, {transform_indices = @transform_10, window_bounds = array<i64: 1, 256, 256>}, {transform_indices = @transform_11, window_bounds = array<i64: 1, 1, 256>}, {transform_indices = @transform_12, window_bounds = array<i64: 1, 256, 256>}, {transform_indices = @transform_13, window_bounds = array<i64: 1, 1, 256>}, {transform_indices = @transform_14, window_bounds = array<i64: 1, 1, 256>}, {transform_indices = @transform_15, window_bounds = array<i64: 1, 1, 256>}, {transform_indices = @transform_16, window_bounds = array<i64: 64, 128>}]} {
    %c0_i32 = arith.constant 0 : i32
    %0 = arith.cmpi eq, %arg1, %c0_i32 : i32
    %1 = arith.extui %0 : i1 to i32
    %c0_i32_0 = arith.constant 0 : i32
    %2 = arith.cmpi ne, %1, %c0_i32_0 : i32
    scf.if %2 {
      %c0_71 = arith.constant 0 : index
      %c0_72 = arith.constant 0 : index
      %143 = vector.load %arg2[%c0_71, %c0_72] : memref<64x256xf32, #tpu.memory_space<vmem>>, vector<64x256xf32>
      %c0_73 = arith.constant 0 : index
      %c0_74 = arith.constant 0 : index
      %144 = vector.load %arg19[%c0_73, %c0_74] : memref<64x256xf32, #tpu.memory_space<vmem>>, vector<64x256xf32>
      tpu.vector_store %arg19[%c0_73, %c0_74], %143 {strides = array<i32>} : memref<64x256xf32, #tpu.memory_space<vmem>>, vector<64x256xf32>,
    } else {
    }
    %c0 = arith.constant 0 : index
    %c0_1 = arith.constant 0 : index
    %3 = vector.load %arg19[%c0, %c0_1] : memref<64x256xf32, #tpu.memory_space<vmem>>, vector<64x256xf32>
    %c0_2 = arith.constant 0 : index
    %c0_3 = arith.constant 0 : index
    %c0_4 = arith.constant 0 : index
    %4 = vector.load %arg3[%c0_2, %c0_3, %c0_4] : memref<1x1x64xf32, #tpu.memory_space<vmem>>, vector<1x1x64xf32>
    %5 = vector.shape_cast %4 : vector<1x1x64xf32> to vector<1x64xf32>
    %6 = arith.truncf %3 : vector<64x256xf32> to vector<64x256xbf16>
    %c0_5 = arith.constant 0 : index
    %c0_6 = arith.constant 0 : index
    %c0_7 = arith.constant 0 : index
    %7 = vector.load %arg6[%c0_5, %c0_6, %c0_7] : memref<1x256x768xbf16, #tpu.memory_space<vmem>>, vector<1x256x768xbf16>
    %8 = vector.shape_cast %7 : vector<1x256x768xbf16> to vector<256x768xbf16>
    %cst = arith.constant dense<0.000000e+00> : vector<64x768xf32>
    %9 = tpu.matmul %6, %8, %cst {dimension_numbers = #tpu.dot_dimension_numbers<[1], [0], [0], [1], [0, 0, 1, 1], [], []>} : vector<64x256xbf16>, vector<256x768xbf16>, vector<64x768xf32> -> vector<64x768xf32>
    %c0_8 = arith.constant 0 : index
    %c0_9 = arith.constant 0 : index
    %c0_10 = arith.constant 0 : index
    %10 = vector.load %arg7[%c0_8, %c0_9, %c0_10] : memref<1x1x768xf32, #tpu.memory_space<vmem>>, vector<1x1x768xf32>
    %11 = vector.shape_cast %10 : vector<1x1x768xf32> to vector<1x768xf32>
    %12 = vector.broadcast %11 : vector<1x768xf32> to vector<64x768xf32>
    %13 = arith.addf %9, %12 : vector<64x768xf32>
    %14 = vector.extract_strided_slice %13 {offsets = [0, 0], sizes = [64, 128], strides = [1, 1]} : vector<64x768xf32> to vector<64x128xf32>
    %15 = arith.truncf %14 : vector<64x128xf32> to vector<64x128xbf16>
    %16 = vector.extract_strided_slice %13 {offsets = [0, 256], sizes = [64, 128], strides = [1, 1]} : vector<64x768xf32> to vector<64x128xf32>
    %17 = arith.truncf %16 : vector<64x128xf32> to vector<64x128xbf16>
    %18 = vector.extract_strided_slice %13 {offsets = [0, 512], sizes = [64, 128], strides = [1, 1]} : vector<64x768xf32> to vector<64x128xf32>
    %19 = arith.truncf %18 : vector<64x128xf32> to vector<64x128xbf16>
    %cst_11 = arith.constant dense<0.000000e+00> : vector<64x64xf32>
    %20 = tpu.matmul %15, %17, %cst_11 {dimension_numbers = #tpu.dot_dimension_numbers<[1], [1], [0], [0], [0, 0, 1, 0], [], []>} : vector<64x128xbf16>, vector<64x128xbf16>, vector<64x64xf32> -> vector<64x64xf32>
    %21 = vector.broadcast %5 : vector<1x64xf32> to vector<64x64xf32>
    %22 = arith.addf %20, %21 : vector<64x64xf32>
    %cst_12 = arith.constant dense<0xFF800000> : vector<64xf32>
    %23 = vector.multi_reduction <maximumf>, %22, %cst_12 [1] : vector<64x64xf32> to vector<64xf32>
    %24 = vector.shape_cast %23 : vector<64xf32> to vector<64x1xf32>
    %25 = vector.broadcast %24 : vector<64x1xf32> to vector<64x64xf32>
    %26 = arith.subf %22, %25 : vector<64x64xf32>
    %27 = math.exp %26 : vector<64x64xf32>
    %cst_13 = arith.constant dense<0.000000e+00> : vector<64xf32>
    %28 = vector.multi_reduction <add>, %27, %cst_13 [1] : vector<64x64xf32> to vector<64xf32>
    %29 = vector.shape_cast %28 : vector<64xf32> to vector<64x1xf32>
    %30 = tpu.reciprocal %29 {approx = true} : vector<64x1xf32> -> vector<64x1xf32>
    %31 = vector.broadcast %30 : vector<64x1xf32> to vector<64x64xf32>
    %32 = arith.mulf %27, %31 : vector<64x64xf32>
    %33 = arith.truncf %32 : vector<64x64xf32> to vector<64x64xbf16>
    %cst_14 = arith.constant dense<0.000000e+00> : vector<64x128xf32>
    %34 = tpu.matmul %33, %19, %cst_14 {dimension_numbers = #tpu.dot_dimension_numbers<[1], [0], [0], [1], [0, 0, 1, 1], [], []>} : vector<64x64xbf16>, vector<64x128xbf16>, vector<64x128xf32> -> vector<64x128xf32>
    %c0_15 = arith.constant 0 : index
    %c0_16 = arith.constant 0 : index
    %35 = vector.load %arg20[%c0_15, %c0_16] : memref<64x256xf32, #tpu.memory_space<vmem>>, vector<64x128xf32>
    tpu.vector_store %arg20[%c0_15, %c0_16], %34 {strides = array<i32>} : memref<64x256xf32, #tpu.memory_space<vmem>>, vector<64x128xf32>,
    %36 = vector.extract_strided_slice %13 {offsets = [0, 128], sizes = [64, 128], strides = [1, 1]} : vector<64x768xf32> to vector<64x128xf32>
    %37 = arith.truncf %36 : vector<64x128xf32> to vector<64x128xbf16>
    %38 = vector.extract_strided_slice %13 {offsets = [0, 384], sizes = [64, 128], strides = [1, 1]} : vector<64x768xf32> to vector<64x128xf32>
    %39 = arith.truncf %38 : vector<64x128xf32> to vector<64x128xbf16>
    %40 = vector.extract_strided_slice %13 {offsets = [0, 640], sizes = [64, 128], strides = [1, 1]} : vector<64x768xf32> to vector<64x128xf32>
    %41 = arith.truncf %40 : vector<64x128xf32> to vector<64x128xbf16>
    %cst_17 = arith.constant dense<0.000000e+00> : vector<64x64xf32>
    %42 = tpu.matmul %37, %39, %cst_17 {dimension_numbers = #tpu.dot_dimension_numbers<[1], [1], [0], [0], [0, 0, 1, 0], [], []>} : vector<64x128xbf16>, vector<64x128xbf16>, vector<64x64xf32> -> vector<64x64xf32>
    %43 = vector.broadcast %5 : vector<1x64xf32> to vector<64x64xf32>
    %44 = arith.addf %42, %43 : vector<64x64xf32>
    %cst_18 = arith.constant dense<0xFF800000> : vector<64xf32>
    %45 = vector.multi_reduction <maximumf>, %44, %cst_18 [1] : vector<64x64xf32> to vector<64xf32>
    %46 = vector.shape_cast %45 : vector<64xf32> to vector<64x1xf32>
    %47 = vector.broadcast %46 : vector<64x1xf32> to vector<64x64xf32>
    %48 = arith.subf %44, %47 : vector<64x64xf32>
    %49 = math.exp %48 : vector<64x64xf32>
    %cst_19 = arith.constant dense<0.000000e+00> : vector<64xf32>
    %50 = vector.multi_reduction <add>, %49, %cst_19 [1] : vector<64x64xf32> to vector<64xf32>
    %51 = vector.shape_cast %50 : vector<64xf32> to vector<64x1xf32>
    %52 = tpu.reciprocal %51 {approx = true} : vector<64x1xf32> -> vector<64x1xf32>
    %53 = vector.broadcast %52 : vector<64x1xf32> to vector<64x64xf32>
    %54 = arith.mulf %49, %53 : vector<64x64xf32>
    %55 = arith.truncf %54 : vector<64x64xf32> to vector<64x64xbf16>
    %cst_20 = arith.constant dense<0.000000e+00> : vector<64x128xf32>
    %56 = tpu.matmul %55, %41, %cst_20 {dimension_numbers = #tpu.dot_dimension_numbers<[1], [0], [0], [1], [0, 0, 1, 1], [], []>} : vector<64x64xbf16>, vector<64x128xbf16>, vector<64x128xf32> -> vector<64x128xf32>
    %c0_21 = arith.constant 0 : index
    %c128 = arith.constant 128 : index
    %57 = vector.load %arg20[%c0_21, %c128] : memref<64x256xf32, #tpu.memory_space<vmem>>, vector<64x128xf32>
    tpu.vector_store %arg20[%c0_21, %c128], %56 {strides = array<i32>} : memref<64x256xf32, #tpu.memory_space<vmem>>, vector<64x128xf32>,
    %c0_22 = arith.constant 0 : index
    %c0_23 = arith.constant 0 : index
    %58 = vector.load %arg20[%c0_22, %c0_23] : memref<64x256xf32, #tpu.memory_space<vmem>>, vector<64x256xf32>
    %59 = arith.truncf %58 : vector<64x256xf32> to vector<64x256xbf16>
    %c0_24 = arith.constant 0 : index
    %c0_25 = arith.constant 0 : index
    %c0_26 = arith.constant 0 : index
    %60 = vector.load %arg8[%c0_24, %c0_25, %c0_26] : memref<1x256x256xbf16, #tpu.memory_space<vmem>>, vector<1x256x256xbf16>
    %61 = vector.shape_cast %60 : vector<1x256x256xbf16> to vector<256x256xbf16>
    %cst_27 = arith.constant dense<0.000000e+00> : vector<64x256xf32>
    %62 = tpu.matmul %59, %61, %cst_27 {dimension_numbers = #tpu.dot_dimension_numbers<[1], [0], [0], [1], [0, 0, 1, 1], [], []>} : vector<64x256xbf16>, vector<256x256xbf16>, vector<64x256xf32> -> vector<64x256xf32>
    %c0_28 = arith.constant 0 : index
    %c0_29 = arith.constant 0 : index
    %c0_30 = arith.constant 0 : index
    %63 = vector.load %arg9[%c0_28, %c0_29, %c0_30] : memref<1x1x256xf32, #tpu.memory_space<vmem>>, vector<1x1x256xf32>
    %64 = vector.shape_cast %63 : vector<1x1x256xf32> to vector<1x256xf32>
    %65 = vector.broadcast %64 : vector<1x256xf32> to vector<64x256xf32>
    %66 = arith.addf %62, %65 : vector<64x256xf32>
    %67 = arith.addf %3, %66 : vector<64x256xf32>
    %c0_31 = arith.constant 0 : index
    %c0_32 = arith.constant 0 : index
    %c0_33 = arith.constant 0 : index
    %68 = vector.load %arg10[%c0_31, %c0_32, %c0_33] : memref<1x1x256xf32, #tpu.memory_space<vmem>>, vector<1x1x256xf32>
    %69 = vector.shape_cast %68 : vector<1x1x256xf32> to vector<1x256xf32>
    %c0_34 = arith.constant 0 : index
    %c0_35 = arith.constant 0 : index
    %c0_36 = arith.constant 0 : index
    %70 = vector.load %arg11[%c0_34, %c0_35, %c0_36] : memref<1x1x256xf32, #tpu.memory_space<vmem>>, vector<1x1x256xf32>
    %71 = vector.shape_cast %70 : vector<1x1x256xf32> to vector<1x256xf32>
    %cst_37 = arith.constant dense<0.000000e+00> : vector<64xf32>
    %72 = vector.multi_reduction <add>, %67, %cst_37 [1] : vector<64x256xf32> to vector<64xf32>
    %73 = vector.shape_cast %72 : vector<64xf32> to vector<64x1xf32>
    %cst_38 = arith.constant 2.560000e+02 : f32
    %74 = vector.broadcast %cst_38 : f32 to vector<64x1xf32>
    %75 = arith.divf %73, %74 : vector<64x1xf32>
    %76 = arith.mulf %67, %67 : vector<64x256xf32>
    %cst_39 = arith.constant dense<0.000000e+00> : vector<64xf32>
    %77 = vector.multi_reduction <add>, %76, %cst_39 [1] : vector<64x256xf32> to vector<64xf32>
    %78 = vector.shape_cast %77 : vector<64xf32> to vector<64x1xf32>
    %cst_40 = arith.constant 2.560000e+02 : f32
    %79 = vector.broadcast %cst_40 : f32 to vector<64x1xf32>
    %80 = arith.divf %78, %79 : vector<64x1xf32>
    %81 = arith.mulf %75, %75 : vector<64x1xf32>
    %82 = arith.subf %80, %81 : vector<64x1xf32>
    %83 = vector.broadcast %75 : vector<64x1xf32> to vector<64x256xf32>
    %84 = arith.subf %67, %83 : vector<64x256xf32>
    %cst_41 = arith.constant 9.99999974E-6 : f32
    %85 = vector.broadcast %cst_41 : f32 to vector<64x1xf32>
    %86 = arith.addf %82, %85 : vector<64x1xf32>
    %87 = math.rsqrt %86 : vector<64x1xf32>
    %88 = vector.broadcast %87 : vector<64x1xf32> to vector<64x256xf32>
    %89 = arith.mulf %84, %88 : vector<64x256xf32>
    %90 = vector.broadcast %69 : vector<1x256xf32> to vector<64x256xf32>
    %91 = arith.mulf %89, %90 : vector<64x256xf32>
    %92 = vector.broadcast %71 : vector<1x256xf32> to vector<64x256xf32>
    %93 = arith.addf %91, %92 : vector<64x256xf32>
    %94 = arith.truncf %93 : vector<64x256xf32> to vector<64x256xbf16>
    %c0_42 = arith.constant 0 : index
    %c0_43 = arith.constant 0 : index
    %c0_44 = arith.constant 0 : index
    %95 = vector.load %arg12[%c0_42, %c0_43, %c0_44] : memref<1x256x256xbf16, #tpu.memory_space<vmem>>, vector<1x256x256xbf16>
    %96 = vector.shape_cast %95 : vector<1x256x256xbf16> to vector<256x256xbf16>
    %cst_45 = arith.constant dense<0.000000e+00> : vector<64x256xf32>
    %97 = tpu.matmul %94, %96, %cst_45 {dimension_numbers = #tpu.dot_dimension_numbers<[1], [0], [0], [1], [0, 0, 1, 1], [], []>} : vector<64x256xbf16>, vector<256x256xbf16>, vector<64x256xf32> -> vector<64x256xf32>
    %c0_46 = arith.constant 0 : index
    %c0_47 = arith.constant 0 : index
    %c0_48 = arith.constant 0 : index
    %98 = vector.load %arg13[%c0_46, %c0_47, %c0_48] : memref<1x1x256xf32, #tpu.memory_space<vmem>>, vector<1x1x256xf32>
    %99 = vector.shape_cast %98 : vector<1x1x256xf32> to vector<1x256xf32>
    %100 = vector.broadcast %99 : vector<1x256xf32> to vector<64x256xf32>
    %101 = arith.addf %97, %100 : vector<64x256xf32>
    %cst_49 = arith.constant 0.000000e+00 : f32
    %102 = vector.broadcast %cst_49 : f32 to vector<64x256xf32>
    %103 = arith.maximumf %101, %102 : vector<64x256xf32>
    %104 = arith.truncf %103 : vector<64x256xf32> to vector<64x256xbf16>
    %c0_50 = arith.constant 0 : index
    %c0_51 = arith.constant 0 : index
    %c0_52 = arith.constant 0 : index
    %105 = vector.load %arg14[%c0_50, %c0_51, %c0_52] : memref<1x256x256xbf16, #tpu.memory_space<vmem>>, vector<1x256x256xbf16>
    %106 = vector.shape_cast %105 : vector<1x256x256xbf16> to vector<256x256xbf16>
    %cst_53 = arith.constant dense<0.000000e+00> : vector<64x256xf32>
    %107 = tpu.matmul %104, %106, %cst_53 {dimension_numbers = #tpu.dot_dimension_numbers<[1], [0], [0], [1], [0, 0, 1, 1], [], []>} : vector<64x256xbf16>, vector<256x256xbf16>, vector<64x256xf32> -> vector<64x256xf32>
    %c0_54 = arith.constant 0 : index
    %c0_55 = arith.constant 0 : index
    %c0_56 = arith.constant 0 : index
    %108 = vector.load %arg15[%c0_54, %c0_55, %c0_56] : memref<1x1x256xf32, #tpu.memory_space<vmem>>, vector<1x1x256xf32>
    %109 = vector.shape_cast %108 : vector<1x1x256xf32> to vector<1x256xf32>
    %110 = vector.broadcast %109 : vector<1x256xf32> to vector<64x256xf32>
    %111 = arith.addf %107, %110 : vector<64x256xf32>
    %112 = arith.addf %93, %111 : vector<64x256xf32>
    %c0_57 = arith.constant 0 : index
    %c0_58 = arith.constant 0 : index
    %c0_59 = arith.constant 0 : index
    %113 = vector.load %arg16[%c0_57, %c0_58, %c0_59] : memref<1x1x256xf32, #tpu.memory_space<vmem>>, vector<1x1x256xf32>
    %114 = vector.shape_cast %113 : vector<1x1x256xf32> to vector<1x256xf32>
    %c0_60 = arith.constant 0 : index
    %c0_61 = arith.constant 0 : index
    %c0_62 = arith.constant 0 : index
    %115 = vector.load %arg17[%c0_60, %c0_61, %c0_62] : memref<1x1x256xf32, #tpu.memory_space<vmem>>, vector<1x1x256xf32>
    %116 = vector.shape_cast %115 : vector<1x1x256xf32> to vector<1x256xf32>
    %cst_63 = arith.constant dense<0.000000e+00> : vector<64xf32>
    %117 = vector.multi_reduction <add>, %112, %cst_63 [1] : vector<64x256xf32> to vector<64xf32>
    %118 = vector.shape_cast %117 : vector<64xf32> to vector<64x1xf32>
    %cst_64 = arith.constant 2.560000e+02 : f32
    %119 = vector.broadcast %cst_64 : f32 to vector<64x1xf32>
    %120 = arith.divf %118, %119 : vector<64x1xf32>
    %121 = arith.mulf %112, %112 : vector<64x256xf32>
    %cst_65 = arith.constant dense<0.000000e+00> : vector<64xf32>
    %122 = vector.multi_reduction <add>, %121, %cst_65 [1] : vector<64x256xf32> to vector<64xf32>
    %123 = vector.shape_cast %122 : vector<64xf32> to vector<64x1xf32>
    %cst_66 = arith.constant 2.560000e+02 : f32
    %124 = vector.broadcast %cst_66 : f32 to vector<64x1xf32>
    %125 = arith.divf %123, %124 : vector<64x1xf32>
    %126 = arith.mulf %120, %120 : vector<64x1xf32>
    %127 = arith.subf %125, %126 : vector<64x1xf32>
    %128 = vector.broadcast %120 : vector<64x1xf32> to vector<64x256xf32>
    %129 = arith.subf %112, %128 : vector<64x256xf32>
    %cst_67 = arith.constant 9.99999974E-6 : f32
    %130 = vector.broadcast %cst_67 : f32 to vector<64x1xf32>
    %131 = arith.addf %127, %130 : vector<64x1xf32>
    %132 = math.rsqrt %131 : vector<64x1xf32>
    %133 = vector.broadcast %132 : vector<64x1xf32> to vector<64x256xf32>
    %134 = arith.mulf %129, %133 : vector<64x256xf32>
    %135 = vector.broadcast %114 : vector<1x256xf32> to vector<64x256xf32>
    %136 = arith.mulf %134, %135 : vector<64x256xf32>
    %137 = vector.broadcast %116 : vector<1x256xf32> to vector<64x256xf32>
    %138 = arith.addf %136, %137 : vector<64x256xf32>
    %c0_68 = arith.constant 0 : index
    %c0_69 = arith.constant 0 : index
    %139 = vector.load %arg19[%c0_68, %c0_69] : memref<64x256xf32, #tpu.memory_space<vmem>>, vector<64x256xf32>
    tpu.vector_store %arg19[%c0_68, %c0_69], %138 {strides = array<i32>} : memref<64x256xf32, #tpu.memory_space<vmem>>, vector<64x256xf32>,
    %c3_i32 = arith.constant 3 : i32
    %140 = arith.cmpi eq, %arg1, %c3_i32 : i32
    %141 = arith.extui %140 : i1 to i32
    %c0_i32_70 = arith.constant 0 : i32
    %142 = arith.cmpi ne, %141, %c0_i32_70 : i32
    scf.if %142 {
      %143 = arith.truncf %138 : vector<64x256xf32> to vector<64x256xbf16>
      %c0_71 = arith.constant 0 : index
      %c0_72 = arith.constant 0 : index
      %144 = vector.load %arg4[%c0_71, %c0_72] : memref<256x128xbf16, #tpu.memory_space<vmem>>, vector<256x128xbf16>
      %cst_73 = arith.constant dense<0.000000e+00> : vector<64x128xf32>
      %145 = tpu.matmul %143, %144, %cst_73 {dimension_numbers = #tpu.dot_dimension_numbers<[1], [0], [0], [1], [0, 0, 1, 1], [], []>} : vector<64x256xbf16>, vector<256x128xbf16>, vector<64x128xf32> -> vector<64x128xf32>
      %c0_74 = arith.constant 0 : index
      %c0_75 = arith.constant 0 : index
      %146 = vector.load %arg5[%c0_74, %c0_75] : memref<1x128xf32, #tpu.memory_space<vmem>>, vector<1x128xf32>
      %147 = vector.broadcast %146 : vector<1x128xf32> to vector<64x128xf32>
      %148 = arith.addf %145, %147 : vector<64x128xf32>
      %c0_76 = arith.constant 0 : index
      %c0_77 = arith.constant 0 : index
      %149 = vector.load %arg18[%c0_76, %c0_77] : memref<64x128xf32, #tpu.memory_space<vmem>>, vector<64x128xf32>
      tpu.vector_store %arg18[%c0_76, %c0_77], %148 {strides = array<i32>} : memref<64x128xf32, #tpu.memory_space<vmem>>, vector<64x128xf32>,
    } else {
    }
    return
  }
  func.func @transform_0(%arg0: i32, %arg1: i32) -> (i32, i32) {
    %c0_i32 = arith.constant 0 : i32
    %c0_i32_0 = arith.constant 0 : i32
    return %arg0, %c0_i32 : i32, i32
  }
  func.func @transform_1(%arg0: i32, %arg1: i32) -> (i32, i32, i32) {
    %c0_i32 = arith.constant 0 : i32
    %c0_i32_0 = arith.constant 0 : i32
    %c0_i32_1 = arith.constant 0 : i32
    return %arg0, %c0_i32, %c0_i32_0 : i32, i32, i32
  }
  func.func @transform_2(%arg0: i32, %arg1: i32) -> (i32, i32) {
    %c0_i32 = arith.constant 0 : i32
    %c0_i32_0 = arith.constant 0 : i32
    %c0_i32_1 = arith.constant 0 : i32
    return %c0_i32, %c0_i32_0 : i32, i32
  }
  func.func @transform_3(%arg0: i32, %arg1: i32) -> (i32, i32) {
    %c0_i32 = arith.constant 0 : i32
    %c0_i32_0 = arith.constant 0 : i32
    %c0_i32_1 = arith.constant 0 : i32
    return %c0_i32, %c0_i32_0 : i32, i32
  }
  func.func @transform_4(%arg0: i32, %arg1: i32) -> (i32, i32, i32) {
    %c0_i32 = arith.constant 0 : i32
    %c0_i32_0 = arith.constant 0 : i32
    %c0_i32_1 = arith.constant 0 : i32
    return %arg1, %c0_i32, %c0_i32_0 : i32, i32, i32
  }
  func.func @transform_5(%arg0: i32, %arg1: i32) -> (i32, i32, i32) {
    %c0_i32 = arith.constant 0 : i32
    %c0_i32_0 = arith.constant 0 : i32
    %c0_i32_1 = arith.constant 0 : i32
    return %arg1, %c0_i32, %c0_i32_0 : i32, i32, i32
  }
  func.func @transform_6(%arg0: i32, %arg1: i32) -> (i32, i32, i32) {
    %c0_i32 = arith.constant 0 : i32
    %c0_i32_0 = arith.constant 0 : i32
    %c0_i32_1 = arith.constant 0 : i32
    return %arg1, %c0_i32, %c0_i32_0 : i32, i32, i32
  }
  func.func @transform_7(%arg0: i32, %arg1: i32) -> (i32, i32, i32) {
    %c0_i32 = arith.constant 0 : i32
    %c0_i32_0 = arith.constant 0 : i32
    %c0_i32_1 = arith.constant 0 : i32
    return %arg1, %c0_i32, %c0_i32_0 : i32, i32, i32
  }
  func.func @transform_8(%arg0: i32, %arg1: i32) -> (i32, i32, i32) {
    %c0_i32 = arith.constant 0 : i32
    %c0_i32_0 = arith.constant 0 : i32
    %c0_i32_1 = arith.constant 0 : i32
    return %arg1, %c0_i32, %c0_i32_0 : i32, i32, i32
  }
  func.func @transform_9(%arg0: i32, %arg1: i32) -> (i32, i32, i32) {
    %c0_i32 = arith.constant 0 : i32
    %c0_i32_0 = arith.constant 0 : i32
    %c0_i32_1 = arith.constant 0 : i32
    return %arg1, %c0_i32, %c0_i32_0 : i32, i32, i32
  }
  func.func @transform_10(%arg0: i32, %arg1: i32) -> (i32, i32, i32) {
    %c0_i32 = arith.constant 0 : i32
    %c0_i32_0 = arith.constant 0 : i32
    %c0_i32_1 = arith.constant 0 : i32
    return %arg1, %c0_i32, %c0_i32_0 : i32, i32, i32
  }
  func.func @transform_11(%arg0: i32, %arg1: i32) -> (i32, i32, i32) {
    %c0_i32 = arith.constant 0 : i32
    %c0_i32_0 = arith.constant 0 : i32
    %c0_i32_1 = arith.constant 0 : i32
    return %arg1, %c0_i32, %c0_i32_0 : i32, i32, i32
  }
  func.func @transform_12(%arg0: i32, %arg1: i32) -> (i32, i32, i32) {
    %c0_i32 = arith.constant 0 : i32
    %c0_i32_0 = arith.constant 0 : i32
    %c0_i32_1 = arith.constant 0 : i32
    return %arg1, %c0_i32, %c0_i32_0 : i32, i32, i32
  }
  func.func @transform_13(%arg0: i32, %arg1: i32) -> (i32, i32, i32) {
    %c0_i32 = arith.constant 0 : i32
    %c0_i32_0 = arith.constant 0 : i32
    %c0_i32_1 = arith.constant 0 : i32
    return %arg1, %c0_i32, %c0_i32_0 : i32, i32, i32
  }
  func.func @transform_14(%arg0: i32, %arg1: i32) -> (i32, i32, i32) {
    %c0_i32 = arith.constant 0 : i32
    %c0_i32_0 = arith.constant 0 : i32
    %c0_i32_1 = arith.constant 0 : i32
    return %arg1, %c0_i32, %c0_i32_0 : i32, i32, i32
  }
  func.func @transform_15(%arg0: i32, %arg1: i32) -> (i32, i32, i32) {
    %c0_i32 = arith.constant 0 : i32
    %c0_i32_0 = arith.constant 0 : i32
    %c0_i32_1 = arith.constant 0 : i32
    return %arg1, %c0_i32, %c0_i32_0 : i32, i32, i32
  }
  func.func @transform_16(%arg0: i32, %arg1: i32) -> (i32, i32) {
    %c0_i32 = arith.constant 0 : i32
    %c0_i32_0 = arith.constant 0 : i32
    return %arg0, %c0_i32 : i32, i32
  }
}

</mosaic_0001>

<bundles_post_ra>
// kernel: fastspeech2_forward.4
= control target key start
LH: loop header
LB: loop body
LE: loop exit
PB: predicated region body
PF: predicated region fallthrough
CT: control target
= control target key end

     0   :  { %s2763_s20 = smov 0   ;;  %s3461_s0 = inlined_call_operand.vmem [shape: f32[16,256], index: 0, kind: input, shape index: {}]   ;;  %s3462_s1 = inlined_call_operand.vmem [shape: bf16[256,256], index: 1, kind: input, shape index: {}]   ;;  %s3463_s2 = inlined_call_operand.vmem [shape: bf16[256,256], index: 2, kind: input, shape index: {}]   ;;  %s3464_s3 = inlined_call_operand.vmem [shape: bf16[256,256], index: 3, kind: input, shape index: {}]   ;;  %s3465_s4 = inlined_call_operand.vmem [shape: f32[1,256], index: 4, kind: input, shape index: {}]   ;;  %s3466_s5 = inlined_call_operand.vmem [shape: f32[1,256], index: 5, kind: input, shape index: {}]   ;;  %s3467_s6 = inlined_call_operand.vmem [shape: f32[1,256], index: 6, kind: input, shape index: {}]   ;;  %s3468_s7 = inlined_call_operand.vmem [shape: bf16[256,256], index: 7, kind: input, shape index: {}]   ;;  %s3469_s8 = inlined_call_operand.vmem [shape: bf16[256,256], index: 8, kind: input, shape index: {}]   ;;  %s3470_s9 = inlined_call_operand.vmem [shape: bf16[256,256], index: 9, kind: input, shape index: {}]   ;;  %s3471_s10 = inlined_call_operand.vmem [shape: f32[1,256], index: 10, kind: input, shape index: {}]   ;;  %s3472_s11 = inlined_call_operand.vmem [shape: f32[1,256], index: 11, kind: input, shape index: {}]   ;;  %s3473_s12 = inlined_call_operand.vmem [shape: f32[1,256], index: 12, kind: input, shape index: {}]   ;;  %s3474_s13 = inlined_call_operand.vmem [shape: f32[1,256], index: 13, kind: input, shape index: {}]   ;;  %s3475_s14 = inlined_call_operand.<no memory space> [shape: f32[1,1], index: 14, kind: input, shape index: {}]   ;;  %s3476_s15 = inlined_call_operand.vmem [shape: f32[16,128], index: 15, kind: output, shape index: {}]  }
   0x1   :  { %v20_v0 = vstv %s3475_s14 }
   0x2   :  { %21 = vst [vmem:[#allocation2] sm:$0x1] %v20_v0 }
   0x3 LB: > { %s2140_s21 = sadd.s32 4294967295, %s2677_s20   ;;  %p2144_p0 = scmp.ge.s32.totalorder %s2677_s20, 1  ;;  %s2677_s20 = sphi %s2763_s20, %s27_s20  }
   0x4   : > { %p439_p1 = scmp.lt.s32.totalorder %s2677_s20, 3 }
   0x6   : > { %p440_p2 = pnand %p2144_p0, %p439_p1 }
   0x7   : > { %p486_p3 = scmp.lt.s32.totalorder (!%p440_p2), %s2140_s21, 1 }
   0x8   : > { %443 = sbr.rel (%p440_p2) target bundleno = 1220 (0x4c4), region = 80 }
   0xd   : > { %v2379_v1 = vld [vmem:[%s3463_s2 + $0x74] ss:$8 sps:$4 sm:$0xff]   ;;  %v2383_v3 = vld [vmem:[%s3463_s2 + $0x70] ss:$8 sps:$4 sm:$0xff]   ;;  %v2385_v5 = vld [vmem:[%s3463_s2 + $0x64] ss:$8 sps:$4 sm:$0xff]   ;;  %v499_v42 = vlaneseq }
   0xe   : > { %v2381_v2 = vld [vmem:[%s3462_s1 + $0x74] ss:$8 sps:$4 sm:$0xff]   ;;  %739 = vmatprep.subr.bf16.mxu0 %v2379_v1  ;;  %v2384_v4 = vld [vmem:[%s3462_s1 + $0x70] ss:$8 sps:$4 sm:$0xff]   ;;  %v2387_v6 = vld [vmem:[%s3462_s1 + $0x64] ss:$8 sps:$4 sm:$0xff]  }
   0xf   : > { %940 = vmatprep.subr.bf16.mxu1 %v2381_v2  ;;  %740 = vmatpush1.bf16.msra.mxu0 %v2383_v3  ;;  %v2389_v7 = vld [vmem:[%s3463_s2 + $0x60] ss:$8 sps:$4 sm:$0xff]   ;;  %v2391_v9 = vld [vmem:[%s3463_s2 + $0x54] ss:$8 sps:$4 sm:$0xff]   ;;  %v2395_v11 = vld [vmem:[%s3463_s2 + $0x50] ss:$8 sps:$4 sm:$0xff]  }
  0x10   : > { %941 = vmatpush1.bf16.msra.mxu1 %v2384_v4  ;;  %741 = vmatprep.subr.bf16.mxu0 %v2385_v5  ;;  %v2390_v8 = vld [vmem:[%s3462_s1 + $0x60] ss:$8 sps:$4 sm:$0xff]   ;;  %v2393_v10 = vld [vmem:[%s3462_s1 + $0x54] ss:$8 sps:$4 sm:$0xff]   ;;  %v2396_v12 = vld [vmem:[%s3462_s1 + $0x50] ss:$8 sps:$4 sm:$0xff]  }
  0x11   : > { %942 = vmatprep.subr.bf16.mxu1 %v2387_v6  ;;  %v2397_v13 = vld [vmem:[%s3463_s2 + $0x44] ss:$8 sps:$4 sm:$0xff]   ;;  %v2401_v15 = vld [vmem:[%s3463_s2 + $0x40] ss:$8 sps:$4 sm:$0xff]   ;;  %v2403_v17 = vld [vmem:[%s3463_s2 + $0x34] ss:$8 sps:$4 sm:$0xff]  }
  0x12   : > { %v2399_v14 = vld [vmem:[%s3462_s1 + $0x44] ss:$8 sps:$4 sm:$0xff]   ;;  %v2402_v16 = vld [vmem:[%s3462_s1 + $0x40] ss:$8 sps:$4 sm:$0xff]   ;;  %v2405_v18 = vld [vmem:[%s3462_s1 + $0x34] ss:$8 sps:$4 sm:$0xff]  }
  0x13   : > { %742 = vmatpush1.bf16.msra.mxu0 %v2389_v7  ;;  %v2407_v19 = vld [vmem:[%s3463_s2 + $0x30] ss:$8 sps:$4 sm:$0xff]   ;;  %v2409_v21 = vld [vmem:[%s3463_s2 + $0x24] ss:$8 sps:$4 sm:$0xff]   ;;  %v2413_v23 = vld [vmem:[%s3463_s2 + $0x20] ss:$8 sps:$4 sm:$0xff]  }
  0x14   : > { %943 = vmatpush1.bf16.msra.mxu1 %v2390_v8  ;;  %743 = vmatprep.subr.bf16.mxu0 %v2391_v9  ;;  %v2408_v20 = vld [vmem:[%s3462_s1 + $0x30] ss:$8 sps:$4 sm:$0xff]   ;;  %v2411_v22 = vld [vmem:[%s3462_s1 + $0x24] ss:$8 sps:$4 sm:$0xff]   ;;  %v2414_v24 = vld [vmem:[%s3462_s1 + $0x20] ss:$8 sps:$4 sm:$0xff]  }
  0x15   : > { %944 = vmatprep.subr.bf16.mxu1 %v2393_v10  ;;  %v2415_v25 = vld [vmem:[%s3463_s2 + $0x14] ss:$8 sps:$4 sm:$0xff]   ;;  %v2419_v27 = vld [vmem:[%s3463_s2 + $0x10] ss:$8 sps:$4 sm:$0xff]   ;;  %v2421_v29 = vld [vmem:[%s3463_s2 + $0x4] ss:$8 sps:$4 sm:$0xff]  }
  0x16   : > { %v2417_v26 = vld [vmem:[%s3462_s1 + $0x14] ss:$8 sps:$4 sm:$0xff]   ;;  %v2420_v28 = vld [vmem:[%s3462_s1 + $0x10] ss:$8 sps:$4 sm:$0xff]   ;;  %v2423_v30 = vld [vmem:[%s3462_s1 + $0x4] ss:$8 sps:$4 sm:$0xff]  }
  0x17   : > { %744 = vmatpush1.bf16.msra.mxu0 %v2395_v11  ;;  %v2425_v31 = vld [vmem:[%s3463_s2] ss:$8 sps:$4 sm:$0xff]   ;;  %v2427_v33 = vld [vmem:[%s3463_s2 + $0xf4] ss:$8 sps:$4 sm:$0xff]   ;;  %v2431_v35 = vld [vmem:[%s3463_s2 + $0xf0] ss:$8 sps:$4 sm:$0xff]  }
  0x18   : > { %945 = vmatpush1.bf16.msra.mxu1 %v2396_v12  ;;  %745 = vmatprep.subr.bf16.mxu0 %v2397_v13  ;;  %v2426_v32 = vld [vmem:[%s3462_s1] ss:$8 sps:$4 sm:$0xff]   ;;  %v2429_v34 = vld [vmem:[%s3462_s1 + $0xf4] ss:$8 sps:$4 sm:$0xff]   ;;  %v2432_v36 = vld [vmem:[%s3462_s1 + $0xf0] ss:$8 sps:$4 sm:$0xff]  }
  0x19   : > { %946 = vmatprep.subr.bf16.mxu1 %v2399_v14  ;;  %v2433_v37 = vld [vmem:[%s3463_s2 + $0xe4] ss:$8 sps:$4 sm:$0xff]   ;;  %s3482_s21 = smov (!%p486_p3, %s2140_s21), 1  ;;  %v2437_v39 = vld [vmem:[%s3463_s2 + $0xe0] ss:$8 sps:$4 sm:$0xff]   ;;  %v2918_v47 = vshrl.u32 %v499_v42, 7 }
  0x1a   : > { %v2435_v38 = vld [vmem:[%s3462_s1 + $0xe4] ss:$8 sps:$4 sm:$0xff]   ;;  %v2438_v40 = vld [vmem:[%s3462_s1 + $0xe0] ss:$8 sps:$4 sm:$0xff]   ;;  %v2439_v41 = vld [vmem:[%s3463_s2 + $0xd4] ss:$8 sps:$4 sm:$0xff]  }
  0x1b   : > { %746 = vmatpush1.bf16.msra.mxu0 %v2401_v15  ;;  %v2441_v43 = vld [vmem:[%s3462_s1 + $0xd4] ss:$8 sps:$4 sm:$0xff]   ;;  %s2367_s22 = sshll.u32 %s3482_s21, 4  ;;  %v2443_v44 = vld [vmem:[%s3463_s2 + $0xd0] ss:$8 sps:$4 sm:$0xff]   ;;  %vm501_vm0 = vcmp.gt.s32.totalorder %v2918_v47, 0 }
  0x1c   : > { %947 = vmatpush1.bf16.msra.mxu1 %v2402_v16  ;;  %747 = vmatprep.subr.bf16.mxu0 %v2403_v17  ;;  %v2444_v45 = vld [vmem:[%s3462_s1 + $0xd0] ss:$8 sps:$4 sm:$0xff]   ;;  %v2445_v46 = vld [vmem:[%s3463_s2 + $0xc4] ss:$8 sps:$4 sm:$0xff]   ;;  %s2916_s30 = scalar_lea.vmem %s3461_s0, %s2367_s22  ;;  %v2449_v49 = vld [vmem:[%s3463_s2 + $0xc0] ss:$8 sps:$4 sm:$0xff]  }
  0x1d   : > { %948 = vmatprep.subr.bf16.mxu1 %v2405_v18  ;;  %v2447_v48 = vld [vmem:[%s3462_s1 + $0xc4] ss:$8 sps:$4 sm:$0xff]   ;;  %v2450_v51 = vld [vmem:[%s3462_s1 + $0xc0] ss:$8 sps:$4 sm:$0xff]   ;;  %v2451_v54 = vld [vmem:[%s3463_s2 + $0xb4] ss:$8 sps:$4 sm:$0xff]  }
  0x1e   : > { %v496_v50 = vld [vmem:[%s2916_s30 + $0x8] sm:$0xff]  ;;  %v2453_v55 = vld [vmem:[%s3462_s1 + $0xb4] ss:$8 sps:$4 sm:$0xff]   ;;  %v2455_v57 = vld [vmem:[%s3463_s2 + $0xb0] ss:$8 sps:$4 sm:$0xff]   ;;  %vm508_vm2 = vcmp.lt.s32.totalorder %v2918_v47, 7 }
  0x1f   : > { %748 = vmatpush1.bf16.msra.mxu0 %v2407_v19  ;;  %v546_v52 = vpack.c.bf16 %v496_v50, %v496_v50  ;;  %v498_v53 = vrot.slane %v496_v50, 7  ;;  %vm2940_vm1 = vmpackc.low %vm501_vm0, %vm501_vm0  ;;  %v2456_v59 = vld [vmem:[%s3462_s1 + $0xb0] ss:$8 sps:$4 sm:$0xff]   ;;  %v2457_v60 = vld [vmem:[%s3463_s2 + $0xa4] ss:$8 sps:$4 sm:$0xff]   ;;  %v507_v10 = vrot.slane %v496_v50, 1 }
  0x20   : > { %949 = vmatpush1.bf16.msra.mxu1 %v2408_v20  ;;  %749 = vmatprep.subr.bf16.mxu0 %v2409_v21  ;;  %v2459_v61 = vld [vmem:[%s3462_s1 + $0xa4] ss:$8 sps:$4 sm:$0xff]   ;;  %v2461_v62 = vld [vmem:[%s3463_s2 + $0xa0] ss:$8 sps:$4 sm:$0xff]   ;;  %v2463_v0 = vld [vmem:[%s3463_s2 + $0x94] ss:$8 sps:$4 sm:$0xff]  }
  0x21   : > { %950 = vmatprep.subr.bf16.mxu1 %v2411_v22  ;;  %771 = vmatprep.mubr.bf16.mxu0 %v546_v52  ;;  %v2213_v56 = vpack.c.bf16 %v498_v53, %v498_v53  ;;  %v2462_v63 = vld [vmem:[%s3462_s1 + $0xa0] ss:$8 sps:$4 sm:$0xff]   ;;  %v2465_v1 = vld [vmem:[%s3462_s1 + $0x94] ss:$8 sps:$4 sm:$0xff]   ;;  %v2467_v2 = vld [vmem:[%s3463_s2 + $0x90] ss:$8 sps:$4 sm:$0xff]   ;;  %v2251_v14 = vpack.c.bf16 %v507_v10, %v507_v10 }
  0x22   : > { %v2468_v3 = vld [vmem:[%s3462_s1 + $0x90] ss:$8 sps:$4 sm:$0xff]   ;;  %v2469_v4 = vld [vmem:[%s3463_s2 + $0x84] ss:$8 sps:$4 sm:$0xff]   ;;  %v2473_v8 = vld [vmem:[%s3463_s2 + $0x80] ss:$8 sps:$4 sm:$0xff]  }
  0x23   : > { %750 = vmatpush1.bf16.msra.mxu0 %v2413_v23  ;;  %2214 = vmatprep.mubr.msk.bf16.mxu1 %vm2940_vm1, %v2213_v56  ;;  %v2977_v5 = vld [vmem:[%s2916_s30] sm:$0xff]  ;;  %v2477_v11 = vld [vmem:[%s3464_s3 + $0x74] ss:$8 sps:$4 sm:$0xff]   ;;  %v2475_v15 = vld [vmem:[%s3464_s3 + $0x70] ss:$8 sps:$4 sm:$0xff]   ;;  %s2147_s18 = sshll.u32 %s3482_s21, 3 }
  0x24   : > { %951 = vmatpush1.bf16.msra.mxu1 %v2414_v24  ;;  %751 = vmatprep.subr.bf16.mxu0 %v2415_v25  ;;  %v2471_v6 = vld [vmem:[%s3462_s1 + $0x84] ss:$8 sps:$4 sm:$0xff]   ;;  %v497_v7 = vrot.slane %v2977_v5, 7  ;;  %v2474_v9 = vld [vmem:[%s3462_s1 + $0x80] ss:$8 sps:$4 sm:$0xff]   ;;  %v545_v13 = vpack.c.bf16 %v2977_v5, %v2977_v5  ;;  %vm3001_vm3 = vmpackc.low %vm508_vm2, %vm508_vm2  ;;  %s494_s14 = scalar_lea.vmem %s3476_s15, %s2147_s18 }
  0x25   : > { %952 = vmatprep.subr.bf16.mxu1 %v2417_v26  ;;  %v2480_v16 = vld [vmem:[%s3464_s3 + $0x64] ss:$8 sps:$4 sm:$0xff]   ;;  %v2478_v18 = vld [vmem:[%s3464_s3 + $0x60] ss:$8 sps:$4 sm:$0xff]   ;;  %v2483_v19 = vld [vmem:[%s3464_s3 + $0x54] ss:$8 sps:$4 sm:$0xff]  }
  0x26   : > { %v2216_v12 = vpack.c.bf16 %v497_v7, %v497_v7  ;;  %v2481_v20 = vld [vmem:[%s3464_s3 + $0x50] ss:$8 sps:$4 sm:$0xff]   ;;  %v2486_v21 = vld [vmem:[%s3464_s3 + $0x44] ss:$8 sps:$4 sm:$0xff]   ;;  %v2484_v22 = vld [vmem:[%s3464_s3 + $0x40] ss:$8 sps:$4 sm:$0xff]  }
  0x27   : > { %752 = vmatpush1.bf16.msra.mxu0 %v2419_v27  ;;  %v2489_v23 = vld [vmem:[%s3464_s3 + $0x34] ss:$8 sps:$4 sm:$0xff]   ;;  %v2487_v24 = vld [vmem:[%s3464_s3 + $0x30] ss:$8 sps:$4 sm:$0xff]   ;;  %v2492_v25 = vld [vmem:[%s3464_s3 + $0x24] ss:$8 sps:$4 sm:$0xff]  }
  0x28   : > { %953 = vmatpush1.bf16.msra.mxu1 %v2420_v28  ;;  %753 = vmatprep.subr.bf16.mxu0 %v2421_v29  ;;  %v2490_v26 = vld [vmem:[%s3464_s3 + $0x20] ss:$8 sps:$4 sm:$0xff]   ;;  %v2495_v27 = vld [vmem:[%s3464_s3 + $0x14] ss:$8 sps:$4 sm:$0xff]   ;;  %v2493_v28 = vld [vmem:[%s3464_s3 + $0x10] ss:$8 sps:$4 sm:$0xff]  }
  0x29   : > { %954 = vmatprep.subr.bf16.mxu1 %v2423_v30  ;;  %v2498_v29 = vld [vmem:[%s3464_s3 + $0x4] ss:$8 sps:$4 sm:$0xff]   ;;  %v2496_v30 = vld [vmem:[%s3464_s3] ss:$8 sps:$4 sm:$0xff]   ;;  %v2523_v50 = vld [vmem:[%s3469_s8 + $0x70] ss:$8 sps:$4 sm:$0xff]  }
  0x2a   : > { %v2514_v42 = vld [vmem:[%s3464_s3 + $0xa0] ss:$8 sps:$4 sm:$0xff]   ;;  %v2526_v52 = vld [vmem:[%s3468_s7 + $0x70] ss:$8 sps:$4 sm:$0xff]   ;;  %v2528_v53 = vld [vmem:[%s3468_s7 + $0x74] ss:$8 sps:$4 sm:$0xff]  }
  0x2b   : > { %754 = vmatpush1.bf16.msra.mxu0 %v2425_v31  ;;  %v2501_v31 = vld [vmem:[%s3464_s3 + $0xf4] ss:$8 sps:$4 sm:$0xff]   ;;  %v2529_v56 = vld [vmem:[%s3469_s8 + $0x60] ss:$8 sps:$4 sm:$0xff]   ;;  %v2555_v7 = vld [vmem:[%s3469_s8 + $0x24] ss:$8 sps:$4 sm:$0xff]  }
  0x2c   : > { %955 = vmatpush1.bf16.msra.mxu1 %v2426_v32  ;;  %755 = vmatprep.subr.bf16.mxu0 %v2427_v33  ;;  %v2499_v32 = vld [vmem:[%s3464_s3 + $0xf0] ss:$8 sps:$4 sm:$0xff]   ;;  %v2504_v33 = vld [vmem:[%s3464_s3 + $0xe4] ss:$8 sps:$4 sm:$0xff]   ;;  %v2556_v10 = vld [vmem:[%s3468_s7 + $0x20] ss:$8 sps:$4 sm:$0xff]  }
  0x2d   : > { %956 = vmatprep.subr.bf16.mxu1 %v2429_v34  ;;  %v2502_v34 = vld [vmem:[%s3464_s3 + $0xe0] ss:$8 sps:$4 sm:$0xff]  }
  0x2e   : > { %v2628_v58 = vld [vmem:[%s3470_s9 + $0x40] ss:$8 sps:$4 sm:$0xff]  }
  0x2f   : > { %756 = vmatpush2.bf16.msra.mxu0 %v2431_v35  ;;  %v2507_v35 = vld [vmem:[%s3464_s3 + $0xd4] ss:$8 sps:$4 sm:$0xff]  }
  0x30   : > { %957 = vmatpush2.bf16.msra.mxu1 %v2432_v36  ;;  %757 = vmatprep.subr.bf16.mxu0 %v2433_v37  ;;  %v2505_v36 = vld [vmem:[%s3464_s3 + $0xd0] ss:$8 sps:$4 sm:$0xff]   ;;  %v2510_v37 = vld [vmem:[%s3464_s3 + $0xc4] ss:$8 sps:$4 sm:$0xff]  }
  0x31   : > { %958 = vmatprep.subr.bf16.mxu1 %v2435_v38  ;;  %v2508_v38 = vld [vmem:[%s3464_s3 + $0xc0] ss:$8 sps:$4 sm:$0xff]  }
  0x33   : > { %758 = vmatpush2.bf16.msra.mxu0 %v2437_v39  ;;  %v2513_v39 = vld [vmem:[%s3464_s3 + $0xb4] ss:$8 sps:$4 sm:$0xff]  }
  0x34   : > { %959 = vmatpush2.bf16.msra.mxu1 %v2438_v40  ;;  %759 = vmatprep.subr.bf16.mxu0 %v2439_v41  ;;  %v2511_v40 = vld [vmem:[%s3464_s3 + $0xb0] ss:$8 sps:$4 sm:$0xff]   ;;  %v2516_v41 = vld [vmem:[%s3464_s3 + $0xa4] ss:$8 sps:$4 sm:$0xff]  }
  0x35   : > { %960 = vmatprep.subr.bf16.mxu1 %v2441_v43  ;;  %v2519_v43 = vld [vmem:[%s3464_s3 + $0x94] ss:$8 sps:$4 sm:$0xff]  }
  0x37   : > { %760 = vmatpush2.bf16.msra.mxu0 %v2443_v44  ;;  %v2517_v44 = vld [vmem:[%s3464_s3 + $0x90] ss:$8 sps:$4 sm:$0xff]  }
  0x38   : > { %961 = vmatpush2.bf16.msra.mxu1 %v2444_v45  ;;  %761 = vmatprep.subr.bf16.mxu0 %v2445_v46  ;;  %v2522_v45 = vld [vmem:[%s3464_s3 + $0x84] ss:$8 sps:$4 sm:$0xff]   ;;  %v506_v46 = vrot.slane %v2977_v5, 1  ;;  %v2547_v5 = vld [vmem:[%s3469_s8 + $0x30] ss:$8 sps:$4 sm:$0xff]  }
  0x39   : > { %962 = vmatprep.subr.bf16.mxu1 %v2447_v48  ;;  %v2520_v48 = vld [vmem:[%s3464_s3 + $0x80] ss:$8 sps:$4 sm:$0xff]  }
  0x3b   : > { %762 = vmatpush2.bf16.msra.mxu0 %v2449_v49  ;;  %v2254_v49 = vpack.c.bf16 %v506_v46, %v506_v46 }
  0x3c   : > { %963 = vmatpush2.bf16.msra.mxu1 %v2450_v51  ;;  %763 = vmatprep.subr.bf16.mxu0 %v2451_v54  ;;  %v2525_v51 = vld [vmem:[%s3469_s8 + $0x74] ss:$8 sps:$4 sm:$0xff]   ;;  %v2531_v54 = vld [vmem:[%s3469_s8 + $0x64] ss:$8 sps:$4 sm:$0xff]  }
  0x3d   : > { %964 = vmatprep.subr.bf16.mxu1 %v2453_v55  ;;  %v2534_v55 = vld [vmem:[%s3468_s7 + $0x64] ss:$8 sps:$4 sm:$0xff]  }
  0x3f   : > { %764 = vmatpush2.bf16.msra.mxu0 %v2455_v57  ;;  %v2532_v57 = vld [vmem:[%s3468_s7 + $0x60] ss:$8 sps:$4 sm:$0xff]  }
  0x40   : > { %965 = vmatpush2.bf16.msra.mxu1 %v2456_v59  ;;  %765 = vmatprep.subr.bf16.mxu0 %v2457_v60  ;;  %v2537_v59 = vld [vmem:[%s3469_s8 + $0x54] ss:$8 sps:$4 sm:$0xff]  }
  0x41   : > { %966 = vmatprep.subr.bf16.mxu1 %v2459_v61  ;;  %v2540_v60 = vld [vmem:[%s3468_s7 + $0x54] ss:$8 sps:$4 sm:$0xff]   ;;  %v2535_v61 = vld [vmem:[%s3469_s8 + $0x50] ss:$8 sps:$4 sm:$0xff]  }
  0x43   : > { %766 = vmatpush2.bf16.msra.mxu0 %v2461_v62  ;;  %v2538_v62 = vld [vmem:[%s3468_s7 + $0x50] ss:$8 sps:$4 sm:$0xff]  }
  0x44   : > { %967 = vmatpush2.bf16.msra.mxu1 %v2462_v63  ;;  %767 = vmatprep.subr.bf16.mxu0 %v2463_v0  ;;  %v2543_v63 = vld [vmem:[%s3469_s8 + $0x44] ss:$8 sps:$4 sm:$0xff]  }
  0x45   : > { %968 = vmatprep.subr.bf16.mxu1 %v2465_v1  ;;  %v2546_v0 = vld [vmem:[%s3468_s7 + $0x44] ss:$8 sps:$4 sm:$0xff]   ;;  %v2541_v1 = vld [vmem:[%s3469_s8 + $0x40] ss:$8 sps:$4 sm:$0xff]  }
  0x47   : > { %768 = vmatpush2.bf16.msra.mxu0 %v2467_v2  ;;  %v2544_v2 = vld [vmem:[%s3468_s7 + $0x40] ss:$8 sps:$4 sm:$0xff]  }
  0x48   : > { %969 = vmatpush2.bf16.msra.mxu1 %v2468_v3  ;;  %769 = vmatprep.subr.bf16.mxu0 %v2469_v4  ;;  %v2549_v3 = vld [vmem:[%s3469_s8 + $0x34] ss:$8 sps:$4 sm:$0xff]  }
  0x49   : > { %970 = vmatprep.subr.bf16.mxu1 %v2471_v6  ;;  %v2552_v4 = vld [vmem:[%s3468_s7 + $0x34] ss:$8 sps:$4 sm:$0xff]   ;;  %v2550_v6 = vld [vmem:[%s3468_s7 + $0x30] ss:$8 sps:$4 sm:$0xff]  }
  0x4b   : > { %770 = vmatpush2.bf16.msra.mxu0 %v2473_v8  ;;  %v2558_v8 = vld [vmem:[%s3468_s7 + $0x24] ss:$8 sps:$4 sm:$0xff]  }
  0x4c   : > { %971 = vmatpush2.bf16.msra.mxu1 %v2474_v9  ;;  %1173 = vmatprep.subr.bf16.mxu0 %v2477_v11  ;;  %v2553_v9 = vld [vmem:[%s3469_s8 + $0x20] ss:$8 sps:$4 sm:$0xff]   ;;  %v2561_v11 = vld [vmem:[%s3469_s8 + $0x14] ss:$8 sps:$4 sm:$0xff]  }
  0x4d   : > { %1517 = vmatprep.subr.bf16.mxu1 %v2525_v51  ;;  %v2576_v51 = vld [vmem:[%s3468_s7 + $0xf4] ss:$8 sps:$4 sm:$0xff]  }
  0x4e   : > { %772 = vmatmul.mubr.bf16.vlgmr.msra.gmra.mxu0 %v545_v13  ;;  %v2559_v13 = vld [vmem:[%s3469_s8 + $0x10] ss:$8 sps:$4 sm:$0xff]  }
  0x4f   : > { %2217 = vmatmul.mubr.msk.bf16.vlgmr.msra.gmra.mxu1 %vm2940_vm1, %v2216_v12  ;;  %1174 = vmatpush1.bf16.msra.mxu0 %v2475_v15  ;;  %v2564_v12 = vld [vmem:[%s3468_s7 + $0x14] ss:$8 sps:$4 sm:$0xff]   ;;  %v2567_v15 = vld [vmem:[%s3469_s8 + $0x4] ss:$8 sps:$4 sm:$0xff]  }
  0x50   : > { %2252 = vmatprep.mubr.msk.bf16.mxu0 %vm3001_vm3, %v2251_v14  ;;  %1175 = vmatprep.subr.bf16.mxu0 %v2480_v16  ;;  %v2562_v14 = vld [vmem:[%s3468_s7 + $0x10] ss:$8 sps:$4 sm:$0xff]   ;;  %v2570_v16 = vld [vmem:[%s3468_s7 + $0x4] ss:$8 sps:$4 sm:$0xff]  }
  0x51   : > { %1518 = vmatpush1.bf16.msra.mxu1 %v2523_v50  ;;  %v2571_v50 = vld [vmem:[%s3469_s8 + $0xf0] ss:$8 sps:$4 sm:$0xff]  }
  0x52   : > { %1519 = vmatprep.subr.bf16.mxu1 %v2531_v54  ;;  %v2577_v54 = vld [vmem:[%s3469_s8 + $0xe0] ss:$8 sps:$4 sm:$0xff]  }
  0x53   : > { %1176 = vmatpush1.bf16.msra.mxu0 %v2478_v18  ;;  %v2565_v18 = vld [vmem:[%s3469_s8] ss:$8 sps:$4 sm:$0xff]  }
  0x54   : > { %1177 = vmatprep.subr.bf16.mxu0 %v2483_v19  ;;  %v2568_v19 = vld [vmem:[%s3468_s7] ss:$8 sps:$4 sm:$0xff]  }
  0x55   : > { %1520 = vmatpush1.bf16.msra.mxu1 %v2529_v56  ;;  %v2580_v56 = vld [vmem:[%s3468_s7 + $0xe0] ss:$8 sps:$4 sm:$0xff]  }
  0x56   : > { %1521 = vmatprep.subr.bf16.mxu1 %v2537_v59  ;;  %v2583_v59 = vld [vmem:[%s3469_s8 + $0xd0] ss:$8 sps:$4 sm:$0xff]  }
  0x57   : > { %1178 = vmatpush1.bf16.msra.mxu0 %v2481_v20 }
  0x58   : > { %1179 = vmatprep.subr.bf16.mxu0 %v2486_v21 }
  0x59   : > { %1522 = vmatpush1.bf16.msra.mxu1 %v2535_v61  ;;  %v2586_v61 = vld [vmem:[%s3468_s7 + $0xd0] ss:$8 sps:$4 sm:$0xff]  }
  0x5a   : > { %1523 = vmatprep.subr.bf16.mxu1 %v2543_v63  ;;  %v2591_v63 = vld [vmem:[%s3469_s8 + $0xc4] ss:$8 sps:$4 sm:$0xff]  }
  0x5b   : > { %1180 = vmatpush1.bf16.msra.mxu0 %v2484_v22 }
  0x5c   : > { %1181 = vmatprep.subr.bf16.mxu0 %v2489_v23 }
  0x5d   : > { %1524 = vmatpush1.bf16.msra.mxu1 %v2541_v1  ;;  %v2592_v1 = vld [vmem:[%s3468_s7 + $0xc0] ss:$8 sps:$4 sm:$0xff]  }
  0x5e   : > { %1525 = vmatprep.subr.bf16.mxu1 %v2549_v3  ;;  %v2595_v3 = vld [vmem:[%s3469_s8 + $0xb0] ss:$8 sps:$4 sm:$0xff]  }
  0x5f   : > { %1182 = vmatpush1.bf16.msra.mxu0 %v2487_v24 }
  0x60   : > { %1183 = vmatprep.subr.bf16.mxu0 %v2492_v25 }
  0x61   : > { %1526 = vmatpush1.bf16.msra.mxu1 %v2547_v5  ;;  %v2603_v5 = vld [vmem:[%s3469_s8 + $0xa4] ss:$8 sps:$4 sm:$0xff]  }
  0x62   : > { %1527 = vmatprep.subr.bf16.mxu1 %v2555_v7  ;;  %v2601_v7 = vld [vmem:[%s3469_s8 + $0xa0] ss:$8 sps:$4 sm:$0xff]  }
  0x63   : > { %1184 = vmatpush1.bf16.msra.mxu0 %v2490_v26 }
  0x64   : > { %1185 = vmatprep.subr.bf16.mxu0 %v2495_v27 }
  0x65   : > { %1528 = vmatpush1.bf16.msra.mxu1 %v2553_v9  ;;  %v2609_v9 = vld [vmem:[%s3469_s8 + $0x94] ss:$8 sps:$4 sm:$0xff]  }
  0x66   : > { %1529 = vmatprep.subr.bf16.mxu1 %v2561_v11  ;;  %v2607_v11 = vld [vmem:[%s3469_s8 + $0x90] ss:$8 sps:$4 sm:$0xff]  }
  0x67   : > { %1186 = vmatpush1.bf16.msra.mxu0 %v2493_v28 }
  0x68   : > { %1187 = vmatprep.subr.bf16.mxu0 %v2498_v29  ;;  %v3196_v29 = vsub.s32 0, %v2918_v47 }
  0x69   : > { %1530 = vmatpush1.bf16.msra.mxu1 %v2559_v13  ;;  %v2615_v13 = vld [vmem:[%s3469_s8 + $0x84] ss:$8 sps:$4 sm:$0xff]  }
  0x6a   : > { %1531 = vmatprep.subr.bf16.mxu1 %v2567_v15  ;;  %v2613_v15 = vld [vmem:[%s3469_s8 + $0x80] ss:$8 sps:$4 sm:$0xff]  }
  0x6b   : > { %1188 = vmatpush1.bf16.msra.mxu0 %v2496_v30  ;;  %v1216_v30 = vld [vmem:[%s3465_s4] sm:$0x3] }
  0x6c   : > { %1189 = vmatprep.subr.bf16.mxu0 %v2501_v31  ;;  %v3202_v31 = vsub.s32 1, %v2918_v47 }
  0x6d   : > { %1532 = vmatpush1.bf16.msra.mxu1 %v2565_v18  ;;  %v2616_v18 = vld [vmem:[%s3468_s7 + $0x80] ss:$8 sps:$4 sm:$0xff]  }
  0x6f   : > { %1190 = vmatpush2.bf16.msra.mxu0 %v2499_v32  ;;  %v1221_v32 = vrot.slane %v1216_v30, %v3196_v29 }
  0x70   : > { %1191 = vmatprep.subr.bf16.mxu0 %v2504_v33 }
  0x73   : > { %1192 = vmatpush2.bf16.msra.mxu0 %v2502_v34 }
  0x74   : > { %1193 = vmatprep.subr.bf16.mxu0 %v2507_v35 }
  0x77   : > { %1194 = vmatpush2.bf16.msra.mxu0 %v2505_v36  ;;  %v1225_v36 = vrot.slane %v1216_v30, %v3202_v31 }
  0x78   : > { %1195 = vmatprep.subr.bf16.mxu0 %v2510_v37 }
  0x7b   : > { %1196 = vmatpush2.bf16.msra.mxu0 %v2508_v38 }
  0x7c   : > { %1197 = vmatprep.subr.bf16.mxu0 %v2513_v39 }
  0x7f   : > { %1198 = vmatpush2.bf16.msra.mxu0 %v2511_v40 }
  0x80   : > { %1199 = vmatprep.subr.bf16.mxu0 %v2516_v41 }
  0x83   : > { %1200 = vmatpush2.bf16.msra.mxu0 %v2514_v42 }
  0x84   : > { %1201 = vmatprep.subr.bf16.mxu0 %v2519_v43 }
  0x87   : > { %1202 = vmatpush2.bf16.msra.mxu0 %v2517_v44 }
  0x88   : > { %1203 = vmatprep.subr.bf16.mxu0 %v2522_v45 }
  0x8b   : > { %1204 = vmatpush2.bf16.msra.mxu0 %v2520_v48 }
  0x8c   : > { %1718 = vmatprep.subr.bf16.mxu0 %v2528_v53  ;;  %v2579_v53 = vld [vmem:[%s3469_s8 + $0xe4] ss:$8 sps:$4 sm:$0xff]  }
  0x8e   : > { %2255 = vmatmul.mubr.msk.bf16.vlgmr.msra.gmra.mxu0 %vm3001_vm3, %v2254_v49  ;;  %v2573_v49 = vld [vmem:[%s3469_s8 + $0xf4] ss:$8 sps:$4 sm:$0xff]  }
  0x8f   : > { %1719 = vmatpush1.bf16.msra.mxu0 %v2526_v52  ;;  %1533 = vmatprep.subr.bf16.mxu1 %v2573_v49  ;;  %v2574_v52 = vld [vmem:[%s3468_s7 + $0xf0] ss:$8 sps:$4 sm:$0xff]  }
  0x90   : > { %1720 = vmatprep.subr.bf16.mxu0 %v2534_v55  ;;  %1534 = vmatpush2.bf16.msra.mxu1 %v2571_v50  ;;  %v2582_v55 = vld [vmem:[%s3468_s7 + $0xe4] ss:$8 sps:$4 sm:$0xff]  }
  0x91   : > { %1535 = vmatprep.subr.bf16.mxu1 %v2579_v53 }
  0x93   : > { %1721 = vmatpush1.bf16.msra.mxu0 %v2532_v57  ;;  %v2585_v57 = vld [vmem:[%s3469_s8 + $0xd4] ss:$8 sps:$4 sm:$0xff]  }
  0x94   : > { %1722 = vmatprep.subr.bf16.mxu0 %v2540_v60  ;;  %1536 = vmatpush2.bf16.msra.mxu1 %v2577_v54  ;;  %v2588_v60 = vld [vmem:[%s3468_s7 + $0xd4] ss:$8 sps:$4 sm:$0xff]   ;;  %v2622_v54 = vld [vmem:[%s3470_s9 + $0x60] ss:$8 sps:$4 sm:$0xff]  }
  0x95   : > { %1537 = vmatprep.subr.bf16.mxu1 %v2585_v57  ;;  %v2630_v57 = vld [vmem:[%s3470_s9 + $0x44] ss:$8 sps:$4 sm:$0xff]  }
  0x97   : > { %1723 = vmatpush1.bf16.msra.mxu0 %v2538_v62  ;;  %v2589_v62 = vld [vmem:[%s3469_s8 + $0xc0] ss:$8 sps:$4 sm:$0xff]  }
  0x98   : > { %1724 = vmatprep.subr.bf16.mxu0 %v2546_v0  ;;  %1538 = vmatpush2.bf16.msra.mxu1 %v2583_v59  ;;  %v2594_v0 = vld [vmem:[%s3468_s7 + $0xc4] ss:$8 sps:$4 sm:$0xff]   ;;  %v2633_v59 = vld [vmem:[%s3470_s9 + $0x34] ss:$8 sps:$4 sm:$0xff]  }
  0x99   : > { %1539 = vmatprep.subr.bf16.mxu1 %v2591_v63  ;;  %v2639_v63 = vld [vmem:[%s3470_s9 + $0x14] ss:$8 sps:$4 sm:$0xff]  }
  0x9b   : > { %1725 = vmatpush1.bf16.msra.mxu0 %v2544_v2  ;;  %v2597_v2 = vld [vmem:[%s3469_s8 + $0xb4] ss:$8 sps:$4 sm:$0xff]  }
  0x9c   : > { %1726 = vmatprep.subr.bf16.mxu0 %v2552_v4  ;;  %1540 = vmatpush2.bf16.msra.mxu1 %v2589_v62  ;;  %v2600_v4 = vld [vmem:[%s3468_s7 + $0xb4] ss:$8 sps:$4 sm:$0xff]   ;;  %v2634_v62 = vld [vmem:[%s3470_s9 + $0x20] ss:$8 sps:$4 sm:$0xff]  }
  0x9d   : > { %1541 = vmatprep.subr.bf16.mxu1 %v2597_v2  ;;  %v2640_v2 = vld [vmem:[%s3470_s9] ss:$8 sps:$4 sm:$0xff]  }
  0x9f   : > { %1727 = vmatpush1.bf16.msra.mxu0 %v2550_v6  ;;  %v2598_v6 = vld [vmem:[%s3468_s7 + $0xb0] ss:$8 sps:$4 sm:$0xff]  }
  0xa0   : > { %1728 = vmatprep.subr.bf16.mxu0 %v2558_v8  ;;  %1542 = vmatpush2.bf16.msra.mxu1 %v2595_v3  ;;  %v2606_v8 = vld [vmem:[%s3468_s7 + $0xa4] ss:$8 sps:$4 sm:$0xff]   ;;  %v2645_v3 = vld [vmem:[%s3470_s9 + $0xf4] ss:$8 sps:$4 sm:$0xff]  }
  0xa1   : > { %1543 = vmatprep.subr.bf16.mxu1 %v2603_v5  ;;  %v2648_v5 = vld [vmem:[%s3470_s9 + $0xe4] ss:$8 sps:$4 sm:$0xff]  }
  0xa3   : > { %1729 = vmatpush1.bf16.msra.mxu0 %v2556_v10  ;;  %v2604_v10 = vld [vmem:[%s3468_s7 + $0xa0] ss:$8 sps:$4 sm:$0xff]  }
  0xa4   : > { %1730 = vmatprep.subr.bf16.mxu0 %v2564_v12  ;;  %1544 = vmatpush2.bf16.msra.mxu1 %v2601_v7  ;;  %v2612_v12 = vld [vmem:[%s3468_s7 + $0x94] ss:$8 sps:$4 sm:$0xff]  }
  0xa5   : > { %1545 = vmatprep.subr.bf16.mxu1 %v2609_v9  ;;  %v2651_v7 = vld [vmem:[%s3470_s9 + $0xd4] ss:$8 sps:$4 sm:$0xff]   ;;  %v2654_v9 = vld [vmem:[%s3470_s9 + $0xc4] ss:$8 sps:$4 sm:$0xff]  }
  0xa7   : > { %1731 = vmatpush1.bf16.msra.mxu0 %v2562_v14  ;;  %v2610_v14 = vld [vmem:[%s3468_s7 + $0x90] ss:$8 sps:$4 sm:$0xff]  }
  0xa8   : > { %1732 = vmatprep.subr.bf16.mxu0 %v2570_v16  ;;  %1546 = vmatpush2.bf16.msra.mxu1 %v2607_v11  ;;  %v2618_v16 = vld [vmem:[%s3468_s7 + $0x84] ss:$8 sps:$4 sm:$0xff]   ;;  %v2657_v11 = vld [vmem:[%s3470_s9 + $0xb4] ss:$8 sps:$4 sm:$0xff]  }
  0xa9   : > { %1547 = vmatprep.subr.bf16.mxu1 %v2615_v13  ;;  %v2660_v13 = vld [vmem:[%s3470_s9 + $0xa4] ss:$8 sps:$4 sm:$0xff]  }
  0xab   : > { %1733 = vmatpush1.bf16.msra.mxu0 %v2568_v19  ;;  %v2621_v19 = vld [vmem:[%s3470_s9 + $0x74] ss:$8 sps:$4 sm:$0xff]  }
  0xac   : > { %1734 = vmatprep.subr.bf16.mxu0 %v2576_v51  ;;  %1548 = vmatpush2.bf16.msra.mxu1 %v2613_v15  ;;  %v2663_v15 = vld [vmem:[%s3470_s9 + $0x94] ss:$8 sps:$4 sm:$0xff]  }
  0xad   : > { %1951 = vmatprep.subr.bf16.mxu1 %v2621_v19  ;;  %v2664_v19 = vld [vmem:[%s3470_s9 + $0x80] ss:$8 sps:$4 sm:$0xff]  }
  0xaf   : > { %1735 = vmatpush2.bf16.msra.mxu0 %v2574_v52  ;;  %v2624_v52 = vld [vmem:[%s3470_s9 + $0x64] ss:$8 sps:$4 sm:$0xff]  }
  0xb0   : > { %1736 = vmatprep.subr.bf16.mxu0 %v2582_v55  ;;  %v2627_v55 = vld [vmem:[%s3470_s9 + $0x54] ss:$8 sps:$4 sm:$0xff]  }
  0xb3   : > { %1737 = vmatpush2.bf16.msra.mxu0 %v2580_v56  ;;  %v2625_v56 = vld [vmem:[%s3470_s9 + $0x50] ss:$8 sps:$4 sm:$0xff]  }
  0xb4   : > { %1738 = vmatprep.subr.bf16.mxu0 %v2588_v60  ;;  %v2631_v60 = vld [vmem:[%s3470_s9 + $0x30] ss:$8 sps:$4 sm:$0xff]  }
  0xb7   : > { %1739 = vmatpush2.bf16.msra.mxu0 %v2586_v61  ;;  %v2636_v61 = vld [vmem:[%s3470_s9 + $0x24] ss:$8 sps:$4 sm:$0xff]  }
  0xb8   : > { %1740 = vmatprep.subr.bf16.mxu0 %v2594_v0  ;;  %v2637_v0 = vld [vmem:[%s3470_s9 + $0x10] ss:$8 sps:$4 sm:$0xff]  }
  0xbb   : > { %1741 = vmatpush2.bf16.msra.mxu0 %v2592_v1  ;;  %v2642_v1 = vld [vmem:[%s3470_s9 + $0x4] ss:$8 sps:$4 sm:$0xff]  }
  0xbc   : > { %1742 = vmatprep.subr.bf16.mxu0 %v2600_v4  ;;  %v2643_v4 = vld [vmem:[%s3470_s9 + $0xf0] ss:$8 sps:$4 sm:$0xff]  }
  0xbf   : > { %1743 = vmatpush2.bf16.msra.mxu0 %v2598_v6  ;;  %v2646_v6 = vld [vmem:[%s3470_s9 + $0xe0] ss:$8 sps:$4 sm:$0xff]  }
  0xc0   : > { %1744 = vmatprep.subr.bf16.mxu0 %v2606_v8  ;;  %v2649_v8 = vld [vmem:[%s3470_s9 + $0xd0] ss:$8 sps:$4 sm:$0xff]  }
  0xc3   : > { %1745 = vmatpush2.bf16.msra.mxu0 %v2604_v10  ;;  %v2652_v10 = vld [vmem:[%s3470_s9 + $0xc0] ss:$8 sps:$4 sm:$0xff]  }
  0xc4   : > { %1746 = vmatprep.subr.bf16.mxu0 %v2612_v12  ;;  %v2655_v12 = vld [vmem:[%s3470_s9 + $0xb0] ss:$8 sps:$4 sm:$0xff]  }
  0xc7   : > { %1747 = vmatpush2.bf16.msra.mxu0 %v2610_v14  ;;  %v2658_v14 = vld [vmem:[%s3470_s9 + $0xa0] ss:$8 sps:$4 sm:$0xff]  }
  0xc8   : > { %1748 = vmatprep.subr.bf16.mxu0 %v2618_v16  ;;  %v2661_v16 = vld [vmem:[%s3470_s9 + $0x90] ss:$8 sps:$4 sm:$0xff]  }
  0xcb   : > { %1749 = vmatpush2.bf16.msra.mxu0 %v2616_v18  ;;  %v2666_v18 = vld [vmem:[%s3470_s9 + $0x84] ss:$8 sps:$4 sm:$0xff]  }
 0x10e   : > { %v773_v20 = vpop.f32.mrf.mxu0 }
 0x10f   : > { %v974_v21 = vpop.f32.mrf.mxu1 }
 0x110   : > { %v975_v22 = vadd.f32 %v974_v21, %v773_v20  ;;  %v775_v23 = vpop.f32.mrf.mxu0 }
 0x111   : > { %v976_v24 = vpop.f32.mrf.mxu1 }
 0x112   : > { %v777_v25 = vpop.f32.mrf.mxu0  ;;  %v977_v34 = vadd.f32 %v976_v24, %v775_v23 }
 0x113   : > { %v978_v26 = vpop.f32.mrf.mxu1 }
 0x114   : > { %v778_v27 = vpop.f32.mrf.mxu0 }
 0x115   : > { %v979_v28 = vpop.f32.mrf.mxu1  ;;  %v1232_v27 = vld [vmem:[%s3466_s5] sm:$0x3] }
 0x116   : > { %v1233_v28 = vld [vmem:[%s3467_s6] sm:$0x3] }
 0x14e   : > { %v1207_v33 = vpop.f32.mrf.mxu0 }
 0x14f   : > { %v1214_v35 = vadd.f32 %v1207_v33, %v975_v22  ;;  %v1257_v33 = vrot.slane %v1232_v27, %v3196_v29 }
 0x150   : > { %v1209_v37 = vpop.f32.mrf.mxu0 }
 0x151   : > { %v1228_v38 = vadd.f32 %v1221_v32, %v1214_v35  ;;  %v1215_v39 = vadd.f32 %v1209_v37, %v977_v34  ;;  %v1261_v34 = vrot.slane %v1232_v27, %v3202_v31  ;;  %v1270_v37 = vrot.slane %v1233_v28, %v3196_v29 }
 0x152   : > { %v1211_v40 = vpop.f32.mrf.mxu0 }
 0x153   : > { %v1229_v41 = vadd.f32 %v1225_v36, %v1215_v39  ;;  %v3206_v43 = vmax.f32 %v1228_v38, 0.0  ;;  %v1274_v38 = vrot.slane %v1233_v28, %v3202_v31 }
 0x154   : > { %v1212_v42 = vpop.f32.mrf.mxu0 }
 0x155   : > { %v3208_v44 = vmax.f32 %v1229_v41, 0.0  ;;  %v1239_v46 = vmul.f32 %v3206_v43, %v3206_v43 }
 0x157   : > { %v1234_v47 = vadd.f32 %v3208_v44, %v3206_v43  ;;  %v1240_v45 = vmul.f32 %v3208_v44, %v3208_v44 }
 0x159   : > { %1235 = vadd.xlane.f32.xlu0 %v1234_v47  ;;  %v1241_v48 = vadd.f32 %v1240_v45, %v1239_v46 }
 0x15d   : > { %1242 = vadd.xlane.f32.xlu0 %v1241_v48 }
 0x1e2   : > { %v1236_v20 = vpop.xlane.xlu0 %1235 }
 0x1e3   : > { %v1238_v21 = vmul.f32 0.00390625, %v1236_v20 }
 0x1e5   : > { %v1245_v23 = vmul.f32 %v1238_v21, %v1238_v21  ;;  %v1247_v30 = vsub.f32 %v3206_v43, %v1238_v21  ;;  %v1248_v32 = vsub.f32 %v3208_v44, %v1238_v21  ;;  %v2619_v43 = vld [vmem:[%s3470_s9 + $0x70] ss:$8 sps:$4 sm:$0xff]  }
 0x1e6   : > { %v1243_v22 = vpop.xlane.xlu0 %1242 }
 0x1e7   : > { %v1244_v24 = vmul.f32 0.00390625, %v1243_v22 }
 0x1e9   : > { %v1246_v25 = vsub.f32 %v1244_v24, %v1245_v23 }
 0x1eb   : > { %v1249_v26 = vadd.f32 1e-05, %v1246_v25 }
 0x1ed   : > { %2667 = vrsqrt.f32 %v1249_v26 }
 0x1fa   : > { %v2668_v35 = vpop.eup %2667 }
 0x1fb   : > { %v1252_v36 = vmul.f32 %v2668_v35, %v1248_v32  ;;  %v1251_v39 = vmul.f32 %v2668_v35, %v1247_v30  ;;  %v1994_v32 = vld [vmem:[%s3471_s10] sm:$0x3] }
 0x1fc   : > { %v2003_v17 = vrot.slane %v1994_v32, %v3202_v31 }
 0x1fd   : > { %v1265_v40 = vmul.f32 %v1261_v34, %v1252_v36  ;;  %v1264_v41 = vmul.f32 %v1257_v33, %v1251_v39  ;;  %v1999_v34 = vrot.slane %v1994_v32, %v3196_v29 }
 0x1ff   : > { %v1278_v42 = vadd.f32 %v1274_v38, %v1265_v40  ;;  %v3327_v47 = vadd.f32 %v1270_v37, %v1264_v41 }
 0x201   : > { %v1324_v45 = vpack.c.bf16 %v1278_v42, %v1278_v42  ;;  %v1323_v44 = vpack.c.bf16 %v3327_v47, %v3327_v47  ;;  %v1280_v46 = vrot.slane %v1278_v42, 7  ;;  %v1286_v48 = vrot.slane %v1278_v42, 1 }
 0x202   : > { %v1279_v49 = vrot.slane %v3327_v47, 7  ;;  %v1285_v20 = vrot.slane %v3327_v47, 1 }
 0x203   : > { %1549 = vmatprep.mubr.bf16.mxu1 %v1324_v45  ;;  %v2321_v50 = vpack.c.bf16 %v1280_v46, %v1280_v46  ;;  %v2359_v51 = vpack.c.bf16 %v1286_v48, %v1286_v48 }
 0x204   : > { %1550 = vmatmul.mubr.bf16.vlgmr.msra.gmra.mxu1 %v1323_v44  ;;  %v2324_v53 = vpack.c.bf16 %v1279_v49, %v1279_v49  ;;  %v2362_v21 = vpack.c.bf16 %v1285_v20, %v1285_v20 }
 0x205   : > { %1952 = vmatpush1.bf16.msra.mxu1 %v2619_v43  ;;  %2322 = vmatprep.mubr.msk.bf16.mxu0 %vm2940_vm1, %v2321_v50 }
 0x206   : > { %2360 = vmatprep.mubr.msk.bf16.mxu1 %vm3001_vm3, %v2359_v51  ;;  %2325 = vmatmul.mubr.msk.bf16.vlgmr.msra.gmra.mxu0 %vm2940_vm1, %v2324_v53 }
 0x207   : > { %1953 = vmatprep.subr.bf16.mxu1 %v2624_v52 }
 0x209   : > { %1954 = vmatpush1.bf16.msra.mxu1 %v2622_v54 }
 0x20a   : > { %1955 = vmatprep.subr.bf16.mxu1 %v2627_v55 }
 0x20d   : > { %1956 = vmatpush1.bf16.msra.mxu1 %v2625_v56 }
 0x20e   : > { %1957 = vmatprep.subr.bf16.mxu1 %v2630_v57  ;;  %v2010_v57 = vld [vmem:[%s3472_s11] sm:$0x3] }
 0x211   : > { %1958 = vmatpush1.bf16.msra.mxu1 %v2628_v58  ;;  %v2011_v58 = vld [vmem:[%s3473_s12] sm:$0x3] }
 0x212   : > { %1959 = vmatprep.subr.bf16.mxu1 %v2633_v59 }
 0x215   : > { %1960 = vmatpush1.bf16.msra.mxu1 %v2631_v60 }
 0x216   : > { %1961 = vmatprep.subr.bf16.mxu1 %v2636_v61  ;;  %v2034_v61 = vrot.slane %v2010_v57, %v3196_v29 }
 0x219   : > { %1962 = vmatpush1.bf16.msra.mxu1 %v2634_v62  ;;  %v2038_v62 = vrot.slane %v2010_v57, %v3202_v31 }
 0x21a   : > { %1963 = vmatprep.subr.bf16.mxu1 %v2639_v63 }
 0x21d   : > { %1964 = vmatpush1.bf16.msra.mxu1 %v2637_v0  ;;  %v2056_v0 = vld [vmem:[%s3474_s13] sm:$0x3] }
 0x21e   : > { %1965 = vmatprep.subr.bf16.mxu1 %v2642_v1 }
 0x221   : > { %1966 = vmatpush1.bf16.msra.mxu1 %v2640_v2 }
 0x222   : > { %1967 = vmatprep.subr.bf16.mxu1 %v2645_v3  ;;  %v2047_v3 = vrot.slane %v2011_v58, %v3196_v29 }
 0x225   : > { %1968 = vmatpush2.bf16.msra.mxu1 %v2643_v4  ;;  %v2051_v4 = vrot.slane %v2011_v58, %v3202_v31 }
 0x226   : > { %1969 = vmatprep.subr.bf16.mxu1 %v2648_v5 }
 0x229   : > { %1970 = vmatpush2.bf16.msra.mxu1 %v2646_v6 }
 0x22a   : > { %1971 = vmatprep.subr.bf16.mxu1 %v2651_v7  ;;  %v2061_v7 = vrot.slane %v2056_v0, %v3196_v29 }
 0x22d   : > { %1972 = vmatpush2.bf16.msra.mxu1 %v2649_v8  ;;  %v2065_v8 = vrot.slane %v2056_v0, %v3202_v31 }
 0x22e   : > { %1973 = vmatprep.subr.bf16.mxu1 %v2654_v9 }
 0x231   : > { %1974 = vmatpush2.bf16.msra.mxu1 %v2652_v10 }
 0x232   : > { %1975 = vmatprep.subr.bf16.mxu1 %v2657_v11 }
 0x235   : > { %1976 = vmatpush2.bf16.msra.mxu1 %v2655_v12 }
 0x236   : > { %1977 = vmatprep.subr.bf16.mxu1 %v2660_v13 }
 0x239   : > { %1978 = vmatpush2.bf16.msra.mxu1 %v2658_v14  ;;  %v2679_v14 = vmov 0  }
 0x23a   : > { %1979 = vmatprep.subr.bf16.mxu1 %v2663_v15  ;;  %2377 = vset.pattern.permute.xlu1 %v2679_v14  ;;  %v2364_v15 = vld [vmem:[#allocation2] ss:$0 sm:$0xff] }
 0x23b   : > { %2378 = vset.pattern.permute.xlu0 %v2679_v14 }
 0x23d   : > { %1980 = vmatpush2.bf16.msra.mxu1 %v2661_v16 }
 0x23e   : > { %1981 = vmatprep.subr.bf16.mxu1 %v2666_v18 }
 0x241   : > { %1982 = vmatpush2.bf16.msra.mxu1 %v2664_v19 }
 0x244   : > { %2363 = vmatmul.mubr.msk.bf16.vlgmr.msra.gmra.mxu1 %vm3001_vm3, %v2362_v21 }
 0x2c4   : > { %v1551_v22 = vpop.f32.mrf.mxu1 }
 0x2c6   : > { %v1553_v23 = vpop.f32.mrf.mxu1  ;;  %v1752_v24 = vpop.f32.mrf.mxu0 }
 0x2c7   : > { %v1753_v33 = vadd.f32 %v1752_v24, %v1551_v22 }
 0x2c8   : > { %v1555_v25 = vpop.f32.mrf.mxu1  ;;  %v1754_v26 = vpop.f32.mrf.mxu0 }
 0x2c9   : > { %v1755_v36 = vadd.f32 %v1754_v26, %v1553_v23 }
 0x2ca   : > { %v1556_v27 = vpop.f32.mrf.mxu1  ;;  %v1756_v28 = vpop.f32.mrf.mxu0 }
 0x2cc   : > { %v1757_v30 = vpop.f32.mrf.mxu0 }
 0x304   : > { %v1985_v35 = vpop.f32.mrf.mxu1 }
 0x305   : > { %v1992_v37 = vadd.f32 %v1985_v35, %v1753_v33 }
 0x306   : > { %v1987_v38 = vpop.f32.mrf.mxu1 }
 0x307   : > { %v2006_v39 = vadd.f32 %v1999_v34, %v1992_v37  ;;  %v1993_v40 = vadd.f32 %v1987_v38, %v1755_v36 }
 0x308   : > { %v1989_v41 = vpop.f32.mrf.mxu1 }
 0x309   : > { %v2007_v42 = vadd.f32 %v2003_v17, %v1993_v40  ;;  %v2008_v45 = vmax.f32 %v2006_v39, 0.0 }
 0x30a   : > { %v1990_v47 = vpop.f32.mrf.mxu1 }
 0x30b   : > { %v2009_v43 = vmax.f32 %v2007_v42, 0.0  ;;  %v2016_v48 = vmul.f32 %v2008_v45, %v2008_v45 }
 0x30d   : > { %v2012_v44 = vadd.f32 %v2009_v43, %v2008_v45  ;;  %v2017_v46 = vmul.f32 %v2009_v43, %v2009_v43 }
 0x30f   : > { %2013 = vadd.xlane.f32.xlu1 %v2012_v44  ;;  %v2018_v49 = vadd.f32 %v2017_v46, %v2016_v48 }
 0x313   : > { %2019 = vadd.xlane.f32.xlu1 %v2018_v49 }
 0x398   : > { %v2014_v50 = vpop.xlane.xlu1 %2013 }
 0x399   : > { %v2015_v51 = vmul.f32 0.00390625, %v2014_v50 }
 0x39b   : > { %v2022_v53 = vmul.f32 %v2015_v51, %v2015_v51  ;;  %v2024_v59 = vsub.f32 %v2008_v45, %v2015_v51  ;;  %v2025_v60 = vsub.f32 %v2009_v43, %v2015_v51 }
 0x39c   : > { %v2020_v52 = vpop.xlane.xlu1 %2019 }
 0x39d   : > { %v2021_v54 = vmul.f32 0.00390625, %v2020_v52 }
 0x39f   : > { %v2023_v55 = vsub.f32 %v2021_v54, %v2022_v53 }
 0x3a1   : > { %v2026_v56 = vadd.f32 1e-05, %v2023_v55 }
 0x3a3   : > { %2669 = vrsqrt.f32 %v2026_v56 }
 0x3b0   : > { %v2670_v63 = vpop.eup %2669 }
 0x3b1   : > { %v2028_v1 = vmul.f32 %v2670_v63, %v2024_v59  ;;  %v2029_v2 = vmul.f32 %v2670_v63, %v2025_v60 }
 0x3b3   : > { %v2041_v5 = vmul.f32 %v2034_v61, %v2028_v1  ;;  %v2042_v6 = vmul.f32 %v2038_v62, %v2029_v2 }
 0x3b5   : > { %v2054_v9 = vadd.f32 %v2047_v3, %v2041_v5  ;;  %v2055_v10 = vadd.f32 %v2051_v4, %v2042_v6 }
 0x3b7   : > { %v2068_v11 = vmul.f32 %v2061_v7, %v2054_v9  ;;  %v2069_v12 = vmul.f32 %v2065_v8, %v2055_v10 }
 0x3b9   : > { %v2070_v13 = vadd.f32 %v2069_v12, %v2068_v11 }
 0x3bb   : > { %2071 = vadd.xlane.f32.xlu0 %v2070_v13 }
 0x444   : > { %v2072_v16 = vpop.xlane.xlu0 %2071 }
 0x445   : > { %v2080_v18 = vadd.f32 %v2364_v15, %v2072_v16 }
 0x447   : > { %2083 = vperm.xlu1 %2377, %v2080_v18  }
 0x4c2   : > { %v2084_v29 = vpop.permute.xlu1 %2083 }
 0x4c3   : > { %2086 = vst [vmem:[%s494_s14] sm:$0xff] %v2084_v29 }
 0x4c4 PF: > { %s27_s20 = sadd.s32 1, %s2677_s20  }
 0x4c5   : > { %p24_p4 = scmp.ge.s32.totalorder %s27_s20, 4  }
 0x4c7   :  { %26 = sbr.rel (!%p24_p4) target bundleno = 3 (0x3), region = 110 }

// kernel: fastspeech2_forward.5
= control target key start
LH: loop header
LB: loop body
LE: loop exit
PB: predicated region body
PF: predicated region fallthrough
CT: control target
= control target key end

     0   :  { %s4936_s21 = smov 0   ;;  %s4938_s22 = smov 0   ;;  %s6157_s0 = inlined_call_operand.vmem [shape: f32[128,256], index: 0, kind: input, shape index: {}]   ;;  %s6158_s1 = inlined_call_operand.vmem [shape: f32[2,1,64], index: 1, kind: input, shape index: {}]   ;;  %s6159_s2 = inlined_call_operand.vmem [shape: bf16[256,128], index: 2, kind: input, shape index: {}]   ;;  %s6160_s3 = inlined_call_operand.vmem [shape: f32[1,128], index: 3, kind: input, shape index: {}]   ;;  %s6161_s4 = inlined_call_operand.vmem [shape: bf16[4,256,768], index: 4, kind: input, shape index: {}]   ;;  %s6162_s5 = inlined_call_operand.vmem [shape: f32[4,1,768], index: 5, kind: input, shape index: {}]   ;;  %s6163_s6 = inlined_call_operand.vmem [shape: bf16[4,256,256], index: 6, kind: input, shape index: {}]   ;;  %s6164_s7 = inlined_call_operand.vmem [shape: f32[4,1,256], index: 7, kind: input, shape index: {}]   ;;  %s6165_s8 = inlined_call_operand.vmem [shape: f32[4,1,256], index: 8, kind: input, shape index: {}]   ;;  %s6166_s9 = inlined_call_operand.vmem [shape: f32[4,1,256], index: 9, kind: input, shape index: {}]   ;;  %s6167_s10 = inlined_call_operand.vmem [shape: bf16[4,256,256], index: 10, kind: input, shape index: {}]   ;;  %s6168_s11 = inlined_call_operand.vmem [shape: f32[4,1,256], index: 11, kind: input, shape index: {}]   ;;  %s6169_s12 = inlined_call_operand.vmem [shape: bf16[4,256,256], index: 12, kind: input, shape index: {}]   ;;  %s6170_s13 = inlined_call_operand.vmem [shape: f32[4,1,256], index: 13, kind: input, shape index: {}]   ;;  %s6171_s14 = inlined_call_operand.vmem [shape: f32[4,1,256], index: 14, kind: input, shape index: {}]   ;;  %s6172_s15 = inlined_call_operand.vmem [shape: f32[4,1,256], index: 15, kind: input, shape index: {}]   ;;  %s6173_s16 = inlined_call_operand.vmem [shape: f32[128,128], index: 16, kind: output, shape index: {}]  }
   0x1   :  { %6179 = sst [smem:[#allocation10_spill]] %s6157_s0  ;;  %s4940_s23 = smov 0  }
   0x2   :  { %6180 = sst [smem:[#allocation11_spill]] %s6159_s2  ;;  %s4942_s24 = smov 0  }
   0x3   :  { %6181 = sst [smem:[#allocation12_spill]] %s6160_s3  ;;  %s4944_s25 = smov 0  }
   0x4   :  { %6182 = sst [smem:[#allocation13_spill]] %s6161_s4 }
   0x5   :  { %6183 = sst [smem:[#allocation14_spill]] %s6162_s5 }
   0x6   :  { %6184 = sst [smem:[#allocation15_spill]] %s6163_s6 }
   0x7   :  { %6185 = sst [smem:[#allocation16_spill]] %s6165_s8 }
   0x8   :  { %6186 = sst [smem:[#allocation17_spill]] %s6166_s9 }
   0x9   :  { %6187 = sst [smem:[#allocation18_spill]] %s6167_s10 }
   0xa   :  { %6188 = sst [smem:[#allocation19_spill]] %s6169_s12 }
   0xb   :  { %6189 = sst [smem:[#allocation20_spill]] %s6170_s13 }
   0xc   :  { %6190 = sst [smem:[#allocation21_spill]] %s6171_s14 }
   0xd   :  { %6191 = sst [smem:[#allocation22_spill]] %s6172_s15 }
   0xe   :  { %6192 = sst [smem:[#allocation23_spill]] %s6173_s16 }
   0xf LB: > { %6193 = sst [smem:[#allocation4_spill]] %s4841_s23  ;;  %s35_s26 = sadd.s32 1, %s4841_s23  ;;  %s4849_s25 = sphi %s4944_s25, %s26_s25   ;;  %s4845_s24 = sphi %s4942_s24, %s6227_s24   ;;  %s4841_s23 = sphi %s4940_s23, %s6226_s23   ;;  %s4837_s22 = sphi %s4938_s22, %s6225_s22   ;;  %s4833_s21 = sphi %s4936_s21, %s6224_s21  }
  0x10   : > { %6194 = sst [smem:[#allocation5_spill]] %s4845_s24  ;;  %s38_s27 = sadd.s32 1, %s4845_s24 }
  0x11   : > { %6195 = sst [smem:[#allocation6_spill]] %s4849_s25  ;;  %p36_p0 = scmp.ge.s32.totalorder %s35_s26, 4 }
  0x12   : > { %p3955_p1 = scmp.ge.s32.totalorder %s4849_s25, 1  ;;  %p596_p2 = scmp.lt.s32.totalorder %s4849_s25, 9 }
  0x13   : > { %s6229_s26 = smov (%p36_p0, %s35_s26), 0  ;;  %s6231_s27 = smov (!%p36_p0, %s38_s27), %s4845_s24 }
  0x14   : > { %6196 = sst [smem:[#allocation7_spill]] %s6229_s26  ;;  %p597_p3 = pnand %p3955_p1, %p596_p2 }
  0x15   : > { %p40_p4 = scmp.ge.s32.totalorder %s6231_s27, 2 }
  0x16   : > { %600 = sbr.rel (%p597_p3) target bundleno = 2337 (0x921), region = 84 }
  0x17   : > { %s6233_s27 = smov (%p40_p4, %s6231_s27), 0 }
  0x18   : > { %6197 = sst [smem:[#allocation8_spill]] %s6233_s27 }
  0x1b   : > { %s3956_s28 = sshll.u32 %s4837_s22, 3  ;;  %p709_p5 = scmp.lt.s32.totalorder %s4837_s22, 1 }
  0x1c   : > { %p703_p6 = scmp.lt.s32.totalorder %s3956_s28, 15  ;;  %p712_p7 = scmp.lt.s32.totalorder %s4833_s21, 3 }
  0x1d   : > { %s6235_s22 = smov (!%p709_p5, %s4837_s22), 1  ;;  %s6198_s27 = sld [smem:[#allocation10_spill]] }
  0x1e   : > { %s6237_s28 = smov (!%p703_p6, %s3956_s28), 15  ;;  %s6199_s16 = sld [smem:[#allocation23_spill]] }
  0x1f   : > { %s4197_s17 = sshll.u32 %s6237_s28, 4  ;;  %s3974_s18 = sshll.u32 %s6237_s28, 3 }
  0x20   : > { %s713_s3 = scalar_select %p712_p7, %s4833_s21, 3 }
  0x21   : > { %s6201_s6 = sld [smem:[#allocation15_spill]]  ;;  %p3975_p8 = scmp.ne.s32.totalorder %s4833_s21, 0 }
  0x22   : > { %s4353_s2 = smul.u32 768, %s713_s3  ;;  %s4198_s15 = sshll.u32 %s713_s3, 8 }
  0x23   : > { %s4978_s26 = scalar_lea.vmem %s6198_s27, %s4197_s17  ;;  %s4354_s14 = smul.u32 6, %s713_s3 }
  0x24   : > { %s4983_s25 = scalar_lea.vmem %s6199_s16, %s3974_s18  ;;  %s6202_s4 = sld [smem:[#allocation13_spill]] }
  0x25   : > { %6200 = sst [smem:[#allocation9_spill]] %s4983_s25  ;;  %s4996_s27 = sshll.u32 %s713_s3, 1 }
  0x26   : > { %s6203_s5 = sld [smem:[#allocation14_spill]] }
  0x27   : > { %s4989_s29 = scalar_lea.vmem %s6201_s6, %s4198_s15  ;;  %s6206_s10 = sld [smem:[#allocation18_spill]] }
  0x28   : > { %s6207_s24 = sld [smem:[#allocation19_spill]] }
  0x29   : > { %s6208_s3 = sld [smem:[#allocation20_spill]] }
  0x2a   : > { %s4994_s19 = scalar_lea.vmem %s6202_s4, %s4353_s2  ;;  %s6209_s17 = sld [smem:[#allocation21_spill]] }
  0x2c   : > { %s5001_s12 = scalar_lea.vmem %s6203_s5, %s4354_s14  ;;  %s746_s5 = scalar_lea.vmem %s6168_s11, %s4996_s27 }
  0x2d   : > { %s5018_s4 = scalar_lea.vmem %s6206_s10, %s4198_s15  ;;  %s6210_s10 = sld [smem:[#allocation22_spill]] }
  0x2e   : > { %s5027_s18 = scalar_lea.vmem %s6207_s24, %s4198_s15 }
  0x2f   : > { %s755_s25 = scalar_lea.vmem %s6208_s3, %s4996_s27  ;;  %774 = sbr.rel (%p3975_p8) target bundleno = 61 (0x3d), region = 88 }
  0x30   : > { %s759_s9 = scalar_lea.vmem %s6209_s17, %s4996_s27 }
  0x33   : > { %s763_s8 = scalar_lea.vmem %s6210_s10, %s4996_s27 }
  0x34   : > { %v775_v0 = vld [vmem:[%s4978_s26] sm:$0xff]  ;;  %v776_v1 = vld [vmem:[%s4978_s26 + $0x8] sm:$0xff]  ;;  %v777_v2 = vld [vmem:[%s4978_s26 + $0x10] sm:$0xff] }
  0x35   : > { %791 = vst [vmem:[#allocation2 + $0x30] sm:$0xff] %v775_v0  ;;  %792 = vst [vmem:[#allocation2] sm:$0xff] %v776_v1  ;;  %v778_v3 = vld [vmem:[%s4978_s26 + $0x18] sm:$0xff]  ;;  %v779_v4 = vld [vmem:[%s4978_s26 + $0x20] sm:$0xff] }
  0x36   : > { %793 = vst [vmem:[#allocation2 + $0x58] sm:$0xff] %v777_v2  ;;  %v780_v5 = vld [vmem:[%s4978_s26 + $0x28] sm:$0xff]  ;;  %794 = vst [vmem:[#allocation2 + $0x18] sm:$0xff] %v778_v3  ;;  %v781_v6 = vld [vmem:[%s4978_s26 + $0x30] sm:$0xff] }
  0x37   : > { %795 = vst [vmem:[#allocation2 + $0x50] sm:$0xff] %v779_v4  ;;  %796 = vst [vmem:[#allocation2 + $0x68] sm:$0xff] %v780_v5  ;;  %v782_v7 = vld [vmem:[%s4978_s26 + $0x38] sm:$0xff]  ;;  %v783_v8 = vld [vmem:[%s4978_s26 + $0x40] sm:$0xff] }
  0x38   : > { %797 = vst [vmem:[#allocation2 + $0x8] sm:$0xff] %v781_v6  ;;  %798 = vst [vmem:[#allocation2 + $0x48] sm:$0xff] %v782_v7  ;;  %v784_v9 = vld [vmem:[%s4978_s26 + $0x48] sm:$0xff]  ;;  %v785_v10 = vld [vmem:[%s4978_s26 + $0x50] sm:$0xff] }
  0x39   : > { %799 = vst [vmem:[#allocation2 + $0x40] sm:$0xff] %v783_v8  ;;  %v786_v11 = vld [vmem:[%s4978_s26 + $0x58] sm:$0xff]  ;;  %800 = vst [vmem:[#allocation2 + $0x20] sm:$0xff] %v784_v9  ;;  %v787_v12 = vld [vmem:[%s4978_s26 + $0x60] sm:$0xff] }
  0x3a   : > { %801 = vst [vmem:[#allocation2 + $0x10] sm:$0xff] %v785_v10  ;;  %802 = vst [vmem:[#allocation2 + $0x38] sm:$0xff] %v786_v11  ;;  %v788_v13 = vld [vmem:[%s4978_s26 + $0x68] sm:$0xff]  ;;  %v789_v14 = vld [vmem:[%s4978_s26 + $0x70] sm:$0xff] }
  0x3b   : > { %803 = vst [vmem:[#allocation2 + $0x60] sm:$0xff] %v787_v12  ;;  %804 = vst [vmem:[#allocation2 + $0x70] sm:$0xff] %v788_v13  ;;  %v790_v15 = vld [vmem:[%s4978_s26 + $0x78] sm:$0xff] }
  0x3c   : > { %805 = vst [vmem:[#allocation2 + $0x78] sm:$0xff] %v789_v14  ;;  %806 = vst [vmem:[#allocation2 + $0x28] sm:$0xff] %v790_v15 }
  0x3d PF: > { %v4395_v16 = vld [vmem:[%s4994_s19 + $0x15c] ss:$24 sps:$4 sm:$0xff]   ;;  %v4397_v17 = vld [vmem:[%s4994_s19 + $0x158] ss:$24 sps:$4 sm:$0xff]   ;;  %v4398_v18 = vld [vmem:[%s4994_s19 + $0x12c] ss:$24 sps:$4 sm:$0xff]   ;;  %s6211_s15 = scalar_lea.vmem %s6158_s1, %s6235_s22  ;;  %s6212_s26 = scalar_lea.vmem %s6164_s7, %s4996_s27 }
  0x3e   : > { %1513 = vmatprep.subr.bf16.mxu1 %v4395_v16  ;;  %v4400_v19 = vld [vmem:[%s4994_s19 + $0x128] ss:$24 sps:$4 sm:$0xff]   ;;  %v4401_v20 = vld [vmem:[%s4994_s19 + $0xfc] ss:$24 sps:$4 sm:$0xff]   ;;  %v4403_v21 = vld [vmem:[%s4994_s19 + $0xf8] ss:$24 sps:$4 sm:$0xff]  }
  0x3f   : > { %1514 = vmatpush1.bf16.msra.mxu1 %v4397_v17  ;;  %v4404_v22 = vld [vmem:[%s4994_s19 + $0xcc] ss:$24 sps:$4 sm:$0xff]   ;;  %v4406_v23 = vld [vmem:[%s4994_s19 + $0xc8] ss:$24 sps:$4 sm:$0xff]   ;;  %v4407_v24 = vld [vmem:[%s4994_s19 + $0x9c] ss:$24 sps:$4 sm:$0xff]  }
  0x40   : > { %1515 = vmatprep.subr.bf16.mxu1 %v4398_v18  ;;  %v4425_v25 = vld [vmem:[%s4994_s19 + $0x154] ss:$24 sps:$4 sm:$0xff]   ;;  %v4409_v26 = vld [vmem:[%s4994_s19 + $0x98] ss:$24 sps:$4 sm:$0xff]   ;;  %v4431_v29 = vld [vmem:[%s4994_s19 + $0x124] ss:$24 sps:$4 sm:$0xff]  }
  0x41   : > { %v4410_v27 = vld [vmem:[%s4994_s19 + $0x6c] ss:$24 sps:$4 sm:$0xff]   ;;  %v4429_v28 = vld [vmem:[%s4994_s19 + $0x150] ss:$24 sps:$4 sm:$0xff]   ;;  %1440 = vmatprep.subr.bf16.mxu0 %v4425_v25  ;;  %v4435_v31 = vld [vmem:[%s4994_s19 + $0x120] ss:$24 sps:$4 sm:$0xff]  }
  0x42   : > { %1441 = vmatpush1.bf16.msra.mxu0 %v4429_v28  ;;  %v4412_v30 = vld [vmem:[%s4994_s19 + $0x68] ss:$24 sps:$4 sm:$0xff]   ;;  %v4437_v32 = vld [vmem:[%s4994_s19 + $0xf4] ss:$24 sps:$4 sm:$0xff]   ;;  %v4443_v35 = vld [vmem:[%s4994_s19 + $0xc4] ss:$24 sps:$4 sm:$0xff]  }
  0x43   : > { %1516 = vmatpush1.bf16.msra.mxu1 %v4400_v19  ;;  %1442 = vmatprep.subr.bf16.mxu0 %v4431_v29  ;;  %v4413_v33 = vld [vmem:[%s4994_s19 + $0x3c] ss:$24 sps:$4 sm:$0xff]   ;;  %v4441_v34 = vld [vmem:[%s4994_s19 + $0xf0] ss:$24 sps:$4 sm:$0xff]   ;;  %v4416_v37 = vld [vmem:[%s4994_s19 + $0xc] ss:$24 sps:$4 sm:$0xff]  }
  0x44   : > { %1517 = vmatprep.subr.bf16.mxu1 %v4401_v20  ;;  %v4415_v36 = vld [vmem:[%s4994_s19 + $0x38] ss:$24 sps:$4 sm:$0xff]   ;;  %v4449_v39 = vld [vmem:[%s4994_s19 + $0x94] ss:$24 sps:$4 sm:$0xff]   ;;  %v4418_v40 = vld [vmem:[%s4994_s19 + $0x8] ss:$24 sps:$4 sm:$0xff]  }
  0x45   : > { %v4447_v38 = vld [vmem:[%s4994_s19 + $0xc0] ss:$24 sps:$4 sm:$0xff]   ;;  %v4419_v41 = vld [vmem:[%s4994_s19 + $0x2dc] ss:$24 sps:$4 sm:$0xff]   ;;  %v4453_v42 = vld [vmem:[%s4994_s19 + $0x90] ss:$24 sps:$4 sm:$0xff]  }
  0x46   : > { %1443 = vmatpush1.bf16.msra.mxu0 %v4435_v31  ;;  %v808_v43 = vld [vmem:[#allocation2] sm:$0xff]  ;;  %v810_v44 = vld [vmem:[#allocation2 + $0x18] sm:$0xff]  ;;  %v4461_v50 = vld [vmem:[%s4994_s19 + $0x34] ss:$24 sps:$4 sm:$0xff]   ;;  %vm1742_vm0 = vcmask 523264   ;;  %s6215_s14 = sld [smem:[#allocation17_spill]] }
  0x47   : > { %1518 = vmatpush1.bf16.msra.mxu1 %v4403_v21  ;;  %1444 = vmatprep.subr.bf16.mxu0 %v4437_v32  ;;  %v4455_v45 = vld [vmem:[%s4994_s19 + $0x64] ss:$24 sps:$4 sm:$0xff]   ;;  %v5086_v46 = vpack.c.bf16 %v810_v44, %v808_v43  ;;  %v4421_v47 = vld [vmem:[%s4994_s19 + $0x2d8] ss:$24 sps:$4 sm:$0xff]   ;;  %v4424_v51 = vld [vmem:[%s4994_s19 + $0x2a8] ss:$24 sps:$4 sm:$0xff]  }
  0x48   : > { %1519 = vmatprep.subr.bf16.mxu1 %v4404_v22  ;;  %v4422_v48 = vld [vmem:[%s4994_s19 + $0x2ac] ss:$24 sps:$4 sm:$0xff]   ;;  %v4459_v49 = vld [vmem:[%s4994_s19 + $0x60] ss:$24 sps:$4 sm:$0xff]   ;;  %v4427_v52 = vld [vmem:[%s4994_s19 + $0x27c] ss:$24 sps:$4 sm:$0xff]  }
  0x49   : > { %1545 = vmatprep.mubr.bf16.mxu1 %v5086_v46  ;;  %1472 = vmatprep.mubr.bf16.mxu0 %v5086_v46  ;;  %v4463_v53 = vld [vmem:[%s4994_s19 + $0x30] ss:$24 sps:$4 sm:$0xff]   ;;  %v4464_v54 = vld [vmem:[%s4994_s19 + $0x4] ss:$24 sps:$4 sm:$0xff]   ;;  %v4466_v57 = vld [vmem:[%s4994_s19] ss:$24 sps:$4 sm:$0xff]  }
  0x4a   : > { %1445 = vmatpush1.bf16.msra.mxu0 %v4441_v34  ;;  %v4430_v55 = vld [vmem:[%s4994_s19 + $0x278] ss:$24 sps:$4 sm:$0xff]   ;;  %v4433_v56 = vld [vmem:[%s4994_s19 + $0x24c] ss:$24 sps:$4 sm:$0xff]   ;;  %v4436_v59 = vld [vmem:[%s4994_s19 + $0x248] ss:$24 sps:$4 sm:$0xff]  }
  0x4b   : > { %1520 = vmatpush1.bf16.msra.mxu1 %v4406_v23  ;;  %1446 = vmatprep.subr.bf16.mxu0 %v4443_v35  ;;  %v4467_v58 = vld [vmem:[%s4994_s19 + $0x2d4] ss:$24 sps:$4 sm:$0xff]   ;;  %v4469_v61 = vld [vmem:[%s4994_s19 + $0x2d0] ss:$24 sps:$4 sm:$0xff]   ;;  %v4470_v62 = vld [vmem:[%s4994_s19 + $0x2a4] ss:$24 sps:$4 sm:$0xff]  }
  0x4c   : > { %1521 = vmatprep.subr.bf16.mxu1 %v4407_v24  ;;  %v4439_v60 = vld [vmem:[%s4994_s19 + $0x21c] ss:$24 sps:$4 sm:$0xff]   ;;  %v4442_v63 = vld [vmem:[%s4994_s19 + $0x218] ss:$24 sps:$4 sm:$0xff]   ;;  %v4445_v0 = vld [vmem:[%s4994_s19 + $0x1ec] ss:$24 sps:$4 sm:$0xff]   ;;  %s6216_s13 = scalar_lea.vmem %s6215_s14, %s4996_s27 }
  0x4d   : > { %v4472_v1 = vld [vmem:[%s4994_s19 + $0x2a0] ss:$24 sps:$4 sm:$0xff]   ;;  %v4473_v2 = vld [vmem:[%s4994_s19 + $0x274] ss:$24 sps:$4 sm:$0xff]   ;;  %v4475_v5 = vld [vmem:[%s4994_s19 + $0x270] ss:$24 sps:$4 sm:$0xff]  }
  0x4e   : > { %1447 = vmatpush1.bf16.msra.mxu0 %v4447_v38  ;;  %v4448_v3 = vld [vmem:[%s4994_s19 + $0x1e8] ss:$24 sps:$4 sm:$0xff]   ;;  %v4451_v4 = vld [vmem:[%s4994_s19 + $0x1bc] ss:$24 sps:$4 sm:$0xff]   ;;  %v4454_v7 = vld [vmem:[%s4994_s19 + $0x1b8] ss:$24 sps:$4 sm:$0xff]  }
  0x4f   : > { %1522 = vmatpush1.bf16.msra.mxu1 %v4409_v26  ;;  %1448 = vmatprep.subr.bf16.mxu0 %v4449_v39  ;;  %v4476_v6 = vld [vmem:[%s4994_s19 + $0x244] ss:$24 sps:$4 sm:$0xff]   ;;  %v4460_v9 = vld [vmem:[%s4994_s19 + $0x188] ss:$24 sps:$4 sm:$0xff]   ;;  %v807_v11 = vld [vmem:[#allocation2 + $0x30] sm:$0xff]  ;;  %p4177_p9 = scmp.ne.s32.totalorder %s4833_s21, 3 }
  0x50   : > { %1523 = vmatprep.subr.bf16.mxu1 %v4410_v27  ;;  %v4457_v8 = vld [vmem:[%s4994_s19 + $0x18c] ss:$24 sps:$4 sm:$0xff]   ;;  %v4478_v10 = vld [vmem:[%s4994_s19 + $0x240] ss:$24 sps:$4 sm:$0xff]   ;;  %v4481_v16 = vld [vmem:[%s4994_s19 + $0x210] ss:$24 sps:$4 sm:$0xff]  }
  0x51   : > { %v4479_v12 = vld [vmem:[%s4994_s19 + $0x214] ss:$24 sps:$4 sm:$0xff]   ;;  %v809_v13 = vld [vmem:[#allocation2 + $0x58] sm:$0xff]  ;;  %v816_v24 = vld [vmem:[#allocation2 + $0x20] sm:$0xff]  ;;  %s6221_s22 = sld [smem:[#allocation9_spill]] (!%p4177_p9) }
  0x52   : > { %1449 = vmatpush1.bf16.msra.mxu0 %v4453_v42  ;;  %v812_v14 = vld [vmem:[#allocation2 + $0x68] sm:$0xff]  ;;  %v5120_v17 = vpack.c.bf16 %v809_v13, %v807_v11  ;;  %v4482_v18 = vld [vmem:[%s4994_s19 + $0x1e4] ss:$24 sps:$4 sm:$0xff]   ;;  %v4484_v20 = vld [vmem:[%s4994_s19 + $0x1e0] ss:$24 sps:$4 sm:$0xff]  }
  0x53   : > { %1524 = vmatpush1.bf16.msra.mxu1 %v4412_v30  ;;  %1450 = vmatprep.subr.bf16.mxu0 %v4455_v45  ;;  %v814_v15 = vld [vmem:[#allocation2 + $0x48] sm:$0xff]  ;;  %v811_v21 = vld [vmem:[#allocation2 + $0x50] sm:$0xff]  ;;  %v818_v25 = vld [vmem:[#allocation2 + $0x38] sm:$0xff] }
  0x54   : > { %1525 = vmatprep.subr.bf16.mxu1 %v4413_v33  ;;  %v5123_v19 = vpack.c.bf16 %v814_v15, %v812_v14  ;;  %v4485_v22 = vld [vmem:[%s4994_s19 + $0x1b4] ss:$24 sps:$4 sm:$0xff]   ;;  %v4487_v26 = vld [vmem:[%s4994_s19 + $0x1b0] ss:$24 sps:$4 sm:$0xff]   ;;  %v4488_v27 = vld [vmem:[%s4994_s19 + $0x184] ss:$24 sps:$4 sm:$0xff]   ;;  %v5133_v29 = vpack.c.bf16 %v818_v25, %v816_v24 }
  0x55   : > { %v813_v23 = vld [vmem:[#allocation2 + $0x8] sm:$0xff]  ;;  %v4490_v30 = vld [vmem:[%s4994_s19 + $0x180] ss:$24 sps:$4 sm:$0xff]   ;;  %v4493_v31 = vld [vmem:[%s4994_s19 + $0x164] ss:$24 sps:$4 sm:$0xff]  }
  0x56   : > { %1451 = vmatpush1.bf16.msra.mxu0 %v4459_v49  ;;  %v5131_v28 = vpack.c.bf16 %v813_v23, %v811_v21  ;;  %v815_v32 = vld [vmem:[#allocation2 + $0x40] sm:$0xff]  ;;  %v817_v33 = vld [vmem:[#allocation2 + $0x10] sm:$0xff]  ;;  %v822_v35 = vld [vmem:[#allocation2 + $0x28] sm:$0xff] }
  0x57   : > { %1526 = vmatpush1.bf16.msra.mxu1 %v4415_v36  ;;  %1452 = vmatprep.subr.bf16.mxu0 %v4461_v50  ;;  %v820_v34 = vld [vmem:[#allocation2 + $0x70] sm:$0xff]  ;;  %v4491_v36 = vld [vmem:[%s4994_s19 + $0x160] ss:$24 sps:$4 sm:$0xff]   ;;  %v5141_v38 = vpack.c.bf16 %v817_v33, %v815_v32  ;;  %v4505_v49 = vld [vmem:[%s4994_s19 + $0xa4] ss:$24 sps:$4 sm:$0xff]  }
  0x58   : > { %1527 = vmatprep.subr.bf16.mxu1 %v4416_v37  ;;  %v4496_v37 = vld [vmem:[%s4994_s19 + $0x134] ss:$24 sps:$4 sm:$0xff]   ;;  %v5143_v39 = vpack.c.bf16 %v822_v35, %v820_v34  ;;  %v819_v42 = vld [vmem:[#allocation2 + $0x60] sm:$0xff]  ;;  %v821_v43 = vld [vmem:[#allocation2 + $0x78] sm:$0xff] }
  0x59   : > { %v4497_v44 = vld [vmem:[%s4994_s19 + $0x100] ss:$24 sps:$4 sm:$0xff]   ;;  %v4502_v45 = vld [vmem:[%s4994_s19 + $0xd4] ss:$24 sps:$4 sm:$0xff]  }
  0x5a   : > { %1453 = vmatpush1.bf16.msra.mxu0 %v4463_v53  ;;  %v4503_v50 = vld [vmem:[%s4994_s19 + $0xa0] ss:$24 sps:$4 sm:$0xff]   ;;  %v4511_v53 = vld [vmem:[%s4994_s19 + $0x44] ss:$24 sps:$4 sm:$0xff]  }
  0x5b   : > { %1528 = vmatpush1.bf16.msra.mxu1 %v4418_v40  ;;  %1454 = vmatprep.subr.bf16.mxu0 %v4464_v54  ;;  %v4494_v40 = vld [vmem:[%s4994_s19 + $0x130] ss:$24 sps:$4 sm:$0xff]   ;;  %v4509_v54 = vld [vmem:[%s4994_s19 + $0x40] ss:$24 sps:$4 sm:$0xff]  }
  0x5c   : > { %1529 = vmatprep.subr.bf16.mxu1 %v4419_v41  ;;  %v4499_v41 = vld [vmem:[%s4994_s19 + $0x104] ss:$24 sps:$4 sm:$0xff]  }
  0x5e   : > { %1455 = vmatpush1.bf16.msra.mxu0 %v4466_v57  ;;  %v4517_v57 = vld [vmem:[%s4994_s19 + $0x2e4] ss:$24 sps:$4 sm:$0xff]  }
  0x5f   : > { %1530 = vmatpush2.bf16.msra.mxu1 %v4421_v47  ;;  %1456 = vmatprep.subr.bf16.mxu0 %v4467_v58  ;;  %v5153_v47 = vpack.c.bf16 %v821_v43, %v819_v42  ;;  %v4515_v58 = vld [vmem:[%s4994_s19 + $0x2e0] ss:$24 sps:$4 sm:$0xff]  }
  0x60   : > { %1531 = vmatprep.subr.bf16.mxu1 %v4422_v48  ;;  %v4500_v48 = vld [vmem:[%s4994_s19 + $0xd0] ss:$24 sps:$4 sm:$0xff]  }
  0x62   : > { %1457 = vmatpush2.bf16.msra.mxu0 %v4469_v61  ;;  %v4523_v61 = vld [vmem:[%s4994_s19 + $0x284] ss:$24 sps:$4 sm:$0xff]  }
  0x63   : > { %1532 = vmatpush2.bf16.msra.mxu1 %v4424_v51  ;;  %1458 = vmatprep.subr.bf16.mxu0 %v4470_v62  ;;  %v4508_v51 = vld [vmem:[%s4994_s19 + $0x74] ss:$24 sps:$4 sm:$0xff]   ;;  %v4521_v62 = vld [vmem:[%s4994_s19 + $0x280] ss:$24 sps:$4 sm:$0xff]  }
  0x64   : > { %1533 = vmatprep.subr.bf16.mxu1 %v4427_v52  ;;  %v4506_v52 = vld [vmem:[%s4994_s19 + $0x70] ss:$24 sps:$4 sm:$0xff]  }
  0x66   : > { %1459 = vmatpush2.bf16.msra.mxu0 %v4472_v1  ;;  %v4527_v1 = vld [vmem:[%s4994_s19 + $0x220] ss:$24 sps:$4 sm:$0xff]  }
  0x67   : > { %1534 = vmatpush2.bf16.msra.mxu1 %v4430_v55  ;;  %1460 = vmatprep.subr.bf16.mxu0 %v4473_v2  ;;  %v4514_v55 = vld [vmem:[%s4994_s19 + $0x14] ss:$24 sps:$4 sm:$0xff]  }
  0x68   : > { %1535 = vmatprep.subr.bf16.mxu1 %v4433_v56  ;;  %v4512_v56 = vld [vmem:[%s4994_s19 + $0x10] ss:$24 sps:$4 sm:$0xff]   ;;  %v4532_v2 = vld [vmem:[%s4994_s19 + $0x1f4] ss:$24 sps:$4 sm:$0xff]  }
  0x6a   : > { %1461 = vmatpush2.bf16.msra.mxu0 %v4475_v5  ;;  %v4533_v5 = vld [vmem:[%s4994_s19 + $0x1c0] ss:$24 sps:$4 sm:$0xff]  }
  0x6b   : > { %1536 = vmatpush2.bf16.msra.mxu1 %v4436_v59  ;;  %1462 = vmatprep.subr.bf16.mxu0 %v4476_v6  ;;  %v4520_v59 = vld [vmem:[%s4994_s19 + $0x2b4] ss:$24 sps:$4 sm:$0xff]  }
  0x6c   : > { %1537 = vmatprep.subr.bf16.mxu1 %v4439_v60  ;;  %v4518_v60 = vld [vmem:[%s4994_s19 + $0x2b0] ss:$24 sps:$4 sm:$0xff]   ;;  %v4538_v6 = vld [vmem:[%s4994_s19 + $0x194] ss:$24 sps:$4 sm:$0xff]  }
  0x6e   : > { %1463 = vmatpush2.bf16.msra.mxu0 %v4478_v10  ;;  %v930_v10 = vlaneseq }
  0x6f   : > { %1538 = vmatpush2.bf16.msra.mxu1 %v4442_v63  ;;  %1464 = vmatprep.subr.bf16.mxu0 %v4479_v12  ;;  %v4524_v63 = vld [vmem:[%s4994_s19 + $0x250] ss:$24 sps:$4 sm:$0xff]  }
  0x70   : > { %1539 = vmatprep.subr.bf16.mxu1 %v4445_v0  ;;  %v4529_v0 = vld [vmem:[%s4994_s19 + $0x224] ss:$24 sps:$4 sm:$0xff]   ;;  %v5202_v13 = vshrl.u32 %v930_v10, 7 }
  0x72   : > { %1465 = vmatpush2.bf16.msra.mxu0 %v4481_v16  ;;  %v5205_v15 = vsub.s32 0, %v5202_v13 }
  0x73   : > { %1540 = vmatpush2.bf16.msra.mxu1 %v4448_v3  ;;  %1466 = vmatprep.subr.bf16.mxu0 %v4482_v18  ;;  %v4530_v3 = vld [vmem:[%s4994_s19 + $0x1f0] ss:$24 sps:$4 sm:$0xff]   ;;  %v5211_v18 = vld [vmem:[%s5001_s12] sm:$0x3f] }
  0x74   : > { %1541 = vmatprep.subr.bf16.mxu1 %v4451_v4  ;;  %v4535_v4 = vld [vmem:[%s4994_s19 + $0x1c4] ss:$24 sps:$4 sm:$0xff]  }
  0x76   : > { %1467 = vmatpush2.bf16.msra.mxu0 %v4484_v20  ;;  %v5215_v20 = vrot.slane %v5211_v18, %v5205_v15 }
  0x77   : > { %1542 = vmatpush2.bf16.msra.mxu1 %v4454_v7  ;;  %1468 = vmatprep.subr.bf16.mxu0 %v4485_v22  ;;  %v4536_v7 = vld [vmem:[%s4994_s19 + $0x190] ss:$24 sps:$4 sm:$0xff]  }
  0x78   : > { %1543 = vmatprep.subr.bf16.mxu1 %v4457_v8 }
  0x7a   : > { %1469 = vmatpush2.bf16.msra.mxu0 %v4487_v26 }
  0x7b   : > { %1544 = vmatpush2.bf16.msra.mxu1 %v4460_v9  ;;  %1470 = vmatprep.subr.bf16.mxu0 %v4488_v27 }
  0x7e   : > { %1546 = vmatmul.mubr.bf16.vlgmr.msra.gmra.mxu1 %v5120_v17  ;;  %1471 = vmatpush2.bf16.msra.mxu0 %v4490_v30 }
  0x7f   : > { %1555 = vmatprep.mubr.bf16.mxu1 %v5123_v19  ;;  %1586 = vmatprep.subr.bf16.mxu0 %v4493_v31 }
  0x81   : > { %1473 = vmatmul.mubr.bf16.vlgmr.msra.gmra.mxu0 %v5120_v17 }
  0x82   : > { %1482 = vmatprep.mubr.bf16.mxu0 %v5123_v19  ;;  %1587 = vmatpush1.bf16.msra.mxu0 %v4491_v36 }
  0x83   : > { %1588 = vmatprep.subr.bf16.mxu0 %v4496_v37  ;;  %v940_v37 = vsub.s32 2, %v5202_v13 }
  0x85   : > { %v941_v43 = vrot.slane %v5211_v18, %v940_v37 }
  0x86   : > { %1556 = vmatmul.mubr.bf16.gmra.mxu1 %v5131_v28  ;;  %1589 = vmatpush1.bf16.msra.mxu0 %v4494_v40 }
  0x87   : > { %1565 = vmatprep.mubr.bf16.mxu1 %v5133_v29  ;;  %1590 = vmatprep.subr.bf16.mxu0 %v4499_v41  ;;  %v944_v41 = vsub.s32 3, %v5202_v13 }
  0x89   : > { %1483 = vmatmul.mubr.bf16.gmra.mxu0 %v5131_v28 }
  0x8a   : > { %1492 = vmatprep.mubr.bf16.mxu0 %v5133_v29  ;;  %1591 = vmatpush1.bf16.msra.mxu0 %v4497_v44 }
  0x8b   : > { %1592 = vmatprep.subr.bf16.mxu0 %v4502_v45 }
  0x8e   : > { %1566 = vmatmul.mubr.bf16.gmra.mxu1 %v5141_v38  ;;  %1593 = vmatpush1.bf16.msra.mxu0 %v4500_v48 }
  0x8f   : > { %1575 = vmatprep.mubr.bf16.mxu1 %v5143_v39  ;;  %1594 = vmatprep.subr.bf16.mxu0 %v4505_v49 }
  0x91   : > { %1493 = vmatmul.mubr.bf16.gmra.mxu0 %v5141_v38 }
  0x92   : > { %1502 = vmatprep.mubr.bf16.mxu0 %v5143_v39  ;;  %1595 = vmatpush1.bf16.msra.mxu0 %v4503_v50 }
  0x93   : > { %1596 = vmatprep.subr.bf16.mxu0 %v4508_v51 }
  0x96   : > { %1576 = vmatmul.mubr.bf16.gmra.mxu1 %v5153_v47  ;;  %1597 = vmatpush1.bf16.msra.mxu0 %v4506_v52 }
  0x97   : > { %1598 = vmatprep.subr.bf16.mxu0 %v4511_v53 }
  0x99   : > { %1503 = vmatmul.mubr.bf16.gmra.mxu0 %v5153_v47 }
  0x9a   : > { %1599 = vmatpush1.bf16.msra.mxu0 %v4509_v54  ;;  %1618 = vmatprep.mubr.bf16.mxu0 %v5086_v46  ;;  %v4526_v46 = vld [vmem:[%s4994_s19 + $0x254] ss:$24 sps:$4 sm:$0xff]   ;;  %s6213_s19 = sld [smem:[#allocation16_spill]] }
  0x9b   : > { %1600 = vmatprep.subr.bf16.mxu0 %v4514_v55 }
  0x9e   : > { %1601 = vmatpush1.bf16.msra.mxu0 %v4512_v56 }
  0x9f   : > { %1602 = vmatprep.subr.bf16.mxu0 %v4517_v57 }
  0xa0   : > { %s6214_s12 = scalar_lea.vmem %s6213_s19, %s4996_s27  ;;  %s6220_s27 = sld [smem:[#allocation11_spill]] (!%p4177_p9) }
  0xa2   : > { %1603 = vmatpush2.bf16.msra.mxu0 %v4515_v58 }
  0xa3   : > { %1604 = vmatprep.subr.bf16.mxu0 %v4520_v59 }
  0xa6   : > { %1605 = vmatpush2.bf16.msra.mxu0 %v4518_v60 }
  0xa7   : > { %1606 = vmatprep.subr.bf16.mxu0 %v4523_v61 }
  0xaa   : > { %1607 = vmatpush2.bf16.msra.mxu0 %v4521_v62 }
  0xab   : > { %1608 = vmatprep.subr.bf16.mxu0 %v4526_v46 }
  0xae   : > { %1609 = vmatpush2.bf16.msra.mxu0 %v4524_v63 }
  0xaf   : > { %1610 = vmatprep.subr.bf16.mxu0 %v4529_v0 }
  0xb2   : > { %1611 = vmatpush2.bf16.msra.mxu0 %v4527_v1 }
  0xb3   : > { %1612 = vmatprep.subr.bf16.mxu0 %v4532_v2 }
  0xb6   : > { %1613 = vmatpush2.bf16.msra.mxu0 %v4530_v3 }
  0xb7   : > { %1614 = vmatprep.subr.bf16.mxu0 %v4535_v4 }
  0xba   : > { %1615 = vmatpush2.bf16.msra.mxu0 %v4533_v5 }
  0xbb   : > { %1616 = vmatprep.subr.bf16.mxu0 %v4538_v6 }
  0xbe   : > { %1617 = vmatpush2.bf16.msra.mxu0 %v4536_v7 }
  0xc1   : > { %1619 = vmatmul.mubr.bf16.vlgmr.msra.gmra.mxu0 %v5120_v17  ;;  %v5208_v17 = vsub.s32 1, %v5202_v13 }
  0xc2   : > { %1628 = vmatprep.mubr.bf16.mxu0 %v5123_v19 }
  0xc3   : > { %v5219_v23 = vrot.slane %v5211_v18, %v5208_v17 }
  0xc9   : > { %1629 = vmatmul.mubr.bf16.gmra.mxu0 %v5131_v28 }
  0xca   : > { %1638 = vmatprep.mubr.bf16.mxu0 %v5133_v29 }
  0xd1   : > { %1639 = vmatmul.mubr.bf16.gmra.mxu0 %v5141_v38 }
  0xd2   : > { %1648 = vmatprep.mubr.bf16.mxu0 %v5143_v39 }
  0xd9   : > { %1649 = vmatmul.mubr.bf16.gmra.mxu0 %v5153_v47  ;;  %v945_v47 = vrot.slane %v5211_v18, %v944_v41 }
 0x13e   : > { %v5194_v8 = vpop.f32.mrf.mxu1 }
 0x13f   : > { %v1548_v7 = vadd.f32 %v5194_v8, %v941_v43 }
 0x140   : > { %v5196_v9 = vpop.f32.mrf.mxu1 }
 0x141   : > { %v1474_v22 = vpop.f32.mrf.mxu0 }
 0x142   : > { %v5198_v11 = vpop.f32.mrf.mxu1  ;;  %v1475_v26 = vadd.f32 %v1474_v22, %v5215_v20 }
 0x143   : > { %v1476_v25 = vpop.f32.mrf.mxu0  ;;  %v1552_v6 = vadd.f32 %v5198_v11, %v941_v43 }
 0x144   : > { %v5200_v12 = vpop.f32.mrf.mxu1  ;;  %v1477_v29 = vadd.f32 %v1476_v25, %v5219_v23 }
 0x145   : > { %v1478_v28 = vpop.f32.mrf.mxu0  ;;  %v1554_v10 = vadd.f32 %v5200_v12, %v945_v47 }
 0x146   : > { %v1557_v14 = vpop.f32.mrf.mxu1  ;;  %v1479_v30 = vadd.f32 %v1478_v28, %v5215_v20 }
 0x147   : > { %v1480_v32 = vpop.f32.mrf.mxu0  ;;  %v1558_v63 = vadd.f32 %v1557_v14, %v941_v43  ;;  %v1663_v14 = vpack.c.bf16 %v1552_v6, %v1548_v7 }
 0x148   : > { %v1559_v16 = vpop.f32.mrf.mxu1  ;;  %v1659_v33 = vpack.c.bf16 %v1479_v30, %v1475_v26  ;;  %v1481_v34 = vadd.f32 %v1480_v32, %v5219_v23 }
 0x149   : > { %v1484_v36 = vpop.f32.mrf.mxu0  ;;  %v1560_v2 = vadd.f32 %v1559_v16, %v945_v47 }
 0x14a   : > { %v1561_v19 = vpop.f32.mrf.mxu1  ;;  %v1920_v38 = vpack.c.bf16 %v1481_v34, %v1477_v29  ;;  %4281 = vmatprep.mubr.bf16.mxu1 %v1659_v33  ;;  %v1485_v8 = vadd.f32 %v1484_v36, %v5215_v20 }
 0x14b   : > { %v5226_v40 = vpop.f32.mrf.mxu0  ;;  %v1562_v46 = vadd.f32 %v1561_v19, %v941_v43  ;;  %v1550_v19 = vadd.f32 %v5196_v9, %v945_v47 }
 0x14c   : > { %v1563_v21 = vpop.f32.mrf.mxu1  ;;  %4313 = vmatprep.mubr.bf16.mxu0 %v1920_v38  ;;  %v1487_v28 = vadd.f32 %v5226_v40, %v5219_v23 }
 0x14d   : > { %v1488_v45 = vpop.f32.mrf.mxu0  ;;  %v1564_v0 = vadd.f32 %v1563_v21, %v945_v47  ;;  %v1664_v3 = vpack.c.bf16 %v1562_v46, %v1558_v63  ;;  %v1924_v21 = vpack.c.bf16 %v1554_v10, %v1550_v19 }
 0x14e   : > { %v1567_v24 = vpop.f32.mrf.mxu1  ;;  %v1489_v12 = vadd.f32 %v1488_v45, %v5215_v20 }
 0x14f   : > { %v1568_v51 = vadd.f32 %v1567_v24, %v941_v43  ;;  %v1490_v57 = vpop.f32.mrf.mxu0  ;;  %v1925_v4 = vpack.c.bf16 %v1564_v0, %v1560_v2 }
 0x150   : > { %v1569_v27 = vpop.f32.mrf.mxu1  ;;  %v1491_v29 = vadd.f32 %v1490_v57, %v5219_v23 }
 0x151   : > { %v1570_v58 = vadd.f32 %v1569_v27, %v945_v47  ;;  %v1494_v62 = vpop.f32.mrf.mxu0 }
 0x152   : > { %v1571_v31 = vpop.f32.mrf.mxu1  ;;  %v1495_v25 = vadd.f32 %v1494_v62, %v5215_v20  ;;  %v1921_v34 = vpack.c.bf16 %v1491_v29, %v1487_v28 }
 0x153   : > { %v1572_v48 = vadd.f32 %v1571_v31, %v941_v43  ;;  %v1496_v1 = vpop.f32.mrf.mxu0  ;;  %v1660_v31 = vpack.c.bf16 %v1489_v12, %v1485_v8  ;;  %v4072_v12 = vld [vmem:[%s6211_s15] ss:$0 sm:$0xff] }
 0x154   : > { %v1573_v35 = vpop.f32.mrf.mxu1  ;;  %v1497_v26 = vadd.f32 %v1496_v1, %v5219_v23 }
 0x155   : > { %v1574_v53 = vadd.f32 %v1573_v35, %v945_v47  ;;  %v1665_v59 = vpack.c.bf16 %v1572_v48, %v1568_v51  ;;  %v1498_v5 = vpop.f32.mrf.mxu0  ;;  %v948_v51 = vsub.s32 4, %v5202_v13 }
 0x156   : > { %v1577_v39 = vpop.f32.mrf.mxu1  ;;  %v1499_v11 = vadd.f32 %v1498_v5, %v5215_v20 }
 0x157   : > { %v1578_v49 = vadd.f32 %v1577_v39, %v941_v43  ;;  %v1926_v61 = vpack.c.bf16 %v1574_v53, %v1570_v58  ;;  %v1500_v22 = vpop.f32.mrf.mxu0 }
 0x158   : > { %v1579_v42 = vpop.f32.mrf.mxu1  ;;  %v1501_v9 = vadd.f32 %v1500_v22, %v5219_v23  ;;  %v1661_v30 = vpack.c.bf16 %v1499_v11, %v1495_v25 }
 0x159   : > { %v1580_v54 = vadd.f32 %v1579_v42, %v945_v47  ;;  %v1504_v16 = vpop.f32.mrf.mxu0 }
 0x15a   : > { %v1581_v44 = vpop.f32.mrf.mxu1  ;;  %v1922_v32 = vpack.c.bf16 %v1501_v9, %v1497_v26  ;;  %v1505_v35 = vadd.f32 %v1504_v16, %v5215_v20 }
 0x15b   : > { %v1582_v50 = vadd.f32 %v1581_v44, %v941_v43  ;;  %v1506_v24 = vpop.f32.mrf.mxu0 }
 0x15c   : > { %v1583_v52 = vpop.f32.mrf.mxu1  ;;  %v1507_v37 = vadd.f32 %v1506_v24, %v5219_v23 }
 0x15d   : > { %v1666_v55 = vpack.c.bf16 %v1582_v50, %v1578_v49  ;;  %v1584_v56 = vadd.f32 %v1583_v52, %v945_v47  ;;  %v1508_v27 = vpop.f32.mrf.mxu0 }
 0x15e   : > { %v1509_v36 = vadd.f32 %v1508_v27, %v5215_v20 }
 0x15f   : > { %v1927_v60 = vpack.c.bf16 %v1584_v56, %v1580_v54  ;;  %4273 = vmatprep.subr.bf16.mxu1 %v1666_v55  ;;  %v1510_v33 = vpop.f32.mrf.mxu0  ;;  %v949_v54 = vrot.slane %v5211_v18, %v948_v51 }
 0x160   : > { %4274 = vmatpush3.bf16.xpose.msra.mxu1 %v1666_v55  ;;  %v1511_v38 = vadd.f32 %v1510_v33, %v5219_v23  ;;  %v1662_v39 = vpack.c.bf16 %v1509_v36, %v1505_v35  ;;  %v952_v23 = vsub.s32 5, %v5202_v13 }
 0x161   : > { %4275 = vmatprep.subr.bf16.mxu1 %v1665_v59  ;;  %4305 = vmatprep.subr.bf16.mxu0 %v1927_v60 }
 0x162   : > { %4306 = vmatpush3.bf16.xpose.msra.mxu0 %v1927_v60  ;;  %v1923_v40 = vpack.c.bf16 %v1511_v38, %v1507_v37  ;;  %v953_v56 = vrot.slane %v5211_v18, %v952_v23 }
 0x163   : > { %4307 = vmatprep.subr.bf16.mxu0 %v1926_v61 }
 0x168   : > { %4276 = vmatpush3.bf16.xpose.msra.mxu1 %v1665_v59 }
 0x169   : > { %4277 = vmatprep.subr.bf16.mxu1 %v1664_v3 }
 0x16a   : > { %4308 = vmatpush3.bf16.xpose.msra.mxu0 %v1926_v61 }
 0x16b   : > { %4309 = vmatprep.subr.bf16.mxu0 %v1925_v4 }
 0x170   : > { %4278 = vmatpush3.bf16.xpose.msra.mxu1 %v1664_v3 }
 0x171   : > { %4279 = vmatprep.subr.bf16.mxu1 %v1663_v14 }
 0x172   : > { %4310 = vmatpush3.bf16.xpose.msra.mxu0 %v1925_v4 }
 0x173   : > { %4311 = vmatprep.subr.bf16.mxu0 %v1924_v21 }
 0x178   : > { %4280 = vmatpush3.bf16.xpose.msra.mxu1 %v1663_v14 }
 0x17a   : > { %4312 = vmatpush3.bf16.xpose.msra.mxu0 %v1924_v21 }
 0x17f   : > { %4282 = vmatmul.mubr.bf16.vlgmr.msra.gmra.mxu1 %v1660_v31 }
 0x180   : > { %4285 = vmatprep.mubr.bf16.mxu1 %v1661_v30 }
 0x181   : > { %4314 = vmatmul.mubr.bf16.vlgmr.msra.gmra.mxu0 %v1921_v34  ;;  %v1620_v41 = vpop.f32.mrf.mxu0 }
 0x182   : > { %4317 = vmatprep.mubr.bf16.mxu0 %v1922_v32  ;;  %v1621_v18 = vadd.f32 %v1620_v41, %v949_v54 }
 0x183   : > { %v1622_v42 = vpop.f32.mrf.mxu0 }
 0x184   : > { %v1623_v21 = vadd.f32 %v1622_v42, %v953_v56 }
 0x185   : > { %v1624_v43 = vpop.f32.mrf.mxu0 }
 0x186   : > { %v1625_v19 = vadd.f32 %v1624_v43, %v949_v54 }
 0x187   : > { %4286 = vmatmul.mubr.bf16.gmra.mxu1 %v1662_v39  ;;  %v1626_v44 = vpop.f32.mrf.mxu0 }
 0x188   : > { %v1627_v16 = vadd.f32 %v1626_v44, %v953_v56  ;;  %v1667_v25 = vpack.c.bf16 %v1625_v19, %v1621_v18 }
 0x189   : > { %4318 = vmatmul.mubr.bf16.gmra.mxu0 %v1923_v40  ;;  %v1630_v45 = vpop.f32.mrf.mxu0 }
 0x18a   : > { %v1631_v1 = vadd.f32 %v1630_v45, %v949_v54  ;;  %v1928_v11 = vpack.c.bf16 %v1627_v16, %v1623_v21 }
 0x18b   : > { %v1632_v47 = vpop.f32.mrf.mxu0 }
 0x18c   : > { %v1633_v6 = vadd.f32 %v1632_v47, %v953_v56 }
 0x18d   : > { %v1634_v48 = vpop.f32.mrf.mxu0 }
 0x18e   : > { %v1635_v3 = vadd.f32 %v1634_v48, %v949_v54 }
 0x18f   : > { %v1636_v49 = vpop.f32.mrf.mxu0 }
 0x190   : > { %v1637_v7 = vadd.f32 %v1636_v49, %v953_v56  ;;  %v1668_v14 = vpack.c.bf16 %v1635_v3, %v1631_v1 }
 0x191   : > { %v1640_v20 = vpop.f32.mrf.mxu0 }
 0x192   : > { %v1641_v58 = vadd.f32 %v1640_v20, %v949_v54  ;;  %v1929_v24 = vpack.c.bf16 %v1637_v7, %v1633_v6 }
 0x193   : > { %v1642_v50 = vpop.f32.mrf.mxu0 }
 0x194   : > { %v1643_v62 = vadd.f32 %v1642_v50, %v953_v56 }
 0x195   : > { %v1644_v52 = vpop.f32.mrf.mxu0 }
 0x196   : > { %v1645_v59 = vadd.f32 %v1644_v52, %v949_v54 }
 0x197   : > { %v1646_v53 = vpop.f32.mrf.mxu0 }
 0x198   : > { %v1647_v46 = vadd.f32 %v1646_v53, %v953_v56  ;;  %v1669_v4 = vpack.c.bf16 %v1645_v59, %v1641_v58 }
 0x199   : > { %v1650_v55 = vpop.f32.mrf.mxu0 }
 0x19a   : > { %v1651_v60 = vadd.f32 %v1650_v55, %v949_v54  ;;  %v1930_v10 = vpack.c.bf16 %v1647_v46, %v1643_v62 }
 0x19b   : > { %v1652_v57 = vpop.f32.mrf.mxu0 }
 0x19c   : > { %v1653_v63 = vadd.f32 %v1652_v57, %v953_v56 }
 0x19d   : > { %v1654_v61 = vpop.f32.mrf.mxu0 }
 0x19e   : > { %v1655_v0 = vadd.f32 %v1654_v61, %v949_v54 }
 0x19f   : > { %v1656_v2 = vpop.f32.mrf.mxu0 }
 0x1a0   : > { %v1670_v13 = vpack.c.bf16 %v1655_v0, %v1651_v60  ;;  %v1657_v5 = vadd.f32 %v1656_v2, %v953_v56 }
 0x1a2   : > { %v1931_v22 = vpack.c.bf16 %v1657_v5, %v1653_v63  ;;  %4289 = vmatprep.subr.bf16.mxu1 %v1670_v13 }
 0x1a3   : > { %4290 = vmatpush3.bf16.msra.mxu1 %v1670_v13 }
 0x1a4   : > { %4321 = vmatprep.subr.bf16.mxu0 %v1931_v22  ;;  %4291 = vmatprep.subr.bf16.mxu1 %v1669_v4 }
 0x1a5   : > { %4322 = vmatpush3.bf16.msra.mxu0 %v1931_v22 }
 0x1a6   : > { %4323 = vmatprep.subr.bf16.mxu0 %v1930_v10 }
 0x1a7   : > { %4292 = vmatpush3.bf16.msra.mxu1 %v1669_v4 }
 0x1a8   : > { %4293 = vmatprep.subr.bf16.mxu1 %v1668_v14 }
 0x1a9   : > { %4324 = vmatpush3.bf16.msra.mxu0 %v1930_v10 }
 0x1aa   : > { %4325 = vmatprep.subr.bf16.mxu0 %v1929_v24 }
 0x1ab   : > { %4294 = vmatpush3.bf16.msra.mxu1 %v1668_v14 }
 0x1ac   : > { %4295 = vmatprep.subr.bf16.mxu1 %v1667_v25 }
 0x1ad   : > { %4326 = vmatpush3.bf16.msra.mxu0 %v1929_v24 }
 0x1ae   : > { %4327 = vmatprep.subr.bf16.mxu0 %v1928_v11 }
 0x1af   : > { %4296 = vmatpush3.bf16.msra.mxu1 %v1667_v25 }
 0x1b1   : > { %4328 = vmatpush3.bf16.msra.mxu0 %v1928_v11 }
 0x23f   : > { %v4283_v8 = vpop.f32.mrf.mxu1 }
 0x240   : > { %v5274_v47 = vadd.f32 %v4283_v8, %v4072_v12 }
 0x241   : > { %v1711_v26 = vpop.f32.mrf.mxu1  ;;  %v4315_v9 = vpop.f32.mrf.mxu0 }
 0x242   : > { %v5257_v27 = vadd.f32 %v4072_v12, %v1711_v26  ;;  %v5259_v28 = vadd.f32 %v4315_v9, %v4072_v12  ;;  %v1749_v53 = vsel %vm1742_vm0, %v5274_v47, -inf }
 0x243   : > { %v4284_v29 = vpop.f32.mrf.mxu1  ;;  %v1966_v30 = vpop.f32.mrf.mxu0 }
 0x244   : > { %v5261_v31 = vadd.f32 %v4072_v12, %v1966_v30  ;;  %v2003_v32 = vsel %vm1742_vm0, %v5259_v28, -inf  ;;  %v1743_v33 = vsel %vm1742_vm0, %v5257_v27, -inf  ;;  %v5276_v48 = vadd.f32 %v4284_v29, %v4072_v12 }
 0x245   : > { %2004 = vmax.xlane.f32.xlu0 %v2003_v32  ;;  %v1714_v34 = vpop.f32.mrf.mxu1  ;;  %v4316_v35 = vpop.f32.mrf.mxu0  ;;  %1744 = vmax.xlane.f32.xlu1 %v1743_v33 }
 0x246   : > { %v1715_v36 = vadd.f32 %v4072_v12, %v1714_v34  ;;  %v5267_v39 = vadd.f32 %v4316_v35, %v4072_v12  ;;  %v1997_v41 = vsel %vm1742_vm0, %v5261_v31, -inf  ;;  %v1752_v54 = vsel %vm1742_vm0, %v5276_v48, -inf }
 0x247   : > { %v4287_v37 = vpop.f32.mrf.mxu1  ;;  %v1969_v38 = vpop.f32.mrf.mxu0 }
 0x248   : > { %v5269_v40 = vadd.f32 %v4072_v12, %v1969_v38  ;;  %v1746_v42 = vsel %vm1742_vm0, %v1715_v36, -inf  ;;  %v2006_v20 = vsel %vm1742_vm0, %v5267_v39, -inf  ;;  %v5306_v0 = vadd.f32 %v4287_v37, %v4072_v12 }
 0x249   : > { %v4319_v43 = vpop.f32.mrf.mxu0  ;;  %1998 = vmax.xlane.f32.xlu0 %v1997_v41  ;;  %v1727_v44 = vpop.f32.mrf.mxu1  ;;  %1747 = vmax.xlane.f32.xlu1 %v1746_v42 }
 0x24a   : > { %v2000_v49 = vsel %vm1742_vm0, %v5269_v40, -inf  ;;  %v5282_v52 = vadd.f32 %v4072_v12, %v1727_v44  ;;  %v5290_v56 = vadd.f32 %v4319_v43, %v4072_v12  ;;  %v1761_v4 = vsel %vm1742_vm0, %v5306_v0, -inf }
 0x24b   : > { %v4288_v45 = vpop.f32.mrf.mxu1  ;;  %v1982_v50 = vpop.f32.mrf.mxu0 }
 0x24c   : > { %v1755_v58 = vsel %vm1742_vm0, %v5282_v52, -inf  ;;  %v5298_v61 = vadd.f32 %v4072_v12, %v1982_v50  ;;  %v2015_v46 = vsel %vm1742_vm0, %v5290_v56, -inf  ;;  %v5308_v1 = vadd.f32 %v4288_v45, %v4072_v12 }
 0x24d   : > { %2001 = vmax.xlane.f32.xlu0 %v2000_v49  ;;  %v1730_v51 = vpop.f32.mrf.mxu1  ;;  %2007 = vmax.xlane.f32.xlu1 %v2006_v20  ;;  %v4320_v55 = vpop.f32.mrf.mxu0 }
 0x24e   : > { %v5284_v23 = vadd.f32 %v4072_v12, %v1730_v51  ;;  %v5292_v57 = vadd.f32 %v4320_v55, %v4072_v12  ;;  %v2009_v2 = vsel %vm1742_vm0, %v5298_v61, -inf  ;;  %v1764_v13 = vsel %vm1742_vm0, %v5308_v1, -inf }
 0x24f   : > { %v1985_v60 = vpop.f32.mrf.mxu0 }
 0x250   : > { %v1758_v59 = vsel %vm1742_vm0, %v5284_v23, -inf  ;;  %v5300_v62 = vadd.f32 %v4072_v12, %v1985_v60  ;;  %v2018_v63 = vsel %vm1742_vm0, %v5292_v57, -inf }
 0x251   : > { %1750 = vmax.xlane.f32.xlu0 %v1749_v53  ;;  %1753 = vmax.xlane.f32.xlu1 %v1752_v54 }
 0x252   : > { %v2012_v3 = vsel %vm1742_vm0, %v5300_v62, -inf }
 0x255   : > { %1756 = vmax.xlane.f32.xlu0 %v1755_v58  ;;  %1759 = vmax.xlane.f32.xlu1 %v1758_v59 }
 0x259   : > { %2016 = vmax.xlane.f32.xlu0 %v2015_v46  ;;  %2019 = vmax.xlane.f32.xlu1 %v2018_v63 }
 0x25d   : > { %2010 = vmax.xlane.f32.xlu0 %v2009_v2  ;;  %2013 = vmax.xlane.f32.xlu1 %v2012_v3 }
 0x261   : > { %1762 = vmax.xlane.f32.xlu0 %v1761_v4  ;;  %1765 = vmax.xlane.f32.xlu1 %v1764_v13 }
 0x2ce   : > { %v2005_v5 = vpop.xlane.xlu0 %2004  ;;  %v1745_v6 = vpop.xlane.xlu1 %1744 }
 0x2cf   : > { %v2023_v7 = vsub.f32 %v5259_v28, %v2005_v5  ;;  %v1767_v10 = vsub.f32 %v5257_v27, %v1745_v6 }
 0x2d1   : > { %v1775_v22 = vmul.f32 1.442695, %v1767_v10  ;;  %v2033_v18 = vmul.f32 1.442695, %v2023_v7 }
 0x2d2   : > { %v1999_v19 = vpop.xlane.xlu0 %1998  ;;  %v1748_v14 = vpop.xlane.xlu1 %1747 }
 0x2d3   : > { %v2021_v21 = vsub.f32 %v5261_v31, %v1999_v19  ;;  %v1768_v16 = vsub.f32 %v1715_v36, %v1748_v14  ;;  %4683 = vpow2.f32 %v1775_v22 }
 0x2d4   : > { %4685 = vpow2.f32 %v2033_v18 }
 0x2d5   : > { %v1777_v24 = vmul.f32 1.442695, %v1768_v16  ;;  %v2029_v25 = vmul.f32 1.442695, %v2021_v21 }
 0x2d6   : > { %v2002_v11 = vpop.xlane.xlu0 %2001  ;;  %v2008_v8 = vpop.xlane.xlu1 %2007 }
 0x2d7   : > { %v2022_v12 = vsub.f32 %v5269_v40, %v2002_v11  ;;  %v2024_v26 = vsub.f32 %v5267_v39, %v2008_v8  ;;  %4687 = vpow2.f32 %v1777_v24 }
 0x2d8   : > { %4689 = vpow2.f32 %v2029_v25 }
 0x2d9   : > { %v2035_v9 = vmul.f32 1.442695, %v2024_v26  ;;  %v2031_v27 = vmul.f32 1.442695, %v2022_v12 }
 0x2da   : > { %v1751_v28 = vpop.xlane.xlu0 %1750  ;;  %v1754_v29 = vpop.xlane.xlu1 %1753 }
 0x2db   : > { %v1769_v30 = vsub.f32 %v5274_v47, %v1751_v28  ;;  %v1770_v31 = vsub.f32 %v5276_v48, %v1754_v29  ;;  %4691 = vpow2.f32 %v2035_v9  ;;  %v4541_v28 = vld [vmem:[%s4989_s29 + $0x74] ss:$8 sps:$4 sm:$0xff]  }
 0x2dc   : > { %4693 = vpow2.f32 %v2031_v27  ;;  %2402 = vmatprep.subr.bf16.mxu1 %v4541_v28 }
 0x2dd   : > { %v1779_v32 = vmul.f32 1.442695, %v1769_v30  ;;  %v1781_v33 = vmul.f32 1.442695, %v1770_v31 }
 0x2de   : > { %v1757_v34 = vpop.xlane.xlu0 %1756  ;;  %v1760_v35 = vpop.xlane.xlu1 %1759 }
 0x2df   : > { %4695 = vpow2.f32 %v1779_v32  ;;  %v1771_v36 = vsub.f32 %v5282_v52, %v1757_v34  ;;  %v1772_v37 = vsub.f32 %v5284_v23, %v1760_v35 }
 0x2e0   : > { %v5327_v38 = vpop.eup %4683  ;;  %4697 = vpow2.f32 %v1781_v33 }
 0x2e1   : > { %v1783_v39 = vmul.f32 1.442695, %v1771_v36  ;;  %v1785_v40 = vmul.f32 1.442695, %v1772_v37  ;;  %v1791_v42 = vsel %vm1742_vm0, %v5327_v38, 0.0  ;;  %v5331_v44 = vpop.eup %4685 }
 0x2e2   : > { %v2017_v41 = vpop.xlane.xlu0 %2016  ;;  %v2020_v43 = vpop.xlane.xlu1 %2019  ;;  %1792 = vadd.xlane.f32.xlu0 %v1791_v42  ;;  %v2051_v51 = vsel %vm1742_vm0, %v5331_v44, 0.0 }
 0x2e3   : > { %4699 = vpow2.f32 %v1783_v39  ;;  %v2027_v45 = vsub.f32 %v5290_v56, %v2017_v41  ;;  %v2028_v47 = vsub.f32 %v5292_v57, %v2020_v43 }
 0x2e4   : > { %v5335_v48 = vpop.eup %4687  ;;  %4701 = vpow2.f32 %v1785_v40 }
 0x2e5   : > { %v2041_v49 = vmul.f32 1.442695, %v2027_v45  ;;  %v2043_v20 = vmul.f32 1.442695, %v2028_v47  ;;  %v1794_v52 = vsel %vm1742_vm0, %v5335_v48, 0.0  ;;  %v5341_v53 = vpop.eup %4689 }
 0x2e6   : > { %v2011_v50 = vpop.xlane.xlu0 %2010  ;;  %v2014_v23 = vpop.xlane.xlu1 %2013  ;;  %2052 = vadd.xlane.f32.xlu0 %v2051_v51  ;;  %1795 = vadd.xlane.f32.xlu1 %v1794_v52  ;;  %v2045_v60 = vsel %vm1742_vm0, %v5341_v53, 0.0 }
 0x2e7   : > { %4703 = vpow2.f32 %v2041_v49  ;;  %v2025_v54 = vsub.f32 %v5298_v61, %v2011_v50  ;;  %v2026_v55 = vsub.f32 %v5300_v62, %v2014_v23 }
 0x2e8   : > { %v5345_v56 = vpop.eup %4691  ;;  %4705 = vpow2.f32 %v2043_v20 }
 0x2e9   : > { %v2037_v57 = vmul.f32 1.442695, %v2025_v54  ;;  %v2039_v58 = vmul.f32 1.442695, %v2026_v55  ;;  %v2054_v46 = vsel %vm1742_vm0, %v5345_v56, 0.0  ;;  %v5351_v2 = vpop.eup %4693 }
 0x2ea   : > { %v1763_v59 = vpop.xlane.xlu0 %1762  ;;  %v1766_v63 = vpop.xlane.xlu1 %1765  ;;  %2046 = vadd.xlane.f32.xlu0 %v2045_v60  ;;  %2055 = vadd.xlane.f32.xlu1 %v2054_v46  ;;  %v2048_v6 = vsel %vm1742_vm0, %v5351_v2, 0.0 }
 0x2eb   : > { %4707 = vpow2.f32 %v2037_v57  ;;  %v1773_v61 = vsub.f32 %v5306_v0, %v1763_v59  ;;  %v1774_v62 = vsub.f32 %v5308_v1, %v1766_v63 }
 0x2ec   : > { %v5355_v3 = vpop.eup %4695  ;;  %4709 = vpow2.f32 %v2039_v58 }
 0x2ed   : > { %v1787_v4 = vmul.f32 1.442695, %v1773_v61  ;;  %v1797_v13 = vsel %vm1742_vm0, %v5355_v3, 0.0  ;;  %v1789_v5 = vmul.f32 1.442695, %v1774_v62  ;;  %v5361_v7 = vpop.eup %4697 }
 0x2ee   : > { %1798 = vadd.xlane.f32.xlu0 %v1797_v13  ;;  %2049 = vadd.xlane.f32.xlu1 %v2048_v6  ;;  %v1800_v10 = vsel %vm1742_vm0, %v5361_v7, 0.0  ;;  %v4542_v6 = vld [vmem:[%s4989_s29 + $0x60] ss:$8 sps:$4 sm:$0xff]  }
 0x2ef   : > { %4711 = vpow2.f32 %v1787_v4  ;;  %v4544_v4 = vld [vmem:[%s4989_s29 + $0x64] ss:$8 sps:$4 sm:$0xff]  }
 0x2f0   : > { %v5363_v0 = vpop.eup %4699  ;;  %4713 = vpow2.f32 %v1789_v5 }
 0x2f1   : > { %v1803_v1 = vsel %vm1742_vm0, %v5363_v0, 0.0  ;;  %v5369_v22 = vpop.eup %4701 }
 0x2f2   : > { %1804 = vadd.xlane.f32.xlu0 %v1803_v1  ;;  %1801 = vadd.xlane.f32.xlu1 %v1800_v10  ;;  %v1806_v14 = vsel %vm1742_vm0, %v5369_v22, 0.0  ;;  %v4547_v1 = vld [vmem:[%s4989_s29 + $0x54] ss:$8 sps:$4 sm:$0xff]  }
 0x2f4   : > { %v5371_v18 = vpop.eup %4703 }
 0x2f5   : > { %v2063_v19 = vsel %vm1742_vm0, %v5371_v18, 0.0  ;;  %v5377_v21 = vpop.eup %4705 }
 0x2f6   : > { %2064 = vadd.xlane.f32.xlu0 %v2063_v19  ;;  %1807 = vadd.xlane.f32.xlu1 %v1806_v14  ;;  %v2066_v25 = vsel %vm1742_vm0, %v5377_v21, 0.0  ;;  %v4545_v14 = vld [vmem:[%s4989_s29 + $0x50] ss:$8 sps:$4 sm:$0xff]  }
 0x2f8   : > { %v5379_v16 = vpop.eup %4707 }
 0x2f9   : > { %v2057_v24 = vsel %vm1742_vm0, %v5379_v16, 0.0  ;;  %v5385_v11 = vpop.eup %4709 }
 0x2fa   : > { %2058 = vadd.xlane.f32.xlu0 %v2057_v24  ;;  %2067 = vadd.xlane.f32.xlu1 %v2066_v25  ;;  %v2060_v26 = vsel %vm1742_vm0, %v5385_v11, 0.0  ;;  %v4550_v25 = vld [vmem:[%s4989_s29 + $0x44] ss:$8 sps:$4 sm:$0xff]  }
 0x2fc   : > { %v5387_v8 = vpop.eup %4711 }
 0x2fd   : > { %v1809_v12 = vsel %vm1742_vm0, %v5387_v8, 0.0  ;;  %v5393_v9 = vpop.eup %4713 }
 0x2fe   : > { %1810 = vadd.xlane.f32.xlu0 %v1809_v12  ;;  %2061 = vadd.xlane.f32.xlu1 %v2060_v26  ;;  %v1812_v27 = vsel %vm1742_vm0, %v5393_v9, 0.0 }
 0x302   : > { %1813 = vadd.xlane.f32.xlu1 %v1812_v27 }
 0x36b   : > { %v1793_v29 = vpop.xlane.xlu0 %1792 }
 0x36c   : > { %4715 = vrcp.f32 %v1793_v29  ;;  %v4548_v29 = vld [vmem:[%s4989_s29 + $0x40] ss:$8 sps:$4 sm:$0xff]  }
 0x36f   : > { %v2053_v30 = vpop.xlane.xlu0 %2052  ;;  %v1796_v31 = vpop.xlane.xlu1 %1795 }
 0x370   : > { %4717 = vrcp.f32 %v1796_v31 }
 0x373   : > { %v2047_v32 = vpop.xlane.xlu0 %2046  ;;  %v2056_v33 = vpop.xlane.xlu1 %2055 }
 0x374   : > { %4719 = vrcp.f32 %v2056_v33 }
 0x375   : > { %4721 = vrcp.f32 %v2047_v32  ;;  %v4553_v32 = vld [vmem:[%s4989_s29 + $0x34] ss:$8 sps:$4 sm:$0xff]  }
 0x376   : > { %4723 = vrcp.f32 %v2053_v30 }
 0x377   : > { %v1799_v34 = vpop.xlane.xlu0 %1798  ;;  %v2050_v35 = vpop.xlane.xlu1 %2049 }
 0x378   : > { %4725 = vrcp.f32 %v2050_v35  ;;  %v4557_v35 = vld [vmem:[%s4989_s29 + $0x10] ss:$8 sps:$4 sm:$0xff]  }
 0x379   : > { %4727 = vrcp.f32 %v1799_v34  ;;  %v4716_v39 = vpop.eup %4715  ;;  %v4556_v34 = vld [vmem:[%s4989_s29 + $0x24] ss:$8 sps:$4 sm:$0xff]  }
 0x37a   : > { %v1823_v43 = vmul.f32 %v4716_v39, %v5327_v38  ;;  %v4565_v39 = vld [vmem:[%s4989_s29 + $0xf4] ss:$8 sps:$4 sm:$0xff]  }
 0x37b   : > { %v1805_v36 = vpop.xlane.xlu0 %1804  ;;  %v1802_v37 = vpop.xlane.xlu1 %1801 }
 0x37c   : > { %4729 = vrcp.f32 %v1802_v37  ;;  %v4560_v37 = vld [vmem:[%s4989_s29] ss:$8 sps:$4 sm:$0xff]  }
 0x37d   : > { %v4718_v40 = vpop.eup %4717  ;;  %4731 = vrcp.f32 %v1805_v36  ;;  %v4562_v36 = vld [vmem:[%s4989_s29 + $0x4] ss:$8 sps:$4 sm:$0xff]  }
 0x37e   : > { %v1824_v45 = vmul.f32 %v4718_v40, %v5335_v48  ;;  %v4563_v40 = vld [vmem:[%s4989_s29 + $0xf0] ss:$8 sps:$4 sm:$0xff]  }
 0x37f   : > { %v2065_v41 = vpop.xlane.xlu0 %2064  ;;  %v1808_v42 = vpop.xlane.xlu1 %1807 }
 0x380   : > { %4733 = vrcp.f32 %v1808_v42  ;;  %v1831_v47 = vpack.c.bf16 %v1824_v45, %v1823_v43  ;;  %v4566_v42 = vld [vmem:[%s4989_s29 + $0xe0] ss:$8 sps:$4 sm:$0xff]   ;;  %v4571_v43 = vld [vmem:[%s4989_s29 + $0xd4] ss:$8 sps:$4 sm:$0xff]   ;;  %v4569_v45 = vld [vmem:[%s4989_s29 + $0xd0] ss:$8 sps:$4 sm:$0xff]  }
 0x381   : > { %v4720_v49 = vpop.eup %4719 }
 0x382   : > { %4297 = vmatprep.mubr.msk.bf16.mxu1 %vm1742_vm0, %v1831_v47  ;;  %v4722_v51 = vpop.eup %4721  ;;  %v2080_v54 = vmul.f32 %v4720_v49, %v5345_v56  ;;  %v4574_v47 = vld [vmem:[%s4989_s29 + $0xc4] ss:$8 sps:$4 sm:$0xff]   ;;  %v4572_v49 = vld [vmem:[%s4989_s29 + $0xc0] ss:$8 sps:$4 sm:$0xff]  }
 0x383   : > { %v2059_v20 = vpop.xlane.xlu0 %2058  ;;  %v2068_v50 = vpop.xlane.xlu1 %2067  ;;  %v2077_v38 = vmul.f32 %v4722_v51, %v5341_v53  ;;  %v4580_v51 = vld [vmem:[%s4989_s29 + $0xa4] ss:$8 sps:$4 sm:$0xff]  }
 0x384   : > { %v4724_v52 = vpop.eup %4723  ;;  %4735 = vrcp.f32 %v2068_v50  ;;  %v4575_v50 = vld [vmem:[%s4989_s29 + $0xb0] ss:$8 sps:$4 sm:$0xff]  }
 0x385   : > { %v4726_v23 = vpop.eup %4725  ;;  %4737 = vrcp.f32 %v2059_v20  ;;  %v2079_v59 = vmul.f32 %v4724_v52, %v5331_v44  ;;  %v4539_v44 = vld [vmem:[%s4989_s29 + $0x70] ss:$8 sps:$4 sm:$0xff]   ;;  %v4577_v20 = vld [vmem:[%s4989_s29 + $0xb4] ss:$8 sps:$4 sm:$0xff]   ;;  %v4578_v52 = vld [vmem:[%s4989_s29 + $0xa0] ss:$8 sps:$4 sm:$0xff]  }
 0x386   : > { %v2078_v48 = vmul.f32 %v4726_v23, %v5351_v2  ;;  %v4728_v58 = vpop.eup %4727  ;;  %4739 = vrcp.f32 %v2065_v41  ;;  %v4568_v41 = vld [vmem:[%s4989_s29 + $0xe4] ss:$8 sps:$4 sm:$0xff]   ;;  %v4583_v23 = vld [vmem:[%s4989_s29 + $0x94] ss:$8 sps:$4 sm:$0xff]  }
 0x387   : > { %v1811_v55 = vpop.xlane.xlu0 %1810  ;;  %v2062_v57 = vpop.xlane.xlu1 %2061  ;;  %v2086_v63 = vpack.c.bf16 %v2080_v54, %v2079_v59  ;;  %v1825_v56 = vmul.f32 %v4728_v58, %v5355_v3  ;;  %v4581_v54 = vld [vmem:[%s4989_s29 + $0x90] ss:$8 sps:$4 sm:$0xff]  }
 0x388   : > { %4741 = vrcp.f32 %v2062_v57  ;;  %v2085_v60 = vpack.c.bf16 %v2078_v48, %v2077_v38  ;;  %v4584_v57 = vld [vmem:[%s4989_s29 + $0x80] ss:$8 sps:$4 sm:$0xff]  }
 0x389   : > { %v4730_v46 = vpop.eup %4729  ;;  %4743 = vrcp.f32 %v1811_v55  ;;  %v4586_v55 = vld [vmem:[%s4989_s29 + $0x84] ss:$8 sps:$4 sm:$0xff]  }
 0x38a   : > { %v1826_v61 = vmul.f32 %v4730_v46, %v5361_v7  ;;  %4329 = vmatprep.mubr.msk.bf16.mxu0 %vm1742_vm0, %v2085_v60  ;;  %v4732_v2 = vpop.eup %4731 }
 0x38b   : > { %v1814_v53 = vpop.xlane.xlu1 %1813  ;;  %4330 = vmatmul.mubr.msk.bf16.vlgmr.msra.gmra.mxu0 %vm1742_vm0, %v2086_v63  ;;  %v1827_v3 = vmul.f32 %v4732_v2, %v5363_v0 }
 0x38c   : > { %4745 = vrcp.f32 %v1814_v53  ;;  %v1832_v62 = vpack.c.bf16 %v1826_v61, %v1825_v56 }
 0x38d   : > { %v4734_v13 = vpop.eup %4733 }
 0x38e   : > { %4298 = vmatmul.mubr.msk.bf16.vlgmr.msra.gmra.mxu1 %vm1742_vm0, %v1832_v62  ;;  %v1828_v5 = vmul.f32 %v4734_v13, %v5369_v22 }
 0x38f   : > { %2403 = vmatpush1.bf16.msra.mxu1 %v4539_v44 }
 0x390   : > { %v1833_v7 = vpack.c.bf16 %v1828_v5, %v1827_v3  ;;  %2404 = vmatprep.subr.bf16.mxu1 %v4544_v4 }
 0x391   : > { %v4736_v10 = vpop.eup %4735 }
 0x392   : > { %4301 = vmatprep.mubr.msk.bf16.mxu1 %vm1742_vm0, %v1833_v7  ;;  %v4738_v19 = vpop.eup %4737  ;;  %v2084_v0 = vmul.f32 %v4736_v10, %v5377_v21 }
 0x393   : > { %2405 = vmatpush1.bf16.msra.mxu1 %v4542_v6  ;;  %v4740_v24 = vpop.eup %4739  ;;  %v2081_v26 = vmul.f32 %v4738_v19, %v5379_v16 }
 0x394   : > { %2406 = vmatprep.subr.bf16.mxu1 %v4547_v1  ;;  %v2083_v28 = vmul.f32 %v4740_v24, %v5371_v18 }
 0x395   : > { %v4742_v12 = vpop.eup %4741 }
 0x396   : > { %v4744_v22 = vpop.eup %4743  ;;  %v2082_v27 = vmul.f32 %v4742_v12, %v5385_v11  ;;  %v2088_v33 = vpack.c.bf16 %v2084_v0, %v2083_v28  ;;  %v4551_v11 = vld [vmem:[%s4989_s29 + $0x30] ss:$8 sps:$4 sm:$0xff]   ;;  %v4589_v12 = vld [vmem:[%s5018_s4 + $0x74] ss:$8 sps:$4 sm:$0xff]   ;;  %v4592_v0 = vld [vmem:[%s5018_s4 + $0x64] ss:$8 sps:$4 sm:$0xff]  }
 0x397   : > { %2407 = vmatpush1.bf16.msra.mxu1 %v4545_v14  ;;  %v1829_v21 = vmul.f32 %v4744_v22, %v5387_v8  ;;  %v4554_v8 = vld [vmem:[%s4989_s29 + $0x20] ss:$8 sps:$4 sm:$0xff]   ;;  %2904 = vmatprep.subr.bf16.mxu0 %v4589_v12  ;;  %v4598_v28 = vld [vmem:[%s5018_s4 + $0x44] ss:$8 sps:$4 sm:$0xff]  }
 0x398   : > { %v2087_v31 = vpack.c.bf16 %v2082_v27, %v2081_v26  ;;  %2408 = vmatprep.subr.bf16.mxu1 %v4550_v25  ;;  %v4587_v25 = vld [vmem:[%s5018_s4 + $0x70] ss:$8 sps:$4 sm:$0xff]   ;;  %v4590_v22 = vld [vmem:[%s5018_s4 + $0x60] ss:$8 sps:$4 sm:$0xff]   ;;  %v4595_v26 = vld [vmem:[%s5018_s4 + $0x54] ss:$8 sps:$4 sm:$0xff]  }
 0x399   : > { %v4746_v30 = vpop.eup %4745  ;;  %2905 = vmatpush1.bf16.msra.mxu0 %v4587_v25  ;;  %v4593_v27 = vld [vmem:[%s5018_s4 + $0x50] ss:$8 sps:$4 sm:$0xff]  }
 0x39a   : > { %v1830_v16 = vmul.f32 %v4746_v30, %v5393_v9  ;;  %4333 = vmatprep.mubr.msk.bf16.mxu0 %vm1742_vm0, %v2087_v31  ;;  %v4559_v9 = vld [vmem:[%s4989_s29 + $0x14] ss:$8 sps:$4 sm:$0xff]   ;;  %2906 = vmatprep.subr.bf16.mxu0 %v4592_v0  ;;  %v4599_v31 = vld [vmem:[%s5018_s4 + $0x30] ss:$8 sps:$4 sm:$0xff]  }
 0x39b   : > { %4334 = vmatmul.mubr.msk.bf16.gmra.mxu0 %vm1742_vm0, %v2088_v33  ;;  %2409 = vmatpush1.bf16.msra.mxu1 %v4548_v29  ;;  %v4596_v29 = vld [vmem:[%s5018_s4 + $0x40] ss:$8 sps:$4 sm:$0xff]   ;;  %v4601_v30 = vld [vmem:[%s5018_s4 + $0x34] ss:$8 sps:$4 sm:$0xff]  }
 0x39c   : > { %v1834_v18 = vpack.c.bf16 %v1830_v16, %v1829_v21  ;;  %2410 = vmatprep.subr.bf16.mxu1 %v4553_v32  ;;  %v4604_v32 = vld [vmem:[%s5018_s4 + $0x24] ss:$8 sps:$4 sm:$0xff]   ;;  %v4602_v33 = vld [vmem:[%s5018_s4 + $0x20] ss:$8 sps:$4 sm:$0xff]   ;;  %v4607_v21 = vld [vmem:[%s5018_s4 + $0x14] ss:$8 sps:$4 sm:$0xff]  }
 0x39d   : > { %2907 = vmatpush1.bf16.msra.mxu0 %v4590_v22  ;;  %v4605_v16 = vld [vmem:[%s5018_s4 + $0x10] ss:$8 sps:$4 sm:$0xff]  }
 0x39e   : > { %4302 = vmatmul.mubr.msk.bf16.gmra.mxu1 %vm1742_vm0, %v1834_v18  ;;  %2908 = vmatprep.subr.bf16.mxu0 %v4595_v26  ;;  %v2230_v18 = vld [vmem:[%s6212_s26] sm:$0x3] }
 0x39f   : > { %2411 = vmatpush1.bf16.msra.mxu1 %v4551_v11  ;;  %v5473_v11 = vrot.slane %v2230_v18, %v5205_v15 }
 0x3a0   : > { %2412 = vmatprep.subr.bf16.mxu1 %v4556_v34  ;;  %v5476_v34 = vrot.slane %v2230_v18, %v5208_v17 }
 0x3a1   : > { %2909 = vmatpush1.bf16.msra.mxu0 %v4593_v27  ;;  %v4610_v27 = vld [vmem:[%s5018_s4 + $0x4] ss:$8 sps:$4 sm:$0xff]  }
 0x3a2   : > { %2910 = vmatprep.subr.bf16.mxu0 %v4598_v28 }
 0x3a3   : > { %2413 = vmatpush1.bf16.msra.mxu1 %v4554_v8 }
 0x3a4   : > { %2414 = vmatprep.subr.bf16.mxu1 %v4559_v9 }
 0x3a5   : > { %2911 = vmatpush1.bf16.msra.mxu0 %v4596_v29 }
 0x3a6   : > { %2912 = vmatprep.subr.bf16.mxu0 %v4601_v30  ;;  %v4608_v30 = vld [vmem:[%s5018_s4] ss:$8 sps:$4 sm:$0xff]  }
 0x3a7   : > { %2415 = vmatpush1.bf16.msra.mxu1 %v4557_v35 }
 0x3a8   : > { %2416 = vmatprep.subr.bf16.mxu1 %v4562_v36 }
 0x3a9   : > { %2913 = vmatpush1.bf16.msra.mxu0 %v4599_v31  ;;  %v4787_v31 = vld [vmem:[#allocation2 + $0x40] sm:$0xff] }
 0x3aa   : > { %2914 = vmatprep.subr.bf16.mxu0 %v4604_v32 }
 0x3ab   : > { %2417 = vmatpush1.bf16.msra.mxu1 %v4560_v37 }
 0x3ac   : > { %2418 = vmatprep.subr.bf16.mxu1 %v4565_v39  ;;  %v4779_v39 = vld [vmem:[#allocation2 + $0x30] sm:$0xff] }
 0x3ad   : > { %2915 = vmatpush1.bf16.msra.mxu0 %v4602_v33  ;;  %v4788_v33 = vld [vmem:[#allocation2 + $0x20] sm:$0xff] }
 0x3ae   : > { %2916 = vmatprep.subr.bf16.mxu0 %v4607_v21 }
 0x3af   : > { %2419 = vmatpush2.bf16.msra.mxu1 %v4563_v40 }
 0x3b0   : > { %2420 = vmatprep.subr.bf16.mxu1 %v4568_v41  ;;  %v4780_v41 = vld [vmem:[#allocation2] sm:$0xff] }
 0x3b1   : > { %2917 = vmatpush1.bf16.msra.mxu0 %v4605_v16 }
 0x3b2   : > { %2918 = vmatprep.subr.bf16.mxu0 %v4610_v27 }
 0x3b3   : > { %2421 = vmatpush2.bf16.msra.mxu1 %v4566_v42 }
 0x3b4   : > { %2422 = vmatprep.subr.bf16.mxu1 %v4571_v43 }
 0x3b5   : > { %2919 = vmatpush1.bf16.msra.mxu0 %v4608_v30  ;;  %v4623_v30 = vld [vmem:[%s5018_s4 + $0xb0] ss:$8 sps:$4 sm:$0xff]  }
 0x3b7   : > { %2423 = vmatpush2.bf16.msra.mxu1 %v4569_v45 }
 0x3b8   : > { %2424 = vmatprep.subr.bf16.mxu1 %v4574_v47 }
 0x3bb   : > { %2425 = vmatpush2.bf16.msra.mxu1 %v4572_v49 }
 0x3bc   : > { %2426 = vmatprep.subr.bf16.mxu1 %v4577_v20 }
 0x3bf   : > { %2427 = vmatpush2.bf16.msra.mxu1 %v4575_v50  ;;  %v4781_v50 = vld [vmem:[#allocation2 + $0x58] sm:$0xff] }
 0x3c0   : > { %2428 = vmatprep.subr.bf16.mxu1 %v4580_v51 }
 0x3c3   : > { %2429 = vmatpush2.bf16.msra.mxu1 %v4578_v52 }
 0x3c4   : > { %2430 = vmatprep.subr.bf16.mxu1 %v4583_v23  ;;  %v4782_v23 = vld [vmem:[#allocation2 + $0x18] sm:$0xff] }
 0x3c7   : > { %2431 = vmatpush2.bf16.msra.mxu1 %v4581_v54 }
 0x3c8   : > { %2432 = vmatprep.subr.bf16.mxu1 %v4586_v55 }
 0x3cb   : > { %2433 = vmatpush2.bf16.msra.mxu1 %v4584_v57 }
 0x44b   : > { %v4331_v38 = vpop.f32.mrf.mxu0 }
 0x44d   : > { %v2135_v48 = vpop.f32.mrf.mxu0 }
 0x44e   : > { %v4299_v58 = vpop.f32.mrf.mxu1 }
 0x44f   : > { %v4332_v59 = vpop.f32.mrf.mxu0 }
 0x450   : > { %v1881_v60 = vpop.f32.mrf.mxu1  ;;  %v2193_v2 = vpack.c.bf16 %v4332_v59, %v4331_v38 }
 0x451   : > { %v2138_v46 = vpop.f32.mrf.mxu0 }
 0x452   : > { %v2191_v63 = vpack.c.bf16 %v2138_v46, %v2135_v48  ;;  %v4300_v56 = vpop.f32.mrf.mxu1 }
 0x453   : > { %v2192_v62 = vpack.c.bf16 %v4300_v56, %v4299_v58  ;;  %v4783_v56 = vld [vmem:[#allocation2 + $0x50] sm:$0xff] }
 0x454   : > { %v1884_v61 = vpop.f32.mrf.mxu1  ;;  %2434 = vmatprep.mubr.bf16.mxu1 %v2191_v63 }
 0x455   : > { %v2190_v53 = vpack.c.bf16 %v1884_v61, %v1881_v60 }
 0x457   : > { %2435 = vmatmul.mubr.bf16.vlgmr.msra.gmra.mxu1 %v2190_v53  ;;  %v4784_v53 = vld [vmem:[#allocation2 + $0x68] sm:$0xff] }
 0x458   : > { %2444 = vmatprep.mubr.bf16.mxu1 %v2193_v2 }
 0x45b   : > { %v4335_v44 = vpop.f32.mrf.mxu0 }
 0x45d   : > { %v2151_v4 = vpop.f32.mrf.mxu0 }
 0x45e   : > { %v4303_v13 = vpop.f32.mrf.mxu1 }
 0x45f   : > { %v4336_v3 = vpop.f32.mrf.mxu0  ;;  %2445 = vmatmul.mubr.bf16.gmra.mxu1 %v2192_v62 }
 0x460   : > { %v1897_v5 = vpop.f32.mrf.mxu1  ;;  %v2197_v14 = vpack.c.bf16 %v4336_v3, %v4335_v44 }
 0x461   : > { %v2154_v6 = vpop.f32.mrf.mxu0 }
 0x462   : > { %v4304_v7 = vpop.f32.mrf.mxu1  ;;  %v2195_v1 = vpack.c.bf16 %v2154_v6, %v2151_v4  ;;  %v4785_v6 = vld [vmem:[#allocation2 + $0x8] sm:$0xff] }
 0x463   : > { %v2196_v24 = vpack.c.bf16 %v4304_v7, %v4303_v13 }
 0x464   : > { %v1900_v10 = vpop.f32.mrf.mxu1  ;;  %2454 = vmatprep.mubr.bf16.mxu1 %v2195_v1 }
 0x465   : > { %v2194_v19 = vpack.c.bf16 %v1900_v10, %v1897_v5  ;;  %v4786_v10 = vld [vmem:[#allocation2 + $0x48] sm:$0xff] }
 0x467   : > { %2455 = vmatmul.mubr.bf16.gmra.mxu1 %v2194_v19 }
 0x468   : > { %2464 = vmatprep.mubr.bf16.mxu1 %v2197_v14 }
 0x46f   : > { %2465 = vmatmul.mubr.bf16.gmra.mxu1 %v2196_v24 }
 0x517   : > { %v2436_v8 = vpop.f32.mrf.mxu1 }
 0x518   : > { %v2437_v9 = vadd.f32 %v2436_v8, %v5473_v11 }
 0x519   : > { %v2438_v35 = vpop.f32.mrf.mxu1 }
 0x51a   : > { %v2439_v36 = vadd.f32 %v2438_v35, %v5476_v34  ;;  %v5480_v40 = vadd.f32 %v4779_v39, %v2437_v9  ;;  %v4789_v39 = vld [vmem:[#allocation2 + $0x10] sm:$0xff] }
 0x51b   : > { %v2440_v37 = vpop.f32.mrf.mxu1 }
 0x51c   : > { %v5482_v42 = vadd.f32 %v4780_v41, %v2439_v36  ;;  %v2441_v43 = vadd.f32 %v2440_v37, %v5473_v11  ;;  %v2526_v57 = vmul.f32 %v5480_v40, %v5480_v40  ;;  %v4613_v37 = vld [vmem:[%s5018_s4 + $0xf4] ss:$8 sps:$4 sm:$0xff]  }
 0x51d   : > { %v2442_v45 = vpop.f32.mrf.mxu1  ;;  %2920 = vmatprep.subr.bf16.mxu0 %v4613_v37  ;;  %v4640_v37 = vld [vmem:[%s5027_s18 + $0x64] ss:$8 sps:$4 sm:$0xff]  }
 0x51e   : > { %v2443_v47 = vadd.f32 %v2442_v45, %v5476_v34  ;;  %v2493_v49 = vadd.f32 %v5482_v42, %v5480_v40  ;;  %v2527_v20 = vmul.f32 %v5482_v42, %v5482_v42  ;;  %v5490_v51 = vadd.f32 %v4781_v50, %v2441_v43  ;;  %v4611_v45 = vld [vmem:[%s5018_s4 + $0xf0] ss:$8 sps:$4 sm:$0xff]  }
 0x51f   : > { %v2446_v52 = vpop.f32.mrf.mxu1  ;;  %2921 = vmatpush2.bf16.msra.mxu0 %v4611_v45  ;;  %v4641_v45 = vld [vmem:[%s5027_s18 + $0x50] ss:$8 sps:$4 sm:$0xff]  }
 0x520   : > { %v5492_v54 = vadd.f32 %v4782_v23, %v2443_v47  ;;  %v2447_v55 = vadd.f32 %v2446_v52, %v5473_v11  ;;  %2494 = vadd.xlane.f32.xlu0 %v2493_v49  ;;  %v2542_v59 = vadd.f32 %v2527_v20, %v2526_v57  ;;  %v2528_v63 = vmul.f32 %v5490_v51, %v5490_v51  ;;  %v4790_v47 = vld [vmem:[#allocation2 + $0x38] sm:$0xff] }
 0x521   : > { %v2448_v38 = vpop.f32.mrf.mxu1 }
 0x522   : > { %v2449_v48 = vadd.f32 %v2448_v38, %v5476_v34  ;;  %v2496_v58 = vadd.f32 %v5492_v54, %v5490_v51  ;;  %v2529_v60 = vmul.f32 %v5492_v54, %v5492_v54  ;;  %v5504_v61 = vadd.f32 %v4783_v56, %v2447_v55  ;;  %v4792_v56 = vld [vmem:[#allocation2 + $0x70] sm:$0xff] }
 0x523   : > { %v2450_v46 = vpop.f32.mrf.mxu1 }
 0x524   : > { %v5506_v2 = vadd.f32 %v4784_v53, %v2449_v48  ;;  %v2451_v44 = vadd.f32 %v2450_v46, %v5473_v11  ;;  %2497 = vadd.xlane.f32.xlu1 %v2496_v58  ;;  %2543 = vadd.xlane.f32.xlu0 %v2542_v59  ;;  %v2545_v13 = vadd.f32 %v2529_v60, %v2528_v63  ;;  %v4616_v48 = vld [vmem:[%s5018_s4 + $0xe4] ss:$8 sps:$4 sm:$0xff]   ;;  %v4614_v60 = vld [vmem:[%s5018_s4 + $0xe0] ss:$8 sps:$4 sm:$0xff]  }
 0x525   : > { %v2452_v62 = vpop.f32.mrf.mxu1  ;;  %v2530_v24 = vmul.f32 %v5504_v61, %v5504_v61  ;;  %v4791_v46 = vld [vmem:[#allocation2 + $0x60] sm:$0xff]  ;;  %2922 = vmatprep.subr.bf16.mxu0 %v4616_v48 }
 0x526   : > { %v2453_v4 = vadd.f32 %v2452_v62, %v5476_v34  ;;  %v2499_v3 = vadd.f32 %v5506_v2, %v5504_v61  ;;  %v2531_v5 = vmul.f32 %v5506_v2, %v5506_v2  ;;  %v5514_v7 = vadd.f32 %v4785_v6, %v2451_v44  ;;  %2923 = vmatpush2.bf16.msra.mxu0 %v4614_v60  ;;  %v4619_v6 = vld [vmem:[%s5018_s4 + $0xd4] ss:$8 sps:$4 sm:$0xff]   ;;  %v4658_v48 = vld [vmem:[%s5027_s18 + $0x4] ss:$8 sps:$4 sm:$0xff]   ;;  %v4659_v60 = vld [vmem:[%s5027_s18 + $0xf0] ss:$8 sps:$4 sm:$0xff]  }
 0x527   : > { %v2456_v1 = vpop.f32.mrf.mxu1  ;;  %2924 = vmatprep.subr.bf16.mxu0 %v4619_v6 }
 0x528   : > { %v5516_v19 = vadd.f32 %v4786_v10, %v2453_v4  ;;  %v2457_v14 = vadd.f32 %v2456_v1, %v5473_v11  ;;  %2546 = vadd.xlane.f32.xlu1 %v2545_v13  ;;  %2500 = vadd.xlane.f32.xlu0 %v2499_v3  ;;  %v2548_v22 = vadd.f32 %v2531_v5, %v2530_v24  ;;  %v4617_v1 = vld [vmem:[%s5018_s4 + $0xd0] ss:$8 sps:$4 sm:$0xff]  }
 0x529   : > { %v2458_v25 = vpop.f32.mrf.mxu1  ;;  %v2532_v29 = vmul.f32 %v5514_v7, %v5514_v7  ;;  %v4793_v10 = vld [vmem:[#allocation2 + $0x78] sm:$0xff] }
 0x52a   : > { %v2459_v12 = vadd.f32 %v2458_v25, %v5476_v34  ;;  %v2502_v0 = vadd.f32 %v5516_v19, %v5514_v7  ;;  %v2533_v26 = vmul.f32 %v5516_v19, %v5516_v19  ;;  %v5530_v32 = vadd.f32 %v4787_v31, %v2457_v14  ;;  %v4794_v14 = vld [vmem:[#allocation2 + $0x28] sm:$0xff]  ;;  %2925 = vmatpush2.bf16.msra.mxu0 %v4617_v1 }
 0x52b   : > { %v2460_v28 = vpop.f32.mrf.mxu1  ;;  %v4628_v31 = vld [vmem:[%s5018_s4 + $0xa4] ss:$8 sps:$4 sm:$0xff]  }
 0x52c   : > { %v5532_v21 = vadd.f32 %v4788_v33, %v2459_v12  ;;  %v2461_v16 = vadd.f32 %v2460_v28, %v5473_v11  ;;  %2503 = vadd.xlane.f32.xlu1 %v2502_v0  ;;  %2549 = vadd.xlane.f32.xlu0 %v2548_v22  ;;  %v2551_v9 = vadd.f32 %v2533_v26, %v2532_v29  ;;  %v4622_v22 = vld [vmem:[%s5018_s4 + $0xc4] ss:$8 sps:$4 sm:$0xff]   ;;  %v4620_v26 = vld [vmem:[%s5018_s4 + $0xc0] ss:$8 sps:$4 sm:$0xff]   ;;  %v4625_v29 = vld [vmem:[%s5018_s4 + $0xb4] ss:$8 sps:$4 sm:$0xff]  }
 0x52d   : > { %v2462_v18 = vpop.f32.mrf.mxu1  ;;  %v2534_v50 = vmul.f32 %v5530_v32, %v5530_v32  ;;  %2926 = vmatprep.subr.bf16.mxu0 %v4622_v22  ;;  %v4626_v33 = vld [vmem:[%s5018_s4 + $0xa0] ss:$8 sps:$4 sm:$0xff]  }
 0x52e   : > { %v2463_v8 = vadd.f32 %v2462_v18, %v5476_v34  ;;  %v2505_v35 = vadd.f32 %v5532_v21, %v5530_v32  ;;  %v2535_v36 = vmul.f32 %v5532_v21, %v5532_v21  ;;  %v5541_v41 = vadd.f32 %v4789_v39, %v2461_v16  ;;  %2927 = vmatpush2.bf16.msra.mxu0 %v4620_v26  ;;  %v4631_v16 = vld [vmem:[%s5018_s4 + $0x94] ss:$8 sps:$4 sm:$0xff]   ;;  %v4629_v18 = vld [vmem:[%s5018_s4 + $0x90] ss:$8 sps:$4 sm:$0xff]   ;;  %v4638_v39 = vld [vmem:[%s5027_s18 + $0x60] ss:$8 sps:$4 sm:$0xff]  }
 0x52f   : > { %v2466_v43 = vpop.f32.mrf.mxu1  ;;  %2928 = vmatprep.subr.bf16.mxu0 %v4625_v29 }
 0x530   : > { %v5544_v49 = vadd.f32 %v4790_v47, %v2463_v8  ;;  %v2467_v20 = vadd.f32 %v2466_v43, %v5473_v11  ;;  %2552 = vadd.xlane.f32.xlu1 %v2551_v9  ;;  %2506 = vadd.xlane.f32.xlu0 %v2505_v35  ;;  %v2554_v57 = vadd.f32 %v2535_v36, %v2534_v50  ;;  %v4634_v8 = vld [vmem:[%s5018_s4 + $0x84] ss:$8 sps:$4 sm:$0xff]   ;;  %v4632_v9 = vld [vmem:[%s5018_s4 + $0x80] ss:$8 sps:$4 sm:$0xff]   ;;  %v4635_v35 = vld [vmem:[%s5027_s18 + $0x70] ss:$8 sps:$4 sm:$0xff]  }
 0x531   : > { %v2468_v52 = vpop.f32.mrf.mxu1  ;;  %v2536_v59 = vmul.f32 %v5541_v41, %v5541_v41  ;;  %v4637_v36 = vld [vmem:[%s5027_s18 + $0x74] ss:$8 sps:$4 sm:$0xff]   ;;  %v4646_v47 = vld [vmem:[%s5027_s18 + $0x44] ss:$8 sps:$4 sm:$0xff]   ;;  %s6222_s4 = sld [smem:[#allocation12_spill]] (!%p4177_p9) }
 0x532   : > { %v2469_v23 = vadd.f32 %v2468_v52, %v5476_v34  ;;  %v2508_v55 = vadd.f32 %v5544_v49, %v5541_v41  ;;  %v2537_v38 = vmul.f32 %v5544_v49, %v5544_v49  ;;  %v5558_v63 = vadd.f32 %v4791_v46, %v2467_v20  ;;  %2929 = vmatpush2.bf16.msra.mxu0 %v4623_v30  ;;  %v4643_v43 = vld [vmem:[%s5027_s18 + $0x54] ss:$8 sps:$4 sm:$0xff]   ;;  %v4644_v20 = vld [vmem:[%s5027_s18 + $0x40] ss:$8 sps:$4 sm:$0xff]   ;;  %v4647_v52 = vld [vmem:[%s5027_s18 + $0x30] ss:$8 sps:$4 sm:$0xff]  }
 0x533   : > { %v2470_v58 = vpop.f32.mrf.mxu1  ;;  %2930 = vmatprep.subr.bf16.mxu0 %v4628_v31  ;;  %3205 = vmatprep.subr.bf16.mxu1 %v4637_v36  ;;  %v4649_v50 = vld [vmem:[%s5027_s18 + $0x34] ss:$8 sps:$4 sm:$0xff]   ;;  %v4664_v46 = vld [vmem:[%s5027_s18 + $0xe4] ss:$8 sps:$4 sm:$0xff]  }
 0x534   : > { %v5560_v53 = vadd.f32 %v4792_v56, %v2469_v23  ;;  %v2471_v44 = vadd.f32 %v2470_v58, %v5473_v11  ;;  %2509 = vadd.xlane.f32.xlu1 %v2508_v55  ;;  %2555 = vadd.xlane.f32.xlu0 %v2554_v57  ;;  %v2557_v13 = vadd.f32 %v2537_v38, %v2536_v59  ;;  %v4652_v23 = vld [vmem:[%s5027_s18 + $0x24] ss:$8 sps:$4 sm:$0xff]   ;;  %v4650_v55 = vld [vmem:[%s5027_s18 + $0x20] ss:$8 sps:$4 sm:$0xff]   ;;  %v4655_v57 = vld [vmem:[%s5027_s18 + $0x14] ss:$8 sps:$4 sm:$0xff]  }
 0x535   : > { %v2472_v62 = vpop.f32.mrf.mxu1  ;;  %3206 = vmatpush1.bf16.msra.mxu1 %v4635_v35  ;;  %v4653_v38 = vld [vmem:[%s5027_s18 + $0x10] ss:$8 sps:$4 sm:$0xff]   ;;  %v4656_v58 = vld [vmem:[%s5027_s18] ss:$8 sps:$4 sm:$0xff]   ;;  %v4661_v59 = vld [vmem:[%s5027_s18 + $0xf4] ss:$8 sps:$4 sm:$0xff]  }
 0x536   : > { %v2473_v4 = vadd.f32 %v2472_v62, %v5476_v34  ;;  %v2511_v3 = vadd.f32 %v5560_v53, %v5558_v63  ;;  %v2539_v5 = vmul.f32 %v5560_v53, %v5560_v53  ;;  %v5570_v11 = vadd.f32 %v4793_v10, %v2471_v44  ;;  %2931 = vmatpush2.bf16.msra.mxu0 %v4626_v33  ;;  %v4662_v56 = vld [vmem:[%s5027_s18 + $0xe0] ss:$8 sps:$4 sm:$0xff]   ;;  %v4667_v44 = vld [vmem:[%s5027_s18 + $0xd4] ss:$8 sps:$4 sm:$0xff]   ;;  %v4665_v62 = vld [vmem:[%s5027_s18 + $0xd0] ss:$8 sps:$4 sm:$0xff]  }
 0x537   : > { %v2538_v34 = vmul.f32 %v5558_v63, %v5558_v63  ;;  %2932 = vmatprep.subr.bf16.mxu0 %v4631_v16  ;;  %3207 = vmatprep.subr.bf16.mxu1 %v4640_v37 }
 0x538   : > { %v5572_v24 = vadd.f32 %v4794_v14, %v2473_v4  ;;  %2558 = vadd.xlane.f32.xlu1 %v2557_v13  ;;  %2512 = vadd.xlane.f32.xlu0 %v2511_v3  ;;  %v2540_v27 = vmul.f32 %v5570_v11, %v5570_v11  ;;  %v4670_v4 = vld [vmem:[%s5027_s18 + $0xc4] ss:$8 sps:$4 sm:$0xff]   ;;  %v4668_v13 = vld [vmem:[%s5027_s18 + $0xc0] ss:$8 sps:$4 sm:$0xff]   ;;  %v4673_v3 = vld [vmem:[%s5027_s18 + $0xb4] ss:$8 sps:$4 sm:$0xff]  }
 0x539   : > { %v2560_v12 = vadd.f32 %v2539_v5, %v2538_v34  ;;  %3208 = vmatpush1.bf16.msra.mxu1 %v4638_v39  ;;  %v4671_v5 = vld [vmem:[%s5027_s18 + $0xb0] ss:$8 sps:$4 sm:$0xff]  }
 0x53a   : > { %v2514_v25 = vadd.f32 %v5572_v24, %v5570_v11  ;;  %v2541_v0 = vmul.f32 %v5572_v24, %v5572_v24  ;;  %2933 = vmatpush2.bf16.msra.mxu0 %v4629_v18  ;;  %3209 = vmatprep.subr.bf16.mxu1 %v4643_v43 }
 0x53b   : > { %2934 = vmatprep.subr.bf16.mxu0 %v4634_v8 }
 0x53c   : > { %2515 = vadd.xlane.f32.xlu1 %v2514_v25  ;;  %2561 = vadd.xlane.f32.xlu0 %v2560_v12  ;;  %v2563_v28 = vadd.f32 %v2541_v0, %v2540_v27 }
 0x53d   : > { %3210 = vmatpush1.bf16.msra.mxu1 %v4641_v45 }
 0x53e   : > { %2935 = vmatpush2.bf16.msra.mxu0 %v4632_v9  ;;  %3211 = vmatprep.subr.bf16.mxu1 %v4646_v47 }
 0x540   : > { %2564 = vadd.xlane.f32.xlu1 %v2563_v28 }
 0x541   : > { %3212 = vmatpush1.bf16.msra.mxu1 %v4644_v20 }
 0x542   : > { %3213 = vmatprep.subr.bf16.mxu1 %v4649_v50 }
 0x545   : > { %3214 = vmatpush1.bf16.msra.mxu1 %v4647_v52 }
 0x546   : > { %3215 = vmatprep.subr.bf16.mxu1 %v4652_v23 }
 0x549   : > { %3216 = vmatpush1.bf16.msra.mxu1 %v4650_v55 }
 0x54a   : > { %3217 = vmatprep.subr.bf16.mxu1 %v4655_v57 }
 0x54d   : > { %3218 = vmatpush1.bf16.msra.mxu1 %v4653_v38 }
 0x54e   : > { %3219 = vmatprep.subr.bf16.mxu1 %v4658_v48 }
 0x551   : > { %3220 = vmatpush1.bf16.msra.mxu1 %v4656_v58 }
 0x552   : > { %3221 = vmatprep.subr.bf16.mxu1 %v4661_v59  ;;  %v2491_v59 = vld [vmem:[%s6214_s12] sm:$0x3] }
 0x555   : > { %3222 = vmatpush2.bf16.msra.mxu1 %v4659_v60 }
 0x556   : > { %3223 = vmatprep.subr.bf16.mxu1 %v4664_v46 }
 0x559   : > { %3224 = vmatpush2.bf16.msra.mxu1 %v4662_v56 }
 0x55a   : > { %3225 = vmatprep.subr.bf16.mxu1 %v4667_v44 }
 0x55d   : > { %3226 = vmatpush2.bf16.msra.mxu1 %v4665_v62 }
 0x55e   : > { %3227 = vmatprep.subr.bf16.mxu1 %v4670_v4 }
 0x561   : > { %3228 = vmatpush2.bf16.msra.mxu1 %v4668_v13 }
 0x562   : > { %3229 = vmatprep.subr.bf16.mxu1 %v4673_v3 }
 0x565   : > { %3230 = vmatpush2.bf16.msra.mxu1 %v4671_v5 }
 0x5a9   : > { %v2495_v6 = vpop.xlane.xlu0 %2494 }
 0x5aa   : > { %v2518_v1 = vmul.f32 0.00390625, %v2495_v6  ;;  %v2492_v6 = vld [vmem:[%s6216_s13] sm:$0x3] }
 0x5ac   : > { %v2574_v25 = vmul.f32 %v2518_v1, %v2518_v1  ;;  %v2590_v46 = vsub.f32 %v5480_v40, %v2518_v1  ;;  %v2591_v56 = vsub.f32 %v5482_v42, %v2518_v1  ;;  %v5653_v40 = vrot.slane %v2491_v59, %v5205_v15 }
 0x5ad   : > { %v2498_v10 = vpop.xlane.xlu1 %2497  ;;  %v2544_v14 = vpop.xlane.xlu0 %2543  ;;  %v5656_v42 = vrot.slane %v2491_v59, %v5208_v17 }
 0x5ae   : > { %v5618_v34 = vmul.f32 0.00390625, %v2498_v10  ;;  %v2566_v12 = vmul.f32 0.00390625, %v2544_v14 }
 0x5b0   : > { %v2582_v0 = vsub.f32 %v2566_v12, %v2574_v25  ;;  %v2575_v28 = vmul.f32 %v5618_v34, %v5618_v34  ;;  %v2592_v1 = vsub.f32 %v5490_v51, %v5618_v34 }
 0x5b1   : > { %v2547_v22 = vpop.xlane.xlu1 %2546  ;;  %v2501_v26 = vpop.xlane.xlu0 %2500 }
 0x5b2   : > { %v2606_v27 = vadd.f32 1e-05, %v2582_v0  ;;  %v2567_v29 = vmul.f32 0.00390625, %v2547_v22  ;;  %v5622_v30 = vmul.f32 0.00390625, %v2501_v26  ;;  %v2593_v0 = vsub.f32 %v5492_v54, %v5618_v34 }
 0x5b4   : > { %4747 = vrsqrt.f32 %v2606_v27  ;;  %v2583_v31 = vsub.f32 %v2567_v29, %v2575_v28  ;;  %v2576_v9 = vmul.f32 %v5622_v30, %v5622_v30  ;;  %v5665_v28 = vrot.slane %v2492_v6, %v5205_v15 }
 0x5b5   : > { %v2504_v33 = vpop.xlane.xlu1 %2503  ;;  %v2550_v16 = vpop.xlane.xlu0 %2549  ;;  %v2594_v34 = vsub.f32 %v5504_v61, %v5622_v30 }
 0x5b6   : > { %v2607_v18 = vadd.f32 1e-05, %v2583_v31  ;;  %v5624_v8 = vmul.f32 0.00390625, %v2504_v33  ;;  %v2568_v35 = vmul.f32 0.00390625, %v2550_v16 }
 0x5b8   : > { %4749 = vrsqrt.f32 %v2607_v18  ;;  %v2584_v36 = vsub.f32 %v2568_v35, %v2576_v9  ;;  %v2577_v45 = vmul.f32 %v5624_v8, %v5624_v8  ;;  %v5671_v9 = vrot.slane %v2492_v6, %v5208_v17 }
 0x5b9   : > { %v2553_v37 = vpop.xlane.xlu1 %2552  ;;  %v2507_v39 = vpop.xlane.xlu0 %2506  ;;  %v2595_v35 = vsub.f32 %v5506_v2, %v5622_v30 }
 0x5ba   : > { %v2608_v43 = vadd.f32 1e-05, %v2584_v36  ;;  %v2569_v47 = vmul.f32 0.00390625, %v2553_v37  ;;  %v5630_v20 = vmul.f32 0.00390625, %v2507_v39 }
 0x5bc   : > { %4751 = vrsqrt.f32 %v2608_v43  ;;  %v2585_v50 = vsub.f32 %v2569_v47, %v2577_v45  ;;  %v2578_v38 = vmul.f32 %v5630_v20, %v5630_v20 }
 0x5bd   : > { %v2510_v52 = vpop.xlane.xlu1 %2509  ;;  %v2556_v23 = vpop.xlane.xlu0 %2555 }
 0x5be   : > { %v2609_v55 = vadd.f32 1e-05, %v2585_v50  ;;  %v5632_v57 = vmul.f32 0.00390625, %v2510_v52  ;;  %v2570_v48 = vmul.f32 0.00390625, %v2556_v23 }
 0x5c0   : > { %4753 = vrsqrt.f32 %v2609_v55  ;;  %v2586_v58 = vsub.f32 %v2570_v48, %v2578_v38  ;;  %v2579_v13 = vmul.f32 %v5632_v57, %v5632_v57  ;;  %v2596_v48 = vsub.f32 %v5514_v7, %v5624_v8 }
 0x5c1   : > { %v4748_v60 = vpop.eup %4747  ;;  %v2559_v44 = vpop.xlane.xlu1 %2558  ;;  %v2598_v7 = vsub.f32 %v5530_v32, %v5630_v20 }
 0x5c2   : > { %v2513_v62 = vpop.xlane.xlu0 %2512  ;;  %v2610_v4 = vadd.f32 1e-05, %v2586_v58  ;;  %v2571_v3 = vmul.f32 0.00390625, %v2559_v44  ;;  %v2622_v10 = vmul.f32 %v4748_v60, %v2590_v46  ;;  %v2623_v14 = vmul.f32 %v4748_v60, %v2591_v56 }
 0x5c3   : > { %v5645_v5 = vmul.f32 0.00390625, %v2513_v62  ;;  %v2597_v58 = vsub.f32 %v5516_v19, %v5624_v8  ;;  %v2599_v19 = vsub.f32 %v5532_v21, %v5630_v20 }
 0x5c4   : > { %4755 = vrsqrt.f32 %v2610_v4  ;;  %v2587_v25 = vsub.f32 %v2571_v3, %v2579_v13  ;;  %v2650_v18 = vmul.f32 %v5656_v42, %v2623_v14  ;;  %v2649_v54 = vmul.f32 %v5653_v40, %v2622_v10 }
 0x5c5   : > { %v4750_v12 = vpop.eup %4749  ;;  %v2516_v22 = vpop.xlane.xlu1 %2515  ;;  %v2580_v26 = vmul.f32 %v5645_v5, %v5645_v5 }
 0x5c6   : > { %v2562_v27 = vpop.xlane.xlu0 %2561  ;;  %v2624_v29 = vmul.f32 %v4750_v12, %v2592_v1  ;;  %v2611_v31 = vadd.f32 1e-05, %v2587_v25  ;;  %v5667_v33 = vmul.f32 0.00390625, %v2516_v22  ;;  %v2625_v51 = vmul.f32 %v4750_v12, %v2593_v0 }
 0x5c7   : > { %v2572_v16 = vmul.f32 0.00390625, %v2562_v27  ;;  %v5683_v61 = vadd.f32 %v5671_v9, %v2650_v18  ;;  %v5689_v30 = vadd.f32 %v5665_v28, %v2649_v54  ;;  %v2600_v12 = vsub.f32 %v5541_v41, %v5632_v57 }
 0x5c8   : > { %4757 = vrsqrt.f32 %v2611_v31  ;;  %v2581_v39 = vmul.f32 %v5667_v33, %v5667_v33  ;;  %v2652_v45 = vmul.f32 %v5656_v42, %v2625_v51  ;;  %v2651_v47 = vmul.f32 %v5653_v40, %v2624_v29 }
 0x5c9   : > { %v2588_v36 = vsub.f32 %v2572_v16, %v2580_v26  ;;  %v4752_v37 = vpop.eup %4751  ;;  %v2565_v43 = vpop.xlane.xlu1 %2564  ;;  %v2601_v0 = vsub.f32 %v5544_v49, %v5632_v57  ;;  %v2602_v41 = vsub.f32 %v5558_v63, %v5645_v5  ;;  %v2603_v49 = vsub.f32 %v5560_v53, %v5645_v5 }
 0x5ca   : > { %v2573_v52 = vmul.f32 0.00390625, %v2565_v43  ;;  %v2627_v23 = vmul.f32 %v4752_v37, %v2595_v35  ;;  %v2626_v55 = vmul.f32 %v4752_v37, %v2594_v34  ;;  %v5686_v2 = vadd.f32 %v5671_v9, %v2652_v45 }
 0x5cb   : > { %v2612_v50 = vadd.f32 1e-05, %v2588_v36  ;;  %v5692_v38 = vadd.f32 %v5665_v28, %v2651_v47  ;;  %v2604_v5 = vsub.f32 %v5570_v11, %v5667_v33 }
 0x5cc   : > { %v2589_v59 = vsub.f32 %v2573_v52, %v2581_v39  ;;  %v2693_v46 = vpack.c.bf16 %v5686_v2, %v5683_v61  ;;  %v2654_v44 = vmul.f32 %v5656_v42, %v2627_v23  ;;  %v2653_v62 = vmul.f32 %v5653_v40, %v2626_v55 }
 0x5cd   : > { %4759 = vrsqrt.f32 %v2612_v50  ;;  %v4754_v60 = vpop.eup %4753  ;;  %v2692_v56 = vpack.c.bf16 %v5692_v38, %v5689_v30  ;;  %v2605_v39 = vsub.f32 %v5572_v24, %v5667_v33 }
 0x5ce   : > { %v2613_v4 = vadd.f32 1e-05, %v2589_v59  ;;  %v2629_v13 = vmul.f32 %v4754_v60, %v2597_v58  ;;  %v2628_v3 = vmul.f32 %v4754_v60, %v2596_v48  ;;  %2936 = vmatprep.mubr.bf16.mxu0 %v2693_v46  ;;  %v5711_v14 = vadd.f32 %v5671_v9, %v2654_v44  ;;  %v4674_v46 = vld [vmem:[%s5027_s18 + $0xa0] ss:$8 sps:$4 sm:$0xff]   ;;  %v4682_v44 = vld [vmem:[%s5027_s18 + $0x84] ss:$8 sps:$4 sm:$0xff]  }
 0x5cf   : > { %2937 = vmatmul.mubr.bf16.vlgmr.msra.gmra.mxu0 %v2692_v56  ;;  %v5714_v1 = vadd.f32 %v5665_v28, %v2653_v62  ;;  %v4677_v56 = vld [vmem:[%s5027_s18 + $0x90] ss:$8 sps:$4 sm:$0xff]   ;;  %v2732_v62 = vld [vmem:[%s746_s5] sm:$0x3] }
 0x5d0   : > { %4761 = vrsqrt.f32 %v2613_v4  ;;  %v2656_v8 = vmul.f32 %v5656_v42, %v2629_v13  ;;  %v2655_v6 = vmul.f32 %v5653_v40, %v2628_v3  ;;  %v2741_v13 = vrot.slane %v2732_v62, %v5208_v17 }
 0x5d1   : > { %v4756_v10 = vpop.eup %4755  ;;  %v2737_v3 = vrot.slane %v2732_v62, %v5205_v15 }
 0x5d2   : > { %v5717_v25 = vadd.f32 %v5671_v9, %v2656_v8  ;;  %v5720_v32 = vadd.f32 %v5665_v28, %v2655_v6  ;;  %v2631_v21 = vmul.f32 %v4756_v10, %v2599_v19  ;;  %v2630_v20 = vmul.f32 %v4756_v10, %v2598_v7 }
 0x5d4   : > { %v2695_v22 = vpack.c.bf16 %v5717_v25, %v5711_v14  ;;  %v2694_v26 = vpack.c.bf16 %v5720_v32, %v5714_v1  ;;  %v2658_v29 = vmul.f32 %v5656_v42, %v2631_v21  ;;  %v2657_v31 = vmul.f32 %v5653_v40, %v2630_v20 }
 0x5d5   : > { %v4758_v27 = vpop.eup %4757 }
 0x5d6   : > { %2946 = vmatprep.mubr.bf16.mxu0 %v2695_v22  ;;  %v2633_v16 = vmul.f32 %v4758_v27, %v2601_v0  ;;  %v2632_v51 = vmul.f32 %v4758_v27, %v2600_v12  ;;  %v5739_v34 = vadd.f32 %v5671_v9, %v2658_v29  ;;  %v5742_v35 = vadd.f32 %v5665_v28, %v2657_v31 }
 0x5d7   : > { %2947 = vmatmul.mubr.bf16.gmra.mxu0 %v2694_v26 }
 0x5d8   : > { %v2660_v57 = vmul.f32 %v5656_v42, %v2633_v16  ;;  %v2659_v18 = vmul.f32 %v5653_v40, %v2632_v51 }
 0x5da   : > { %v4760_v54 = vpop.eup %4759  ;;  %v5745_v36 = vadd.f32 %v5671_v9, %v2660_v57  ;;  %v5748_v63 = vadd.f32 %v5665_v28, %v2659_v18 }
 0x5db   : > { %v2635_v37 = vmul.f32 %v4760_v54, %v2603_v49  ;;  %v2634_v53 = vmul.f32 %v4760_v54, %v2602_v41 }
 0x5dc   : > { %v2697_v43 = vpack.c.bf16 %v5745_v36, %v5739_v34  ;;  %v2696_v45 = vpack.c.bf16 %v5748_v63, %v5742_v35 }
 0x5dd   : > { %v4762_v47 = vpop.eup %4761  ;;  %v2662_v52 = vmul.f32 %v5656_v42, %v2635_v37  ;;  %v2661_v55 = vmul.f32 %v5653_v40, %v2634_v53 }
 0x5de   : > { %2956 = vmatprep.mubr.bf16.mxu0 %v2697_v43  ;;  %v2637_v50 = vmul.f32 %v4762_v47, %v2605_v39  ;;  %v2636_v23 = vmul.f32 %v4762_v47, %v2604_v5 }
 0x5df   : > { %2957 = vmatmul.mubr.bf16.gmra.mxu0 %v2696_v45  ;;  %v5763_v33 = vadd.f32 %v5671_v9, %v2662_v52  ;;  %v5769_v58 = vadd.f32 %v5665_v28, %v2661_v55 }
 0x5e0   : > { %v2664_v11 = vmul.f32 %v5656_v42, %v2637_v50  ;;  %v2663_v24 = vmul.f32 %v5653_v40, %v2636_v23  ;;  %v4676_v42 = vld [vmem:[%s5027_s18 + $0xa4] ss:$8 sps:$4 sm:$0xff]  }
 0x5e1   : > { %3231 = vmatprep.subr.bf16.mxu1 %v4676_v42 }
 0x5e2   : > { %v5766_v48 = vadd.f32 %v5671_v9, %v2664_v11  ;;  %v5772_v59 = vadd.f32 %v5665_v28, %v2663_v24  ;;  %3232 = vmatpush2.bf16.msra.mxu1 %v4674_v46  ;;  %v4679_v9 = vld [vmem:[%s5027_s18 + $0x94] ss:$8 sps:$4 sm:$0xff]   ;;  %v4680_v28 = vld [vmem:[%s5027_s18 + $0x80] ss:$8 sps:$4 sm:$0xff]  }
 0x5e3   : > { %3233 = vmatprep.subr.bf16.mxu1 %v4679_v9 }
 0x5e4   : > { %v2699_v60 = vpack.c.bf16 %v5766_v48, %v5763_v33  ;;  %v2698_v40 = vpack.c.bf16 %v5772_v59, %v5769_v58 }
 0x5e6   : > { %2966 = vmatprep.mubr.bf16.mxu0 %v2699_v60  ;;  %3234 = vmatpush2.bf16.msra.mxu1 %v4677_v56 }
 0x5e7   : > { %2967 = vmatmul.mubr.bf16.gmra.mxu0 %v2698_v40  ;;  %3235 = vmatprep.subr.bf16.mxu1 %v4682_v44 }
 0x5ea   : > { %3236 = vmatpush2.bf16.msra.mxu1 %v4680_v28 }
 0x68f   : > { %v2938_v4 = vpop.f32.mrf.mxu0 }
 0x690   : > { %v2939_v10 = vadd.f32 %v2938_v4, %v2737_v3 }
 0x691   : > { %v2940_v7 = vpop.f32.mrf.mxu0 }
 0x692   : > { %v2941_v8 = vadd.f32 %v2940_v7, %v2741_v13  ;;  %v2977_v27 = vmax.f32 %v2939_v10, 0.0 }
 0x693   : > { %v2942_v19 = vpop.f32.mrf.mxu0 }
 0x694   : > { %v2943_v6 = vadd.f32 %v2942_v19, %v2737_v3  ;;  %v2978_v22 = vmax.f32 %v2941_v8, 0.0 }
 0x695   : > { %v2944_v21 = vpop.f32.mrf.mxu0 }
 0x696   : > { %v2945_v20 = vadd.f32 %v2944_v21, %v2741_v13  ;;  %v2979_v12 = vmax.f32 %v2943_v6, 0.0 }
 0x697   : > { %v2948_v0 = vpop.f32.mrf.mxu0 }
 0x698   : > { %v2980_v26 = vmax.f32 %v2945_v20, 0.0  ;;  %v2993_v16 = vpack.c.bf16 %v2979_v12, %v2977_v27  ;;  %v2949_v57 = vadd.f32 %v2948_v0, %v2737_v3  ;;  %v3033_v27 = vld [vmem:[%s755_s25] sm:$0x3] }
 0x699   : > { %v2950_v29 = vpop.f32.mrf.mxu0 }
 0x69a   : > { %v2994_v31 = vpack.c.bf16 %v2980_v26, %v2978_v22  ;;  %v2951_v41 = vadd.f32 %v2950_v29, %v2741_v13  ;;  %v2981_v43 = vmax.f32 %v2949_v57, 0.0  ;;  %v5797_v29 = vrot.slane %v3033_v27, %v5205_v15 }
 0x69b   : > { %v2952_v51 = vpop.f32.mrf.mxu0 }
 0x69c   : > { %v2953_v49 = vadd.f32 %v2952_v51, %v2737_v3  ;;  %3237 = vmatprep.mubr.bf16.mxu1 %v2994_v31  ;;  %v2982_v5 = vmax.f32 %v2951_v41, 0.0 }
 0x69d   : > { %v2954_v18 = vpop.f32.mrf.mxu0  ;;  %3238 = vmatmul.mubr.bf16.vlgmr.msra.gmra.mxu1 %v2993_v16 }
 0x69e   : > { %v2955_v54 = vadd.f32 %v2954_v18, %v2741_v13  ;;  %v2983_v37 = vmax.f32 %v2953_v49, 0.0 }
 0x69f   : > { %v2958_v53 = vpop.f32.mrf.mxu0 }
 0x6a0   : > { %v2984_v39 = vmax.f32 %v2955_v54, 0.0  ;;  %v2995_v50 = vpack.c.bf16 %v2983_v37, %v2981_v43  ;;  %v2959_v11 = vadd.f32 %v2958_v53, %v2737_v3 }
 0x6a1   : > { %v2960_v45 = vpop.f32.mrf.mxu0 }
 0x6a2   : > { %v2996_v47 = vpack.c.bf16 %v2984_v39, %v2982_v5  ;;  %v2961_v23 = vadd.f32 %v2960_v45, %v2741_v13  ;;  %v2985_v56 = vmax.f32 %v2959_v11, 0.0 }
 0x6a3   : > { %v2962_v52 = vpop.f32.mrf.mxu0 }
 0x6a4   : > { %v2963_v55 = vadd.f32 %v2962_v52, %v2737_v3  ;;  %3247 = vmatprep.mubr.bf16.mxu1 %v2996_v47  ;;  %v2986_v46 = vmax.f32 %v2961_v23, 0.0 }
 0x6a5   : > { %v2964_v24 = vpop.f32.mrf.mxu0  ;;  %3248 = vmatmul.mubr.bf16.gmra.mxu1 %v2995_v50 }
 0x6a6   : > { %v2965_v60 = vadd.f32 %v2964_v24, %v2741_v13  ;;  %v2987_v40 = vmax.f32 %v2963_v55, 0.0 }
 0x6a7   : > { %v2968_v42 = vpop.f32.mrf.mxu0 }
 0x6a8   : > { %v2988_v9 = vmax.f32 %v2965_v60, 0.0  ;;  %v2997_v62 = vpack.c.bf16 %v2987_v40, %v2985_v56  ;;  %v2969_v8 = vadd.f32 %v2968_v42, %v2737_v3 }
 0x6a9   : > { %v2970_v44 = vpop.f32.mrf.mxu0 }
 0x6aa   : > { %v2998_v28 = vpack.c.bf16 %v2988_v9, %v2986_v46  ;;  %v2971_v7 = vadd.f32 %v2970_v44, %v2741_v13  ;;  %v2989_v0 = vmax.f32 %v2969_v8, 0.0 }
 0x6ab   : > { %v2972_v4 = vpop.f32.mrf.mxu0 }
 0x6ac   : > { %v2973_v19 = vadd.f32 %v2972_v4, %v2737_v3  ;;  %3257 = vmatprep.mubr.bf16.mxu1 %v2998_v28  ;;  %v2990_v20 = vmax.f32 %v2971_v7, 0.0  ;;  %v5800_v3 = vrot.slane %v3033_v27, %v5208_v17 }
 0x6ad   : > { %v2974_v6 = vpop.f32.mrf.mxu0  ;;  %3258 = vmatmul.mubr.bf16.gmra.mxu1 %v2997_v62 }
 0x6ae   : > { %v2975_v10 = vadd.f32 %v2974_v6, %v2741_v13  ;;  %v2991_v21 = vmax.f32 %v2973_v19, 0.0 }
 0x6b0   : > { %v2992_v12 = vmax.f32 %v2975_v10, 0.0  ;;  %v2999_v26 = vpack.c.bf16 %v2991_v21, %v2989_v0 }
 0x6b2   : > { %v3000_v22 = vpack.c.bf16 %v2992_v12, %v2990_v20 }
 0x6b4   : > { %3267 = vmatprep.mubr.bf16.mxu1 %v3000_v22 }
 0x6b5   : > { %3268 = vmatmul.mubr.bf16.gmra.mxu1 %v2999_v26 }
 0x75d   : > { %v3239_v13 = vpop.f32.mrf.mxu1 }
 0x75e   : > { %v3240_v31 = vadd.f32 %v3239_v13, %v5797_v29 }
 0x75f   : > { %v3241_v16 = vpop.f32.mrf.mxu1 }
 0x760   : > { %v3242_v51 = vadd.f32 %v3241_v16, %v5800_v3  ;;  %v5805_v49 = vadd.f32 %v3240_v31, %v5689_v30 }
 0x761   : > { %v3243_v41 = vpop.f32.mrf.mxu1 }
 0x762   : > { %v5808_v57 = vadd.f32 %v3242_v51, %v5683_v61  ;;  %v3244_v18 = vadd.f32 %v3243_v41, %v5797_v29  ;;  %v3328_v45 = vmul.f32 %v5805_v49, %v5805_v49 }
 0x763   : > { %v3245_v54 = vpop.f32.mrf.mxu1 }
 0x764   : > { %v3246_v37 = vadd.f32 %v3245_v54, %v5800_v3  ;;  %v3296_v53 = vadd.f32 %v5808_v57, %v5805_v49  ;;  %v3329_v5 = vmul.f32 %v5808_v57, %v5808_v57  ;;  %v5817_v39 = vadd.f32 %v3244_v18, %v5692_v38 }
 0x765   : > { %v3249_v43 = vpop.f32.mrf.mxu1 }
 0x766   : > { %v5820_v30 = vadd.f32 %v3246_v37, %v5686_v2  ;;  %v3250_v61 = vadd.f32 %v3249_v43, %v5797_v29  ;;  %3297 = vadd.xlane.f32.xlu0 %v3296_v53  ;;  %v3344_v23 = vadd.f32 %v3329_v5, %v3328_v45  ;;  %v3330_v2 = vmul.f32 %v5817_v39, %v5817_v39 }
 0x767   : > { %v3251_v47 = vpop.f32.mrf.mxu1 }
 0x768   : > { %v3252_v50 = vadd.f32 %v3251_v47, %v5800_v3  ;;  %v3299_v52 = vadd.f32 %v5820_v30, %v5817_v39  ;;  %v3331_v38 = vmul.f32 %v5820_v30, %v5820_v30  ;;  %v5833_v11 = vadd.f32 %v3250_v61, %v5714_v1 }
 0x769   : > { %v3253_v55 = vpop.f32.mrf.mxu1 }
 0x76a   : > { %v5836_v24 = vadd.f32 %v3252_v50, %v5711_v14  ;;  %v3254_v60 = vadd.f32 %v3253_v55, %v5797_v29  ;;  %3300 = vadd.xlane.f32.xlu1 %v3299_v52  ;;  %3345 = vadd.xlane.f32.xlu0 %v3344_v23  ;;  %v3347_v46 = vadd.f32 %v3331_v38, %v3330_v2 }
 0x76b   : > { %v3255_v40 = vpop.f32.mrf.mxu1  ;;  %v3332_v62 = vmul.f32 %v5833_v11, %v5833_v11 }
 0x76c   : > { %v3256_v42 = vadd.f32 %v3255_v40, %v5800_v3  ;;  %v3302_v9 = vadd.f32 %v5836_v24, %v5833_v11  ;;  %v3333_v56 = vmul.f32 %v5836_v24, %v5836_v24  ;;  %v5845_v1 = vadd.f32 %v3254_v60, %v5720_v32 }
 0x76d   : > { %v3259_v44 = vpop.f32.mrf.mxu1 }
 0x76e   : > { %v5848_v14 = vadd.f32 %v3256_v42, %v5717_v25  ;;  %v3260_v28 = vadd.f32 %v3259_v44, %v5797_v29  ;;  %3348 = vadd.xlane.f32.xlu1 %v3347_v46  ;;  %3303 = vadd.xlane.f32.xlu0 %v3302_v9  ;;  %v3350_v8 = vadd.f32 %v3333_v56, %v3332_v62 }
 0x76f   : > { %v3261_v4 = vpop.f32.mrf.mxu1  ;;  %v3334_v25 = vmul.f32 %v5845_v1, %v5845_v1 }
 0x770   : > { %v3262_v7 = vadd.f32 %v3261_v4, %v5800_v3  ;;  %v3305_v19 = vadd.f32 %v5848_v14, %v5845_v1  ;;  %v3335_v32 = vmul.f32 %v5848_v14, %v5848_v14  ;;  %v5861_v10 = vadd.f32 %v3260_v28, %v5742_v35 }
 0x771   : > { %v3263_v6 = vpop.f32.mrf.mxu1 }
 0x772   : > { %v5864_v21 = vadd.f32 %v3262_v7, %v5739_v34  ;;  %v3264_v20 = vadd.f32 %v3263_v6, %v5797_v29  ;;  %3306 = vadd.xlane.f32.xlu1 %v3305_v19  ;;  %3351 = vadd.xlane.f32.xlu0 %v3350_v8  ;;  %v3353_v22 = vadd.f32 %v3335_v32, %v3334_v25 }
 0x773   : > { %v3265_v12 = vpop.f32.mrf.mxu1  ;;  %v3336_v16 = vmul.f32 %v5861_v10, %v5861_v10 }
 0x774   : > { %v3266_v0 = vadd.f32 %v3265_v12, %v5800_v3  ;;  %v3308_v26 = vadd.f32 %v5864_v21, %v5861_v10  ;;  %v3337_v27 = vmul.f32 %v5864_v21, %v5864_v21  ;;  %v5873_v35 = vadd.f32 %v3264_v20, %v5748_v63 }
 0x775   : > { %v3269_v13 = vpop.f32.mrf.mxu1 }
 0x776   : > { %v5876_v34 = vadd.f32 %v3266_v0, %v5745_v36  ;;  %v3270_v31 = vadd.f32 %v3269_v13, %v5797_v29  ;;  %3354 = vadd.xlane.f32.xlu1 %v3353_v22  ;;  %3309 = vadd.xlane.f32.xlu0 %v3308_v26  ;;  %v3356_v54 = vadd.f32 %v3337_v27, %v3336_v16 }
 0x777   : > { %v3271_v51 = vpop.f32.mrf.mxu1  ;;  %v3338_v36 = vmul.f32 %v5873_v35, %v5873_v35 }
 0x778   : > { %v3272_v41 = vadd.f32 %v3271_v51, %v5800_v3  ;;  %v3311_v18 = vadd.f32 %v5876_v34, %v5873_v35  ;;  %v3339_v63 = vmul.f32 %v5876_v34, %v5876_v34  ;;  %v5889_v53 = vadd.f32 %v3270_v31, %v5769_v58 }
 0x779   : > { %v3273_v37 = vpop.f32.mrf.mxu1 }
 0x77a   : > { %v5892_v5 = vadd.f32 %v3272_v41, %v5763_v33  ;;  %v3274_v43 = vadd.f32 %v3273_v37, %v5797_v29  ;;  %3312 = vadd.xlane.f32.xlu1 %v3311_v18  ;;  %3357 = vadd.xlane.f32.xlu0 %v3356_v54  ;;  %v3359_v47 = vadd.f32 %v3339_v63, %v3338_v36  ;;  %v3294_v41 = vld [vmem:[%s759_s9] sm:$0x3] }
 0x77b   : > { %v3275_v61 = vpop.f32.mrf.mxu1  ;;  %v3340_v29 = vmul.f32 %v5889_v53, %v5889_v53  ;;  %v3295_v37 = vld [vmem:[%s763_s8] sm:$0x3] }
 0x77c   : > { %v3276_v45 = vadd.f32 %v3275_v61, %v5800_v3  ;;  %v3314_v50 = vadd.f32 %v5892_v5, %v5889_v53  ;;  %v3341_v52 = vmul.f32 %v5892_v5, %v5892_v5  ;;  %v5901_v58 = vadd.f32 %v3274_v43, %v5772_v59 }
 0x77e   : > { %v5904_v33 = vadd.f32 %v3276_v45, %v5766_v48  ;;  %3360 = vadd.xlane.f32.xlu1 %v3359_v47  ;;  %3315 = vadd.xlane.f32.xlu0 %v3314_v50  ;;  %v3362_v23 = vadd.f32 %v3341_v52, %v3340_v29  ;;  %v3342_v59 = vmul.f32 %v5901_v58, %v5901_v58 }
 0x77f   : > { %v5943_v47 = vrot.slane %v3294_v41, %v5205_v15  ;;  %v5946_v50 = vrot.slane %v3294_v41, %v5208_v17 }
 0x780   : > { %v3317_v3 = vadd.f32 %v5904_v33, %v5901_v58  ;;  %v3343_v38 = vmul.f32 %v5904_v33, %v5904_v33 }
 0x782   : > { %3318 = vadd.xlane.f32.xlu1 %v3317_v3  ;;  %3363 = vadd.xlane.f32.xlu0 %v3362_v23  ;;  %v3365_v55 = vadd.f32 %v3343_v38, %v3342_v59  ;;  %v5951_v38 = vrot.slane %v3295_v37, %v5205_v15  ;;  %v5954_v59 = vrot.slane %v3295_v37, %v5208_v17 }
 0x786   : > { %3366 = vadd.xlane.f32.xlu1 %v3365_v55 }
 0x7ef   : > { %v3298_v48 = vpop.xlane.xlu0 %3297 }
 0x7f0   : > { %v3320_v2 = vmul.f32 0.00390625, %v3298_v48 }
 0x7f2   : > { %v3376_v46 = vmul.f32 %v3320_v2, %v3320_v2  ;;  %v3392_v52 = vsub.f32 %v5805_v49, %v3320_v2  ;;  %v3393_v29 = vsub.f32 %v5808_v57, %v3320_v2 }
 0x7f3   : > { %v3301_v60 = vpop.xlane.xlu1 %3300  ;;  %v3346_v40 = vpop.xlane.xlu0 %3345 }
 0x7f4   : > { %v5914_v42 = vmul.f32 0.00390625, %v3301_v60  ;;  %v3368_v9 = vmul.f32 0.00390625, %v3346_v40 }
 0x7f6   : > { %v3384_v56 = vsub.f32 %v3368_v9, %v3376_v46  ;;  %v3377_v4 = vmul.f32 %v5914_v42, %v5914_v42  ;;  %v3394_v57 = vsub.f32 %v5817_v39, %v5914_v42  ;;  %v3395_v2 = vsub.f32 %v5820_v30, %v5914_v42 }
 0x7f7   : > { %v3349_v44 = vpop.xlane.xlu1 %3348  ;;  %v3304_v28 = vpop.xlane.xlu0 %3303 }
 0x7f8   : > { %v3408_v62 = vadd.f32 1e-05, %v3384_v56  ;;  %v3369_v7 = vmul.f32 0.00390625, %v3349_v44  ;;  %v5918_v19 = vmul.f32 0.00390625, %v3304_v28 }
 0x7fa   : > { %4763 = vrsqrt.f32 %v3408_v62  ;;  %v3385_v8 = vsub.f32 %v3369_v7, %v3377_v4  ;;  %v3378_v12 = vmul.f32 %v5918_v19, %v5918_v19 }
 0x7fb   : > { %v3307_v32 = vpop.xlane.xlu1 %3306  ;;  %v3352_v6 = vpop.xlane.xlu0 %3351 }
 0x7fc   : > { %v3409_v25 = vadd.f32 1e-05, %v3385_v8  ;;  %v5920_v20 = vmul.f32 0.00390625, %v3307_v32  ;;  %v3370_v0 = vmul.f32 0.00390625, %v3352_v6 }
 0x7fe   : > { %4765 = vrsqrt.f32 %v3409_v25  ;;  %v3386_v22 = vsub.f32 %v3370_v0, %v3378_v12  ;;  %v3379_v31 = vmul.f32 %v5920_v20, %v5920_v20 }
 0x7ff   : > { %v3355_v26 = vpop.xlane.xlu1 %3354  ;;  %v3310_v27 = vpop.xlane.xlu0 %3309 }
 0x800   : > { %v3410_v13 = vadd.f32 1e-05, %v3386_v22  ;;  %v3371_v16 = vmul.f32 0.00390625, %v3355_v26  ;;  %v5926_v51 = vmul.f32 0.00390625, %v3310_v27  ;;  %v3396_v22 = vsub.f32 %v5833_v11, %v5918_v19 }
 0x801   : > { %v3397_v26 = vsub.f32 %v5836_v24, %v5918_v19  ;;  %v3398_v24 = vsub.f32 %v5845_v1, %v5920_v20  ;;  %v3399_v19 = vsub.f32 %v5848_v14, %v5920_v20 }
 0x802   : > { %4767 = vrsqrt.f32 %v3410_v13  ;;  %v3387_v18 = vsub.f32 %v3371_v16, %v3379_v31  ;;  %v3380_v61 = vmul.f32 %v5926_v51, %v5926_v51  ;;  %v3400_v20 = vsub.f32 %v5861_v10, %v5926_v51 }
 0x803   : > { %v3313_v54 = vpop.xlane.xlu1 %3312  ;;  %v3358_v63 = vpop.xlane.xlu0 %3357 }
 0x804   : > { %v3411_v36 = vadd.f32 1e-05, %v3387_v18  ;;  %v5938_v43 = vmul.f32 0.00390625, %v3313_v54  ;;  %v3372_v45 = vmul.f32 0.00390625, %v3358_v63 }
 0x806   : > { %4769 = vrsqrt.f32 %v3411_v36  ;;  %v3388_v3 = vsub.f32 %v3372_v45, %v3380_v61  ;;  %v3381_v55 = vmul.f32 %v5938_v43, %v5938_v43 }
 0x807   : > { %v4764_v23 = vpop.eup %4763  ;;  %v3361_v48 = vpop.xlane.xlu1 %3360 }
 0x808   : > { %v3316_v60 = vpop.xlane.xlu0 %3315  ;;  %v3424_v40 = vmul.f32 %v4764_v23, %v3392_v52  ;;  %v3425_v46 = vmul.f32 %v4764_v23, %v3393_v29  ;;  %v3412_v9 = vadd.f32 1e-05, %v3388_v3  ;;  %v3373_v49 = vmul.f32 0.00390625, %v3361_v48 }
 0x809   : > { %v5962_v15 = vmul.f32 0.00390625, %v3316_v60  ;;  %v3401_v60 = vsub.f32 %v5864_v21, %v5926_v51  ;;  %v3402_v21 = vsub.f32 %v5873_v35, %v5938_v43  ;;  %v3403_v51 = vsub.f32 %v5876_v34, %v5938_v43 }
 0x80a   : > { %v3451_v17 = vmul.f32 %v5943_v47, %v3424_v40  ;;  %v3452_v56 = vmul.f32 %v5946_v50, %v3425_v46  ;;  %4771 = vrsqrt.f32 %v3412_v9  ;;  %v3389_v44 = vsub.f32 %v3373_v49, %v3381_v55 }
 0x80b   : > { %v4766_v28 = vpop.eup %4765  ;;  %v3319_v62 = vpop.xlane.xlu1 %3318  ;;  %v3382_v6 = vmul.f32 %v5962_v15, %v5962_v15  ;;  %v3404_v35 = vsub.f32 %v5889_v53, %v5962_v15  ;;  %v3405_v34 = vsub.f32 %v5892_v5, %v5962_v15 }
 0x80c   : > { %v3364_v4 = vpop.xlane.xlu0 %3363  ;;  %v5967_v7 = vadd.f32 %v5951_v38, %v3451_v17  ;;  %v5970_v8 = vadd.f32 %v5954_v59, %v3452_v56  ;;  %v3426_v39 = vmul.f32 %v4766_v28, %v3394_v57  ;;  %v3427_v32 = vmul.f32 %v4766_v28, %v3395_v2 }
 0x80d   : > { %v3413_v30 = vadd.f32 1e-05, %v3389_v44  ;;  %v5972_v42 = vmul.f32 0.00390625, %v3319_v62  ;;  %v3374_v25 = vmul.f32 0.00390625, %v3364_v4 }
 0x80e   : > { %3494 = vst [vmem:[#allocation2 + $0x30] sm:$0xff] %v5967_v7  ;;  %3495 = vst [vmem:[#allocation2] sm:$0xff] %v5970_v8  ;;  %v3453_v12 = vmul.f32 %v5943_v47, %v3426_v39  ;;  %v3454_v0 = vmul.f32 %v5946_v50, %v3427_v32 }
 0x80f   : > { %v4768_v27 = vpop.eup %4767  ;;  %4773 = vrsqrt.f32 %v3413_v30  ;;  %v3390_v13 = vsub.f32 %v3374_v25, %v3382_v6  ;;  %v3367_v31 = vpop.xlane.xlu1 %3366  ;;  %v3383_v37 = vmul.f32 %v5972_v42, %v5972_v42  ;;  %v3407_v53 = vsub.f32 %v5904_v33, %v5972_v42 }
 0x810   : > { %v5985_v16 = vadd.f32 %v5951_v38, %v3453_v12  ;;  %v5988_v41 = vadd.f32 %v5954_v59, %v3454_v0  ;;  %v3428_v18 = vmul.f32 %v4768_v27, %v3396_v22  ;;  %v3429_v54 = vmul.f32 %v4768_v27, %v3397_v26 }
 0x811   : > { %v3414_v63 = vadd.f32 1e-05, %v3390_v13  ;;  %v3375_v11 = vmul.f32 0.00390625, %v3367_v31  ;;  %v3406_v12 = vsub.f32 %v5901_v58, %v5972_v42 }
 0x812   : > { %3496 = vst [vmem:[#allocation2 + $0x58] sm:$0xff] %v5985_v16  ;;  %3497 = vst [vmem:[#allocation2 + $0x18] sm:$0xff] %v5988_v41  ;;  %v3455_v36 = vmul.f32 %v5943_v47, %v3428_v18  ;;  %v3456_v61 = vmul.f32 %v5946_v50, %v3429_v54 }
 0x813   : > { %v4770_v45 = vpop.eup %4769  ;;  %4775 = vrsqrt.f32 %v3414_v63  ;;  %v3391_v52 = vsub.f32 %v3375_v11, %v3383_v37 }
 0x814   : > { %v6001_v29 = vadd.f32 %v5951_v38, %v3455_v36  ;;  %v6004_v3 = vadd.f32 %v5954_v59, %v3456_v61  ;;  %v3430_v23 = vmul.f32 %v4770_v45, %v3398_v24  ;;  %v3431_v55 = vmul.f32 %v4770_v45, %v3399_v19 }
 0x815   : > { %v3415_v48 = vadd.f32 1e-05, %v3391_v52 }
 0x816   : > { %3498 = vst [vmem:[#allocation2 + $0x50] sm:$0xff] %v6001_v29  ;;  %3499 = vst [vmem:[#allocation2 + $0x68] sm:$0xff] %v6004_v3  ;;  %v3457_v1 = vmul.f32 %v5943_v47, %v3430_v23  ;;  %v3458_v14 = vmul.f32 %v5946_v50, %v3431_v55 }
 0x817   : > { %v4772_v40 = vpop.eup %4771  ;;  %4777 = vrsqrt.f32 %v3415_v48 }
 0x818   : > { %v6015_v46 = vadd.f32 %v5951_v38, %v3457_v1  ;;  %v6018_v9 = vadd.f32 %v5954_v59, %v3458_v14  ;;  %v3432_v49 = vmul.f32 %v4772_v40, %v3400_v20  ;;  %v3433_v57 = vmul.f32 %v4772_v40, %v3401_v60 }
 0x81a   : > { %3500 = vst [vmem:[#allocation2 + $0x8] sm:$0xff] %v6015_v46  ;;  %3501 = vst [vmem:[#allocation2 + $0x48] sm:$0xff] %v6018_v9  ;;  %v3459_v2 = vmul.f32 %v5943_v47, %v3432_v49  ;;  %v3460_v10 = vmul.f32 %v5946_v50, %v3433_v57 }
 0x81c   : > { %v4774_v17 = vpop.eup %4773  ;;  %v6029_v56 = vadd.f32 %v5951_v38, %v3459_v2  ;;  %v3487_v44 = vadd.f32 %v5954_v59, %v3460_v10 }
 0x81d   : > { %v3434_v28 = vmul.f32 %v4774_v17, %v3402_v21  ;;  %v3435_v62 = vmul.f32 %v4774_v17, %v3403_v51 }
 0x81e   : > { %3502 = vst [vmem:[#allocation2 + $0x40] sm:$0xff] %v6029_v56  ;;  %3503 = vst [vmem:[#allocation2 + $0x20] sm:$0xff] %v3487_v44 }
 0x81f   : > { %v3461_v4 = vmul.f32 %v5943_v47, %v3434_v28  ;;  %v3462_v39 = vmul.f32 %v5946_v50, %v3435_v62 }
 0x820   : > { %v4776_v43 = vpop.eup %4775 }
 0x821   : > { %v6040_v32 = vadd.f32 %v5951_v38, %v3461_v4  ;;  %v3489_v30 = vadd.f32 %v5954_v59, %v3462_v39  ;;  %v3436_v6 = vmul.f32 %v4776_v43, %v3404_v35  ;;  %v3437_v25 = vmul.f32 %v4776_v43, %v3405_v34 }
 0x823   : > { %3504 = vst [vmem:[#allocation2 + $0x10] sm:$0xff] %v6040_v32  ;;  %3505 = vst [vmem:[#allocation2 + $0x38] sm:$0xff] %v3489_v30  ;;  %v3463_v0 = vmul.f32 %v5943_v47, %v3436_v6  ;;  %v3464_v5 = vmul.f32 %v5946_v50, %v3437_v25 }
 0x824   : > { %v4778_v15 = vpop.eup %4777 }
 0x825   : > { %v6051_v22 = vadd.f32 %v5951_v38, %v3463_v0  ;;  %v6054_v26 = vadd.f32 %v5954_v59, %v3464_v5  ;;  %v3438_v27 = vmul.f32 %v4778_v15, %v3406_v12  ;;  %v3439_v13 = vmul.f32 %v4778_v15, %v3407_v53 }
 0x827   : > { %3506 = vst [vmem:[#allocation2 + $0x60] sm:$0xff] %v6051_v22  ;;  %3507 = vst [vmem:[#allocation2 + $0x70] sm:$0xff] %v6054_v26  ;;  %v3465_v58 = vmul.f32 %v5943_v47, %v3438_v27  ;;  %v3466_v33 = vmul.f32 %v5946_v50, %v3439_v13  ;;  %3513 = sbr.rel (%p4177_p9) target bundleno = 2337 (0x921), region = 92 }
 0x829   : > { %v6061_v42 = vadd.f32 %v5951_v38, %v3465_v58  ;;  %v6064_v31 = vadd.f32 %v5954_v59, %v3466_v33 }
 0x82b   : > { %3508 = vst [vmem:[#allocation2 + $0x78] sm:$0xff] %v6061_v42  ;;  %3509 = vst [vmem:[#allocation2 + $0x28] sm:$0xff] %v6064_v31 }
 0x82c   : > { %v4795_v18 = vld [vmem:[%s6220_s27 + $0x78] sm:$0xff]   ;;  %v3515_v50 = vpack.c.bf16 %v5988_v41, %v5970_v8  ;;  %v3519_v38 = vpack.c.bf16 %v3489_v30, %v3487_v44  ;;  %v4797_v59 = vld [vmem:[%s6220_s27 + $0x70] sm:$0xff]   ;;  %v4799_v63 = vld [vmem:[%s6220_s27 + $0x68] sm:$0xff]   ;;  %v3514_v55 = vpack.c.bf16 %v5985_v16, %v5967_v7  ;;  %v3518_v48 = vpack.c.bf16 %v6040_v32, %v6029_v56 }
 0x82d   : > { %v4796_v47 = vld [vmem:[%s6220_s27 + $0x38] sm:$0xff]   ;;  %4233 = vmatprep.subr.bf16.mxu0 %v4795_v18  ;;  %4337 = vmatprep.subr.bf16.mxu1 %v4795_v18  ;;  %v4798_v54 = vld [vmem:[%s6220_s27 + $0x30] sm:$0xff]   ;;  %v4800_v8 = vld [vmem:[%s6220_s27 + $0x28] sm:$0xff]   ;;  %v3517_v1 = vpack.c.bf16 %v6018_v9, %v6004_v3  ;;  %v3521_v14 = vpack.c.bf16 %v6064_v31, %v6054_v26  ;;  %v3516_v20 = vpack.c.bf16 %v6015_v46, %v6001_v29 }
 0x82e   : > { %4234 = vmatpush3.bf16.msra.mxu0 %v4796_v47  ;;  %4345 = vmatpush3.bf16.msra.mxu1 %v4796_v47  ;;  %v4801_v41 = vld [vmem:[%s6220_s27 + $0x60] sm:$0xff]   ;;  %v4803_v11 = vld [vmem:[%s6220_s27 + $0x58] sm:$0xff]   ;;  %v4805_v19 = vld [vmem:[%s6220_s27 + $0x50] sm:$0xff]   ;;  %v3520_v7 = vpack.c.bf16 %v6061_v42, %v6051_v22 }
 0x82f   : > { %4235 = vmatprep.subr.bf16.mxu0 %v4797_v59  ;;  %4338 = vmatprep.subr.bf16.mxu1 %v4797_v59  ;;  %v4802_v37 = vld [vmem:[%s6220_s27 + $0x20] sm:$0xff]   ;;  %v4804_v24 = vld [vmem:[%s6220_s27 + $0x18] sm:$0xff]   ;;  %v4806_v36 = vld [vmem:[%s6220_s27 + $0x10] sm:$0xff]  }
 0x830   : > { %3689 = vmatprep.mubr.bf16.mxu0 %v3515_v50  ;;  %3705 = vmatprep.mubr.bf16.mxu1 %v3519_v38  ;;  %v4807_v61 = vld [vmem:[%s6220_s27 + $0x48] sm:$0xff]   ;;  %v4809_v52 = vld [vmem:[%s6220_s27 + $0x40] sm:$0xff]  }
 0x831   : > { %v4808_v45 = vld [vmem:[%s6220_s27 + $0x8] sm:$0xff]   ;;  %v4810_v23 = vld [vmem:[%s6220_s27] sm:$0xff]  }
 0x832   : > { %4236 = vmatpush3.bf16.msra.mxu0 %v4798_v54  ;;  %4346 = vmatpush3.bf16.msra.mxu1 %v4798_v54  ;;  %v4178_v3 = vld [vmem:[%s6222_s4] ss:$0 sm:$0xff] }
 0x833   : > { %4237 = vmatprep.subr.bf16.mxu0 %v4799_v63  ;;  %4339 = vmatprep.subr.bf16.mxu1 %v4799_v63 }
 0x836   : > { %4238 = vmatpush3.bf16.msra.mxu0 %v4800_v8  ;;  %4347 = vmatpush3.bf16.msra.mxu1 %v4800_v8 }
 0x837   : > { %4239 = vmatprep.subr.bf16.mxu0 %v4801_v41  ;;  %4340 = vmatprep.subr.bf16.mxu1 %v4801_v41 }
 0x83a   : > { %4240 = vmatpush3.bf16.msra.mxu0 %v4802_v37  ;;  %4348 = vmatpush3.bf16.msra.mxu1 %v4802_v37 }
 0x83b   : > { %4241 = vmatprep.subr.bf16.mxu0 %v4803_v11  ;;  %4341 = vmatprep.subr.bf16.mxu1 %v4803_v11 }
 0x83e   : > { %4242 = vmatpush3.bf16.msra.mxu0 %v4804_v24  ;;  %4349 = vmatpush3.bf16.msra.mxu1 %v4804_v24 }
 0x83f   : > { %4243 = vmatprep.subr.bf16.mxu0 %v4805_v19  ;;  %4342 = vmatprep.subr.bf16.mxu1 %v4805_v19 }
 0x842   : > { %4244 = vmatpush3.bf16.msra.mxu0 %v4806_v36  ;;  %4350 = vmatpush3.bf16.msra.mxu1 %v4806_v36 }
 0x843   : > { %4245 = vmatprep.subr.bf16.mxu0 %v4807_v61  ;;  %4343 = vmatprep.subr.bf16.mxu1 %v4807_v61 }
 0x846   : > { %4246 = vmatpush3.bf16.msra.mxu0 %v4808_v45  ;;  %4351 = vmatpush3.bf16.msra.mxu1 %v4808_v45 }
 0x847   : > { %4247 = vmatprep.subr.bf16.mxu0 %v4809_v52  ;;  %4344 = vmatprep.subr.bf16.mxu1 %v4809_v52 }
 0x84a   : > { %4248 = vmatpush3.bf16.msra.mxu0 %v4810_v23  ;;  %4352 = vmatpush3.bf16.msra.mxu1 %v4810_v23 }
 0x84d   : > { %3690 = vmatmul.mubr.bf16.vlgmr.msra.gmra.mxu0 %v3514_v55  ;;  %3706 = vmatmul.mubr.bf16.vlgmr.msra.gmra.mxu1 %v3518_v48 }
 0x84e   : > { %3697 = vmatprep.mubr.bf16.mxu0 %v3517_v1  ;;  %3713 = vmatprep.mubr.bf16.mxu1 %v3521_v14 }
 0x855   : > { %3698 = vmatmul.mubr.bf16.gmra.mxu0 %v3516_v20  ;;  %3714 = vmatmul.mubr.bf16.gmra.mxu1 %v3520_v7 }
 0x90d   : > { %v4249_v16 = vpop.f32.mrf.mxu0  ;;  %v4261_v60 = vpop.f32.mrf.mxu1 }
 0x90f   : > { %v4250_v40 = vpop.f32.mrf.mxu0  ;;  %v4262_v9 = vpop.f32.mrf.mxu1 }
 0x910   : > { %v4251_v49 = vadd.f32 %v4250_v40, %v4249_v16  ;;  %v4263_v57 = vadd.f32 %v4262_v9, %v4261_v60 }
 0x911   : > { %v4252_v2 = vpop.f32.mrf.mxu0  ;;  %v4264_v29 = vpop.f32.mrf.mxu1 }
 0x912   : > { %v3692_v46 = vadd.f32 %v4251_v49, %v4178_v3  ;;  %v3708_v10 = vadd.f32 %v4263_v57, %v4178_v3 }
 0x913   : > { %v4253_v21 = vpop.f32.mrf.mxu0  ;;  %v4265_v51 = vpop.f32.mrf.mxu1 }
 0x914   : > { %3722 = vst [vmem:[%s6221_s22] sm:$0xff] %v3692_v46  ;;  %3726 = vst [vmem:[%s6221_s22 + $0x20] sm:$0xff] %v3708_v10  ;;  %v4254_v17 = vadd.f32 %v4253_v21, %v4252_v2  ;;  %v4266_v56 = vadd.f32 %v4265_v51, %v4264_v29 }
 0x915   : > { %v4255_v44 = vpop.f32.mrf.mxu0  ;;  %v4267_v28 = vpop.f32.mrf.mxu1 }
 0x916   : > { %v3695_v62 = vadd.f32 %v4254_v17, %v4178_v3  ;;  %v3711_v4 = vadd.f32 %v4266_v56, %v4178_v3 }
 0x917   : > { %v4256_v39 = vpop.f32.mrf.mxu0  ;;  %v4268_v35 = vpop.f32.mrf.mxu1 }
 0x918   : > { %3723 = vst [vmem:[%s6221_s22 + $0x8] sm:$0xff] %v3695_v62  ;;  %3727 = vst [vmem:[%s6221_s22 + $0x28] sm:$0xff] %v3711_v4  ;;  %v4257_v34 = vadd.f32 %v4256_v39, %v4255_v44  ;;  %v4269_v43 = vadd.f32 %v4268_v35, %v4267_v28 }
 0x919   : > { %v4258_v32 = vpop.f32.mrf.mxu0  ;;  %v4270_v30 = vpop.f32.mrf.mxu1 }
 0x91a   : > { %v3700_v6 = vadd.f32 %v4257_v34, %v4178_v3  ;;  %v3716_v25 = vadd.f32 %v4269_v43, %v4178_v3 }
 0x91b   : > { %v4259_v12 = vpop.f32.mrf.mxu0  ;;  %v4271_v53 = vpop.f32.mrf.mxu1 }
 0x91c   : > { %3724 = vst [vmem:[%s6221_s22 + $0x10] sm:$0xff] %v3700_v6  ;;  %3728 = vst [vmem:[%s6221_s22 + $0x30] sm:$0xff] %v3716_v25  ;;  %v4260_v0 = vadd.f32 %v4259_v12, %v4258_v32  ;;  %v4272_v5 = vadd.f32 %v4271_v53, %v4270_v30 }
 0x91e   : > { %v3703_v15 = vadd.f32 %v4260_v0, %v4178_v3  ;;  %v3719_v22 = vadd.f32 %v4272_v5, %v4178_v3 }
 0x920   : > { %3725 = vst [vmem:[%s6221_s22 + $0x18] sm:$0xff] %v3703_v15  ;;  %3729 = vst [vmem:[%s6221_s22 + $0x38] sm:$0xff] %v3719_v22 }
 0x921 PF: > { %s6223_s29 = sld [smem:[#allocation6_spill]] }
 0x922   : > { %s6224_s21 = sld [smem:[#allocation4_spill]] }
 0x923   : > { %s6225_s22 = sld [smem:[#allocation5_spill]] }
 0x924   : > { %s6226_s23 = sld [smem:[#allocation7_spill]] }
 0x925   : > { %s6227_s24 = sld [smem:[#allocation8_spill]] }
 0x927   : > { %s26_s25 = sadd.s32 1, %s6223_s29  }
 0x928   : > { %p23_p10 = scmp.ge.s32.totalorder %s26_s25, 10  }
 0x92a   :  { %25 = sbr.rel (!%p23_p10) target bundleno = 15 (0xf), region = 161 }

// kernel: fastspeech2_forward.3
= control target key start
LH: loop header
LB: loop body
LE: loop exit
PB: predicated region body
PF: predicated region fallthrough
CT: control target
= control target key end

     0   :  { %s9670_s0 = inlined_call_operand.vmem [shape: f32[16,256], index: 0, kind: input, shape index: {}]   ;;  %s9671_s1 = inlined_call_operand.hbm [shape: f32[8,256], index: 1, kind: input, shape index: {}]   ;;  %s9672_s2 = inlined_call_operand.hbm [shape: bf16[4,256,768], index: 2, kind: input, shape index: {}]   ;;  %s9673_s3 = inlined_call_operand.hbm [shape: f32[4,1,768], index: 3, kind: input, shape index: {}]   ;;  %s9674_s4 = inlined_call_operand.hbm [shape: bf16[4,256,256], index: 4, kind: input, shape index: {}]   ;;  %s9675_s5 = inlined_call_operand.hbm [shape: f32[4,1,256], index: 5, kind: input, shape index: {}]   ;;  %s9676_s6 = inlined_call_operand.hbm [shape: f32[4,1,256], index: 6, kind: input, shape index: {}]   ;;  %s9677_s7 = inlined_call_operand.hbm [shape: f32[4,1,256], index: 7, kind: input, shape index: {}]   ;;  %s9678_s8 = inlined_call_operand.hbm [shape: bf16[4,256,2048], index: 8, kind: input, shape index: {}]   ;;  %s9679_s9 = inlined_call_operand.hbm [shape: f32[4,1,2048], index: 9, kind: input, shape index: {}]   ;;  %s9680_s10 = inlined_call_operand.hbm [shape: bf16[4,2048,256], index: 10, kind: input, shape index: {}]   ;;  %s9681_s11 = inlined_call_operand.hbm [shape: f32[4,1,256], index: 11, kind: input, shape index: {}]   ;;  %s9682_s12 = inlined_call_operand.hbm [shape: f32[4,1,256], index: 12, kind: input, shape index: {}]   ;;  %s9683_s13 = inlined_call_operand.hbm [shape: f32[4,1,256], index: 13, kind: input, shape index: {}]   ;;  %s9684_s14 = inlined_call_operand.vmem [shape: f32[16,256], index: 14, kind: output, shape index: {}]  }
   0x1   :  { %9706 = sst [smem:[#allocation38_spill]] %s9670_s0 }
   0x2   :  { %9707 = sst [smem:[#allocation39_spill]] %s9671_s1 }
   0x3   :  { %9708 = sst [smem:[#allocation40_spill]] %s9672_s2 }
   0x4   :  { %9709 = sst [smem:[#allocation41_spill]] %s9673_s3 }
   0x5   :  { %9710 = sst [smem:[#allocation42_spill]] %s9674_s4 }
   0x6   :  { %9711 = sst [smem:[#allocation43_spill]] %s9675_s5 }
   0x7   :  { %9712 = sst [smem:[#allocation44_spill]] %s9676_s6 }
   0x8   :  { %9713 = sst [smem:[#allocation45_spill]] %s9677_s7 }
   0x9   :  { %9714 = sst [smem:[#allocation46_spill]] %s9679_s9 }
   0xa   :  { %9715 = sst [smem:[#allocation47_spill]] %s9681_s11 }
   0xb   :  { %9716 = sst [smem:[#allocation48_spill]] %s9683_s13 }
   0xc   :  { %9717 = sst [smem:[#allocation49_spill]] %s9684_s14 }
   0xd   :  { %19 = vsyncpa [#allocation5], 0 }
   0xe   :  { %20 = vsyncpa [#allocation7], 0 }
   0xf   :  { %22 = vsyncpa [#allocation7 + $0x1], 0 }
  0x10   :  { %23 = vsyncpa [#allocation10], 0 }
  0x11   :  { %25 = vsyncpa [#allocation10 + $0x1], 0 }
  0x12   :  { %26 = vsyncpa [#allocation13], 0 }
  0x13   :  { %28 = vsyncpa [#allocation13 + $0x1], 0 }
  0x14   :  { %29 = vsyncpa [#allocation16], 0 }
  0x15   :  { %31 = vsyncpa [#allocation16 + $0x1], 0 }
  0x16   :  { %32 = vsyncpa [#allocation19], 0 }
  0x17   :  { %34 = vsyncpa [#allocation19 + $0x1], 0 }
  0x18   :  { %35 = vsyncpa [#allocation22], 0 }
  0x19   :  { %37 = vsyncpa [#allocation22 + $0x1], 0  ;;  %s8480_s29 = smov 0   ;;  %s8482_s30 = smov 0  }
  0x1a   :  { %s8484_s15 = smov 0   ;;  %s8486_s16 = smov 0  }
  0x1b   :  { %s8488_s17 = smov 0   ;;  %s8490_s18 = smov 0  }
  0x1c   :  { %s8492_s19 = smov 0   ;;  %s8494_s20 = smov 0  }
  0x1d LB: > { %9718 = sst [smem:[#allocation31_spill]] %s8362_s15  ;;  %s52_s21 = sadd.s32 1, %s8374_s18  ;;  %s8382_s20 = sphi %s8494_s20, %s43_s20   ;;  %s8378_s19 = sphi %s8492_s19, %s9765_s19   ;;  %s8374_s18 = sphi %s8490_s18, %s9769_s18   ;;  %s8370_s17 = sphi %s8488_s17, %s9763_s17   ;;  %s8366_s16 = sphi %s8486_s16, %s9768_s16   ;;  %s8362_s15 = sphi %s8484_s15, %s9762_s15   ;;  %s8358_s30 = sphi %s8482_s30, %s9767_s30   ;;  %s8354_s29 = sphi %s8480_s29, %s9766_s29  }
  0x1e   : > { %9719 = sst [smem:[#allocation32_spill]] %s8366_s16  ;;  %s55_s22 = sadd.s32 1, %s8378_s19 }
  0x1f   : > { %9720 = sst [smem:[#allocation33_spill]] %s8370_s17  ;;  %p53_p0 = scmp.ge.s32.totalorder %s52_s21, 4 }
  0x20   : > { %9721 = sst [smem:[#allocation34_spill]] %s8378_s19  ;;  %s109_s23 = sadd.s32 1, %s8362_s15 }
  0x21   : > { %p116_p1 = scmp.ne.s32.totalorder %s8362_s15, %s8358_s30  ;;  %p117_p2 = scmp.eq.s32.totalorder %s8382_s20, 0 }
  0x22   : > { %s9771_s21 = smov (%p53_p0, %s52_s21), 0  ;;  %s9773_s22 = smov (!%p53_p0, %s55_s22), %s8378_s19 }
  0x23   : > { %9722 = sst [smem:[#allocation35_spill]] %s9771_s21  ;;  %s106_s24 = ssub.s32 %s8374_s18, %s9771_s21 }
  0x24   : > { %p118_p3 = por %p117_p2, %p116_p1  ;;  %p57_p4 = scmp.ge.s32.totalorder %s9773_s22, 2 }
  0x25   : > { %p107_p5 = scmp.eq.s32.totalorder %s106_s24, 0  ;;  %p7265_p6 = scmp.lt.s32.totalorder %s8382_s20, 8 }
  0x26   : > { %s9775_s22 = smov (%p57_p4, %s9773_s22), 0  ;;  %s8538_s26 = sand.u32 1, %s8382_s20  }
  0x27   : > { %9723 = sst [smem:[#allocation36_spill]] %s9775_s22  ;;  %s8541_s27 = sand.u32 1, %s8362_s15  }
  0x28   : > { %s8535_s25 = scalar_select %p107_p5, %s8362_s15, %s109_s23  }
  0x29   : > { %s7189_s28 = smul.u32 768, %s8541_s27  ;;  %p8545_p7 = pnand %p7265_p6, %p118_p3 }
  0x2a   : > { %9724 = sst [smem:[#allocation37_spill]] %s8535_s25  ;;  %s7190_s16 = smul.u32 12288, %s8374_s18 }
  0x2b   : > { %s9726_s2 = sld [smem:[#allocation40_spill]]  ;;  %s481_s22 = scalar_lea.vmem [#allocation6], %s7189_s28 }
  0x2c   : > { %s488_s23 = sshll.u32 %s481_s22, 4  ;;  %s9693_s25 = scalar_lea.sflag [#allocation7], %s8538_s26  ;;  %s489_s23 = int_to_ptr.vmem [resolvable:$true] %s488_s23 }
  0x2d   : > { %p8555_p8 = pneg %p8545_p7  ;;  %s7943_s0 = scalar_lea.vmem %s489_s23, 12288 }
  0x2e   : > { %p7944_p9 = scmp.ne.s32.totalorder %s489_s23, %s7943_s0  ;;  %s8384_s17 = smov [#allocation6]  }
  0x2f   : > { %s7948_s13 = sshll.u32 %s8384_s17, 4  ;;  %s7949_s13 = int_to_ptr.vmem [resolvable:$false] %s7948_s13 }
  0x30   : > { %p7946_p10 = pnand %p7944_p9, %p8555_p8  ;;  %s7950_s19 = scalar_lea.vmem %s7949_s13, 24576 }
  0x31   : > { %s487_s24 = scalar_lea.hbm %s9726_s2, %s7190_s16  ;;  %p7951_p12 = scmp.lt.s32.totalorder %s489_s23, %s7949_s13 }
  0x32   : > { %p7947_p11 = pneg %p7946_p10  ;;  %p7952_p13 = scmp.lt.s32.totalorder %s7950_s19, %s7943_s0 }
  0x34   : > { %p7953_p0 = por %p7952_p13, %p7951_p12 }
  0x36   : > { %p7954_p1 = pnand %p7953_p0, %p7947_p11 }
  0x38   : > { %7957 = shalt.err (!%p7954_p1)
}
  0x39   : > { %s8385_s16 = smov 384   ;;  %s8386_s21 = smov 24  }
  0x3a   : > { %7230 = dma.hbm_to_vmem [thread:$0]  (!%p8545_p7), %s487_s24, 12288, %s489_s23, %s9693_s25, %s8385_s16, %s8385_s16, %s8386_s21  }
  0x3b   : > { %s6453_s22 = sshll.u32 %s8541_s27, 8  ;;  %s7145_s17 = sshll.u32 %s8374_s18, 12 }
  0x3c   : > { %s9728_s4 = sld [smem:[#allocation42_spill]]  ;;  %s521_s13 = scalar_lea.vmem [#allocation9], %s6453_s22 }
  0x3d   : > { %s528_s19 = sshll.u32 %s521_s13, 4  ;;  %s9692_s11 = scalar_lea.sflag [#allocation10], %s8538_s26  ;;  %s529_s19 = int_to_ptr.vmem [resolvable:$true] %s528_s19 }
  0x3e   : > { %s7971_s9 = scalar_lea.vmem %s529_s19, 4096  ;;  %s8387_s7 = smov [#allocation9]  }
  0x3f   : > { %p7972_p2 = scmp.ne.s32.totalorder %s529_s19, %s7971_s9  ;;  %s7976_s1 = sshll.u32 %s8387_s7, 4  ;;  %s7977_s1 = int_to_ptr.vmem [resolvable:$false] %s7976_s1 }
  0x40   : > { %s7978_s5 = scalar_lea.vmem %s7977_s1, 8192  ;;  %p7979_p5 = scmp.lt.s32.totalorder %s529_s19, %s7977_s1 }
  0x41   : > { %p7974_p3 = pnand %p7972_p2, %p8555_p8  ;;  %p7980_p6 = scmp.lt.s32.totalorder %s7978_s5, %s7971_s9 }
  0x42   : > { %s527_s0 = scalar_lea.hbm %s9728_s4, %s7145_s17 }
  0x43   : > { %p7975_p4 = pneg %p7974_p3  ;;  %p7981_p9 = por %p7980_p6, %p7979_p5 }
  0x45   : > { %p7982_p10 = pnand %p7981_p9, %p7975_p4 }
  0x47   : > { %7985 = shalt.err (!%p7982_p10)
}
  0x48   : > { %s9694_s2 = smov 128   ;;  %s9695_s24 = smov 8  }
  0x49   : > { %7236 = dma.hbm_to_vmem [thread:$0]  (!%p8545_p7), %s527_s0, 4096, %s529_s19, %s9692_s11, %s9694_s2, %s9694_s2, %s9695_s24  }
  0x4a   : > { %s8581_s7 = sshll.u32 %s8541_s27, 1  ;;  %s8584_s1 = sshll.u32 %s8374_s18, 5 }
  0x4b   : > { %s9729_s6 = sld [smem:[#allocation44_spill]]  ;;  %s561_s16 = scalar_lea.vmem [#allocation12], %s8581_s7 }
  0x4c   : > { %s569_s21 = sshll.u32 %s561_s16, 4  ;;  %s9696_s22 = scalar_lea.sflag [#allocation13], %s8538_s26  ;;  %s570_s21 = int_to_ptr.vmem [resolvable:$true] %s569_s21 }
  0x4d   : > { %s7999_s17 = scalar_lea.vmem %s570_s21, 32  ;;  %s8390_s28 = smov [#allocation12]  }
  0x4e   : > { %p8000_p11 = scmp.ne.s32.totalorder %s570_s21, %s7999_s17  ;;  %s8004_s0 = sshll.u32 %s8390_s28, 4  ;;  %s8005_s0 = int_to_ptr.vmem [resolvable:$false] %s8004_s0 }
  0x4f   : > { %s8006_s13 = scalar_lea.vmem %s8005_s0, 64  ;;  %p8007_p0 = scmp.lt.s32.totalorder %s570_s21, %s8005_s0 }
  0x50   : > { %p8002_p12 = pnand %p8000_p11, %p8555_p8  ;;  %p8008_p1 = scmp.lt.s32.totalorder %s8006_s13, %s7999_s17 }
  0x51   : > { %s567_s23 = scalar_lea.hbm %s9729_s6, %s8584_s1 }
  0x52   : > { %p8003_p13 = pneg %p8002_p12  ;;  %p8009_p2 = por %p8008_p1, %p8007_p0 }
  0x54   : > { %p8010_p3 = pnand %p8009_p2, %p8003_p13 }
  0x56   : > { %8013 = shalt.err (!%p8010_p3)
}
  0x57   : > { %7242 = dma.hbm_to_vmem [thread:$0]  (!%p8545_p7), %s567_s23, 32, %s570_s21, %s9696_s22  }
  0x58   : > { %s6465_s19 = sshll.u32 %s8541_s27, 11  ;;  %s7149_s5 = sshll.u32 %s8374_s18, 15 }
  0x59   : > { %s605_s28 = scalar_lea.hbm %s9678_s8, %s7149_s5  ;;  %s599_s0 = scalar_lea.vmem [#allocation15], %s6465_s19 }
  0x5a   : > { %s606_s17 = sshll.u32 %s599_s0, 4  ;;  %s9704_s13 = scalar_lea.sflag [#allocation16], %s8538_s26  ;;  %s607_s17 = int_to_ptr.vmem [resolvable:$true] %s606_s17 }
  0x5b   : > { %s8027_s11 = scalar_lea.vmem %s607_s17, 32768  ;;  %s8391_s25 = smov [#allocation15]  }
  0x5c   : > { %p8028_p4 = scmp.ne.s32.totalorder %s607_s17, %s8027_s11  ;;  %s8032_s2 = sshll.u32 %s8391_s25, 4  ;;  %s8033_s2 = int_to_ptr.vmem [resolvable:$false] %s8032_s2 }
  0x5d   : > { %s8034_s24 = scalar_lea.vmem %s8033_s2, 65536  ;;  %p8035_p9 = scmp.lt.s32.totalorder %s607_s17, %s8033_s2 }
  0x5e   : > { %p8030_p5 = pnand %p8028_p4, %p8555_p8  ;;  %p8036_p10 = scmp.lt.s32.totalorder %s8034_s24, %s8027_s11 }
  0x60   : > { %p8031_p6 = pneg %p8030_p5  ;;  %p8037_p11 = por %p8036_p10, %p8035_p9 }
  0x62   : > { %p8038_p12 = pnand %p8037_p11, %p8031_p6 }
  0x64   : > { %8041 = shalt.err (!%p8038_p12)
}
  0x65   : > { %s8392_s23 = smov 1024   ;;  %s8393_s21 = smov 64  }
  0x66   : > { %7248 = dma.hbm_to_vmem [thread:$0]  (!%p8545_p7), %s605_s28, 32768, %s607_s17, %s9704_s13, %s8392_s23, %s8392_s23, %s8393_s21  }
  0x67   : > { %s645_s25 = scalar_lea.hbm %s9680_s10, %s7149_s5  ;;  %s639_s0 = scalar_lea.vmem [#allocation18], %s6465_s19 }
  0x68   : > { %s646_s22 = sshll.u32 %s639_s0, 4  ;;  %s9699_s11 = scalar_lea.sflag [#allocation19], %s8538_s26  ;;  %s647_s22 = int_to_ptr.vmem [resolvable:$true] %s646_s22 }
  0x69   : > { %s8055_s2 = scalar_lea.vmem %s647_s22, 32768  ;;  %s8394_s24 = smov [#allocation18]  }
  0x6a   : > { %p8056_p13 = scmp.ne.s32.totalorder %s647_s22, %s8055_s2  ;;  %s8060_s4 = sshll.u32 %s8394_s24, 4  ;;  %s8061_s4 = int_to_ptr.vmem [resolvable:$false] %s8060_s4 }
  0x6b   : > { %s8062_s6 = scalar_lea.vmem %s8061_s4, 65536  ;;  %p8063_p2 = scmp.lt.s32.totalorder %s647_s22, %s8061_s4 }
  0x6c   : > { %p8058_p0 = pnand %p8056_p13, %p8555_p8  ;;  %p8064_p3 = scmp.lt.s32.totalorder %s8062_s6, %s8055_s2 }
  0x6e   : > { %p8059_p1 = pneg %p8058_p0  ;;  %p8065_p4 = por %p8064_p3, %p8063_p2 }
  0x70   : > { %p8066_p5 = pnand %p8065_p4, %p8059_p1 }
  0x72   : > { %8069 = shalt.err (!%p8066_p5)
}
  0x73   : > { %s9730_s19 = smov 8   ;;  %s9731_s5 = smov 128  }
  0x74   : > { %7254 = dma.hbm_to_vmem [thread:$0]  (!%p8545_p7), %s645_s25, 32768, %s647_s22, %s9699_s11, %s9731_s5, %s9731_s5, %s9730_s19  }
  0x75   : > { %s685_s4 = scalar_lea.hbm %s9682_s12, %s8584_s1  ;;  %s679_s6 = scalar_lea.vmem [#allocation21], %s8581_s7 }
  0x76   : > { %s687_s23 = sshll.u32 %s679_s6, 4  ;;  %s9698_s21 = scalar_lea.sflag [#allocation22], %s8538_s26  ;;  %s688_s23 = int_to_ptr.vmem [resolvable:$true] %s687_s23 }
  0x77   : > { %s8083_s9 = scalar_lea.vmem %s688_s23, 32  ;;  %s8395_s16 = smov [#allocation21]  }
  0x78   : > { %p8084_p6 = scmp.ne.s32.totalorder %s688_s23, %s8083_s9  ;;  %s8088_s0 = sshll.u32 %s8395_s16, 4  ;;  %s8089_s0 = int_to_ptr.vmem [resolvable:$false] %s8088_s0 }
  0x79   : > { %s8090_s2 = scalar_lea.vmem %s8089_s0, 64  ;;  %p8091_p11 = scmp.lt.s32.totalorder %s688_s23, %s8089_s0 }
  0x7a   : > { %p8086_p9 = pnand %p8084_p6, %p8555_p8  ;;  %p8092_p12 = scmp.lt.s32.totalorder %s8090_s2, %s8083_s9 }
  0x7c   : > { %p8087_p10 = pneg %p8086_p9  ;;  %p8093_p13 = por %p8092_p12, %p8091_p11 }
  0x7e   : > { %p8094_p0 = pnand %p8093_p13, %p8087_p10 }
  0x80   : > { %8097 = shalt.err (!%p8094_p0)
}
  0x81   : > { %7260 = dma.hbm_to_vmem [thread:$0]  (!%p8545_p7), %s685_s4, 32, %s688_s23, %s9698_s21  }
  0x82   : > { %s9697_s22 = sadd.s32 4294967295, %s8382_s20   ;;  %p122_p1 = scmp.ne.s32.totalorder %s8358_s30, %s8354_s29 }
  0x83   : > { %p8640_p2 = scmp.eq.s32.totalorder %s9697_s22, 0  ;;  %p6448_p3 = scmp.ge.s32.totalorder %s8382_s20, 1 }
  0x84   : > { %p445_p4 = scmp.lt.s32.totalorder %s8382_s20, 9  ;;  %s8396_s29 = smov [#allocation4]  }
  0x85   : > { %s9732_s25 = scalar_select %p8640_p2, 1, 0 }
  0x86   : > { %p8648_p5 = por %p8640_p2, %p122_p1  ;;  %p8652_p6 = pnand %p6448_p3, %p445_p4 }
  0x87   : > { %s458_s5 = sshll.u32 %s8396_s29, 4  ;;  %s7191_s28 = smul.u32 6, %s8541_s27  ;;  %s459_s5 = int_to_ptr.vmem [resolvable:$true] %s458_s5 }
  0x88   : > { %s9733_s24 = scalar_select %p8648_p5, 1, 0 }
  0x89   : > { %s9734_s19 = scalar_select %p8652_p6, 1, 0 }
  0x8a   : > { %p7223_p9 = pneg %p8652_p6  ;;  %s7192_s17 = smul.u32 96, %s8374_s18 }
  0x8b   : > { %s9736_s3 = sld [smem:[#allocation41_spill]]  ;;  %s502_s16 = scalar_lea.vmem [#allocation8], %s7191_s28 }
  0x8c   : > { %p8662_p10 = pnand %p7223_p9, %p8640_p2  ;;  %s510_s0 = sshll.u32 %s502_s16, 4  ;;  %s511_s0 = int_to_ptr.vmem [resolvable:$true] %s510_s0 }
  0x8d   : > { %s9737_s22 = sld [smem:[#allocation43_spill]]  ;;  %s8109_s11 = scalar_lea.vmem %s459_s5, 256 }
  0x8e   : > { %p8100_p11 = pneg %p8662_p10  ;;  %p8110_p12 = scmp.ne.s32.totalorder %s459_s5, %s8109_s11 }
  0x8f   : > { %p8117_p1 = scmp.lt.s32.totalorder %s459_s5, %s459_s5  ;;  %p8118_p3 = scmp.lt.s32.totalorder %s8109_s11, %s8109_s11 }
  0x90   : > { %p8112_p13 = pnand %p8110_p12, %p8100_p11 }
  0x91   : > { %s8669_s9 = scalar_lea.hbm %s9736_s3, %s7192_s17  ;;  %p8119_p4 = por %p8118_p3, %p8117_p1 }
  0x92   : > { %p8113_p0 = pneg %p8112_p13 }
  0x93   : > { %s548_s21 = scalar_lea.hbm %s9737_s22, %s8584_s1 }
  0x94   : > { %p8120_p9 = pnand %p8119_p4, %p8113_p0 }
  0x96   : > { %8123 = shalt.err (!%p8120_p9)
}
  0x97   : > { %s9738_s6 = sld [smem:[#allocation39_spill]]  ;;  %s8137_s23 = scalar_lea.vmem %s511_s0, 96 }
  0x98   : > { %p8138_p5 = scmp.ne.s32.totalorder %s511_s0, %s8137_s23  ;;  %s8397_s16 = smov [#allocation8]  }
  0x99   : > { %s8142_s2 = sshll.u32 %s8397_s16, 4  ;;  %s8143_s2 = int_to_ptr.vmem [resolvable:$false] %s8142_s2 }
  0x9a   : > { %p8140_p2 = pnand %p8138_p5, %p8555_p8  ;;  %s8144_s29 = scalar_lea.vmem %s8143_s2, 192 }
  0x9b   : > { %p8145_p11 = scmp.lt.s32.totalorder %s511_s0, %s8143_s2  ;;  %p8146_p12 = scmp.lt.s32.totalorder %s8144_s29, %s8137_s23 }
  0x9c   : > { %p8141_p6 = pneg %p8140_p2 }
  0x9d   : > { %7226 = dma.hbm_to_vmem [thread:$0]  (!%p8662_p10), %s9738_s6, 256, %s459_s5, [#allocation5]  }
  0x9e   : > { %p8147_p13 = por %p8146_p12, %p8145_p11 }
  0xa0   : > { %p8148_p0 = pnand %p8147_p13, %p8141_p6 }
  0xa2   : > { %8151 = shalt.err (!%p8148_p0)
}
  0xa3   : > { %s9739_s11 = scalar_lea.sflag [#allocation7], %s8538_s26  ;;  %s542_s5 = scalar_lea.vmem [#allocation11], %s8581_s7 }
  0xa4   : > { %7233 = dma.hbm_to_vmem [thread:$0]  (!%p8545_p7), %s8669_s9, 96, %s511_s0, %s9739_s11  }
  0xa5   : > { %s550_s4 = sshll.u32 %s542_s5, 4  ;;  %s9740_s6 = sld [smem:[#allocation45_spill]]  ;;  %s551_s4 = int_to_ptr.vmem [resolvable:$true] %s550_s4 }
  0xa6   : > { %s8165_s23 = scalar_lea.vmem %s551_s4, 32  ;;  %s8398_s2 = smov [#allocation11]  }
  0xa7   : > { %p8166_p2 = scmp.ne.s32.totalorder %s551_s4, %s8165_s23  ;;  %s8170_s29 = sshll.u32 %s8398_s2, 4  ;;  %s8171_s29 = int_to_ptr.vmem [resolvable:$false] %s8170_s29 }
  0xa8   : > { %s8172_s13 = scalar_lea.vmem %s8171_s29, 64  ;;  %p8173_p10 = scmp.lt.s32.totalorder %s551_s4, %s8171_s29 }
  0xa9   : > { %p8168_p5 = pnand %p8166_p2, %p8555_p8  ;;  %p8174_p1 = scmp.lt.s32.totalorder %s8172_s13, %s8165_s23 }
  0xab   : > { %s586_s16 = scalar_lea.hbm %s9740_s6, %s8584_s1  ;;  %p8169_p6 = pneg %p8168_p5 }
  0xac   : > { %p8175_p3 = por %p8174_p1, %p8173_p10 }
  0xae   : > { %p8176_p4 = pnand %p8175_p3, %p8169_p6 }
  0xb0   : > { %8179 = shalt.err (!%p8176_p4)
}
  0xb1   : > { %s9741_s9 = scalar_lea.sflag [#allocation10], %s8538_s26  ;;  %s580_s5 = scalar_lea.vmem [#allocation14], %s8581_s7 }
  0xb2   : > { %7239 = dma.hbm_to_vmem [thread:$0]  (!%p8545_p7), %s548_s21, 32, %s551_s4, %s9741_s9  }
  0xb3   : > { %s588_s28 = sshll.u32 %s580_s5, 4  ;;  %s6468_s17 = sshll.u32 %s8541_s27, 4  ;;  %s589_s28 = int_to_ptr.vmem [resolvable:$true] %s588_s28 }
  0xb4   : > { %s8193_s13 = scalar_lea.vmem %s589_s28, 32  ;;  %s8399_s23 = smov [#allocation14]  }
  0xb5   : > { %p8194_p9 = scmp.ne.s32.totalorder %s589_s28, %s8193_s13  ;;  %s8198_s2 = sshll.u32 %s8399_s23, 4  ;;  %s8199_s2 = int_to_ptr.vmem [resolvable:$false] %s8198_s2 }
  0xb6   : > { %s8200_s29 = scalar_lea.vmem %s8199_s2, 64  ;;  %p8201_p13 = scmp.lt.s32.totalorder %s589_s28, %s8199_s2 }
  0xb7   : > { %p8196_p11 = pnand %p8194_p9, %p8555_p8  ;;  %p8202_p0 = scmp.lt.s32.totalorder %s8200_s29, %s8193_s13 }
  0xb9   : > { %p8197_p12 = pneg %p8196_p11  ;;  %p8203_p2 = por %p8202_p0, %p8201_p13 }
  0xbb   : > { %p8204_p5 = pnand %p8203_p2, %p8197_p12 }
  0xbd   : > { %8207 = shalt.err (!%p8204_p5)
}
  0xbe   : > { %s9742_s21 = scalar_lea.sflag [#allocation13], %s8538_s26  ;;  %s7150_s9 = sshll.u32 %s8374_s18, 8 }
  0xbf   : > { %7245 = dma.hbm_to_vmem [thread:$0]  (!%p8545_p7), %s586_s16, 32, %s589_s28, %s9742_s21  }
  0xc0   : > { %s620_s0 = scalar_lea.vmem [#allocation17], %s6468_s17  ;;  %s9743_s23 = sld [smem:[#allocation46_spill]] }
  0xc1   : > { %s628_s11 = sshll.u32 %s620_s0, 4  ;;  %s8400_s3 = smov [#allocation17]   ;;  %s629_s11 = int_to_ptr.vmem [resolvable:$true] %s628_s11 }
  0xc2   : > { %s8221_s29 = scalar_lea.vmem %s629_s11, 256  ;;  %s8226_s27 = sshll.u32 %s8400_s3, 4  ;;  %s8227_s27 = int_to_ptr.vmem [resolvable:$false] %s8226_s27 }
  0xc3   : > { %p8222_p6 = scmp.ne.s32.totalorder %s629_s11, %s8221_s29  ;;  %s8228_s4 = scalar_lea.vmem %s8227_s27, 512 }
  0xc4   : > { %p8229_p3 = scmp.lt.s32.totalorder %s629_s11, %s8227_s27  ;;  %p8230_p4 = scmp.lt.s32.totalorder %s8228_s4, %s8221_s29 }
  0xc5   : > { %p8224_p10 = pnand %p8222_p6, %p8555_p8 }
  0xc6   : > { %s626_s2 = scalar_lea.hbm %s9743_s23, %s7150_s9  ;;  %p8231_p9 = por %p8230_p4, %p8229_p3 }
  0xc7   : > { %p8225_p1 = pneg %p8224_p10 }
  0xc9   : > { %p8232_p11 = pnand %p8231_p9, %p8225_p1 }
  0xcb   : > { %8235 = shalt.err (!%p8232_p11)
}
  0xcc   : > { %s9744_s16 = scalar_lea.sflag [#allocation16], %s8538_s26  ;;  %s9745_s21 = sld [smem:[#allocation47_spill]] }
  0xcd   : > { %7251 = dma.hbm_to_vmem [thread:$0]  (!%p8545_p7), %s626_s2, 256, %s629_s11, %s9744_s16  }
  0xce   : > { %s660_s9 = scalar_lea.vmem [#allocation20], %s8581_s7  ;;  %s9746_s23 = sld [smem:[#allocation48_spill]] }
  0xcf   : > { %s668_s0 = sshll.u32 %s660_s9, 4  ;;  %s8401_s4 = smov [#allocation20]   ;;  %s669_s0 = int_to_ptr.vmem [resolvable:$true] %s668_s0 }
  0xd0   : > { %s8249_s27 = scalar_lea.vmem %s669_s0, 32  ;;  %s8254_s6 = sshll.u32 %s8401_s4, 4  ;;  %s8255_s6 = int_to_ptr.vmem [resolvable:$false] %s8254_s6 }
  0xd1   : > { %p8250_p12 = scmp.ne.s32.totalorder %s669_s0, %s8249_s27  ;;  %s8256_s11 = scalar_lea.vmem %s8255_s6, 64 }
  0xd2   : > { %s666_s3 = scalar_lea.hbm %s9745_s21, %s8584_s1  ;;  %p8257_p2 = scmp.lt.s32.totalorder %s669_s0, %s8255_s6 }
  0xd3   : > { %p8252_p13 = pnand %p8250_p12, %p8555_p8  ;;  %p8258_p5 = scmp.lt.s32.totalorder %s8256_s11, %s8249_s27 }
  0xd4   : > { %s704_s29 = scalar_lea.hbm %s9746_s23, %s8584_s1 }
  0xd5   : > { %p8253_p0 = pneg %p8252_p13  ;;  %p8259_p6 = por %p8258_p5, %p8257_p2 }
  0xd7   : > { %p8260_p10 = pnand %p8259_p6, %p8253_p0 }
  0xd9   : > { %8263 = shalt.err (!%p8260_p10)
}
  0xda   : > { %s9747_s2 = scalar_lea.sflag [#allocation19], %s8538_s26  ;;  %s698_s16 = scalar_lea.vmem [#allocation23], %s8581_s7 }
  0xdb   : > { %7257 = dma.hbm_to_vmem [thread:$0]  (!%p8545_p7), %s666_s3, 32, %s669_s0, %s9747_s2  }
  0xdc   : > { %s706_s28 = sshll.u32 %s698_s16, 4  ;;  %s8402_s6 = smov [#allocation23]   ;;  %s707_s28 = int_to_ptr.vmem [resolvable:$true] %s706_s28 }
  0xdd   : > { %s8277_s17 = scalar_lea.vmem %s707_s28, 32  ;;  %s8282_s21 = sshll.u32 %s8402_s6, 4  ;;  %s8283_s21 = int_to_ptr.vmem [resolvable:$false] %s8282_s21 }
  0xde   : > { %p8278_p1 = scmp.ne.s32.totalorder %s707_s28, %s8277_s17  ;;  %s8284_s9 = scalar_lea.vmem %s8283_s21, 64 }
  0xdf   : > { %p8285_p9 = scmp.lt.s32.totalorder %s707_s28, %s8283_s21  ;;  %p8286_p11 = scmp.lt.s32.totalorder %s8284_s9, %s8277_s17 }
  0xe0   : > { %p8280_p3 = pnand %p8278_p1, %p8555_p8 }
  0xe1   : > { %p8287_p12 = por %p8286_p11, %p8285_p9 }
  0xe2   : > { %p8281_p4 = pneg %p8280_p3 }
  0xe4   : > { %p8288_p13 = pnand %p8287_p12, %p8281_p4 }
  0xe6   : > { %8291 = shalt.err (!%p8288_p13)
}
  0xe7   : > { %s9748_s7 = scalar_lea.sflag [#allocation22], %s8538_s26  ;;  %p9749_p8 = scmp.ne.s32.totalorder %s9734_s19, 0 }
  0xe8   : > { %7263 = dma.hbm_to_vmem [thread:$0]  (!%p8545_p7), %s704_s29, 32, %s707_s28, %s9748_s7  }
  0xe9   : > { %715 = sbr.rel (%p9749_p8) target bundleno = 2449 (0x991), region = 76  ;;  %p9750_p0 = scmp.ne.s32.totalorder (!%p9749_p8), %s9732_s25, 0 }
  0xee   : > { %8325 = dma.done.wait (%p9750_p0), [#allocation5], 256  }
  0xef   : > { %8327 = vsyncadd (%p9750_p0), [#allocation5], 4294967040  ;;  %s9751_s15 = sadd.s32 4294967295, %s8382_s20   ;;  %s723_s26 = sand.u32 1, %s8358_s30  }
  0xf0   : > { %s8763_s14 = sand.u32 1, %s9751_s15   ;;  %s7193_s5 = smul.u32 768, %s723_s26 }
  0xf1   : > { %s722_s1 = scalar_lea.sflag [#allocation7], %s8763_s14  ;;  %p9752_p7 = scmp.ne.s32.totalorder %s9733_s24, 0 }
  0xf2   : > { %s8767_s13 = scalar_lea.vmem [#allocation6], %s7193_s5 }
  0xf3   : > { %8329 = dma.done.wait (%p9752_p7), %s722_s1, 12384  }
  0xf4   : > { %8331 = vsyncadd (%p9752_p7), %s722_s1, 4294954912  ;;  %s7194_s25 = smul.u32 6, %s723_s26  ;;  %s6485_s19 = sshll.u32 %s723_s26, 8 }
  0xf5   : > { %s740_s27 = scalar_lea.sflag [#allocation10], %s8763_s14  ;;  %s8776_s4 = scalar_lea.vmem [#allocation9], %s6485_s19 }
  0xf6   : > { %s8773_s29 = scalar_lea.vmem [#allocation8], %s7194_s25 }
  0xf7   : > { %8333 = dma.done.wait (%p9752_p7), %s740_s27, 4128  }
  0xf8   : > { %8335 = vsyncadd (%p9752_p7), %s740_s27, 4294963168  ;;  %s8782_s11 = sshll.u32 %s723_s26, 1  ;;  %s758_s16 = scalar_lea.sflag [#allocation13], %s8763_s14 }
  0xf9   : > { %s752_s2 = scalar_lea.vmem [#allocation11], %s8782_s11  ;;  %s761_s28 = scalar_lea.vmem [#allocation12], %s8782_s11 }
  0xfa   : > { %8337 = dma.done.wait (%p9752_p7), %s758_s16, 64  }
  0xfb   : > { %8339 = vsyncadd (%p9752_p7), %s758_s16, 4294967232  ;;  %s6489_s17 = sshll.u32 %s723_s26, 11  ;;  %s776_s21 = scalar_lea.sflag [#allocation16], %s8763_s14 }
  0xfc   : > { %s8793_s9 = scalar_lea.vmem [#allocation15], %s6489_s17 }
  0xfd   : > { %8341 = dma.done.wait (%p9752_p7), %s776_s21, 33024  }
  0xfe   : > { %8343 = vsyncadd (%p9752_p7), %s776_s21, 4294934272  ;;  %s6490_s7 = sshll.u32 %s723_s26, 4  ;;  %s794_s0 = scalar_lea.sflag [#allocation19], %s8763_s14 }
  0xff   : > { %s8799_s3 = scalar_lea.vmem [#allocation17], %s6490_s7  ;;  %s8802_s15 = scalar_lea.vmem [#allocation18], %s6489_s17 }
 0x100   : > { %8345 = dma.done.wait (%p9752_p7), %s794_s0, 32800  }
 0x101   : > { %8347 = vsyncadd (%p9752_p7), %s794_s0, 4294934496  ;;  %s812_s1 = scalar_lea.sflag [#allocation22], %s8763_s14 }
 0x102   : > { %8349 = dma.done.wait (%p9752_p7), %s812_s1, 64  }
 0x103   : > { %8351 = vsyncadd (%p9752_p7), %s812_s1, 4294967232  ;;  %s9753_s26 = sld [smem:[#allocation33_spill]]  ;;  %s824_s25 = scalar_lea.vmem [#allocation23], %s8782_s11 }
 0x104   : > { %s9754_s17 = sld [smem:[#allocation38_spill]] }
 0x105   : > { %s9755_s5 = sld [smem:[#allocation49_spill]] }
 0x106   : > { %s9756_s6 = sld [smem:[#allocation32_spill]] }
 0x109   : > { %p929_p2 = scmp.lt.s32.totalorder %s9753_s26, 1 }
 0x10b   : > { %s9777_s26 = smov (!%p929_p2, %s9753_s26), 1 }
 0x10c   : > { %s7155_s19 = sshll.u32 %s9777_s26, 4  ;;  %p6499_p5 = scmp.ne.s32.totalorder %s9756_s6, 0 }
 0x10d   : > { %s933_s21 = scalar_lea.vmem %s9754_s17, %s7155_s19  ;;  %s8823_s14 = scalar_lea.vmem %s9755_s5, %s7155_s19 }
 0x10e   : > { %943 = sbr.rel (%p6499_p5) target bundleno = 280 (0x118), region = 132 }
 0x113   : > { %v944_v0 = vld [vmem:[%s933_s21] sm:$0xff]  ;;  %v946_v1 = vld [vmem:[#allocation4] sm:$0xff]  ;;  %v945_v2 = vld [vmem:[%s933_s21 + $0x8] sm:$0xff] }
 0x114   : > { %v948_v3 = vadd.f32 %v946_v1, %v944_v0  ;;  %v947_v4 = vld [vmem:[#allocation4 + $0x8] sm:$0xff] }
 0x115   : > { %v949_v5 = vadd.f32 %v947_v4, %v945_v2 }
 0x116   : > { %950 = vst [vmem:[#allocation2] sm:$0xff] %v948_v3 }
 0x117   : > { %951 = vst [vmem:[#allocation2 + $0x8] sm:$0xff] %v949_v5 }
 0x118 PF: > { %v7340_v6 = vld [vmem:[%s8767_s13 + $0x15c] ss:$24 sps:$4 sm:$0xff]   ;;  %v7342_v7 = vld [vmem:[%s8767_s13 + $0x158] ss:$24 sps:$4 sm:$0xff]   ;;  %v7346_v10 = vld [vmem:[%s8767_s13 + $0x12c] ss:$24 sps:$4 sm:$0xff]  }
 0x119   : > { %1605 = vmatprep.subr.bf16.mxu1 %v7340_v6  ;;  %v7343_v8 = vld [vmem:[%s8767_s13 + $0x154] ss:$24 sps:$4 sm:$0xff]   ;;  %v7345_v9 = vld [vmem:[%s8767_s13 + $0x150] ss:$24 sps:$4 sm:$0xff]   ;;  %v7349_v12 = vld [vmem:[%s8767_s13 + $0x124] ss:$24 sps:$4 sm:$0xff]  }
 0x11a   : > { %1606 = vmatpush1.bf16.msra.mxu1 %v7342_v7  ;;  %v7348_v11 = vld [vmem:[%s8767_s13 + $0x128] ss:$24 sps:$4 sm:$0xff]   ;;  %1564 = vmatprep.subr.bf16.mxu0 %v7343_v8  ;;  %v7352_v14 = vld [vmem:[%s8767_s13 + $0xfc] ss:$24 sps:$4 sm:$0xff]   ;;  %v7354_v15 = vld [vmem:[%s8767_s13 + $0xf8] ss:$24 sps:$4 sm:$0xff]  }
 0x11b   : > { %1565 = vmatpush1.bf16.msra.mxu0 %v7345_v9  ;;  %1607 = vmatprep.subr.bf16.mxu1 %v7346_v10  ;;  %v7351_v13 = vld [vmem:[%s8767_s13 + $0x120] ss:$24 sps:$4 sm:$0xff]   ;;  %v7355_v16 = vld [vmem:[%s8767_s13 + $0xf4] ss:$24 sps:$4 sm:$0xff]   ;;  %v7357_v18 = vld [vmem:[%s8767_s13 + $0xf0] ss:$24 sps:$4 sm:$0xff]  }
 0x11c   : > { %1566 = vmatprep.subr.bf16.mxu0 %v7349_v12  ;;  %v7358_v17 = vld [vmem:[%s8767_s13 + $0xcc] ss:$24 sps:$4 sm:$0xff]   ;;  %v7360_v20 = vld [vmem:[%s8767_s13 + $0xc8] ss:$24 sps:$4 sm:$0xff]   ;;  %v7364_v21 = vld [vmem:[%s8767_s13 + $0x9c] ss:$24 sps:$4 sm:$0xff]  }
 0x11d   : > { %v7361_v19 = vld [vmem:[%s8767_s13 + $0xc4] ss:$24 sps:$4 sm:$0xff]   ;;  %v7363_v22 = vld [vmem:[%s8767_s13 + $0xc0] ss:$24 sps:$4 sm:$0xff]   ;;  %v7367_v23 = vld [vmem:[%s8767_s13 + $0x94] ss:$24 sps:$4 sm:$0xff]  }
 0x11e   : > { %1608 = vmatpush1.bf16.msra.mxu1 %v7348_v11  ;;  %v7366_v24 = vld [vmem:[%s8767_s13 + $0x98] ss:$24 sps:$4 sm:$0xff]   ;;  %v7370_v25 = vld [vmem:[%s8767_s13 + $0x6c] ss:$24 sps:$4 sm:$0xff]   ;;  %v7372_v28 = vld [vmem:[%s8767_s13 + $0x68] ss:$24 sps:$4 sm:$0xff]  }
 0x11f   : > { %1609 = vmatprep.subr.bf16.mxu1 %v7352_v14  ;;  %1567 = vmatpush1.bf16.msra.mxu0 %v7351_v13  ;;  %v7369_v26 = vld [vmem:[%s8767_s13 + $0x90] ss:$24 sps:$4 sm:$0xff]   ;;  %v7373_v27 = vld [vmem:[%s8767_s13 + $0x64] ss:$24 sps:$4 sm:$0xff]   ;;  %v7375_v30 = vld [vmem:[%s8767_s13 + $0x60] ss:$24 sps:$4 sm:$0xff]  }
 0x120   : > { %1568 = vmatprep.subr.bf16.mxu0 %v7355_v16  ;;  %v7376_v29 = vld [vmem:[%s8767_s13 + $0x3c] ss:$24 sps:$4 sm:$0xff]   ;;  %v7378_v32 = vld [vmem:[%s8767_s13 + $0x38] ss:$24 sps:$4 sm:$0xff]   ;;  %v7382_v33 = vld [vmem:[%s8767_s13 + $0xc] ss:$24 sps:$4 sm:$0xff]  }
 0x121   : > { %v7379_v31 = vld [vmem:[%s8767_s13 + $0x34] ss:$24 sps:$4 sm:$0xff]   ;;  %v7381_v34 = vld [vmem:[%s8767_s13 + $0x30] ss:$24 sps:$4 sm:$0xff]   ;;  %v7385_v35 = vld [vmem:[%s8767_s13 + $0x4] ss:$24 sps:$4 sm:$0xff]  }
 0x122   : > { %1610 = vmatpush1.bf16.msra.mxu1 %v7354_v15  ;;  %v7384_v36 = vld [vmem:[%s8767_s13 + $0x8] ss:$24 sps:$4 sm:$0xff]   ;;  %v7388_v37 = vld [vmem:[%s8767_s13 + $0x2dc] ss:$24 sps:$4 sm:$0xff]   ;;  %v7390_v40 = vld [vmem:[%s8767_s13 + $0x2d8] ss:$24 sps:$4 sm:$0xff]  }
 0x123   : > { %1611 = vmatprep.subr.bf16.mxu1 %v7358_v17  ;;  %1569 = vmatpush1.bf16.msra.mxu0 %v7357_v18  ;;  %v7387_v38 = vld [vmem:[%s8767_s13] ss:$24 sps:$4 sm:$0xff]   ;;  %v7391_v39 = vld [vmem:[%s8767_s13 + $0x2d4] ss:$24 sps:$4 sm:$0xff]   ;;  %v7393_v42 = vld [vmem:[%s8767_s13 + $0x2d0] ss:$24 sps:$4 sm:$0xff]  }
 0x124   : > { %1570 = vmatprep.subr.bf16.mxu0 %v7361_v19  ;;  %v7394_v41 = vld [vmem:[%s8767_s13 + $0x2ac] ss:$24 sps:$4 sm:$0xff]   ;;  %v7396_v44 = vld [vmem:[%s8767_s13 + $0x2a8] ss:$24 sps:$4 sm:$0xff]   ;;  %v7400_v45 = vld [vmem:[%s8767_s13 + $0x27c] ss:$24 sps:$4 sm:$0xff]  }
 0x125   : > { %v7397_v43 = vld [vmem:[%s8767_s13 + $0x2a4] ss:$24 sps:$4 sm:$0xff]   ;;  %v7399_v46 = vld [vmem:[%s8767_s13 + $0x2a0] ss:$24 sps:$4 sm:$0xff]   ;;  %v7403_v47 = vld [vmem:[%s8767_s13 + $0x274] ss:$24 sps:$4 sm:$0xff]  }
 0x126   : > { %1612 = vmatpush1.bf16.msra.mxu1 %v7360_v20  ;;  %v7402_v48 = vld [vmem:[%s8767_s13 + $0x278] ss:$24 sps:$4 sm:$0xff]   ;;  %v7406_v49 = vld [vmem:[%s8767_s13 + $0x24c] ss:$24 sps:$4 sm:$0xff]   ;;  %v7408_v53 = vld [vmem:[%s8767_s13 + $0x248] ss:$24 sps:$4 sm:$0xff]  }
 0x127   : > { %1613 = vmatprep.subr.bf16.mxu1 %v7364_v21  ;;  %1571 = vmatpush1.bf16.msra.mxu0 %v7363_v22  ;;  %v7405_v50 = vld [vmem:[%s8767_s13 + $0x270] ss:$24 sps:$4 sm:$0xff]   ;;  %v7409_v51 = vld [vmem:[%s8767_s13 + $0x244] ss:$24 sps:$4 sm:$0xff]   ;;  %v7411_v56 = vld [vmem:[%s8767_s13 + $0x240] ss:$24 sps:$4 sm:$0xff]  }
 0x128   : > { %1572 = vmatprep.subr.bf16.mxu0 %v7367_v23  ;;  %v953_v52 = vld [vmem:[#allocation2 + $0x8] sm:$0xff]  ;;  %v7412_v55 = vld [vmem:[%s8767_s13 + $0x21c] ss:$24 sps:$4 sm:$0xff]   ;;  %v7414_v58 = vld [vmem:[%s8767_s13 + $0x218] ss:$24 sps:$4 sm:$0xff]   ;;  %vm8404_vm0 = vmmov 0  }
 0x129   : > { %v955_v54 = vpack.c.bf16 %v953_v52, %v953_v52  ;;  %v7415_v57 = vld [vmem:[%s8767_s13 + $0x214] ss:$24 sps:$4 sm:$0xff]   ;;  %v7417_v60 = vld [vmem:[%s8767_s13 + $0x210] ss:$24 sps:$4 sm:$0xff]   ;;  %v7421_v61 = vld [vmem:[%s8767_s13 + $0x1e4] ss:$24 sps:$4 sm:$0xff]  }
 0x12a   : > { %1614 = vmatpush1.bf16.msra.mxu1 %v7366_v24  ;;  %v7418_v59 = vld [vmem:[%s8767_s13 + $0x1ec] ss:$24 sps:$4 sm:$0xff]   ;;  %v7420_v62 = vld [vmem:[%s8767_s13 + $0x1e8] ss:$24 sps:$4 sm:$0xff]   ;;  %v7424_v63 = vld [vmem:[%s8767_s13 + $0x1bc] ss:$24 sps:$4 sm:$0xff]  }
 0x12b   : > { %1615 = vmatprep.subr.bf16.mxu1 %v7370_v25  ;;  %1573 = vmatpush1.bf16.msra.mxu0 %v7369_v26  ;;  %v7423_v0 = vld [vmem:[%s8767_s13 + $0x1e0] ss:$24 sps:$4 sm:$0xff]   ;;  %v7427_v1 = vld [vmem:[%s8767_s13 + $0x1b4] ss:$24 sps:$4 sm:$0xff]   ;;  %v7429_v4 = vld [vmem:[%s8767_s13 + $0x1b0] ss:$24 sps:$4 sm:$0xff]  }
 0x12c   : > { %1574 = vmatprep.subr.bf16.mxu0 %v7373_v27  ;;  %1637 = vmatprep.mubr.bf16.mxu1 %v955_v54  ;;  %v7426_v2 = vld [vmem:[%s8767_s13 + $0x1b8] ss:$24 sps:$4 sm:$0xff]   ;;  %v7430_v3 = vld [vmem:[%s8767_s13 + $0x18c] ss:$24 sps:$4 sm:$0xff]   ;;  %v7432_v5 = vld [vmem:[%s8767_s13 + $0x188] ss:$24 sps:$4 sm:$0xff]  }
 0x12d   : > { %1596 = vmatprep.mubr.bf16.mxu0 %v955_v54  ;;  %v7433_v6 = vld [vmem:[%s8767_s13 + $0x184] ss:$24 sps:$4 sm:$0xff]   ;;  %v7435_v8 = vld [vmem:[%s8767_s13 + $0x180] ss:$24 sps:$4 sm:$0xff]   ;;  %v7441_v12 = vld [vmem:[%s8767_s13 + $0x134] ss:$24 sps:$4 sm:$0xff]  }
 0x12e   : > { %1616 = vmatpush1.bf16.msra.mxu1 %v7372_v28  ;;  %v952_v7 = vld [vmem:[#allocation2] sm:$0xff]  ;;  %v7439_v13 = vld [vmem:[%s8767_s13 + $0x130] ss:$24 sps:$4 sm:$0xff]   ;;  %v7447_v16 = vld [vmem:[%s8767_s13 + $0xd4] ss:$24 sps:$4 sm:$0xff]   ;;  %vm1746_vm1 = vcmask 1043456  }
 0x12f   : > { %1617 = vmatprep.subr.bf16.mxu1 %v7376_v29  ;;  %1575 = vmatpush1.bf16.msra.mxu0 %v7375_v30  ;;  %v8891_v9 = vpack.c.bf16 %v952_v7, %v952_v7  ;;  %v7438_v10 = vld [vmem:[%s8767_s13 + $0x164] ss:$24 sps:$4 sm:$0xff]   ;;  %v7436_v11 = vld [vmem:[%s8767_s13 + $0x160] ss:$24 sps:$4 sm:$0xff]   ;;  %v7445_v17 = vld [vmem:[%s8767_s13 + $0xd0] ss:$24 sps:$4 sm:$0xff]  }
 0x130   : > { %1576 = vmatprep.subr.bf16.mxu0 %v7379_v31  ;;  %v7444_v14 = vld [vmem:[%s8767_s13 + $0x104] ss:$24 sps:$4 sm:$0xff]   ;;  %v7442_v15 = vld [vmem:[%s8767_s13 + $0x100] ss:$24 sps:$4 sm:$0xff]   ;;  %v7453_v20 = vld [vmem:[%s8767_s13 + $0x74] ss:$24 sps:$4 sm:$0xff]  }
 0x131   : > { %v7450_v18 = vld [vmem:[%s8767_s13 + $0xa4] ss:$24 sps:$4 sm:$0xff]   ;;  %v7448_v19 = vld [vmem:[%s8767_s13 + $0xa0] ss:$24 sps:$4 sm:$0xff]   ;;  %v7451_v21 = vld [vmem:[%s8767_s13 + $0x70] ss:$24 sps:$4 sm:$0xff]  }
 0x132   : > { %1618 = vmatpush1.bf16.msra.mxu1 %v7378_v32  ;;  %v7456_v22 = vld [vmem:[%s8767_s13 + $0x44] ss:$24 sps:$4 sm:$0xff]   ;;  %v7454_v23 = vld [vmem:[%s8767_s13 + $0x40] ss:$24 sps:$4 sm:$0xff]   ;;  %v7459_v24 = vld [vmem:[%s8767_s13 + $0x14] ss:$24 sps:$4 sm:$0xff]  }
 0x133   : > { %1619 = vmatprep.subr.bf16.mxu1 %v7382_v33  ;;  %1577 = vmatpush1.bf16.msra.mxu0 %v7381_v34  ;;  %v7457_v25 = vld [vmem:[%s8767_s13 + $0x10] ss:$24 sps:$4 sm:$0xff]   ;;  %v7462_v26 = vld [vmem:[%s8767_s13 + $0x2e4] ss:$24 sps:$4 sm:$0xff]   ;;  %v7460_v27 = vld [vmem:[%s8767_s13 + $0x2e0] ss:$24 sps:$4 sm:$0xff]  }
 0x134   : > { %1578 = vmatprep.subr.bf16.mxu0 %v7385_v35  ;;  %v7465_v28 = vld [vmem:[%s8767_s13 + $0x2b4] ss:$24 sps:$4 sm:$0xff]   ;;  %v7463_v29 = vld [vmem:[%s8767_s13 + $0x2b0] ss:$24 sps:$4 sm:$0xff]   ;;  %v7468_v30 = vld [vmem:[%s8767_s13 + $0x284] ss:$24 sps:$4 sm:$0xff]  }
 0x135   : > { %v7466_v31 = vld [vmem:[%s8767_s13 + $0x280] ss:$24 sps:$4 sm:$0xff]   ;;  %v7471_v32 = vld [vmem:[%s8767_s13 + $0x254] ss:$24 sps:$4 sm:$0xff]   ;;  %v7469_v33 = vld [vmem:[%s8767_s13 + $0x250] ss:$24 sps:$4 sm:$0xff]  }
 0x136   : > { %1620 = vmatpush1.bf16.msra.mxu1 %v7384_v36  ;;  %v7474_v34 = vld [vmem:[%s8767_s13 + $0x224] ss:$24 sps:$4 sm:$0xff]   ;;  %v7472_v35 = vld [vmem:[%s8767_s13 + $0x220] ss:$24 sps:$4 sm:$0xff]   ;;  %v7477_v36 = vld [vmem:[%s8767_s13 + $0x1f4] ss:$24 sps:$4 sm:$0xff]  }
 0x137   : > { %1621 = vmatprep.subr.bf16.mxu1 %v7388_v37  ;;  %1579 = vmatpush1.bf16.msra.mxu0 %v7387_v38  ;;  %v7475_v37 = vld [vmem:[%s8767_s13 + $0x1f0] ss:$24 sps:$4 sm:$0xff]   ;;  %v7480_v38 = vld [vmem:[%s8767_s13 + $0x1c4] ss:$24 sps:$4 sm:$0xff]   ;;  %vm1730_vm2 = vcmask 64512   ;;  %s9757_s24 = scalar_lea.vmem [#allocation14], %s8782_s11 }
 0x138   : > { %1580 = vmatprep.subr.bf16.mxu0 %v7391_v39  ;;  %v7478_v39 = vld [vmem:[%s8767_s13 + $0x1c0] ss:$24 sps:$4 sm:$0xff]  }
 0x13a   : > { %1622 = vmatpush2.bf16.msra.mxu1 %v7390_v40  ;;  %v7483_v40 = vld [vmem:[%s8767_s13 + $0x194] ss:$24 sps:$4 sm:$0xff]  }
 0x13b   : > { %1623 = vmatprep.subr.bf16.mxu1 %v7394_v41  ;;  %1581 = vmatpush2.bf16.msra.mxu0 %v7393_v42  ;;  %v7481_v41 = vld [vmem:[%s8767_s13 + $0x190] ss:$24 sps:$4 sm:$0xff]   ;;  %v8403_v42 = vmov 0.0   ;;  %s9758_s13 = scalar_lea.vmem [#allocation20], %s8782_s11 }
 0x13c   : > { %1582 = vmatprep.subr.bf16.mxu0 %v7397_v43  ;;  %v1054_v43 = vlaneseq }
 0x13e   : > { %1624 = vmatpush2.bf16.msra.mxu1 %v7396_v44  ;;  %v8930_v44 = vshrl.u32 %v1054_v43, 7 }
 0x13f   : > { %1625 = vmatprep.subr.bf16.mxu1 %v7400_v45  ;;  %1583 = vmatpush2.bf16.msra.mxu0 %v7399_v46  ;;  %v1052_v46 = vld [vmem:[%s8773_s29] sm:$0x3f]  ;;  %s9759_s29 = scalar_lea.vmem [#allocation21], %s8782_s11 }
 0x140   : > { %1584 = vmatprep.subr.bf16.mxu0 %v7403_v47  ;;  %v8933_v45 = vsub.s32 2, %v8930_v44  ;;  %v8937_v47 = vsub.s32 3, %v8930_v44  ;;  %v8955_v7 = vsub.s32 5, %v8930_v44 }
 0x142   : > { %1626 = vmatpush2.bf16.msra.mxu1 %v7402_v48  ;;  %v8940_v48 = vsub.s32 0, %v8930_v44 }
 0x143   : > { %1627 = vmatprep.subr.bf16.mxu1 %v7406_v49  ;;  %1585 = vmatpush2.bf16.msra.mxu0 %v7405_v50  ;;  %v1065_v49 = vrot.slane %v1052_v46, %v8933_v45  ;;  %v1069_v50 = vrot.slane %v1052_v46, %v8937_v47 }
 0x144   : > { %1586 = vmatprep.subr.bf16.mxu0 %v7409_v51  ;;  %v1057_v52 = vrot.slane %v1052_v46, %v8940_v48 }
 0x146   : > { %1628 = vmatpush2.bf16.msra.mxu1 %v7408_v53  ;;  %v8946_v53 = vsub.s32 1, %v8930_v44 }
 0x147   : > { %1629 = vmatprep.subr.bf16.mxu1 %v7412_v55  ;;  %1587 = vmatpush2.bf16.msra.mxu0 %v7411_v56 }
 0x148   : > { %1588 = vmatprep.subr.bf16.mxu0 %v7415_v57 }
 0x14a   : > { %1630 = vmatpush2.bf16.msra.mxu1 %v7414_v58 }
 0x14b   : > { %1631 = vmatprep.subr.bf16.mxu1 %v7418_v59  ;;  %1589 = vmatpush2.bf16.msra.mxu0 %v7417_v60  ;;  %v1061_v60 = vrot.slane %v1052_v46, %v8946_v53 }
 0x14c   : > { %1590 = vmatprep.subr.bf16.mxu0 %v7421_v61 }
 0x14e   : > { %1632 = vmatpush2.bf16.msra.mxu1 %v7420_v62 }
 0x14f   : > { %1633 = vmatprep.subr.bf16.mxu1 %v7424_v63  ;;  %1591 = vmatpush2.bf16.msra.mxu0 %v7423_v0 }
 0x150   : > { %1592 = vmatprep.subr.bf16.mxu0 %v7427_v1 }
 0x152   : > { %1634 = vmatpush2.bf16.msra.mxu1 %v7426_v2 }
 0x153   : > { %1635 = vmatprep.subr.bf16.mxu1 %v7430_v3  ;;  %1593 = vmatpush2.bf16.msra.mxu0 %v7429_v4 }
 0x154   : > { %1594 = vmatprep.subr.bf16.mxu0 %v7433_v6  ;;  %v8952_v6 = vsub.s32 4, %v8930_v44 }
 0x156   : > { %1636 = vmatpush2.bf16.msra.mxu1 %v7432_v5 }
 0x157   : > { %1595 = vmatpush2.bf16.msra.mxu0 %v7435_v8  ;;  %7177 = vmatprep.subr.bf16.mxu1 %v8403_v42  ;;  %v1073_v8 = vrot.slane %v1052_v46, %v8952_v6 }
 0x158   : > { %1646 = vmatprep.subr.bf16.mxu0 %v7438_v10 }
 0x159   : > { %1638 = vmatmul.mubr.bf16.vlgmr.msra.gmra.mxu1 %v8891_v9 }
 0x15a   : > { %1597 = vmatmul.mubr.bf16.vlgmr.msra.gmra.mxu0 %v8891_v9  ;;  %7179 = vmatprep.mubr.msk.bf16.mxu1 %vm8404_vm0, %v8403_v42 }
 0x15b   : > { %1647 = vmatpush1.bf16.msra.mxu0 %v7436_v11  ;;  %1678 = vmatprep.mubr.bf16.mxu0 %v955_v54 }
 0x15c   : > { %1648 = vmatprep.subr.bf16.mxu0 %v7441_v12 }
 0x15f   : > { %1649 = vmatpush1.bf16.msra.mxu0 %v7439_v13 }
 0x160   : > { %1650 = vmatprep.subr.bf16.mxu0 %v7444_v14 }
 0x163   : > { %1651 = vmatpush1.bf16.msra.mxu0 %v7442_v15 }
 0x164   : > { %1652 = vmatprep.subr.bf16.mxu0 %v7447_v16 }
 0x167   : > { %1653 = vmatpush1.bf16.msra.mxu0 %v7445_v17 }
 0x168   : > { %1654 = vmatprep.subr.bf16.mxu0 %v7450_v18 }
 0x16b   : > { %1655 = vmatpush1.bf16.msra.mxu0 %v7448_v19 }
 0x16c   : > { %1656 = vmatprep.subr.bf16.mxu0 %v7453_v20 }
 0x16f   : > { %1657 = vmatpush1.bf16.msra.mxu0 %v7451_v21 }
 0x170   : > { %1658 = vmatprep.subr.bf16.mxu0 %v7456_v22 }
 0x173   : > { %1659 = vmatpush1.bf16.msra.mxu0 %v7454_v23 }
 0x174   : > { %1660 = vmatprep.subr.bf16.mxu0 %v7459_v24 }
 0x177   : > { %1661 = vmatpush1.bf16.msra.mxu0 %v7457_v25 }
 0x178   : > { %1662 = vmatprep.subr.bf16.mxu0 %v7462_v26 }
 0x17b   : > { %1663 = vmatpush2.bf16.msra.mxu0 %v7460_v27 }
 0x17c   : > { %1664 = vmatprep.subr.bf16.mxu0 %v7465_v28 }
 0x17f   : > { %1665 = vmatpush2.bf16.msra.mxu0 %v7463_v29 }
 0x180   : > { %1666 = vmatprep.subr.bf16.mxu0 %v7468_v30 }
 0x183   : > { %1667 = vmatpush2.bf16.msra.mxu0 %v7466_v31 }
 0x184   : > { %1668 = vmatprep.subr.bf16.mxu0 %v7471_v32 }
 0x187   : > { %1669 = vmatpush2.bf16.msra.mxu0 %v7469_v33 }
 0x188   : > { %1670 = vmatprep.subr.bf16.mxu0 %v7474_v34 }
 0x18b   : > { %1671 = vmatpush2.bf16.msra.mxu0 %v7472_v35 }
 0x18c   : > { %1672 = vmatprep.subr.bf16.mxu0 %v7477_v36 }
 0x18f   : > { %1673 = vmatpush2.bf16.msra.mxu0 %v7475_v37 }
 0x190   : > { %1674 = vmatprep.subr.bf16.mxu0 %v7480_v38 }
 0x193   : > { %1675 = vmatpush2.bf16.msra.mxu0 %v7478_v39 }
 0x194   : > { %1676 = vmatprep.subr.bf16.mxu0 %v7483_v40  ;;  %v7486_v40 = vld [vmem:[%s8776_s4 + $0x74] ss:$8 sps:$4 sm:$0xff]  }
 0x197   : > { %1677 = vmatpush2.bf16.msra.mxu0 %v7481_v41 }
 0x198   : > { %7165 = vmatprep.subr.bf16.mxu0 %v8403_v42 }
 0x19a   : > { %1679 = vmatmul.mubr.bf16.vlgmr.msra.gmra.mxu0 %v8891_v9  ;;  %v1077_v9 = vrot.slane %v1052_v46, %v8955_v7 }
 0x19b   : > { %7167 = vmatprep.mubr.msk.bf16.mxu0 %vm8404_vm0, %v8403_v42 }
 0x219   : > { %v1639_v51 = vpop.f32.mrf.mxu1 }
 0x21a   : > { %v1640_v54 = vadd.f32 %v1639_v51, %v1065_v49  ;;  %v1598_v55 = vpop.f32.mrf.mxu0  ;;  %v7484_v49 = vld [vmem:[%s8776_s4 + $0x70] ss:$8 sps:$4 sm:$0xff]   ;;  %v7489_v51 = vld [vmem:[%s8776_s4 + $0x64] ss:$8 sps:$4 sm:$0xff]  }
 0x21b   : > { %v1641_v56 = vpop.f32.mrf.mxu1  ;;  %v1599_v59 = vadd.f32 %v1598_v55, %v1057_v52  ;;  %v7487_v55 = vld [vmem:[%s8776_s4 + $0x60] ss:$8 sps:$4 sm:$0xff]  }
 0x21c   : > { %v1688_v57 = vpack.c.bf16 %v1640_v54, %v1640_v54  ;;  %v1642_v58 = vadd.f32 %v1641_v56, %v1069_v50  ;;  %v1600_v61 = vpop.f32.mrf.mxu0 }
 0x21d   : > { %v1643_v62 = vpop.f32.mrf.mxu1  ;;  %v1687_v2 = vpack.c.bf16 %v1599_v59, %v1599_v59  ;;  %v1601_v3 = vadd.f32 %v1600_v61, %v1061_v60  ;;  %v7495_v59 = vld [vmem:[%s8776_s4 + $0x44] ss:$8 sps:$4 sm:$0xff]   ;;  %v7493_v60 = vld [vmem:[%s8776_s4 + $0x40] ss:$8 sps:$4 sm:$0xff]   ;;  %v7498_v61 = vld [vmem:[%s8776_s4 + $0x34] ss:$8 sps:$4 sm:$0xff]  }
 0x21e   : > { %v1792_v63 = vpack.c.bf16 %v1642_v58, %v1642_v58  ;;  %7166 = vmatpush3.bf16.xpose.msra.mxu0 %v1688_v57  ;;  %v1602_v0 = vpop.f32.mrf.mxu0  ;;  %v7492_v57 = vld [vmem:[%s8776_s4 + $0x54] ss:$8 sps:$4 sm:$0xff]   ;;  %v7490_v58 = vld [vmem:[%s8776_s4 + $0x50] ss:$8 sps:$4 sm:$0xff]  }
 0x21f   : > { %v1644_v1 = vpop.f32.mrf.mxu1  ;;  %7171 = vmatprep.subr.bf16.mxu0 %v8403_v42  ;;  %v1791_v5 = vpack.c.bf16 %v1601_v3, %v1601_v3  ;;  %v7496_v62 = vld [vmem:[%s8776_s4 + $0x30] ss:$8 sps:$4 sm:$0xff]   ;;  %v7499_v0 = vld [vmem:[%s8776_s4 + $0x20] ss:$8 sps:$4 sm:$0xff]   ;;  %v7507_v3 = vld [vmem:[%s8776_s4 + $0x4] ss:$8 sps:$4 sm:$0xff]  }
 0x220   : > { %7178 = vmatpush3.bf16.xpose.msra.mxu1 %v1792_v63  ;;  %v1603_v4 = vpop.f32.mrf.mxu0  ;;  %v7501_v63 = vld [vmem:[%s8776_s4 + $0x24] ss:$8 sps:$4 sm:$0xff]   ;;  %v7504_v1 = vld [vmem:[%s8776_s4 + $0x14] ss:$8 sps:$4 sm:$0xff]  }
 0x221   : > { %7183 = vmatprep.subr.bf16.mxu1 %v8403_v42  ;;  %v7505_v4 = vld [vmem:[%s8776_s4] ss:$8 sps:$4 sm:$0xff]  }
 0x225   : > { %7168 = vmatmul.mubr.bf16.vlgmr.msra.gmra.mxu0 %v1687_v2  ;;  %v7502_v2 = vld [vmem:[%s8776_s4 + $0x10] ss:$8 sps:$4 sm:$0xff]  }
 0x226   : > { %7173 = vmatprep.mubr.msk.bf16.mxu0 %vm8404_vm0, %v8403_v42 }
 0x227   : > { %7180 = vmatmul.mubr.bf16.vlgmr.msra.gmra.mxu1 %v1791_v5  ;;  %v7510_v5 = vld [vmem:[%s8776_s4 + $0xf4] ss:$8 sps:$4 sm:$0xff]  }
 0x228   : > { %7185 = vmatprep.mubr.msk.bf16.mxu1 %vm8404_vm0, %v8403_v42 }
 0x25a   : > { %v1680_v10 = vpop.f32.mrf.mxu0 }
 0x25b   : > { %v1681_v11 = vadd.f32 %v1680_v10, %v1073_v8  ;;  %v7508_v8 = vld [vmem:[%s8776_s4 + $0xf0] ss:$8 sps:$4 sm:$0xff]   ;;  %v7511_v10 = vld [vmem:[%s8776_s4 + $0xe0] ss:$8 sps:$4 sm:$0xff]  }
 0x25c   : > { %v1682_v12 = vpop.f32.mrf.mxu0 }
 0x25d   : > { %v1689_v13 = vpack.c.bf16 %v1681_v11, %v1681_v11  ;;  %v1683_v14 = vadd.f32 %v1682_v12, %v1077_v9  ;;  %v7513_v9 = vld [vmem:[%s8776_s4 + $0xe4] ss:$8 sps:$4 sm:$0xff]   ;;  %v7516_v11 = vld [vmem:[%s8776_s4 + $0xd4] ss:$8 sps:$4 sm:$0xff]   ;;  %v7514_v12 = vld [vmem:[%s8776_s4 + $0xd0] ss:$8 sps:$4 sm:$0xff]  }
 0x25e   : > { %v1684_v15 = vpop.f32.mrf.mxu0 }
 0x25f   : > { %v1748_v16 = vsel %vm1746_vm1, %v1689_v13, 0  ;;  %v1793_v17 = vpack.c.bf16 %v1683_v14, %v1683_v14  ;;  %v7519_v13 = vld [vmem:[%s8776_s4 + $0xc4] ss:$8 sps:$4 sm:$0xff]   ;;  %v7517_v14 = vld [vmem:[%s8776_s4 + $0xc0] ss:$8 sps:$4 sm:$0xff]  }
 0x260   : > { %v1685_v18 = vpop.f32.mrf.mxu0  ;;  %7172 = vmatpush3.bf16.msra.mxu0 %v1748_v16  ;;  %v7522_v15 = vld [vmem:[%s8776_s4 + $0xb4] ss:$8 sps:$4 sm:$0xff]   ;;  %v7520_v16 = vld [vmem:[%s8776_s4 + $0xb0] ss:$8 sps:$4 sm:$0xff]  }
 0x261   : > { %v1850_v19 = vsel %vm1746_vm1, %v1793_v17, 0  ;;  %v7525_v17 = vld [vmem:[%s8776_s4 + $0xa4] ss:$8 sps:$4 sm:$0xff]   ;;  %v7523_v18 = vld [vmem:[%s8776_s4 + $0xa0] ss:$8 sps:$4 sm:$0xff]  }
 0x262   : > { %7184 = vmatpush3.bf16.msra.mxu1 %v1850_v19  ;;  %v7528_v19 = vld [vmem:[%s8776_s4 + $0x94] ss:$8 sps:$4 sm:$0xff]  }
 0x263   : > { %2101 = vmatprep.subr.bf16.mxu1 %v7486_v40  ;;  %v2297_v40 = vld [vmem:[%s8793_s9 + $0x340] sm:$0xff] }
 0x2e5   : > { %v1724_v20 = vpop.f32.mrf.mxu0 }
 0x2e6   : > { %v1731_v28 = vsel %vm1730_vm2, %v1724_v20, -inf }
 0x2e7   : > { %v7169_v21 = vpop.f32.mrf.mxu0  ;;  %v1828_v22 = vpop.f32.mrf.mxu1 }
 0x2e8   : > { %v1834_v23 = vsel %vm1730_vm2, %v1828_v22, -inf  ;;  %v7529_v21 = vld [vmem:[%s8776_s4 + $0x80] ss:$8 sps:$4 sm:$0xff]  }
 0x2e9   : > { %1835 = vmax.xlane.f32.xlu0 %v1834_v23  ;;  %v1727_v24 = vpop.f32.mrf.mxu0  ;;  %v7181_v25 = vpop.f32.mrf.mxu1 }
 0x2eb   : > { %v7170_v26 = vpop.f32.mrf.mxu0  ;;  %v1831_v27 = vpop.f32.mrf.mxu1 }
 0x2ed   : > { %v7182_v29 = vpop.f32.mrf.mxu1  ;;  %1732 = vmax.xlane.f32.xlu0 %v1731_v28 }
 0x372   : > { %v1836_v30 = vpop.xlane.xlu0 %1835 }
 0x373   : > { %v1837_v31 = vsub.f32 %v1828_v22, %v1836_v30  ;;  %v7531_v22 = vld [vmem:[%s8776_s4 + $0x84] ss:$8 sps:$4 sm:$0xff]  }
 0x375   : > { %v1838_v32 = vmul.f32 1.442695, %v1837_v31 }
 0x376   : > { %v1733_v33 = vpop.xlane.xlu0 %1732 }
 0x377   : > { %7916 = vpow2.f32 %v1838_v32  ;;  %v1734_v34 = vsub.f32 %v1724_v20, %v1733_v33  ;;  %v7526_v20 = vld [vmem:[%s8776_s4 + $0x90] ss:$8 sps:$4 sm:$0xff]   ;;  %s9760_s4 = sld [smem:[#allocation32_spill]] }
 0x378   : > { %v2305_v33 = vld [vmem:[%s8793_s9 + $0x380] sm:$0xff] }
 0x379   : > { %v1735_v35 = vmul.f32 1.442695, %v1734_v34  ;;  %v2313_v34 = vld [vmem:[%s8793_s9 + $0x3c0] sm:$0xff] }
 0x37b   : > { %7918 = vpow2.f32 %v1735_v35  ;;  %v2306_v35 = vld [vmem:[%s8793_s9 + $0x388] sm:$0xff] }
 0x37d   : > { %p7142_p6 = scmp.ne.s32.totalorder %s9760_s4, 3 }
 0x384   : > { %v7917_v36 = vpop.eup %7916 }
 0x385   : > { %v1840_v37 = vsel %vm1730_vm2, %v7917_v36, 0.0 }
 0x386   : > { %1841 = vadd.xlane.f32.xlu1 %v1840_v37  ;;  %v6743_v37 = vcombine.high %v2305_v33, %v2313_v34 }
 0x388   : > { %v7919_v38 = vpop.eup %7918  ;;  %3813 = vmatprep.subr.bf16.mxu0 %v6743_v37 }
 0x389   : > { %v1737_v39 = vsel %vm1730_vm2, %v7919_v38, 0.0 }
 0x38a   : > { %1738 = vadd.xlane.f32.xlu1 %v1737_v39  ;;  %v2289_v39 = vld [vmem:[%s8793_s9 + $0x300] sm:$0xff] }
 0x40f   : > { %v1842_v41 = vpop.xlane.xlu1 %1841 }
 0x410   : > { %7920 = vrcp.f32 %v1842_v41 }
 0x413   : > { %v1739_v42 = vpop.xlane.xlu1 %1738 }
 0x414   : > { %7922 = vrcp.f32 %v1739_v42 }
 0x41d   : > { %v7921_v43 = vpop.eup %7920 }
 0x41e   : > { %v1844_v46 = vmul.f32 %v7921_v43, %v7917_v36  ;;  %v6742_v36 = vcombine.low %v2305_v33, %v2313_v34  ;;  %v6727_v43 = vcombine.high %v2289_v39, %v2297_v40  ;;  %v2202_v33 = vld [vmem:[%s8793_s9 + $0x48] sm:$0xff] }
 0x420   : > { %v1845_v50 = vpack.c.bf16 %v1844_v46, %v1844_v46  ;;  %v2290_v46 = vld [vmem:[%s8793_s9 + $0x308] sm:$0xff] }
 0x421   : > { %v7923_v52 = vpop.eup %7922 }
 0x422   : > { %7186 = vmatmul.mubr.msk.bf16.vlgmr.msra.gmra.mxu1 %vm1730_vm2, %v1845_v50  ;;  %v1741_v54 = vmul.f32 %v7923_v52, %v7919_v38  ;;  %v2314_v38 = vld [vmem:[%s8793_s9 + $0x3c8] sm:$0xff]  ;;  %v2273_v50 = vld [vmem:[%s8793_s9 + $0x280] sm:$0xff] }
 0x423   : > { %2102 = vmatpush1.bf16.msra.mxu1 %v7484_v49  ;;  %v6744_v41 = vcombine.low %v2306_v35, %v2314_v38  ;;  %v6745_v42 = vcombine.high %v2306_v35, %v2314_v38  ;;  %v2298_v49 = vld [vmem:[%s8793_s9 + $0x348] sm:$0xff]  ;;  %v2281_v52 = vld [vmem:[%s8793_s9 + $0x2c0] sm:$0xff] }
 0x424   : > { %v1742_v56 = vpack.c.bf16 %v1741_v54, %v1741_v54  ;;  %2103 = vmatprep.subr.bf16.mxu1 %v7489_v51  ;;  %v6729_v51 = vcombine.high %v2290_v46, %v2298_v49  ;;  %v2274_v54 = vld [vmem:[%s8793_s9 + $0x288] sm:$0xff]  ;;  %v2433_v38 = vld [vmem:[%s8793_s9 + $0x780] sm:$0xff] }
 0x426   : > { %7174 = vmatmul.mubr.msk.bf16.vlgmr.msra.gmra.mxu0 %vm1730_vm2, %v1742_v56  ;;  %v6726_v56 = vcombine.low %v2289_v39, %v2297_v40  ;;  %v2441_v39 = vld [vmem:[%s8793_s9 + $0x7c0] sm:$0xff]  ;;  %v2434_v40 = vld [vmem:[%s8793_s9 + $0x788] sm:$0xff] }
 0x427   : > { %2104 = vmatpush1.bf16.msra.mxu1 %v7487_v55  ;;  %v2282_v55 = vld [vmem:[%s8793_s9 + $0x2c8] sm:$0xff]  ;;  %3814 = vmatpush1.bf16.msra.mxu0 %v6742_v36 }
 0x428   : > { %2105 = vmatprep.subr.bf16.mxu1 %v7492_v57  ;;  %3815 = vmatprep.subr.bf16.mxu0 %v6727_v43  ;;  %v6728_v57 = vcombine.low %v2290_v46, %v2298_v49  ;;  %v6871_v46 = vcombine.high %v2433_v38, %v2441_v39 }
 0x42b   : > { %2106 = vmatpush1.bf16.msra.mxu1 %v7490_v58  ;;  %v6711_v58 = vcombine.high %v2273_v50, %v2281_v52  ;;  %3816 = vmatpush1.bf16.msra.mxu0 %v6726_v56 }
 0x42c   : > { %2107 = vmatprep.subr.bf16.mxu1 %v7495_v59  ;;  %v6713_v59 = vcombine.high %v2274_v54, %v2282_v55 }
 0x42d   : > { %3817 = vmatprep.subr.bf16.mxu0 %v6711_v58 }
 0x42f   : > { %2108 = vmatpush1.bf16.msra.mxu1 %v7493_v60  ;;  %v2257_v60 = vld [vmem:[%s8793_s9 + $0x200] sm:$0xff] }
 0x430   : > { %2109 = vmatprep.subr.bf16.mxu1 %v7498_v61  ;;  %v2265_v61 = vld [vmem:[%s8793_s9 + $0x240] sm:$0xff] }
 0x433   : > { %2110 = vmatpush1.bf16.msra.mxu1 %v7496_v62  ;;  %v2258_v62 = vld [vmem:[%s8793_s9 + $0x208] sm:$0xff] }
 0x434   : > { %2111 = vmatprep.subr.bf16.mxu1 %v7501_v63  ;;  %v2266_v63 = vld [vmem:[%s8793_s9 + $0x248] sm:$0xff] }
 0x437   : > { %2112 = vmatpush1.bf16.msra.mxu1 %v7499_v0  ;;  %v6710_v0 = vcombine.low %v2273_v50, %v2281_v52  ;;  %v6870_v50 = vcombine.low %v2433_v38, %v2441_v39  ;;  %v1929_v52 = vld [vmem:[%s752_s2] sm:$0x3] }
 0x438   : > { %2113 = vmatprep.subr.bf16.mxu1 %v7504_v1  ;;  %v6712_v1 = vcombine.low %v2274_v54, %v2282_v55  ;;  %v1934_v54 = vrot.slane %v1929_v52, %v8940_v48  ;;  %v1938_v55 = vrot.slane %v1929_v52, %v8946_v53  ;;  %v2337_v52 = vld [vmem:[%s8793_s9 + $0x480] sm:$0xff] }
 0x439   : > { %3818 = vmatpush1.bf16.msra.mxu0 %v6710_v0 }
 0x43b   : > { %2114 = vmatpush1.bf16.msra.mxu1 %v7502_v2  ;;  %v6695_v2 = vcombine.high %v2257_v60, %v2265_v61 }
 0x43c   : > { %2115 = vmatprep.subr.bf16.mxu1 %v7507_v3  ;;  %v6697_v3 = vcombine.high %v2258_v62, %v2266_v63 }
 0x43d   : > { %3819 = vmatprep.subr.bf16.mxu0 %v6695_v2 }
 0x43f   : > { %2116 = vmatpush1.bf16.msra.mxu1 %v7505_v4  ;;  %v2241_v4 = vld [vmem:[%s8793_s9 + $0x180] sm:$0xff] }
 0x440   : > { %2117 = vmatprep.subr.bf16.mxu1 %v7510_v5  ;;  %v2249_v5 = vld [vmem:[%s8793_s9 + $0x1c0] sm:$0xff] }
 0x443   : > { %2118 = vmatpush2.bf16.msra.mxu1 %v7508_v8  ;;  %v2242_v8 = vld [vmem:[%s8793_s9 + $0x188] sm:$0xff] }
 0x444   : > { %2119 = vmatprep.subr.bf16.mxu1 %v7513_v9  ;;  %v2250_v9 = vld [vmem:[%s8793_s9 + $0x1c8] sm:$0xff] }
 0x447   : > { %2120 = vmatpush2.bf16.msra.mxu1 %v7511_v10  ;;  %v6694_v10 = vcombine.low %v2257_v60, %v2265_v61 }
 0x448   : > { %2121 = vmatprep.subr.bf16.mxu1 %v7516_v11  ;;  %v6696_v11 = vcombine.low %v2258_v62, %v2266_v63  ;;  %v7929_v63 = vld [vmem:[#allocation2 + $0x8] sm:$0xff] }
 0x449   : > { %3820 = vmatpush1.bf16.msra.mxu0 %v6694_v10  ;;  %v2418_v10 = vld [vmem:[%s8793_s9 + $0x708] sm:$0xff] }
 0x44b   : > { %2122 = vmatpush2.bf16.msra.mxu1 %v7514_v12  ;;  %v6679_v12 = vcombine.high %v2241_v4, %v2249_v5 }
 0x44c   : > { %2123 = vmatprep.subr.bf16.mxu1 %v7519_v13  ;;  %v6681_v13 = vcombine.high %v2242_v8, %v2250_v9 }
 0x44d   : > { %3821 = vmatprep.subr.bf16.mxu0 %v6679_v12  ;;  %v2426_v12 = vld [vmem:[%s8793_s9 + $0x748] sm:$0xff] }
 0x44f   : > { %2124 = vmatpush2.bf16.msra.mxu1 %v7517_v14  ;;  %v2225_v14 = vld [vmem:[%s8793_s9 + $0x100] sm:$0xff] }
 0x450   : > { %2125 = vmatprep.subr.bf16.mxu1 %v7522_v15  ;;  %v2233_v15 = vld [vmem:[%s8793_s9 + $0x140] sm:$0xff] }
 0x453   : > { %2126 = vmatpush2.bf16.msra.mxu1 %v7520_v16  ;;  %v2226_v16 = vld [vmem:[%s8793_s9 + $0x108] sm:$0xff] }
 0x454   : > { %2127 = vmatprep.subr.bf16.mxu1 %v7525_v17  ;;  %v2234_v17 = vld [vmem:[%s8793_s9 + $0x148] sm:$0xff] }
 0x457   : > { %2128 = vmatpush2.bf16.msra.mxu1 %v7523_v18  ;;  %v6678_v18 = vcombine.low %v2241_v4, %v2249_v5 }
 0x458   : > { %2129 = vmatprep.subr.bf16.mxu1 %v7528_v19  ;;  %v6680_v19 = vcombine.low %v2242_v8, %v2250_v9  ;;  %v2417_v8 = vld [vmem:[%s8793_s9 + $0x700] sm:$0xff] }
 0x459   : > { %3822 = vmatpush1.bf16.msra.mxu0 %v6678_v18  ;;  %v2425_v9 = vld [vmem:[%s8793_s9 + $0x740] sm:$0xff]  ;;  %v2402_v18 = vld [vmem:[%s8793_s9 + $0x688] sm:$0xff] }
 0x45b   : > { %2130 = vmatpush2.bf16.msra.mxu1 %v7526_v20  ;;  %v6663_v20 = vcombine.high %v2225_v14, %v2233_v15 }
 0x45c   : > { %2131 = vmatprep.subr.bf16.mxu1 %v7531_v22  ;;  %v2209_v22 = vld [vmem:[%s8793_s9 + $0x80] sm:$0xff] }
 0x45d   : > { %3823 = vmatprep.subr.bf16.mxu0 %v6663_v20  ;;  %v2410_v20 = vld [vmem:[%s8793_s9 + $0x6c8] sm:$0xff] }
 0x45f   : > { %2132 = vmatpush2.bf16.msra.mxu1 %v7529_v21  ;;  %v6665_v21 = vcombine.high %v2226_v16, %v2234_v17 }
 0x460   : > { %3854 = vmatprep.subr.bf16.mxu1 %v6745_v42 }
 0x4e2   : > { %v1886_v23 = vpop.f32.mrf.mxu1 }
 0x4e3   : > { %v1896_v24 = vpack.c.bf16 %v1886_v23, %v1886_v23  ;;  %v2217_v23 = vld [vmem:[%s8793_s9 + $0xc0] sm:$0xff] }
 0x4e4   : > { %v7187_v25 = vpop.f32.mrf.mxu1  ;;  %v6646_v34 = vcombine.low %v2209_v22, %v2217_v23 }
 0x4e5   : > { %2133 = vmatprep.mubr.bf16.mxu1 %v1896_v24  ;;  %v2210_v24 = vld [vmem:[%s8793_s9 + $0x88] sm:$0xff] }
 0x4e6   : > { %v1784_v26 = vpop.f32.mrf.mxu0  ;;  %v1889_v27 = vpop.f32.mrf.mxu1  ;;  %v2218_v25 = vld [vmem:[%s8793_s9 + $0xc8] sm:$0xff] }
 0x4e7   : > { %v1895_v28 = vpack.c.bf16 %v1784_v26, %v1784_v26  ;;  %v6662_v26 = vcombine.low %v2225_v14, %v2233_v15  ;;  %v6664_v27 = vcombine.low %v2226_v16, %v2234_v17  ;;  %v6648_v35 = vcombine.low %v2210_v24, %v2218_v25  ;;  %v2401_v16 = vld [vmem:[%s8793_s9 + $0x680] sm:$0xff] }
 0x4e8   : > { %v7175_v29 = vpop.f32.mrf.mxu0  ;;  %v7188_v30 = vpop.f32.mrf.mxu1  ;;  %v6856_v14 = vcombine.low %v2418_v10, %v2426_v12  ;;  %v6857_v15 = vcombine.high %v2418_v10, %v2426_v12  ;;  %v2409_v17 = vld [vmem:[%s8793_s9 + $0x6c0] sm:$0xff]  ;;  %v2315_v10 = vld [vmem:[%s8793_s9 + $0x3d0] sm:$0xff] }
 0x4e9   : > { %2134 = vmatmul.mubr.bf16.vlgmr.msra.gmra.mxu1 %v1895_v28  ;;  %v6647_v28 = vcombine.high %v2209_v22, %v2217_v23  ;;  %v6649_v29 = vcombine.high %v2210_v24, %v2218_v25  ;;  %v2193_v30 = vld [vmem:[%s8793_s9] sm:$0xff]  ;;  %3824 = vmatpush1.bf16.msra.mxu0 %v6662_v26  ;;  %v6840_v22 = vcombine.low %v2402_v18, %v2410_v20  ;;  %v2386_v26 = vld [vmem:[%s8793_s9 + $0x608] sm:$0xff] }
 0x4ea   : > { %v1787_v31 = vpop.f32.mrf.mxu0  ;;  %3855 = vmatpush1.bf16.msra.mxu1 %v6744_v41  ;;  %v2442_v41 = vld [vmem:[%s8793_s9 + $0x7c8] sm:$0xff]  ;;  %v6841_v23 = vcombine.high %v2402_v18, %v2410_v20  ;;  %v2385_v24 = vld [vmem:[%s8793_s9 + $0x600] sm:$0xff] }
 0x4eb   : > { %3856 = vmatprep.subr.bf16.mxu1 %v6729_v51  ;;  %v2201_v31 = vld [vmem:[%s8793_s9 + $0x40] sm:$0xff]  ;;  %3825 = vmatprep.subr.bf16.mxu0 %v6647_v28  ;;  %v6873_v49 = vcombine.high %v2434_v40, %v2442_v41  ;;  %v6872_v51 = vcombine.low %v2434_v40, %v2442_v41  ;;  %v2394_v28 = vld [vmem:[%s8793_s9 + $0x648] sm:$0xff] }
 0x4ec   : > { %v7176_v32 = vpop.f32.mrf.mxu0  ;;  %v6631_v36 = vcombine.high %v2193_v30, %v2201_v31  ;;  %v6630_v42 = vcombine.low %v2193_v30, %v2201_v31  ;;  %v2393_v25 = vld [vmem:[%s8793_s9 + $0x640] sm:$0xff]  ;;  %v6824_v30 = vcombine.low %v2386_v26, %v2394_v28  ;;  %v6825_v31 = vcombine.high %v2386_v26, %v2394_v28 }
 0x4ed   : > { %v2194_v32 = vld [vmem:[%s8793_s9 + $0x8] sm:$0xff]  ;;  %3826 = vmatpush1.bf16.msra.mxu0 %v6646_v34  ;;  %v2353_v40 = vld [vmem:[%s8793_s9 + $0x500] sm:$0xff] }
 0x4ee   : > { %3857 = vmatpush1.bf16.msra.mxu1 %v6728_v57  ;;  %v6633_v37 = vcombine.high %v2194_v32, %v2202_v33  ;;  %3827 = vmatprep.subr.bf16.mxu0 %v6631_v36  ;;  %v6632_v43 = vcombine.low %v2194_v32, %v2202_v33  ;;  %v2369_v32 = vld [vmem:[%s8793_s9 + $0x580] sm:$0xff]  ;;  %v2370_v34 = vld [vmem:[%s8793_s9 + $0x588] sm:$0xff] }
 0x4ef   : > { %3858 = vmatprep.subr.bf16.mxu1 %v6713_v59  ;;  %v7928_v59 = vld [vmem:[#allocation2] sm:$0xff]  ;;  %v2377_v33 = vld [vmem:[%s8793_s9 + $0x5c0] sm:$0xff] }
 0x4f0   : > { %v2378_v36 = vld [vmem:[%s8793_s9 + $0x5c8] sm:$0xff]  ;;  %v2361_v41 = vld [vmem:[%s8793_s9 + $0x540] sm:$0xff] }
 0x4f1   : > { %3828 = vmatpush1.bf16.msra.mxu0 %v6630_v42  ;;  %v6808_v38 = vcombine.low %v2370_v34, %v2378_v36  ;;  %v6809_v39 = vcombine.high %v2370_v34, %v2378_v36  ;;  %v2354_v42 = vld [vmem:[%s8793_s9 + $0x508] sm:$0xff] }
 0x4f2   : > { %3859 = vmatpush1.bf16.msra.mxu1 %v6712_v1  ;;  %3829 = vmatprep.subr.bf16.mxu0 %v6871_v46  ;;  %v2362_v46 = vld [vmem:[%s8793_s9 + $0x548] sm:$0xff] }
 0x4f3   : > { %3860 = vmatprep.subr.bf16.mxu1 %v6697_v3 }
 0x4f5   : > { %3830 = vmatpush2.bf16.msra.mxu0 %v6870_v50  ;;  %v6792_v50 = vcombine.low %v2354_v42, %v2362_v46 }
 0x4f6   : > { %3861 = vmatpush1.bf16.msra.mxu1 %v6696_v11  ;;  %v6855_v11 = vcombine.high %v2417_v8, %v2425_v9 }
 0x4f7   : > { %3862 = vmatprep.subr.bf16.mxu1 %v6681_v13  ;;  %v6854_v13 = vcombine.low %v2417_v8, %v2425_v9  ;;  %v2307_v9 = vld [vmem:[%s8793_s9 + $0x390] sm:$0xff] }
 0x4f8   : > { %3831 = vmatprep.subr.bf16.mxu0 %v6855_v11  ;;  %v2308_v11 = vld [vmem:[%s8793_s9 + $0x398] sm:$0xff]  ;;  %v6747_v12 = vcombine.high %v2307_v9, %v2315_v10 }
 0x4f9   : > { %3832 = vmatpush2.bf16.msra.mxu0 %v6854_v13  ;;  %v2316_v13 = vld [vmem:[%s8793_s9 + $0x3d8] sm:$0xff] }
 0x4fa   : > { %3863 = vmatpush1.bf16.msra.mxu1 %v6680_v19  ;;  %v6839_v19 = vcombine.high %v2401_v16, %v2409_v17 }
 0x4fb   : > { %3864 = vmatprep.subr.bf16.mxu1 %v6665_v21  ;;  %v6838_v21 = vcombine.low %v2401_v16, %v2409_v17  ;;  %v6749_v16 = vcombine.high %v2308_v11, %v2316_v13 }
 0x4fc   : > { %3833 = vmatprep.subr.bf16.mxu0 %v6839_v19 }
 0x4fd   : > { %3834 = vmatpush2.bf16.msra.mxu0 %v6838_v21 }
 0x4fe   : > { %3865 = vmatpush1.bf16.msra.mxu1 %v6664_v27  ;;  %v6823_v27 = vcombine.high %v2385_v24, %v2393_v25 }
 0x4ff   : > { %3866 = vmatprep.subr.bf16.mxu1 %v6649_v29  ;;  %v6822_v29 = vcombine.low %v2385_v24, %v2393_v25  ;;  %v2144_v24 = vld [vmem:[%s761_s28] sm:$0x3]  ;;  %v2145_v25 = vld [vmem:[%s9757_s24] sm:$0x3] }
 0x500   : > { %3835 = vmatprep.subr.bf16.mxu0 %v6823_v27  ;;  %v2169_v28 = vrot.slane %v2144_v24, %v8940_v48 }
 0x501   : > { %3836 = vmatpush2.bf16.msra.mxu0 %v6822_v29  ;;  %v2173_v29 = vrot.slane %v2144_v24, %v8946_v53  ;;  %v2212_v24 = vld [vmem:[%s8793_s9 + $0x98] sm:$0xff] }
 0x502   : > { %3867 = vmatpush1.bf16.msra.mxu1 %v6648_v35  ;;  %v6807_v35 = vcombine.high %v2369_v32, %v2377_v33 }
 0x503   : > { %3868 = vmatprep.subr.bf16.mxu1 %v6633_v37  ;;  %v6806_v37 = vcombine.low %v2369_v32, %v2377_v33  ;;  %v2186_v32 = vrot.slane %v2145_v25, %v8946_v53 }
 0x504   : > { %3837 = vmatprep.subr.bf16.mxu0 %v6807_v35 }
 0x505   : > { %3838 = vmatpush2.bf16.msra.mxu0 %v6806_v37  ;;  %v2291_v37 = vld [vmem:[%s8793_s9 + $0x310] sm:$0xff] }
 0x506   : > { %3869 = vmatpush1.bf16.msra.mxu1 %v6632_v43  ;;  %v6791_v43 = vcombine.high %v2353_v40, %v2361_v41 }
 0x507   : > { %3870 = vmatprep.subr.bf16.mxu1 %v6873_v49  ;;  %v6790_v49 = vcombine.low %v2353_v40, %v2361_v41  ;;  %v2300_v40 = vld [vmem:[%s8793_s9 + $0x358] sm:$0xff] }
 0x508   : > { %3839 = vmatprep.subr.bf16.mxu0 %v6791_v43  ;;  %v2275_v43 = vld [vmem:[%s8793_s9 + $0x290] sm:$0xff] }
 0x509   : > { %3840 = vmatpush2.bf16.msra.mxu0 %v6790_v49 }
 0x50a   : > { %3871 = vmatpush2.bf16.msra.mxu1 %v6872_v51  ;;  %v6793_v51 = vcombine.high %v2354_v42, %v2362_v46 }
 0x50b   : > { %3872 = vmatprep.subr.bf16.mxu1 %v6857_v15  ;;  %v6748_v15 = vcombine.low %v2308_v11, %v2316_v13 }
 0x50e   : > { %3873 = vmatpush2.bf16.msra.mxu1 %v6856_v14  ;;  %v6746_v14 = vcombine.low %v2307_v9, %v2315_v10  ;;  %v2252_v9 = vld [vmem:[%s8793_s9 + $0x1d8] sm:$0xff] }
 0x50f   : > { %3874 = vmatprep.subr.bf16.mxu1 %v6841_v23 }
 0x512   : > { %3875 = vmatpush2.bf16.msra.mxu1 %v6840_v22 }
 0x513   : > { %3876 = vmatprep.subr.bf16.mxu1 %v6825_v31  ;;  %v2182_v31 = vrot.slane %v2145_v25, %v8940_v48  ;;  %v2220_v25 = vld [vmem:[%s8793_s9 + $0xd8] sm:$0xff] }
 0x516   : > { %3877 = vmatpush2.bf16.msra.mxu1 %v6824_v30 }
 0x517   : > { %3878 = vmatprep.subr.bf16.mxu1 %v6809_v39  ;;  %v2292_v39 = vld [vmem:[%s8793_s9 + $0x318] sm:$0xff] }
 0x518   : > { %v6733_v49 = vcombine.high %v2292_v39, %v2300_v40 }
 0x51a   : > { %3879 = vmatpush2.bf16.msra.mxu1 %v6808_v38  ;;  %v2299_v38 = vld [vmem:[%s8793_s9 + $0x350] sm:$0xff] }
 0x51b   : > { %3880 = vmatprep.subr.bf16.mxu1 %v6793_v51  ;;  %v6731_v46 = vcombine.high %v2291_v37, %v2299_v38  ;;  %v2276_v51 = vld [vmem:[%s8793_s9 + $0x298] sm:$0xff] }
 0x51e   : > { %3881 = vmatpush2.bf16.msra.mxu1 %v6792_v50  ;;  %v2283_v50 = vld [vmem:[%s8793_s9 + $0x2d0] sm:$0xff] }
 0x5a9   : > { %v2135_v56 = vpop.f32.mrf.mxu1 }
 0x5aa   : > { %v2136_v57 = vadd.f32 %v2135_v56, %v1934_v54  ;;  %v2345_v54 = vld [vmem:[%s8793_s9 + $0x4c0] sm:$0xff] }
 0x5ab   : > { %v2137_v58 = vpop.f32.mrf.mxu1  ;;  %v6775_v56 = vcombine.high %v2337_v52, %v2345_v54 }
 0x5ac   : > { %v9037_v60 = vadd.f32 %v7928_v59, %v2136_v57  ;;  %v2138_v61 = vadd.f32 %v2137_v58, %v1938_v55  ;;  %v2338_v55 = vld [vmem:[%s8793_s9 + $0x488] sm:$0xff]  ;;  %v6774_v58 = vcombine.low %v2337_v52, %v2345_v54  ;;  %v2284_v52 = vld [vmem:[%s8793_s9 + $0x2d8] sm:$0xff]  ;;  %v6730_v54 = vcombine.low %v2291_v37, %v2299_v38  ;;  %v2435_v38 = vld [vmem:[%s8793_s9 + $0x790] sm:$0xff] }
 0x5ad   : > { %v2139_v62 = vpop.f32.mrf.mxu1  ;;  %v2346_v57 = vld [vmem:[%s8793_s9 + $0x4c8] sm:$0xff]  ;;  %3841 = vmatprep.subr.bf16.mxu0 %v6775_v56  ;;  %v6715_v56 = vcombine.high %v2275_v43, %v2283_v50 }
 0x5ae   : > { %v9039_v0 = vadd.f32 %v7929_v63, %v2138_v61  ;;  %v2151_v3 = vmul.f32 %v9037_v60, %v9037_v60  ;;  %v6776_v59 = vcombine.low %v2338_v55, %v2346_v57  ;;  %v6777_v61 = vcombine.high %v2338_v55, %v2346_v57  ;;  %3842 = vmatpush2.bf16.msra.mxu0 %v6774_v58  ;;  %v2321_v62 = vld [vmem:[%s8793_s9 + $0x400] sm:$0xff]  ;;  %v2259_v58 = vld [vmem:[%s8793_s9 + $0x210] sm:$0xff] }
 0x5af   : > { %v2140_v1 = vpop.f32.mrf.mxu1  ;;  %v2329_v63 = vld [vmem:[%s8793_s9 + $0x440] sm:$0xff]  ;;  %v6732_v55 = vcombine.low %v2292_v39, %v2300_v40  ;;  %v6717_v57 = vcombine.high %v2276_v51, %v2284_v52  ;;  %v2443_v39 = vld [vmem:[%s8793_s9 + $0x7d0] sm:$0xff]  ;;  %v2436_v40 = vld [vmem:[%s8793_s9 + $0x798] sm:$0xff] }
 0x5b0   : > { %v2146_v2 = vadd.f32 %v9039_v0, %v9037_v60  ;;  %v2152_v4 = vmul.f32 %v9039_v0, %v9039_v0  ;;  %3882 = vmatprep.subr.bf16.mxu1 %v6777_v61  ;;  %v2322_v1 = vld [vmem:[%s8793_s9 + $0x408] sm:$0xff]  ;;  %v2260_v61 = vld [vmem:[%s8793_s9 + $0x218] sm:$0xff] }
 0x5b1   : > { %3883 = vmatpush2.bf16.msra.mxu1 %v6776_v59  ;;  %v2267_v59 = vld [vmem:[%s8793_s9 + $0x250] sm:$0xff] }
 0x5b2   : > { %2147 = vadd.xlane.f32.xlu0 %v2146_v2  ;;  %v2153_v5 = vadd.f32 %v2152_v4, %v2151_v3  ;;  %v6759_v2 = vcombine.high %v2321_v62, %v2329_v63  ;;  %v2330_v3 = vld [vmem:[%s8793_s9 + $0x448] sm:$0xff]  ;;  %v6758_v4 = vcombine.low %v2321_v62, %v2329_v63  ;;  %v2268_v62 = vld [vmem:[%s8793_s9 + $0x258] sm:$0xff]  ;;  %v6714_v63 = vcombine.low %v2275_v43, %v2283_v50 }
 0x5b3   : > { %v6761_v8 = vcombine.high %v2322_v1, %v2330_v3  ;;  %v6698_v10 = vcombine.low %v2259_v58, %v2267_v59  ;;  %v6700_v11 = vcombine.low %v2260_v61, %v2268_v62  ;;  %v2444_v43 = vld [vmem:[%s8793_s9 + $0x7d8] sm:$0xff]  ;;  %v6875_v50 = vcombine.high %v2435_v38, %v2443_v39 }
 0x5b4   : > { %2154 = vadd.xlane.f32.xlu1 %v2153_v5  ;;  %v6760_v5 = vcombine.low %v2322_v1, %v2330_v3  ;;  %3843 = vmatprep.subr.bf16.mxu0 %v6759_v2  ;;  %v6716_v1 = vcombine.low %v2276_v51, %v2284_v52  ;;  %v6699_v2 = vcombine.high %v2259_v58, %v2267_v59  ;;  %v2419_v52 = vld [vmem:[%s8793_s9 + $0x710] sm:$0xff] }
 0x5b5   : > { %3884 = vmatprep.subr.bf16.mxu1 %v6761_v8  ;;  %3844 = vmatpush2.bf16.msra.mxu0 %v6758_v4  ;;  %v6701_v3 = vcombine.high %v2260_v61, %v2268_v62  ;;  %v2243_v4 = vld [vmem:[%s8793_s9 + $0x190] sm:$0xff]  ;;  %v2244_v8 = vld [vmem:[%s8793_s9 + $0x198] sm:$0xff]  ;;  %v6877_v51 = vcombine.high %v2436_v40, %v2444_v43  ;;  %v6876_v58 = vcombine.low %v2436_v40, %v2444_v43 }
 0x5b6   : > { %3885 = vmatpush2.bf16.msra.mxu1 %v6760_v5  ;;  %3895 = vmatprep.subr.bf16.mxu0 %v6747_v12  ;;  %v2251_v5 = vld [vmem:[%s8793_s9 + $0x1d0] sm:$0xff]  ;;  %v6685_v13 = vcombine.high %v2244_v8, %v2252_v9 }
 0x5b7   : > { %3936 = vmatprep.subr.bf16.mxu1 %v6749_v16  ;;  %v6683_v12 = vcombine.high %v2243_v4, %v2251_v5  ;;  %v2228_v16 = vld [vmem:[%s8793_s9 + $0x118] sm:$0xff]  ;;  %v2403_v62 = vld [vmem:[%s8793_s9 + $0x690] sm:$0xff] }
 0x5b8   : > { %v2323_v43 = vld [vmem:[%s8793_s9 + $0x410] sm:$0xff] }
 0x63b   : > { %v2148_v17 = vpop.xlane.xlu0 %2147 }
 0x63c   : > { %v2150_v18 = vmul.f32 0.00390625, %v2148_v17  ;;  %v2236_v17 = vld [vmem:[%s8793_s9 + $0x158] sm:$0xff] }
 0x63d   : > { %v2155_v19 = vpop.xlane.xlu1 %2154 }
 0x63e   : > { %v2156_v20 = vmul.f32 0.00390625, %v2155_v19  ;;  %v2157_v21 = vmul.f32 %v2150_v18, %v2150_v18  ;;  %v2159_v26 = vsub.f32 %v9037_v60, %v2150_v18  ;;  %v2160_v27 = vsub.f32 %v9039_v0, %v2150_v18 }
 0x63f   : > { %v6682_v18 = vcombine.low %v2243_v4, %v2251_v5  ;;  %v6684_v19 = vcombine.low %v2244_v8, %v2252_v9  ;;  %v2387_v9 = vld [vmem:[%s8793_s9 + $0x610] sm:$0xff] }
 0x640   : > { %v2158_v22 = vsub.f32 %v2156_v20, %v2157_v21  ;;  %v6669_v21 = vcombine.high %v2228_v16, %v2236_v17 }
 0x642   : > { %v2161_v23 = vadd.f32 1e-05, %v2158_v22  ;;  %v2211_v22 = vld [vmem:[%s8793_s9 + $0x90] sm:$0xff] }
 0x644   : > { %7924 = vrsqrt.f32 %v2161_v23  ;;  %v2219_v23 = vld [vmem:[%s8793_s9 + $0xd0] sm:$0xff] }
 0x651   : > { %v7925_v30 = vpop.eup %7924 }
 0x652   : > { %v2163_v33 = vmul.f32 %v7925_v30, %v2159_v26  ;;  %v2164_v34 = vmul.f32 %v7925_v30, %v2160_v27  ;;  %v6668_v27 = vcombine.low %v2228_v16, %v2236_v17  ;;  %v2195_v30 = vld [vmem:[%s8793_s9 + $0x10] sm:$0xff] }
 0x653   : > { %v2371_v17 = vld [vmem:[%s8793_s9 + $0x590] sm:$0xff] }
 0x654   : > { %v2176_v35 = vmul.f32 %v2169_v28, %v2163_v33  ;;  %v2177_v36 = vmul.f32 %v2173_v29, %v2164_v34  ;;  %v6651_v28 = vcombine.high %v2211_v22, %v2219_v23  ;;  %v6653_v29 = vcombine.high %v2212_v24, %v2220_v25  ;;  %v2204_v33 = vld [vmem:[%s8793_s9 + $0x58] sm:$0xff] }
 0x655   : > { %v6650_v34 = vcombine.low %v2211_v22, %v2219_v23 }
 0x656   : > { %v9089_v60 = vadd.f32 %v2182_v31, %v2176_v35  ;;  %v9091_v0 = vadd.f32 %v2186_v32, %v2177_v36  ;;  %v2203_v31 = vld [vmem:[%s8793_s9 + $0x50] sm:$0xff]  ;;  %v2196_v32 = vld [vmem:[%s8793_s9 + $0x18] sm:$0xff]  ;;  %v6652_v35 = vcombine.low %v2212_v24, %v2220_v25 }
 0x657   : > { %v6635_v36 = vcombine.high %v2195_v30, %v2203_v31  ;;  %v6637_v37 = vcombine.high %v2196_v32, %v2204_v33  ;;  %v2355_v25 = vld [vmem:[%s8793_s9 + $0x510] sm:$0xff] }
 0x658   : > { %v9099_v41 = vpack.c.bf16 %v9089_v60, %v9089_v60  ;;  %v9103_v42 = vpack.c.bf16 %v9091_v0, %v9091_v0 }
 0x65a   : > { %3845 = vmatprep.mubr.bf16.mxu0 %v9103_v42  ;;  %3886 = vmatprep.mubr.bf16.mxu1 %v9103_v42 }
 0x65b   : > { %3846 = vmatmul.mubr.bf16.vlgmr.msra.gmra.mxu0 %v9099_v41  ;;  %3887 = vmatmul.mubr.bf16.vlgmr.msra.gmra.mxu1 %v9099_v41 }
 0x65c   : > { %3896 = vmatpush1.bf16.msra.mxu0 %v6746_v14  ;;  %3937 = vmatpush1.bf16.msra.mxu1 %v6748_v15  ;;  %v2227_v14 = vld [vmem:[%s8793_s9 + $0x110] sm:$0xff] }
 0x65d   : > { %3927 = vmatprep.mubr.bf16.mxu0 %v9103_v42  ;;  %3968 = vmatprep.mubr.bf16.mxu1 %v9103_v42  ;;  %v2235_v15 = vld [vmem:[%s8793_s9 + $0x150] sm:$0xff] }
 0x65e   : > { %3897 = vmatprep.subr.bf16.mxu0 %v6731_v46  ;;  %3938 = vmatprep.subr.bf16.mxu1 %v6733_v49  ;;  %v6667_v20 = vcombine.high %v2227_v14, %v2235_v15  ;;  %v6666_v26 = vcombine.low %v2227_v14, %v2235_v15  ;;  %v6634_v46 = vcombine.low %v2195_v30, %v2203_v31 }
 0x65f   : > { %v6636_v49 = vcombine.low %v2196_v32, %v2204_v33  ;;  %v2339_v33 = vld [vmem:[%s8793_s9 + $0x490] sm:$0xff] }
 0x660   : > { %3898 = vmatpush1.bf16.msra.mxu0 %v6730_v54  ;;  %3939 = vmatpush1.bf16.msra.mxu1 %v6732_v55  ;;  %v2427_v54 = vld [vmem:[%s8793_s9 + $0x750] sm:$0xff]  ;;  %v2420_v55 = vld [vmem:[%s8793_s9 + $0x718] sm:$0xff] }
 0x661   : > { %3899 = vmatprep.subr.bf16.mxu0 %v6715_v56  ;;  %3940 = vmatprep.subr.bf16.mxu1 %v6717_v57  ;;  %v2428_v56 = vld [vmem:[%s8793_s9 + $0x758] sm:$0xff]  ;;  %v6874_v57 = vcombine.low %v2435_v38, %v2443_v39  ;;  %v6859_v59 = vcombine.high %v2419_v52, %v2427_v54 }
 0x662   : > { %v6861_v61 = vcombine.high %v2420_v55, %v2428_v56  ;;  %v6860_v4 = vcombine.low %v2420_v55, %v2428_v56  ;;  %v2309_v56 = vld [vmem:[%s8793_s9 + $0x3a0] sm:$0xff] }
 0x664   : > { %3900 = vmatpush1.bf16.msra.mxu0 %v6714_v63  ;;  %3941 = vmatpush1.bf16.msra.mxu1 %v6716_v1  ;;  %v2411_v63 = vld [vmem:[%s8793_s9 + $0x6d0] sm:$0xff]  ;;  %v2404_v1 = vld [vmem:[%s8793_s9 + $0x698] sm:$0xff] }
 0x665   : > { %3901 = vmatprep.subr.bf16.mxu0 %v6699_v2  ;;  %3942 = vmatprep.subr.bf16.mxu1 %v6701_v3  ;;  %v2412_v2 = vld [vmem:[%s8793_s9 + $0x6d8] sm:$0xff]  ;;  %v6858_v3 = vcombine.low %v2419_v52, %v2427_v54  ;;  %v6843_v5 = vcombine.high %v2403_v62, %v2411_v63 }
 0x666   : > { %v6845_v8 = vcombine.high %v2404_v1, %v2412_v2  ;;  %v6844_v14 = vcombine.low %v2404_v1, %v2412_v2  ;;  %v2293_v2 = vld [vmem:[%s8793_s9 + $0x320] sm:$0xff] }
 0x668   : > { %3902 = vmatpush1.bf16.msra.mxu0 %v6698_v10  ;;  %3943 = vmatpush1.bf16.msra.mxu1 %v6700_v11  ;;  %v2395_v10 = vld [vmem:[%s8793_s9 + $0x650] sm:$0xff]  ;;  %v2388_v11 = vld [vmem:[%s8793_s9 + $0x618] sm:$0xff] }
 0x669   : > { %3903 = vmatprep.subr.bf16.mxu0 %v6683_v12  ;;  %3944 = vmatprep.subr.bf16.mxu1 %v6685_v13  ;;  %v2396_v12 = vld [vmem:[%s8793_s9 + $0x658] sm:$0xff]  ;;  %v6842_v13 = vcombine.low %v2403_v62, %v2411_v63  ;;  %v6827_v15 = vcombine.high %v2387_v9, %v2395_v10 }
 0x66a   : > { %v6829_v16 = vcombine.high %v2388_v11, %v2396_v12  ;;  %v6828_v22 = vcombine.low %v2388_v11, %v2396_v12  ;;  %v2277_v12 = vld [vmem:[%s8793_s9 + $0x2a0] sm:$0xff] }
 0x66c   : > { %3904 = vmatpush1.bf16.msra.mxu0 %v6682_v18  ;;  %3945 = vmatpush1.bf16.msra.mxu1 %v6684_v19  ;;  %v2379_v18 = vld [vmem:[%s8793_s9 + $0x5d0] sm:$0xff]  ;;  %v2372_v19 = vld [vmem:[%s8793_s9 + $0x598] sm:$0xff] }
 0x66d   : > { %3905 = vmatprep.subr.bf16.mxu0 %v6667_v20  ;;  %3946 = vmatprep.subr.bf16.mxu1 %v6669_v21  ;;  %v2380_v20 = vld [vmem:[%s8793_s9 + $0x5d8] sm:$0xff]  ;;  %v6826_v21 = vcombine.low %v2387_v9, %v2395_v10  ;;  %v6811_v23 = vcombine.high %v2371_v17, %v2379_v18 }
 0x66e   : > { %v6813_v24 = vcombine.high %v2372_v19, %v2380_v20  ;;  %v6812_v30 = vcombine.low %v2372_v19, %v2380_v20  ;;  %v2261_v20 = vld [vmem:[%s8793_s9 + $0x220] sm:$0xff] }
 0x670   : > { %3906 = vmatpush1.bf16.msra.mxu0 %v6666_v26  ;;  %3947 = vmatpush1.bf16.msra.mxu1 %v6668_v27  ;;  %v2363_v26 = vld [vmem:[%s8793_s9 + $0x550] sm:$0xff]  ;;  %v2356_v27 = vld [vmem:[%s8793_s9 + $0x518] sm:$0xff] }
 0x671   : > { %3907 = vmatprep.subr.bf16.mxu0 %v6651_v28  ;;  %3948 = vmatprep.subr.bf16.mxu1 %v6653_v29  ;;  %v2364_v28 = vld [vmem:[%s8793_s9 + $0x558] sm:$0xff]  ;;  %v6810_v29 = vcombine.low %v2371_v17, %v2379_v18  ;;  %v6795_v31 = vcombine.high %v2355_v25, %v2363_v26 }
 0x672   : > { %v6797_v32 = vcombine.high %v2356_v27, %v2364_v28  ;;  %v6796_v38 = vcombine.low %v2356_v27, %v2364_v28  ;;  %v2245_v28 = vld [vmem:[%s8793_s9 + $0x1a0] sm:$0xff] }
 0x674   : > { %3908 = vmatpush1.bf16.msra.mxu0 %v6650_v34  ;;  %3949 = vmatpush1.bf16.msra.mxu1 %v6652_v35  ;;  %v2347_v34 = vld [vmem:[%s8793_s9 + $0x4d0] sm:$0xff]  ;;  %v2340_v35 = vld [vmem:[%s8793_s9 + $0x498] sm:$0xff] }
 0x675   : > { %3909 = vmatprep.subr.bf16.mxu0 %v6635_v36  ;;  %3950 = vmatprep.subr.bf16.mxu1 %v6637_v37  ;;  %v2348_v36 = vld [vmem:[%s8793_s9 + $0x4d8] sm:$0xff]  ;;  %v6794_v37 = vcombine.low %v2355_v25, %v2363_v26  ;;  %v6779_v39 = vcombine.high %v2339_v33, %v2347_v34 }
 0x676   : > { %v6781_v40 = vcombine.high %v2340_v35, %v2348_v36  ;;  %v6780_v52 = vcombine.low %v2340_v35, %v2348_v36  ;;  %v2229_v36 = vld [vmem:[%s8793_s9 + $0x120] sm:$0xff] }
 0x678   : > { %3910 = vmatpush1.bf16.msra.mxu0 %v6634_v46  ;;  %3951 = vmatpush1.bf16.msra.mxu1 %v6636_v49  ;;  %v2331_v46 = vld [vmem:[%s8793_s9 + $0x450] sm:$0xff]  ;;  %v2324_v49 = vld [vmem:[%s8793_s9 + $0x418] sm:$0xff] }
 0x679   : > { %3911 = vmatprep.subr.bf16.mxu0 %v6875_v50  ;;  %3952 = vmatprep.subr.bf16.mxu1 %v6877_v51  ;;  %v2332_v50 = vld [vmem:[%s8793_s9 + $0x458] sm:$0xff]  ;;  %v6778_v51 = vcombine.low %v2339_v33, %v2347_v34  ;;  %v6763_v54 = vcombine.high %v2323_v43, %v2331_v46 }
 0x67a   : > { %v6765_v55 = vcombine.high %v2324_v49, %v2332_v50  ;;  %v6764_v62 = vcombine.low %v2324_v49, %v2332_v50  ;;  %v2213_v50 = vld [vmem:[%s8793_s9 + $0xa0] sm:$0xff] }
 0x67c   : > { %3912 = vmatpush2.bf16.msra.mxu0 %v6874_v57  ;;  %3953 = vmatpush2.bf16.msra.mxu1 %v6876_v58  ;;  %v2317_v57 = vld [vmem:[%s8793_s9 + $0x3e0] sm:$0xff]  ;;  %v2310_v58 = vld [vmem:[%s8793_s9 + $0x3a8] sm:$0xff] }
 0x67d   : > { %3913 = vmatprep.subr.bf16.mxu0 %v6859_v59  ;;  %3954 = vmatprep.subr.bf16.mxu1 %v6861_v61  ;;  %v2318_v59 = vld [vmem:[%s8793_s9 + $0x3e8] sm:$0xff]  ;;  %v6762_v61 = vcombine.low %v2323_v43, %v2331_v46  ;;  %v6751_v63 = vcombine.high %v2309_v56, %v2317_v57 }
 0x67e   : > { %v6753_v1 = vcombine.high %v2310_v58, %v2318_v59  ;;  %v6752_v9 = vcombine.low %v2310_v58, %v2318_v59  ;;  %v2197_v59 = vld [vmem:[%s8793_s9 + $0x20] sm:$0xff] }
 0x680   : > { %3914 = vmatpush2.bf16.msra.mxu0 %v6858_v3  ;;  %3955 = vmatpush2.bf16.msra.mxu1 %v6860_v4  ;;  %v2301_v3 = vld [vmem:[%s8793_s9 + $0x360] sm:$0xff]  ;;  %v2294_v4 = vld [vmem:[%s8793_s9 + $0x328] sm:$0xff] }
 0x681   : > { %3915 = vmatprep.subr.bf16.mxu0 %v6843_v5  ;;  %3956 = vmatprep.subr.bf16.mxu1 %v6845_v8  ;;  %v2302_v5 = vld [vmem:[%s8793_s9 + $0x368] sm:$0xff]  ;;  %v6750_v8 = vcombine.low %v2309_v56, %v2317_v57  ;;  %v6735_v10 = vcombine.high %v2293_v2, %v2301_v3 }
 0x682   : > { %v6737_v11 = vcombine.high %v2294_v4, %v2302_v5  ;;  %v6736_v17 = vcombine.low %v2294_v4, %v2302_v5  ;;  %v2437_v5 = vld [vmem:[%s8793_s9 + $0x7a0] sm:$0xff] }
 0x684   : > { %3916 = vmatpush2.bf16.msra.mxu0 %v6842_v13  ;;  %3957 = vmatpush2.bf16.msra.mxu1 %v6844_v14  ;;  %v2285_v13 = vld [vmem:[%s8793_s9 + $0x2e0] sm:$0xff]  ;;  %v2278_v14 = vld [vmem:[%s8793_s9 + $0x2a8] sm:$0xff] }
 0x685   : > { %3917 = vmatprep.subr.bf16.mxu0 %v6827_v15  ;;  %3958 = vmatprep.subr.bf16.mxu1 %v6829_v16  ;;  %v2286_v15 = vld [vmem:[%s8793_s9 + $0x2e8] sm:$0xff]  ;;  %v6734_v16 = vcombine.low %v2293_v2, %v2301_v3  ;;  %v6719_v18 = vcombine.high %v2277_v12, %v2285_v13 }
 0x686   : > { %v6721_v19 = vcombine.high %v2278_v14, %v2286_v15  ;;  %v6720_v25 = vcombine.low %v2278_v14, %v2286_v15  ;;  %v2421_v15 = vld [vmem:[%s8793_s9 + $0x720] sm:$0xff] }
 0x688   : > { %3918 = vmatpush2.bf16.msra.mxu0 %v6826_v21  ;;  %3959 = vmatpush2.bf16.msra.mxu1 %v6828_v22  ;;  %v2269_v21 = vld [vmem:[%s8793_s9 + $0x260] sm:$0xff]  ;;  %v2262_v22 = vld [vmem:[%s8793_s9 + $0x228] sm:$0xff] }
 0x689   : > { %3919 = vmatprep.subr.bf16.mxu0 %v6811_v23  ;;  %3960 = vmatprep.subr.bf16.mxu1 %v6813_v24  ;;  %v2270_v23 = vld [vmem:[%s8793_s9 + $0x268] sm:$0xff]  ;;  %v6718_v24 = vcombine.low %v2277_v12, %v2285_v13  ;;  %v6703_v26 = vcombine.high %v2261_v20, %v2269_v21 }
 0x68a   : > { %v6705_v27 = vcombine.high %v2262_v22, %v2270_v23  ;;  %v6704_v33 = vcombine.low %v2262_v22, %v2270_v23  ;;  %v2405_v23 = vld [vmem:[%s8793_s9 + $0x6a0] sm:$0xff] }
 0x68c   : > { %3920 = vmatpush2.bf16.msra.mxu0 %v6810_v29  ;;  %3961 = vmatpush2.bf16.msra.mxu1 %v6812_v30  ;;  %v2253_v29 = vld [vmem:[%s8793_s9 + $0x1e0] sm:$0xff]  ;;  %v2246_v30 = vld [vmem:[%s8793_s9 + $0x1a8] sm:$0xff] }
 0x68d   : > { %3921 = vmatprep.subr.bf16.mxu0 %v6795_v31  ;;  %3962 = vmatprep.subr.bf16.mxu1 %v6797_v32  ;;  %v2254_v31 = vld [vmem:[%s8793_s9 + $0x1e8] sm:$0xff]  ;;  %v6702_v32 = vcombine.low %v2261_v20, %v2269_v21  ;;  %v6687_v34 = vcombine.high %v2245_v28, %v2253_v29 }
 0x68e   : > { %v6689_v35 = vcombine.high %v2246_v30, %v2254_v31  ;;  %v6688_v43 = vcombine.low %v2246_v30, %v2254_v31  ;;  %v2389_v31 = vld [vmem:[%s8793_s9 + $0x620] sm:$0xff] }
 0x690   : > { %3922 = vmatpush2.bf16.msra.mxu0 %v6794_v37  ;;  %3963 = vmatpush2.bf16.msra.mxu1 %v6796_v38  ;;  %v2237_v37 = vld [vmem:[%s8793_s9 + $0x160] sm:$0xff]  ;;  %v2230_v38 = vld [vmem:[%s8793_s9 + $0x128] sm:$0xff] }
 0x691   : > { %3923 = vmatprep.subr.bf16.mxu0 %v6779_v39  ;;  %3964 = vmatprep.subr.bf16.mxu1 %v6781_v40  ;;  %v2238_v39 = vld [vmem:[%s8793_s9 + $0x168] sm:$0xff]  ;;  %v6686_v40 = vcombine.low %v2245_v28, %v2253_v29  ;;  %v6671_v46 = vcombine.high %v2229_v36, %v2237_v37 }
 0x692   : > { %v6673_v49 = vcombine.high %v2230_v38, %v2238_v39  ;;  %v6672_v56 = vcombine.low %v2230_v38, %v2238_v39  ;;  %v2373_v39 = vld [vmem:[%s8793_s9 + $0x5a0] sm:$0xff] }
 0x694   : > { %3924 = vmatpush2.bf16.msra.mxu0 %v6778_v51  ;;  %3965 = vmatpush2.bf16.msra.mxu1 %v6780_v52  ;;  %v2221_v51 = vld [vmem:[%s8793_s9 + $0xe0] sm:$0xff]  ;;  %v2214_v52 = vld [vmem:[%s8793_s9 + $0xa8] sm:$0xff] }
 0x695   : > { %3925 = vmatprep.subr.bf16.mxu0 %v6763_v54  ;;  %3966 = vmatprep.subr.bf16.mxu1 %v6765_v55  ;;  %v2222_v54 = vld [vmem:[%s8793_s9 + $0xe8] sm:$0xff]  ;;  %v6670_v55 = vcombine.low %v2229_v36, %v2237_v37  ;;  %v6655_v57 = vcombine.high %v2213_v50, %v2221_v51 }
 0x696   : > { %v6657_v58 = vcombine.high %v2214_v52, %v2222_v54  ;;  %v6656_v2 = vcombine.low %v2214_v52, %v2222_v54  ;;  %v2357_v54 = vld [vmem:[%s8793_s9 + $0x520] sm:$0xff] }
 0x698   : > { %3926 = vmatpush2.bf16.msra.mxu0 %v6762_v61  ;;  %3967 = vmatpush2.bf16.msra.mxu1 %v6764_v62  ;;  %v2205_v61 = vld [vmem:[%s8793_s9 + $0x60] sm:$0xff]  ;;  %v2198_v62 = vld [vmem:[%s8793_s9 + $0x28] sm:$0xff] }
 0x699   : > { %3977 = vmatprep.subr.bf16.mxu0 %v6751_v63  ;;  %4018 = vmatprep.subr.bf16.mxu1 %v6753_v1  ;;  %v2206_v63 = vld [vmem:[%s8793_s9 + $0x68] sm:$0xff]  ;;  %v6654_v1 = vcombine.low %v2213_v50, %v2221_v51  ;;  %v6639_v3 = vcombine.high %v2197_v59, %v2205_v61 }
 0x69a   : > { %v6641_v4 = vcombine.high %v2198_v62, %v2206_v63  ;;  %v6640_v12 = vcombine.low %v2198_v62, %v2206_v63  ;;  %v2341_v63 = vld [vmem:[%s8793_s9 + $0x4a0] sm:$0xff] }
 0x69b   : > { %3928 = vmatmul.mubr.bf16.vlgmr.msra.gmra.mxu0 %v9099_v41  ;;  %3969 = vmatmul.mubr.bf16.vlgmr.msra.gmra.mxu1 %v9099_v41 }
 0x69c   : > { %3978 = vmatpush1.bf16.msra.mxu0 %v6750_v8  ;;  %4009 = vmatprep.mubr.bf16.mxu0 %v9103_v42  ;;  %v2445_v8 = vld [vmem:[%s8793_s9 + $0x7e0] sm:$0xff] }
 0x69d   : > { %4019 = vmatpush1.bf16.msra.mxu1 %v6752_v9  ;;  %4050 = vmatprep.mubr.bf16.mxu1 %v9103_v42  ;;  %v2438_v9 = vld [vmem:[%s8793_s9 + $0x7a8] sm:$0xff]  ;;  %v6879_v13 = vcombine.high %v2437_v5, %v2445_v8 }
 0x69e   : > { %3979 = vmatprep.subr.bf16.mxu0 %v6735_v10  ;;  %4020 = vmatprep.subr.bf16.mxu1 %v6737_v11  ;;  %v2446_v10 = vld [vmem:[%s8793_s9 + $0x7e8] sm:$0xff]  ;;  %v6638_v11 = vcombine.low %v2197_v59, %v2205_v61 }
 0x69f   : > { %v6881_v14 = vcombine.high %v2438_v9, %v2446_v10  ;;  %v6880_v20 = vcombine.low %v2438_v9, %v2446_v10  ;;  %v2325_v10 = vld [vmem:[%s8793_s9 + $0x420] sm:$0xff] }
 0x6a0   : > { %3980 = vmatpush1.bf16.msra.mxu0 %v6734_v16  ;;  %v2429_v16 = vld [vmem:[%s8793_s9 + $0x760] sm:$0xff] }
 0x6a1   : > { %4021 = vmatpush1.bf16.msra.mxu1 %v6736_v17  ;;  %3981 = vmatprep.subr.bf16.mxu0 %v6719_v18  ;;  %v2422_v17 = vld [vmem:[%s8793_s9 + $0x728] sm:$0xff]  ;;  %v6863_v21 = vcombine.high %v2421_v15, %v2429_v16 }
 0x6a2   : > { %4022 = vmatprep.subr.bf16.mxu1 %v6721_v19  ;;  %v2430_v18 = vld [vmem:[%s8793_s9 + $0x768] sm:$0xff]  ;;  %v6878_v19 = vcombine.low %v2437_v5, %v2445_v8 }
 0x6a3   : > { %v6865_v22 = vcombine.high %v2422_v17, %v2430_v18  ;;  %v6864_v28 = vcombine.low %v2422_v17, %v2430_v18  ;;  %v2311_v18 = vld [vmem:[%s8793_s9 + $0x3b0] sm:$0xff] }
 0x6a4   : > { %3982 = vmatpush1.bf16.msra.mxu0 %v6718_v24  ;;  %v2413_v24 = vld [vmem:[%s8793_s9 + $0x6e0] sm:$0xff] }
 0x6a5   : > { %4023 = vmatpush1.bf16.msra.mxu1 %v6720_v25  ;;  %3983 = vmatprep.subr.bf16.mxu0 %v6703_v26  ;;  %v2406_v25 = vld [vmem:[%s8793_s9 + $0x6a8] sm:$0xff]  ;;  %v6847_v29 = vcombine.high %v2405_v23, %v2413_v24 }
 0x6a6   : > { %4024 = vmatprep.subr.bf16.mxu1 %v6705_v27  ;;  %v2414_v26 = vld [vmem:[%s8793_s9 + $0x6e8] sm:$0xff]  ;;  %v6862_v27 = vcombine.low %v2421_v15, %v2429_v16 }
 0x6a7   : > { %v6849_v30 = vcombine.high %v2406_v25, %v2414_v26  ;;  %v6848_v36 = vcombine.low %v2406_v25, %v2414_v26  ;;  %v2295_v26 = vld [vmem:[%s8793_s9 + $0x330] sm:$0xff] }
 0x6a8   : > { %3984 = vmatpush1.bf16.msra.mxu0 %v6702_v32  ;;  %v2397_v32 = vld [vmem:[%s8793_s9 + $0x660] sm:$0xff] }
 0x6a9   : > { %4025 = vmatpush1.bf16.msra.mxu1 %v6704_v33  ;;  %3985 = vmatprep.subr.bf16.mxu0 %v6687_v34  ;;  %v2390_v33 = vld [vmem:[%s8793_s9 + $0x628] sm:$0xff]  ;;  %v6831_v37 = vcombine.high %v2389_v31, %v2397_v32 }
 0x6aa   : > { %4026 = vmatprep.subr.bf16.mxu1 %v6689_v35  ;;  %v2398_v34 = vld [vmem:[%s8793_s9 + $0x668] sm:$0xff]  ;;  %v6846_v35 = vcombine.low %v2405_v23, %v2413_v24 }
 0x6ab   : > { %v6833_v38 = vcombine.high %v2390_v33, %v2398_v34  ;;  %v6832_v50 = vcombine.low %v2390_v33, %v2398_v34  ;;  %v2279_v33 = vld [vmem:[%s8793_s9 + $0x2b0] sm:$0xff] }
 0x6ac   : > { %3986 = vmatpush1.bf16.msra.mxu0 %v6686_v40  ;;  %v2381_v40 = vld [vmem:[%s8793_s9 + $0x5e0] sm:$0xff]  ;;  %v2287_v34 = vld [vmem:[%s8793_s9 + $0x2f0] sm:$0xff] }
 0x6ad   : > { %4027 = vmatpush1.bf16.msra.mxu1 %v6688_v43  ;;  %3987 = vmatprep.subr.bf16.mxu0 %v6671_v46  ;;  %v2374_v43 = vld [vmem:[%s8793_s9 + $0x5a8] sm:$0xff]  ;;  %v6815_v51 = vcombine.high %v2373_v39, %v2381_v40 }
 0x6ae   : > { %4028 = vmatprep.subr.bf16.mxu1 %v6673_v49  ;;  %v2382_v46 = vld [vmem:[%s8793_s9 + $0x5e8] sm:$0xff]  ;;  %v6830_v49 = vcombine.low %v2389_v31, %v2397_v32 }
 0x6af   : > { %v6817_v52 = vcombine.high %v2374_v43, %v2382_v46  ;;  %v6816_v59 = vcombine.low %v2374_v43, %v2382_v46  ;;  %v2263_v46 = vld [vmem:[%s8793_s9 + $0x230] sm:$0xff] }
 0x6b0   : > { %3988 = vmatpush1.bf16.msra.mxu0 %v6670_v55  ;;  %v2365_v55 = vld [vmem:[%s8793_s9 + $0x560] sm:$0xff] }
 0x6b1   : > { %4029 = vmatpush1.bf16.msra.mxu1 %v6672_v56  ;;  %3989 = vmatprep.subr.bf16.mxu0 %v6655_v57  ;;  %v2358_v56 = vld [vmem:[%s8793_s9 + $0x528] sm:$0xff]  ;;  %v6799_v61 = vcombine.high %v2357_v54, %v2365_v55 }
 0x6b2   : > { %4030 = vmatprep.subr.bf16.mxu1 %v6657_v58  ;;  %v2366_v57 = vld [vmem:[%s8793_s9 + $0x568] sm:$0xff]  ;;  %v6814_v58 = vcombine.low %v2373_v39, %v2381_v40  ;;  %v6723_v40 = vcombine.high %v2279_v33, %v2287_v34 }
 0x6b3   : > { %v6801_v62 = vcombine.high %v2358_v56, %v2366_v57  ;;  %v6800_v5 = vcombine.low %v2358_v56, %v2366_v57  ;;  %v2247_v56 = vld [vmem:[%s8793_s9 + $0x1b0] sm:$0xff] }
 0x6b4   : > { %3990 = vmatpush1.bf16.msra.mxu0 %v6654_v1  ;;  %v2349_v1 = vld [vmem:[%s8793_s9 + $0x4e0] sm:$0xff]  ;;  %v2255_v57 = vld [vmem:[%s8793_s9 + $0x1f0] sm:$0xff] }
 0x6b5   : > { %4031 = vmatpush1.bf16.msra.mxu1 %v6656_v2  ;;  %3991 = vmatprep.subr.bf16.mxu0 %v6639_v3  ;;  %v2342_v2 = vld [vmem:[%s8793_s9 + $0x4a8] sm:$0xff]  ;;  %v6783_v8 = vcombine.high %v2341_v63, %v2349_v1 }
 0x6b6   : > { %4032 = vmatprep.subr.bf16.mxu1 %v6641_v4  ;;  %v2350_v3 = vld [vmem:[%s8793_s9 + $0x4e8] sm:$0xff]  ;;  %v6798_v4 = vcombine.low %v2357_v54, %v2365_v55 }
 0x6b7   : > { %v6785_v9 = vcombine.high %v2342_v2, %v2350_v3  ;;  %v6784_v15 = vcombine.low %v2342_v2, %v2350_v3  ;;  %v2231_v2 = vld [vmem:[%s8793_s9 + $0x130] sm:$0xff] }
 0x6b8   : > { %3992 = vmatpush1.bf16.msra.mxu0 %v6638_v11  ;;  %v2333_v11 = vld [vmem:[%s8793_s9 + $0x460] sm:$0xff]  ;;  %v2239_v3 = vld [vmem:[%s8793_s9 + $0x170] sm:$0xff] }
 0x6b9   : > { %4033 = vmatpush1.bf16.msra.mxu1 %v6640_v12  ;;  %3993 = vmatprep.subr.bf16.mxu0 %v6879_v13  ;;  %v2326_v12 = vld [vmem:[%s8793_s9 + $0x428] sm:$0xff]  ;;  %v6767_v16 = vcombine.high %v2325_v10, %v2333_v11 }
 0x6ba   : > { %4034 = vmatprep.subr.bf16.mxu1 %v6881_v14  ;;  %v2334_v13 = vld [vmem:[%s8793_s9 + $0x468] sm:$0xff]  ;;  %v6782_v14 = vcombine.low %v2341_v63, %v2349_v1  ;;  %v6691_v63 = vcombine.high %v2247_v56, %v2255_v57 }
 0x6bb   : > { %v6769_v17 = vcombine.high %v2326_v12, %v2334_v13  ;;  %v6768_v23 = vcombine.low %v2326_v12, %v2334_v13  ;;  %v2215_v12 = vld [vmem:[%s8793_s9 + $0xb0] sm:$0xff] }
 0x6bc   : > { %3994 = vmatpush2.bf16.msra.mxu0 %v6878_v19  ;;  %v2319_v19 = vld [vmem:[%s8793_s9 + $0x3f0] sm:$0xff] }
 0x6bd   : > { %4035 = vmatpush2.bf16.msra.mxu1 %v6880_v20  ;;  %3995 = vmatprep.subr.bf16.mxu0 %v6863_v21  ;;  %v2312_v20 = vld [vmem:[%s8793_s9 + $0x3b8] sm:$0xff]  ;;  %v6755_v24 = vcombine.high %v2311_v18, %v2319_v19  ;;  %v2223_v13 = vld [vmem:[%s8793_s9 + $0xf0] sm:$0xff] }
 0x6be   : > { %4036 = vmatprep.subr.bf16.mxu1 %v6865_v22  ;;  %v2320_v21 = vld [vmem:[%s8793_s9 + $0x3f8] sm:$0xff]  ;;  %v6766_v22 = vcombine.low %v2325_v10, %v2333_v11  ;;  %v6675_v10 = vcombine.high %v2231_v2, %v2239_v3 }
 0x6bf   : > { %v6757_v25 = vcombine.high %v2312_v20, %v2320_v21  ;;  %v6756_v31 = vcombine.low %v2312_v20, %v2320_v21  ;;  %v2199_v20 = vld [vmem:[%s8793_s9 + $0x30] sm:$0xff] }
 0x6c0   : > { %3996 = vmatpush2.bf16.msra.mxu0 %v6862_v27  ;;  %v2303_v27 = vld [vmem:[%s8793_s9 + $0x370] sm:$0xff] }
 0x6c1   : > { %4037 = vmatpush2.bf16.msra.mxu1 %v6864_v28  ;;  %3997 = vmatprep.subr.bf16.mxu0 %v6847_v29  ;;  %v6754_v28 = vcombine.low %v2311_v18, %v2319_v19  ;;  %v2296_v29 = vld [vmem:[%s8793_s9 + $0x338] sm:$0xff]  ;;  %v6739_v32 = vcombine.high %v2295_v26, %v2303_v27  ;;  %v6659_v18 = vcombine.high %v2215_v12, %v2223_v13  ;;  %v2207_v21 = vld [vmem:[%s8793_s9 + $0x70] sm:$0xff] }
 0x6c2   : > { %4038 = vmatprep.subr.bf16.mxu1 %v6849_v30  ;;  %v2304_v30 = vld [vmem:[%s8793_s9 + $0x378] sm:$0xff] }
 0x6c3   : > { %v6740_v39 = vcombine.low %v2296_v29, %v2304_v30 }
 0x6c4   : > { %3998 = vmatpush2.bf16.msra.mxu0 %v6846_v35  ;;  %v6741_v35 = vcombine.high %v2296_v29, %v2304_v30  ;;  %v2447_v29 = vld [vmem:[%s8793_s9 + $0x7f0] sm:$0xff]  ;;  %v2440_v30 = vld [vmem:[%s8793_s9 + $0x7b8] sm:$0xff] }
 0x6c5   : > { %4039 = vmatpush2.bf16.msra.mxu1 %v6848_v36  ;;  %3999 = vmatprep.subr.bf16.mxu0 %v6831_v37  ;;  %v2280_v36 = vld [vmem:[%s8793_s9 + $0x2b8] sm:$0xff] }
 0x6c6   : > { %4040 = vmatprep.subr.bf16.mxu1 %v6833_v38  ;;  %v2288_v37 = vld [vmem:[%s8793_s9 + $0x2f8] sm:$0xff]  ;;  %v6738_v38 = vcombine.low %v2295_v26, %v2303_v27  ;;  %v6643_v26 = vcombine.high %v2199_v20, %v2207_v21 }
 0x6c7   : > { %v6725_v43 = vcombine.high %v2280_v36, %v2288_v37  ;;  %v6724_v54 = vcombine.low %v2280_v36, %v2288_v37  ;;  %v2423_v36 = vld [vmem:[%s8793_s9 + $0x730] sm:$0xff] }
 0x6c8   : > { %4000 = vmatpush2.bf16.msra.mxu0 %v6830_v49  ;;  %v2271_v49 = vld [vmem:[%s8793_s9 + $0x270] sm:$0xff] }
 0x6c9   : > { %4041 = vmatpush2.bf16.msra.mxu1 %v6832_v50  ;;  %4001 = vmatprep.subr.bf16.mxu0 %v6815_v51  ;;  %v2264_v50 = vld [vmem:[%s8793_s9 + $0x238] sm:$0xff]  ;;  %v6707_v55 = vcombine.high %v2263_v46, %v2271_v49  ;;  %v2431_v37 = vld [vmem:[%s8793_s9 + $0x770] sm:$0xff] }
 0x6ca   : > { %4042 = vmatprep.subr.bf16.mxu1 %v6817_v52  ;;  %v2272_v51 = vld [vmem:[%s8793_s9 + $0x278] sm:$0xff]  ;;  %v6722_v52 = vcombine.low %v2279_v33, %v2287_v34 }
 0x6cc   : > { %4002 = vmatpush2.bf16.msra.mxu0 %v6814_v58  ;;  %v2248_v58 = vld [vmem:[%s8793_s9 + $0x1b8] sm:$0xff] }
 0x6cd   : > { %4043 = vmatpush2.bf16.msra.mxu1 %v6816_v59  ;;  %4003 = vmatprep.subr.bf16.mxu0 %v6799_v61  ;;  %v2256_v59 = vld [vmem:[%s8793_s9 + $0x1f8] sm:$0xff]  ;;  %v6706_v61 = vcombine.low %v2263_v46, %v2271_v49  ;;  %v6867_v46 = vcombine.high %v2423_v36, %v2431_v37 }
 0x6ce   : > { %4044 = vmatprep.subr.bf16.mxu1 %v6801_v62  ;;  %v6708_v62 = vcombine.low %v2264_v50, %v2272_v51  ;;  %v6693_v1 = vcombine.high %v2248_v58, %v2256_v59 }
 0x6d0   : > { %4004 = vmatpush2.bf16.msra.mxu0 %v6798_v4  ;;  %v2232_v4 = vld [vmem:[%s8793_s9 + $0x138] sm:$0xff] }
 0x6d1   : > { %4045 = vmatpush2.bf16.msra.mxu1 %v6800_v5  ;;  %4005 = vmatprep.subr.bf16.mxu0 %v6783_v8  ;;  %v2240_v5 = vld [vmem:[%s8793_s9 + $0x178] sm:$0xff]  ;;  %v6690_v8 = vcombine.low %v2247_v56, %v2255_v57 }
 0x6d2   : > { %4046 = vmatprep.subr.bf16.mxu1 %v6785_v9  ;;  %v6692_v9 = vcombine.low %v2248_v58, %v2256_v59  ;;  %v6677_v11 = vcombine.high %v2232_v4, %v2240_v5  ;;  %v2391_v58 = vld [vmem:[%s8793_s9 + $0x630] sm:$0xff] }
 0x6d3   : > { %v2399_v59 = vld [vmem:[%s8793_s9 + $0x670] sm:$0xff] }
 0x6d4   : > { %4006 = vmatpush2.bf16.msra.mxu0 %v6782_v14  ;;  %v2216_v14 = vld [vmem:[%s8793_s9 + $0xb8] sm:$0xff] }
 0x6d5   : > { %4047 = vmatpush2.bf16.msra.mxu1 %v6784_v15  ;;  %4007 = vmatprep.subr.bf16.mxu0 %v6767_v16  ;;  %v2224_v15 = vld [vmem:[%s8793_s9 + $0xf8] sm:$0xff]  ;;  %v6674_v16 = vcombine.low %v2231_v2, %v2239_v3  ;;  %v6835_v2 = vcombine.high %v2391_v58, %v2399_v59 }
 0x6d6   : > { %4048 = vmatprep.subr.bf16.mxu1 %v6769_v17  ;;  %v6676_v17 = vcombine.low %v2232_v4, %v2240_v5  ;;  %v6661_v19 = vcombine.high %v2216_v14, %v2224_v15  ;;  %v2375_v4 = vld [vmem:[%s8793_s9 + $0x5b0] sm:$0xff] }
 0x6d7   : > { %v2383_v5 = vld [vmem:[%s8793_s9 + $0x5f0] sm:$0xff] }
 0x6d8   : > { %4008 = vmatpush2.bf16.msra.mxu0 %v6766_v22  ;;  %v2200_v22 = vld [vmem:[%s8793_s9 + $0x38] sm:$0xff] }
 0x6d9   : > { %4049 = vmatpush2.bf16.msra.mxu1 %v6768_v23  ;;  %4059 = vmatprep.subr.bf16.mxu0 %v6755_v24  ;;  %v2208_v23 = vld [vmem:[%s8793_s9 + $0x78] sm:$0xff]  ;;  %v6658_v24 = vcombine.low %v2215_v12, %v2223_v13  ;;  %v6819_v12 = vcombine.high %v2375_v4, %v2383_v5 }
 0x6da   : > { %4100 = vmatprep.subr.bf16.mxu1 %v6757_v25  ;;  %v6660_v25 = vcombine.low %v2216_v14, %v2224_v15  ;;  %v6645_v27 = vcombine.high %v2200_v22, %v2208_v23  ;;  %v6644_v33 = vcombine.low %v2200_v22, %v2208_v23  ;;  %v2359_v14 = vld [vmem:[%s8793_s9 + $0x530] sm:$0xff] }
 0x6db   : > { %4010 = vmatmul.mubr.bf16.vlgmr.msra.gmra.mxu0 %v9099_v41  ;;  %v2367_v15 = vld [vmem:[%s8793_s9 + $0x570] sm:$0xff] }
 0x6dc   : > { %4051 = vmatmul.mubr.bf16.vlgmr.msra.gmra.mxu1 %v9099_v41  ;;  %4060 = vmatpush1.bf16.msra.mxu0 %v6754_v28  ;;  %v2439_v28 = vld [vmem:[%s8793_s9 + $0x7b0] sm:$0xff] }
 0x6dd   : > { %4091 = vmatprep.mubr.bf16.mxu0 %v9103_v42  ;;  %4101 = vmatpush1.bf16.msra.mxu1 %v6756_v31  ;;  %v2448_v31 = vld [vmem:[%s8793_s9 + $0x7f8] sm:$0xff]  ;;  %v6883_v34 = vcombine.high %v2439_v28, %v2447_v29  ;;  %v2343_v22 = vld [vmem:[%s8793_s9 + $0x4b0] sm:$0xff] }
 0x6de   : > { %4132 = vmatprep.mubr.bf16.mxu1 %v9103_v42  ;;  %4061 = vmatprep.subr.bf16.mxu0 %v6739_v32  ;;  %v6709_v42 = vcombine.high %v2264_v50, %v2272_v51  ;;  %v6642_v32 = vcombine.low %v2199_v20, %v2207_v21  ;;  %v2407_v50 = vld [vmem:[%s8793_s9 + $0x6b0] sm:$0xff]  ;;  %v6803_v20 = vcombine.high %v2359_v14, %v2367_v15 }
 0x6df   : > { %4102 = vmatprep.subr.bf16.mxu1 %v6741_v35  ;;  %v6885_v35 = vcombine.high %v2440_v30, %v2448_v31  ;;  %v2415_v51 = vld [vmem:[%s8793_s9 + $0x6f0] sm:$0xff] }
 0x6e0   : > { %4062 = vmatpush1.bf16.msra.mxu0 %v6738_v38  ;;  %v2424_v38 = vld [vmem:[%s8793_s9 + $0x738] sm:$0xff]  ;;  %v6851_v56 = vcombine.high %v2407_v50, %v2415_v51  ;;  %v2351_v23 = vld [vmem:[%s8793_s9 + $0x4f0] sm:$0xff] }
 0x6e1   : > { %4103 = vmatpush1.bf16.msra.mxu1 %v6740_v39  ;;  %4063 = vmatprep.subr.bf16.mxu0 %v6723_v40  ;;  %v2432_v39 = vld [vmem:[%s8793_s9 + $0x778] sm:$0xff]  ;;  %v6882_v40 = vcombine.low %v2439_v28, %v2447_v29  ;;  %v6787_v28 = vcombine.high %v2343_v22, %v2351_v23 }
 0x6e2   : > { %4104 = vmatprep.subr.bf16.mxu1 %v6725_v43  ;;  %v6884_v43 = vcombine.low %v2440_v30, %v2448_v31  ;;  %v6869_v49 = vcombine.high %v2424_v38, %v2432_v39  ;;  %v2327_v30 = vld [vmem:[%s8793_s9 + $0x430] sm:$0xff] }
 0x6e3   : > { %v2335_v31 = vld [vmem:[%s8793_s9 + $0x470] sm:$0xff] }
 0x6e4   : > { %4064 = vmatpush1.bf16.msra.mxu0 %v6722_v52  ;;  %v2408_v52 = vld [vmem:[%s8793_s9 + $0x6b8] sm:$0xff] }
 0x6e5   : > { %4105 = vmatpush1.bf16.msra.mxu1 %v6724_v54  ;;  %4065 = vmatprep.subr.bf16.mxu0 %v6707_v55  ;;  %v2416_v54 = vld [vmem:[%s8793_s9 + $0x6f8] sm:$0xff]  ;;  %v6866_v55 = vcombine.low %v2423_v36, %v2431_v37  ;;  %v6771_v36 = vcombine.high %v2327_v30, %v2335_v31 }
 0x6e6   : > { %4106 = vmatprep.subr.bf16.mxu1 %v6709_v42  ;;  %v6868_v42 = vcombine.low %v2424_v38, %v2432_v39  ;;  %v6853_v57 = vcombine.high %v2408_v52, %v2416_v54  ;;  %v6770_v38 = vcombine.low %v2327_v30, %v2335_v31  ;;  %v7576_v30 = vld [vmem:[%s8802_s15 + $0x4] ss:$8 sps:$4 sm:$0xff]  }
 0x6e7   : > { %v7579_v31 = vld [vmem:[%s8802_s15 + $0x104] ss:$8 sps:$4 sm:$0xff]  }
 0x6e8   : > { %4066 = vmatpush1.bf16.msra.mxu0 %v6706_v61  ;;  %v2392_v61 = vld [vmem:[%s8793_s9 + $0x638] sm:$0xff] }
 0x6e9   : > { %4107 = vmatpush1.bf16.msra.mxu1 %v6708_v62  ;;  %4067 = vmatprep.subr.bf16.mxu0 %v6691_v63  ;;  %v2400_v62 = vld [vmem:[%s8793_s9 + $0x678] sm:$0xff]  ;;  %v6850_v63 = vcombine.low %v2407_v50, %v2415_v51  ;;  %v9308_v50 = vld [vmem:[%s8799_s3] sm:$0xff] }
 0x6ea   : > { %4108 = vmatprep.subr.bf16.mxu1 %v6693_v1  ;;  %v6852_v1 = vcombine.low %v2408_v52, %v2416_v54  ;;  %v6837_v3 = vcombine.high %v2392_v61, %v2400_v62  ;;  %v7540_v51 = vld [vmem:[%s8802_s15 + $0x64] ss:$8 sps:$4 sm:$0xff]   ;;  %v2460_v52 = vrot.slane %v9308_v50, %v8946_v53  ;;  %v2468_v54 = vrot.slane %v9308_v50, %v8937_v47 }
 0x6ec   : > { %4068 = vmatpush1.bf16.msra.mxu0 %v6690_v8  ;;  %v2376_v8 = vld [vmem:[%s8793_s9 + $0x5b8] sm:$0xff] }
 0x6ed   : > { %4109 = vmatpush1.bf16.msra.mxu1 %v6692_v9  ;;  %4069 = vmatprep.subr.bf16.mxu0 %v6675_v10  ;;  %v2384_v9 = vld [vmem:[%s8793_s9 + $0x5f8] sm:$0xff]  ;;  %v6834_v10 = vcombine.low %v2391_v58, %v2399_v59 }
 0x6ee   : > { %4110 = vmatprep.subr.bf16.mxu1 %v6677_v11  ;;  %v6836_v11 = vcombine.low %v2392_v61, %v2400_v62  ;;  %v6821_v13 = vcombine.high %v2376_v8, %v2384_v9  ;;  %v7541_v61 = vld [vmem:[%s8802_s15 + $0x160] ss:$8 sps:$4 sm:$0xff]   ;;  %v7546_v62 = vld [vmem:[%s8802_s15 + $0x54] ss:$8 sps:$4 sm:$0xff]  }
 0x6f0   : > { %4070 = vmatpush1.bf16.msra.mxu0 %v6674_v16  ;;  %v2360_v16 = vld [vmem:[%s8793_s9 + $0x538] sm:$0xff] }
 0x6f1   : > { %4111 = vmatpush1.bf16.msra.mxu1 %v6676_v17  ;;  %4071 = vmatprep.subr.bf16.mxu0 %v6659_v18  ;;  %v2368_v17 = vld [vmem:[%s8793_s9 + $0x578] sm:$0xff]  ;;  %v6818_v18 = vcombine.low %v2375_v4, %v2383_v5 }
 0x6f2   : > { %4112 = vmatprep.subr.bf16.mxu1 %v6661_v19  ;;  %v6820_v19 = vcombine.low %v2376_v8, %v2384_v9  ;;  %v6805_v21 = vcombine.high %v2360_v16, %v2368_v17  ;;  %v7544_v8 = vld [vmem:[%s8802_s15 + $0x50] ss:$8 sps:$4 sm:$0xff]  }
 0x6f4   : > { %4072 = vmatpush1.bf16.msra.mxu0 %v6658_v24  ;;  %v2344_v24 = vld [vmem:[%s8793_s9 + $0x4b8] sm:$0xff] }
 0x6f5   : > { %4113 = vmatpush1.bf16.msra.mxu1 %v6660_v25  ;;  %4073 = vmatprep.subr.bf16.mxu0 %v6643_v26  ;;  %v2352_v25 = vld [vmem:[%s8793_s9 + $0x4f8] sm:$0xff]  ;;  %v6802_v26 = vcombine.low %v2359_v14, %v2367_v15  ;;  %v7552_v14 = vld [vmem:[%s8802_s15 + $0x44] ss:$8 sps:$4 sm:$0xff]  }
 0x6f6   : > { %4114 = vmatprep.subr.bf16.mxu1 %v6645_v27  ;;  %v6804_v27 = vcombine.low %v2360_v16, %v2368_v17  ;;  %v6789_v29 = vcombine.high %v2344_v24, %v2352_v25  ;;  %v7555_v15 = vld [vmem:[%s8802_s15 + $0x144] ss:$8 sps:$4 sm:$0xff]   ;;  %v7550_v16 = vld [vmem:[%s8802_s15 + $0x40] ss:$8 sps:$4 sm:$0xff]  }
 0x6f7   : > { %v7553_v17 = vld [vmem:[%s8802_s15 + $0x140] ss:$8 sps:$4 sm:$0xff]  }
 0x6f8   : > { %4074 = vmatpush1.bf16.msra.mxu0 %v6642_v32  ;;  %v2328_v32 = vld [vmem:[%s8793_s9 + $0x438] sm:$0xff] }
 0x6f9   : > { %4115 = vmatpush1.bf16.msra.mxu1 %v6644_v33  ;;  %4075 = vmatprep.subr.bf16.mxu0 %v6883_v34  ;;  %v2336_v33 = vld [vmem:[%s8793_s9 + $0x478] sm:$0xff]  ;;  %v6786_v34 = vcombine.low %v2343_v22, %v2351_v23  ;;  %v7564_v22 = vld [vmem:[%s8802_s15 + $0x24] ss:$8 sps:$4 sm:$0xff]  }
 0x6fa   : > { %4116 = vmatprep.subr.bf16.mxu1 %v6885_v35  ;;  %v6788_v35 = vcombine.low %v2344_v24, %v2352_v25  ;;  %v6773_v37 = vcombine.high %v2328_v32, %v2336_v33  ;;  %v6772_v39 = vcombine.low %v2328_v32, %v2336_v33  ;;  %v7567_v23 = vld [vmem:[%s8802_s15 + $0x124] ss:$8 sps:$4 sm:$0xff]   ;;  %v7562_v24 = vld [vmem:[%s8802_s15 + $0x20] ss:$8 sps:$4 sm:$0xff]  }
 0x6fb   : > { %v7565_v25 = vld [vmem:[%s8802_s15 + $0x120] ss:$8 sps:$4 sm:$0xff]  }
 0x6fc   : > { %4076 = vmatpush2.bf16.msra.mxu0 %v6882_v40  ;;  %v7534_v40 = vld [vmem:[%s8802_s15 + $0x74] ss:$8 sps:$4 sm:$0xff]   ;;  %v7574_v32 = vld [vmem:[%s8802_s15] ss:$8 sps:$4 sm:$0xff]  }
 0x6fd   : > { %4117 = vmatpush2.bf16.msra.mxu1 %v6884_v43  ;;  %4077 = vmatprep.subr.bf16.mxu0 %v6867_v46  ;;  %v7537_v43 = vld [vmem:[%s8802_s15 + $0x174] ss:$8 sps:$4 sm:$0xff]   ;;  %v7532_v46 = vld [vmem:[%s8802_s15 + $0x70] ss:$8 sps:$4 sm:$0xff]   ;;  %v7577_v33 = vld [vmem:[%s8802_s15 + $0x100] ss:$8 sps:$4 sm:$0xff]  }
 0x6fe   : > { %4118 = vmatprep.subr.bf16.mxu1 %v6869_v49  ;;  %v7535_v49 = vld [vmem:[%s8802_s15 + $0x170] ss:$8 sps:$4 sm:$0xff]  }
 0x700   : > { %4078 = vmatpush2.bf16.msra.mxu0 %v6866_v55  ;;  %v7543_v55 = vld [vmem:[%s8802_s15 + $0x164] ss:$8 sps:$4 sm:$0xff]  }
 0x701   : > { %4119 = vmatpush2.bf16.msra.mxu1 %v6868_v42  ;;  %4079 = vmatprep.subr.bf16.mxu0 %v6851_v56 }
 0x702   : > { %4120 = vmatprep.subr.bf16.mxu1 %v6853_v57  ;;  %v7538_v57 = vld [vmem:[%s8802_s15 + $0x60] ss:$8 sps:$4 sm:$0xff]  }
 0x704   : > { %4080 = vmatpush2.bf16.msra.mxu0 %v6850_v63 }
 0x705   : > { %4121 = vmatpush2.bf16.msra.mxu1 %v6852_v1  ;;  %4081 = vmatprep.subr.bf16.mxu0 %v6835_v2  ;;  %v7549_v2 = vld [vmem:[%s8802_s15 + $0x154] ss:$8 sps:$4 sm:$0xff]  }
 0x706   : > { %4122 = vmatprep.subr.bf16.mxu1 %v6837_v3 }
 0x708   : > { %4082 = vmatpush2.bf16.msra.mxu0 %v6834_v10 }
 0x709   : > { %4123 = vmatpush2.bf16.msra.mxu1 %v6836_v11  ;;  %4083 = vmatprep.subr.bf16.mxu0 %v6819_v12  ;;  %v7547_v11 = vld [vmem:[%s8802_s15 + $0x150] ss:$8 sps:$4 sm:$0xff]  }
 0x70a   : > { %4124 = vmatprep.subr.bf16.mxu1 %v6821_v13 }
 0x70c   : > { %4084 = vmatpush2.bf16.msra.mxu0 %v6818_v18  ;;  %v7558_v18 = vld [vmem:[%s8802_s15 + $0x34] ss:$8 sps:$4 sm:$0xff]  }
 0x70d   : > { %4125 = vmatpush2.bf16.msra.mxu1 %v6820_v19  ;;  %4085 = vmatprep.subr.bf16.mxu0 %v6803_v20  ;;  %v7561_v19 = vld [vmem:[%s8802_s15 + $0x134] ss:$8 sps:$4 sm:$0xff]   ;;  %v7556_v20 = vld [vmem:[%s8802_s15 + $0x30] ss:$8 sps:$4 sm:$0xff]  }
 0x70e   : > { %4126 = vmatprep.subr.bf16.mxu1 %v6805_v21  ;;  %v7559_v21 = vld [vmem:[%s8802_s15 + $0x130] ss:$8 sps:$4 sm:$0xff]  }
 0x710   : > { %4086 = vmatpush2.bf16.msra.mxu0 %v6802_v26  ;;  %v7570_v26 = vld [vmem:[%s8802_s15 + $0x14] ss:$8 sps:$4 sm:$0xff]  }
 0x711   : > { %4127 = vmatpush2.bf16.msra.mxu1 %v6804_v27  ;;  %4087 = vmatprep.subr.bf16.mxu0 %v6787_v28  ;;  %v7573_v27 = vld [vmem:[%s8802_s15 + $0x114] ss:$8 sps:$4 sm:$0xff]   ;;  %v7568_v28 = vld [vmem:[%s8802_s15 + $0x10] ss:$8 sps:$4 sm:$0xff]  }
 0x712   : > { %4128 = vmatprep.subr.bf16.mxu1 %v6789_v29  ;;  %v7571_v29 = vld [vmem:[%s8802_s15 + $0x110] ss:$8 sps:$4 sm:$0xff]  }
 0x714   : > { %4088 = vmatpush2.bf16.msra.mxu0 %v6786_v34  ;;  %v7582_v34 = vld [vmem:[%s8802_s15 + $0xf4] ss:$8 sps:$4 sm:$0xff]  }
 0x715   : > { %4129 = vmatpush2.bf16.msra.mxu1 %v6788_v35  ;;  %4089 = vmatprep.subr.bf16.mxu0 %v6771_v36  ;;  %v7585_v35 = vld [vmem:[%s8802_s15 + $0x1f4] ss:$8 sps:$4 sm:$0xff]   ;;  %v7580_v36 = vld [vmem:[%s8802_s15 + $0xf0] ss:$8 sps:$4 sm:$0xff]  }
 0x716   : > { %4130 = vmatprep.subr.bf16.mxu1 %v6773_v37  ;;  %v7583_v37 = vld [vmem:[%s8802_s15 + $0x1f0] ss:$8 sps:$4 sm:$0xff]  }
 0x718   : > { %4090 = vmatpush2.bf16.msra.mxu0 %v6770_v38  ;;  %v7588_v38 = vld [vmem:[%s8802_s15 + $0xe4] ss:$8 sps:$4 sm:$0xff]  }
 0x719   : > { %4131 = vmatpush2.bf16.msra.mxu1 %v6772_v39  ;;  %5721 = vmatprep.subr.bf16.mxu0 %v7534_v40  ;;  %v7591_v39 = vld [vmem:[%s8802_s15 + $0x1e4] ss:$8 sps:$4 sm:$0xff]   ;;  %v7586_v40 = vld [vmem:[%s8802_s15 + $0xe0] ss:$8 sps:$4 sm:$0xff]  }
 0x71a   : > { %5762 = vmatprep.subr.bf16.mxu1 %v7537_v43  ;;  %v7589_v43 = vld [vmem:[%s8802_s15 + $0x1e0] ss:$8 sps:$4 sm:$0xff]  }
 0x71b   : > { %4092 = vmatmul.mubr.bf16.vlgmr.msra.gmra.mxu0 %v9099_v41  ;;  %v9317_v42 = vpop.f32.mrf.mxu0  ;;  %v9319_v56 = vpop.f32.mrf.mxu1 }
 0x71c   : > { %4133 = vmatmul.mubr.bf16.vlgmr.msra.gmra.mxu1 %v9099_v41  ;;  %5722 = vmatpush1.bf16.msra.mxu0 %v7532_v46  ;;  %v7594_v46 = vld [vmem:[%s8802_s15 + $0xd4] ss:$8 sps:$4 sm:$0xff]  }
 0x71d   : > { %5763 = vmatpush1.bf16.msra.mxu1 %v7535_v49  ;;  %v3849_v58 = vpop.f32.mrf.mxu0  ;;  %v3890_v59 = vpop.f32.mrf.mxu1  ;;  %5723 = vmatprep.subr.bf16.mxu0 %v7540_v51  ;;  %v7597_v49 = vld [vmem:[%s8802_s15 + $0x1d4] ss:$8 sps:$4 sm:$0xff]   ;;  %v7592_v51 = vld [vmem:[%s8802_s15 + $0xd0] ss:$8 sps:$4 sm:$0xff]  }
 0x71e   : > { %v3850_v63 = vadd.f32 %v3849_v58, %v2460_v52  ;;  %v3891_v1 = vadd.f32 %v3890_v59, %v2468_v54  ;;  %5764 = vmatprep.subr.bf16.mxu1 %v7543_v55  ;;  %v7595_v52 = vld [vmem:[%s8802_s15 + $0x1d0] ss:$8 sps:$4 sm:$0xff]   ;;  %v7600_v54 = vld [vmem:[%s8802_s15 + $0xc4] ss:$8 sps:$4 sm:$0xff]   ;;  %v7601_v58 = vld [vmem:[%s8802_s15 + $0x1c0] ss:$8 sps:$4 sm:$0xff]  }
 0x71f   : > { %v3851_v3 = vpop.f32.mrf.mxu0  ;;  %v3892_v4 = vpop.f32.mrf.mxu1  ;;  %v7603_v55 = vld [vmem:[%s8802_s15 + $0x1c4] ss:$8 sps:$4 sm:$0xff]   ;;  %v7606_v59 = vld [vmem:[%s8802_s15 + $0xb4] ss:$8 sps:$4 sm:$0xff]  }
 0x720   : > { %v4142_v5 = vmax.f32 %v3850_v63, 0.0  ;;  %v4144_v41 = vmax.f32 %v3891_v1, 0.0  ;;  %5724 = vmatpush1.bf16.msra.mxu0 %v7538_v57  ;;  %v7598_v57 = vld [vmem:[%s8802_s15 + $0xc0] ss:$8 sps:$4 sm:$0xff]   ;;  %v7607_v63 = vld [vmem:[%s8802_s15 + $0x1b0] ss:$8 sps:$4 sm:$0xff]   ;;  %v2456_v4 = vrot.slane %v9308_v50, %v8940_v48 }
 0x721   : > { %5765 = vmatpush1.bf16.msra.mxu1 %v7541_v61  ;;  %v3852_v9 = vpop.f32.mrf.mxu0  ;;  %v3893_v10 = vpop.f32.mrf.mxu1  ;;  %5725 = vmatprep.subr.bf16.mxu0 %v7546_v62  ;;  %v7609_v61 = vld [vmem:[%s8802_s15 + $0x1b4] ss:$8 sps:$4 sm:$0xff]   ;;  %v7604_v62 = vld [vmem:[%s8802_s15 + $0xb0] ss:$8 sps:$4 sm:$0xff]   ;;  %v7612_v1 = vld [vmem:[%s8802_s15 + $0xa4] ss:$8 sps:$4 sm:$0xff]  }
 0x722   : > { %v4158_v12 = vpack.c.bf16 %v4142_v5, %v4142_v5  ;;  %v4160_v13 = vpack.c.bf16 %v4144_v41, %v4144_v41  ;;  %5766 = vmatprep.subr.bf16.mxu1 %v7549_v2  ;;  %v7615_v2 = vld [vmem:[%s8802_s15 + $0x1a4] ss:$8 sps:$4 sm:$0xff]   ;;  %v7610_v3 = vld [vmem:[%s8802_s15 + $0xa0] ss:$8 sps:$4 sm:$0xff]   ;;  %v7618_v41 = vld [vmem:[%s8802_s15 + $0x94] ss:$8 sps:$4 sm:$0xff]  }
 0x723   : > { %v7613_v5 = vld [vmem:[%s8802_s15 + $0x1a0] ss:$8 sps:$4 sm:$0xff]   ;;  %v7621_v9 = vld [vmem:[%s8802_s15 + $0x194] ss:$8 sps:$4 sm:$0xff]   ;;  %v7616_v10 = vld [vmem:[%s8802_s15 + $0x90] ss:$8 sps:$4 sm:$0xff]  }
 0x724   : > { %5726 = vmatpush1.bf16.msra.mxu0 %v7544_v8  ;;  %5753 = vmatprep.mubr.bf16.mxu0 %v4158_v12  ;;  %v2464_v8 = vrot.slane %v9308_v50, %v8933_v45  ;;  %v7619_v12 = vld [vmem:[%s8802_s15 + $0x190] ss:$8 sps:$4 sm:$0xff]  }
 0x725   : > { %5767 = vmatpush1.bf16.msra.mxu1 %v7547_v11  ;;  %5794 = vmatprep.mubr.bf16.mxu1 %v4160_v13  ;;  %v3848_v11 = vadd.f32 %v9317_v42, %v2456_v4  ;;  %v7624_v13 = vld [vmem:[%s8802_s15 + $0x84] ss:$8 sps:$4 sm:$0xff]  }
 0x726   : > { %5727 = vmatprep.subr.bf16.mxu0 %v7552_v14  ;;  %5768 = vmatprep.subr.bf16.mxu1 %v7555_v15  ;;  %v3889_v14 = vadd.f32 %v9319_v56, %v2464_v8  ;;  %v7627_v15 = vld [vmem:[%s8802_s15 + $0x184] ss:$8 sps:$4 sm:$0xff]   ;;  %v7661_v8 = vld [vmem:[%s8802_s15 + $0x320] ss:$8 sps:$4 sm:$0xff]  }
 0x727   : > { %v7660_v4 = vld [vmem:[%s8802_s15 + $0x224] ss:$8 sps:$4 sm:$0xff]  }
 0x728   : > { %5728 = vmatpush1.bf16.msra.mxu0 %v7550_v16  ;;  %v7622_v16 = vld [vmem:[%s8802_s15 + $0x80] ss:$8 sps:$4 sm:$0xff]   ;;  %v4143_v42 = vmax.f32 %v3889_v14, 0.0  ;;  %v7675_v14 = vld [vmem:[%s8802_s15 + $0x304] ss:$8 sps:$4 sm:$0xff]  }
 0x729   : > { %5769 = vmatpush1.bf16.msra.mxu1 %v7553_v17  ;;  %5729 = vmatprep.subr.bf16.mxu0 %v7558_v18  ;;  %v4141_v17 = vmax.f32 %v3848_v11, 0.0  ;;  %v7625_v18 = vld [vmem:[%s8802_s15 + $0x180] ss:$8 sps:$4 sm:$0xff]   ;;  %v7664_v11 = vld [vmem:[%s8802_s15 + $0x210] ss:$8 sps:$4 sm:$0xff]  }
 0x72a   : > { %5770 = vmatprep.subr.bf16.mxu1 %v7561_v19  ;;  %v7630_v19 = vld [vmem:[%s8802_s15 + $0x274] ss:$8 sps:$4 sm:$0xff]  }
 0x72b   : > { %v4157_v56 = vpack.c.bf16 %v4141_v17, %v4141_v17  ;;  %v7678_v17 = vld [vmem:[%s8802_s15 + $0x2f4] ss:$8 sps:$4 sm:$0xff]  }
 0x72c   : > { %5730 = vmatpush1.bf16.msra.mxu0 %v7556_v20  ;;  %v7633_v20 = vld [vmem:[%s8802_s15 + $0x374] ss:$8 sps:$4 sm:$0xff]  }
 0x72d   : > { %5771 = vmatpush1.bf16.msra.mxu1 %v7559_v21  ;;  %5731 = vmatprep.subr.bf16.mxu0 %v7564_v22  ;;  %v2483_v21 = vsub.s32 7, %v8930_v44  ;;  %v7628_v22 = vld [vmem:[%s8802_s15 + $0x270] ss:$8 sps:$4 sm:$0xff]  }
 0x72e   : > { %5772 = vmatprep.subr.bf16.mxu1 %v7567_v23  ;;  %v7631_v23 = vld [vmem:[%s8802_s15 + $0x370] ss:$8 sps:$4 sm:$0xff]  }
 0x730   : > { %5732 = vmatpush1.bf16.msra.mxu0 %v7562_v24  ;;  %v7636_v24 = vld [vmem:[%s8802_s15 + $0x264] ss:$8 sps:$4 sm:$0xff]  }
 0x731   : > { %5773 = vmatpush1.bf16.msra.mxu1 %v7565_v25  ;;  %5733 = vmatprep.subr.bf16.mxu0 %v7570_v26  ;;  %v4159_v25 = vpack.c.bf16 %v4143_v42, %v4143_v42  ;;  %v2476_v26 = vrot.slane %v9308_v50, %v8955_v7  ;;  %v7679_v42 = vld [vmem:[%s8802_s15 + $0x3f0] ss:$8 sps:$4 sm:$0xff]  }
 0x732   : > { %5774 = vmatprep.subr.bf16.mxu1 %v7573_v27  ;;  %v2484_v27 = vrot.slane %v9308_v50, %v2483_v21 }
 0x734   : > { %5734 = vmatpush1.bf16.msra.mxu0 %v7568_v28  ;;  %v7639_v28 = vld [vmem:[%s8802_s15 + $0x364] ss:$8 sps:$4 sm:$0xff]  }
 0x735   : > { %5775 = vmatpush1.bf16.msra.mxu1 %v7571_v29  ;;  %5735 = vmatprep.subr.bf16.mxu0 %v7576_v30 }
 0x736   : > { %5776 = vmatprep.subr.bf16.mxu1 %v7579_v31  ;;  %v7634_v31 = vld [vmem:[%s8802_s15 + $0x260] ss:$8 sps:$4 sm:$0xff]  }
 0x738   : > { %5736 = vmatpush1.bf16.msra.mxu0 %v7574_v32 }
 0x739   : > { %5777 = vmatpush1.bf16.msra.mxu1 %v7577_v33  ;;  %5737 = vmatprep.subr.bf16.mxu0 %v7582_v34  ;;  %v7637_v34 = vld [vmem:[%s8802_s15 + $0x360] ss:$8 sps:$4 sm:$0xff]  }
 0x73a   : > { %5778 = vmatprep.subr.bf16.mxu1 %v7585_v35  ;;  %v7642_v35 = vld [vmem:[%s8802_s15 + $0x254] ss:$8 sps:$4 sm:$0xff]  }
 0x73c   : > { %5738 = vmatpush2.bf16.msra.mxu0 %v7580_v36 }
 0x73d   : > { %5779 = vmatpush2.bf16.msra.mxu1 %v7583_v37  ;;  %5739 = vmatprep.subr.bf16.mxu0 %v7588_v38  ;;  %v7645_v38 = vld [vmem:[%s8802_s15 + $0x354] ss:$8 sps:$4 sm:$0xff]  }
 0x73e   : > { %5780 = vmatprep.subr.bf16.mxu1 %v7591_v39 }
 0x740   : > { %5740 = vmatpush2.bf16.msra.mxu0 %v7586_v40 }
 0x741   : > { %5781 = vmatpush2.bf16.msra.mxu1 %v7589_v43  ;;  %5741 = vmatprep.subr.bf16.mxu0 %v7594_v46 }
 0x742   : > { %5782 = vmatprep.subr.bf16.mxu1 %v7597_v49  ;;  %v7640_v49 = vld [vmem:[%s8802_s15 + $0x250] ss:$8 sps:$4 sm:$0xff]  }
 0x744   : > { %5742 = vmatpush2.bf16.msra.mxu0 %v7592_v51 }
 0x745   : > { %5783 = vmatpush2.bf16.msra.mxu1 %v7595_v52  ;;  %5743 = vmatprep.subr.bf16.mxu0 %v7600_v54  ;;  %v7643_v54 = vld [vmem:[%s8802_s15 + $0x350] ss:$8 sps:$4 sm:$0xff]  }
 0x746   : > { %5784 = vmatprep.subr.bf16.mxu1 %v7603_v55 }
 0x748   : > { %5744 = vmatpush2.bf16.msra.mxu0 %v7598_v57 }
 0x749   : > { %5785 = vmatpush2.bf16.msra.mxu1 %v7601_v58  ;;  %5745 = vmatprep.subr.bf16.mxu0 %v7606_v59  ;;  %v7648_v58 = vld [vmem:[%s8802_s15 + $0x244] ss:$8 sps:$4 sm:$0xff]  }
 0x74a   : > { %5786 = vmatprep.subr.bf16.mxu1 %v7609_v61  ;;  %v7651_v59 = vld [vmem:[%s8802_s15 + $0x344] ss:$8 sps:$4 sm:$0xff]   ;;  %v7646_v61 = vld [vmem:[%s8802_s15 + $0x240] ss:$8 sps:$4 sm:$0xff]  }
 0x74c   : > { %5746 = vmatpush2.bf16.msra.mxu0 %v7604_v62  ;;  %v7649_v62 = vld [vmem:[%s8802_s15 + $0x340] ss:$8 sps:$4 sm:$0xff]  }
 0x74d   : > { %5787 = vmatpush2.bf16.msra.mxu1 %v7607_v63  ;;  %5747 = vmatprep.subr.bf16.mxu0 %v7612_v1  ;;  %v7654_v63 = vld [vmem:[%s8802_s15 + $0x234] ss:$8 sps:$4 sm:$0xff]  }
 0x74e   : > { %5788 = vmatprep.subr.bf16.mxu1 %v7615_v2  ;;  %v7657_v1 = vld [vmem:[%s8802_s15 + $0x334] ss:$8 sps:$4 sm:$0xff]   ;;  %v7652_v2 = vld [vmem:[%s8802_s15 + $0x230] ss:$8 sps:$4 sm:$0xff]  }
 0x750   : > { %5748 = vmatpush2.bf16.msra.mxu0 %v7610_v3  ;;  %v7655_v3 = vld [vmem:[%s8802_s15 + $0x330] ss:$8 sps:$4 sm:$0xff]  }
 0x751   : > { %5789 = vmatpush2.bf16.msra.mxu1 %v7613_v5  ;;  %5749 = vmatprep.subr.bf16.mxu0 %v7618_v41  ;;  %v7663_v5 = vld [vmem:[%s8802_s15 + $0x324] ss:$8 sps:$4 sm:$0xff]   ;;  %v7658_v41 = vld [vmem:[%s8802_s15 + $0x220] ss:$8 sps:$4 sm:$0xff]  }
 0x752   : > { %5790 = vmatprep.subr.bf16.mxu1 %v7621_v9  ;;  %v7666_v9 = vld [vmem:[%s8802_s15 + $0x214] ss:$8 sps:$4 sm:$0xff]  }
 0x754   : > { %5750 = vmatpush2.bf16.msra.mxu0 %v7616_v10  ;;  %v7669_v10 = vld [vmem:[%s8802_s15 + $0x314] ss:$8 sps:$4 sm:$0xff]  }
 0x755   : > { %5791 = vmatpush2.bf16.msra.mxu1 %v7619_v12  ;;  %5751 = vmatprep.subr.bf16.mxu0 %v7624_v13  ;;  %v7667_v12 = vld [vmem:[%s8802_s15 + $0x310] ss:$8 sps:$4 sm:$0xff]   ;;  %v7672_v13 = vld [vmem:[%s8802_s15 + $0x204] ss:$8 sps:$4 sm:$0xff]  }
 0x756   : > { %5792 = vmatprep.subr.bf16.mxu1 %v7627_v15  ;;  %v7670_v15 = vld [vmem:[%s8802_s15 + $0x200] ss:$8 sps:$4 sm:$0xff]  }
 0x758   : > { %5752 = vmatpush2.bf16.msra.mxu0 %v7622_v16  ;;  %v7673_v16 = vld [vmem:[%s8802_s15 + $0x300] ss:$8 sps:$4 sm:$0xff]  }
 0x759   : > { %5793 = vmatpush2.bf16.msra.mxu1 %v7625_v18  ;;  %5803 = vmatprep.subr.bf16.mxu0 %v7630_v19  ;;  %v7681_v18 = vld [vmem:[%s8802_s15 + $0x3f4] ss:$8 sps:$4 sm:$0xff]   ;;  %v7676_v19 = vld [vmem:[%s8802_s15 + $0x2f0] ss:$8 sps:$4 sm:$0xff]  }
 0x75a   : > { %5844 = vmatprep.subr.bf16.mxu1 %v7633_v20  ;;  %v7684_v20 = vld [vmem:[%s8802_s15 + $0x2e4] ss:$8 sps:$4 sm:$0xff]  }
 0x75b   : > { %v9398_v29 = vpop.f32.mrf.mxu0  ;;  %v9400_v30 = vpop.f32.mrf.mxu1  ;;  %5754 = vmatmul.mubr.bf16.vlgmr.msra.gmra.mxu0 %v4157_v56  ;;  %v7682_v56 = vld [vmem:[%s8802_s15 + $0x2e0] ss:$8 sps:$4 sm:$0xff]  }
 0x75c   : > { %5795 = vmatmul.mubr.bf16.vlgmr.msra.gmra.mxu1 %v4159_v25  ;;  %5804 = vmatpush1.bf16.msra.mxu0 %v7628_v22  ;;  %v7687_v22 = vld [vmem:[%s8802_s15 + $0x3e4] ss:$8 sps:$4 sm:$0xff]   ;;  %v7693_v25 = vld [vmem:[%s8802_s15 + $0x3d4] ss:$8 sps:$4 sm:$0xff]  }
 0x75d   : > { %5845 = vmatpush1.bf16.msra.mxu1 %v7631_v23  ;;  %v3931_v32 = vpop.f32.mrf.mxu0  ;;  %v3972_v33 = vpop.f32.mrf.mxu1  ;;  %5805 = vmatprep.subr.bf16.mxu0 %v7636_v24  ;;  %v7685_v23 = vld [vmem:[%s8802_s15 + $0x3e0] ss:$8 sps:$4 sm:$0xff]   ;;  %v7690_v24 = vld [vmem:[%s8802_s15 + $0x2d4] ss:$8 sps:$4 sm:$0xff]  }
 0x75e   : > { %v3932_v36 = vadd.f32 %v3931_v32, %v2476_v26  ;;  %v3973_v37 = vadd.f32 %v3972_v33, %v2484_v27  ;;  %5846 = vmatprep.subr.bf16.mxu1 %v7639_v28  ;;  %v7688_v26 = vld [vmem:[%s8802_s15 + $0x2d0] ss:$8 sps:$4 sm:$0xff]   ;;  %v7696_v28 = vld [vmem:[%s8802_s15 + $0x2c4] ss:$8 sps:$4 sm:$0xff]   ;;  %v7694_v32 = vld [vmem:[%s8802_s15 + $0x2c0] ss:$8 sps:$4 sm:$0xff]  }
 0x75f   : > { %v3933_v39 = vpop.f32.mrf.mxu0  ;;  %v3974_v40 = vpop.f32.mrf.mxu1  ;;  %v7691_v27 = vld [vmem:[%s8802_s15 + $0x3d0] ss:$8 sps:$4 sm:$0xff]   ;;  %v7697_v33 = vld [vmem:[%s8802_s15 + $0x3c0] ss:$8 sps:$4 sm:$0xff]  }
 0x760   : > { %v4146_v43 = vmax.f32 %v3932_v36, 0.0  ;;  %v4148_v46 = vmax.f32 %v3973_v37, 0.0  ;;  %5806 = vmatpush1.bf16.msra.mxu0 %v7634_v31  ;;  %v7699_v31 = vld [vmem:[%s8802_s15 + $0x3c4] ss:$8 sps:$4 sm:$0xff]   ;;  %v7700_v36 = vld [vmem:[%s8802_s15 + $0x2b0] ss:$8 sps:$4 sm:$0xff]  }
 0x761   : > { %5847 = vmatpush1.bf16.msra.mxu1 %v7637_v34  ;;  %v3934_v51 = vpop.f32.mrf.mxu0  ;;  %v3975_v52 = vpop.f32.mrf.mxu1  ;;  %5807 = vmatprep.subr.bf16.mxu0 %v7642_v35  ;;  %v7702_v34 = vld [vmem:[%s8802_s15 + $0x2b4] ss:$8 sps:$4 sm:$0xff]   ;;  %v7703_v37 = vld [vmem:[%s8802_s15 + $0x3b0] ss:$8 sps:$4 sm:$0xff]   ;;  %v2479_v39 = vsub.s32 6, %v8930_v44 }
 0x762   : > { %v4162_v55 = vpack.c.bf16 %v4146_v43, %v4146_v43  ;;  %v4164_v57 = vpack.c.bf16 %v4148_v46, %v4148_v46  ;;  %5848 = vmatprep.subr.bf16.mxu1 %v7645_v38  ;;  %v7705_v35 = vld [vmem:[%s8802_s15 + $0x3b4] ss:$8 sps:$4 sm:$0xff]   ;;  %v7708_v38 = vld [vmem:[%s8802_s15 + $0x2a4] ss:$8 sps:$4 sm:$0xff]   ;;  %v7706_v43 = vld [vmem:[%s8802_s15 + $0x2a0] ss:$8 sps:$4 sm:$0xff]   ;;  %v2472_v46 = vrot.slane %v9308_v50, %v8952_v6 }
 0x763   : > { %v7711_v40 = vld [vmem:[%s8802_s15 + $0x3a4] ss:$8 sps:$4 sm:$0xff]   ;;  %v7714_v51 = vld [vmem:[%s8802_s15 + $0x294] ss:$8 sps:$4 sm:$0xff]   ;;  %v2480_v52 = vrot.slane %v9308_v50, %v2479_v39  ;;  %v7718_v50 = vld [vmem:[%s8802_s15 + $0x280] ss:$8 sps:$4 sm:$0xff]  }
 0x764   : > { %5808 = vmatpush1.bf16.msra.mxu0 %v7640_v49  ;;  %5835 = vmatprep.mubr.bf16.mxu0 %v4162_v55  ;;  %v7709_v49 = vld [vmem:[%s8802_s15 + $0x3a0] ss:$8 sps:$4 sm:$0xff]   ;;  %v7712_v55 = vld [vmem:[%s8802_s15 + $0x290] ss:$8 sps:$4 sm:$0xff]  }
 0x765   : > { %5849 = vmatpush1.bf16.msra.mxu1 %v7643_v54  ;;  %5876 = vmatprep.mubr.bf16.mxu1 %v4164_v57  ;;  %v7717_v54 = vld [vmem:[%s8802_s15 + $0x394] ss:$8 sps:$4 sm:$0xff]   ;;  %v3930_v57 = vadd.f32 %v9398_v29, %v2472_v46  ;;  %v7756_v46 = vld [vmem:[%s8802_s15 + $0x424] ss:$8 sps:$4 sm:$0xff]   ;;  %v7910_v44 = vld [vmem:[%s8802_s15 + $0x680] ss:$8 sps:$4 sm:$0xff]  }
 0x766   : > { %5809 = vmatprep.subr.bf16.mxu0 %v7648_v58  ;;  %5850 = vmatprep.subr.bf16.mxu1 %v7651_v59  ;;  %v7715_v58 = vld [vmem:[%s8802_s15 + $0x390] ss:$8 sps:$4 sm:$0xff]   ;;  %v7720_v59 = vld [vmem:[%s8802_s15 + $0x284] ss:$8 sps:$4 sm:$0xff]   ;;  %v7726_v29 = vld [vmem:[%s8802_s15 + $0x474] ss:$8 sps:$4 sm:$0xff]  }
 0x768   : > { %5810 = vmatpush1.bf16.msra.mxu0 %v7646_v61  ;;  %v3971_v61 = vadd.f32 %v9400_v30, %v2480_v52  ;;  %v9472_v30 = vld [vmem:[%s8799_s3 + $0x8] sm:$0xff] }
 0x769   : > { %5851 = vmatpush1.bf16.msra.mxu1 %v7649_v62  ;;  %5811 = vmatprep.subr.bf16.mxu0 %v7654_v63  ;;  %v7723_v62 = vld [vmem:[%s8802_s15 + $0x384] ss:$8 sps:$4 sm:$0xff]   ;;  %v4145_v63 = vmax.f32 %v3930_v57, 0.0  ;;  %v7757_v52 = vld [vmem:[%s8802_s15 + $0x520] ss:$8 sps:$4 sm:$0xff]  }
 0x76a   : > { %5852 = vmatprep.subr.bf16.mxu1 %v7657_v1  ;;  %v7721_v1 = vld [vmem:[%s8802_s15 + $0x380] ss:$8 sps:$4 sm:$0xff]   ;;  %v7760_v57 = vld [vmem:[%s8802_s15 + $0x410] ss:$8 sps:$4 sm:$0xff]  }
 0x76c   : > { %5812 = vmatpush1.bf16.msra.mxu0 %v7652_v2  ;;  %v4147_v2 = vmax.f32 %v3971_v61, 0.0  ;;  %v7771_v61 = vld [vmem:[%s8802_s15 + $0x504] ss:$8 sps:$4 sm:$0xff]  }
 0x76d   : > { %5853 = vmatpush1.bf16.msra.mxu1 %v7655_v3  ;;  %5813 = vmatprep.subr.bf16.mxu0 %v7660_v4  ;;  %v7729_v3 = vld [vmem:[%s8802_s15 + $0x574] ss:$8 sps:$4 sm:$0xff]   ;;  %v7724_v4 = vld [vmem:[%s8802_s15 + $0x470] ss:$8 sps:$4 sm:$0xff]  }
 0x76e   : > { %5854 = vmatprep.subr.bf16.mxu1 %v7663_v5  ;;  %v4161_v5 = vpack.c.bf16 %v4145_v63, %v4145_v63  ;;  %v7774_v63 = vld [vmem:[%s8802_s15 + $0x4f4] ss:$8 sps:$4 sm:$0xff]  }
 0x770   : > { %5814 = vmatpush1.bf16.msra.mxu0 %v7658_v41  ;;  %v7727_v41 = vld [vmem:[%s8802_s15 + $0x570] ss:$8 sps:$4 sm:$0xff]  }
 0x771   : > { %5855 = vmatpush1.bf16.msra.mxu1 %v7661_v8  ;;  %5815 = vmatprep.subr.bf16.mxu0 %v7666_v9  ;;  %v7732_v8 = vld [vmem:[%s8802_s15 + $0x464] ss:$8 sps:$4 sm:$0xff]   ;;  %v4163_v9 = vpack.c.bf16 %v4147_v2, %v4147_v2  ;;  %v7775_v2 = vld [vmem:[%s8802_s15 + $0x5f0] ss:$8 sps:$4 sm:$0xff]  }
 0x772   : > { %5856 = vmatprep.subr.bf16.mxu1 %v7669_v10  ;;  %v2492_v10 = vrot.slane %v9472_v30, %v8946_v53 }
 0x774   : > { %5816 = vmatpush1.bf16.msra.mxu0 %v7664_v11  ;;  %v7735_v11 = vld [vmem:[%s8802_s15 + $0x564] ss:$8 sps:$4 sm:$0xff]  }
 0x775   : > { %5857 = vmatpush1.bf16.msra.mxu1 %v7667_v12  ;;  %5817 = vmatprep.subr.bf16.mxu0 %v7672_v13  ;;  %v2500_v13 = vrot.slane %v9472_v30, %v8937_v47 }
 0x776   : > { %5858 = vmatprep.subr.bf16.mxu1 %v7675_v14 }
 0x778   : > { %5818 = vmatpush1.bf16.msra.mxu0 %v7670_v15  ;;  %v7730_v15 = vld [vmem:[%s8802_s15 + $0x460] ss:$8 sps:$4 sm:$0xff]  }
 0x779   : > { %5859 = vmatpush1.bf16.msra.mxu1 %v7673_v16  ;;  %5819 = vmatprep.subr.bf16.mxu0 %v7678_v17  ;;  %v7733_v17 = vld [vmem:[%s8802_s15 + $0x560] ss:$8 sps:$4 sm:$0xff]  }
 0x77a   : > { %5860 = vmatprep.subr.bf16.mxu1 %v7681_v18  ;;  %v7738_v18 = vld [vmem:[%s8802_s15 + $0x454] ss:$8 sps:$4 sm:$0xff]  }
 0x77c   : > { %5820 = vmatpush2.bf16.msra.mxu0 %v7676_v19 }
 0x77d   : > { %5861 = vmatpush2.bf16.msra.mxu1 %v7679_v42  ;;  %5821 = vmatprep.subr.bf16.mxu0 %v7684_v20  ;;  %v7741_v20 = vld [vmem:[%s8802_s15 + $0x554] ss:$8 sps:$4 sm:$0xff]  }
 0x77e   : > { %5862 = vmatprep.subr.bf16.mxu1 %v7687_v22 }
 0x780   : > { %5822 = vmatpush2.bf16.msra.mxu0 %v7682_v56 }
 0x781   : > { %5863 = vmatpush2.bf16.msra.mxu1 %v7685_v23  ;;  %5823 = vmatprep.subr.bf16.mxu0 %v7690_v24  ;;  %v7736_v24 = vld [vmem:[%s8802_s15 + $0x450] ss:$8 sps:$4 sm:$0xff]  }
 0x782   : > { %5864 = vmatprep.subr.bf16.mxu1 %v7693_v25 }
 0x784   : > { %5824 = vmatpush2.bf16.msra.mxu0 %v7688_v26 }
 0x785   : > { %5865 = vmatpush2.bf16.msra.mxu1 %v7691_v27  ;;  %5825 = vmatprep.subr.bf16.mxu0 %v7696_v28  ;;  %v7739_v27 = vld [vmem:[%s8802_s15 + $0x550] ss:$8 sps:$4 sm:$0xff]  }
 0x786   : > { %5866 = vmatprep.subr.bf16.mxu1 %v7699_v31 }
 0x788   : > { %5826 = vmatpush2.bf16.msra.mxu0 %v7694_v32  ;;  %v7744_v32 = vld [vmem:[%s8802_s15 + $0x444] ss:$8 sps:$4 sm:$0xff]  }
 0x789   : > { %5867 = vmatpush2.bf16.msra.mxu1 %v7697_v33  ;;  %5827 = vmatprep.subr.bf16.mxu0 %v7702_v34  ;;  %v7747_v33 = vld [vmem:[%s8802_s15 + $0x544] ss:$8 sps:$4 sm:$0xff]  }
 0x78a   : > { %5868 = vmatprep.subr.bf16.mxu1 %v7705_v35  ;;  %v7742_v35 = vld [vmem:[%s8802_s15 + $0x440] ss:$8 sps:$4 sm:$0xff]  }
 0x78c   : > { %5828 = vmatpush2.bf16.msra.mxu0 %v7700_v36  ;;  %v7745_v36 = vld [vmem:[%s8802_s15 + $0x540] ss:$8 sps:$4 sm:$0xff]  }
 0x78d   : > { %5869 = vmatpush2.bf16.msra.mxu1 %v7703_v37  ;;  %5829 = vmatprep.subr.bf16.mxu0 %v7708_v38  ;;  %v7750_v37 = vld [vmem:[%s8802_s15 + $0x434] ss:$8 sps:$4 sm:$0xff]  }
 0x78e   : > { %5870 = vmatprep.subr.bf16.mxu1 %v7711_v40  ;;  %v7753_v38 = vld [vmem:[%s8802_s15 + $0x534] ss:$8 sps:$4 sm:$0xff]   ;;  %v7748_v40 = vld [vmem:[%s8802_s15 + $0x430] ss:$8 sps:$4 sm:$0xff]  }
 0x790   : > { %5830 = vmatpush2.bf16.msra.mxu0 %v7706_v43  ;;  %v7751_v43 = vld [vmem:[%s8802_s15 + $0x530] ss:$8 sps:$4 sm:$0xff]  }
 0x791   : > { %5871 = vmatpush2.bf16.msra.mxu1 %v7709_v49  ;;  %5831 = vmatprep.subr.bf16.mxu0 %v7714_v51  ;;  %v7759_v49 = vld [vmem:[%s8802_s15 + $0x524] ss:$8 sps:$4 sm:$0xff]   ;;  %v7754_v51 = vld [vmem:[%s8802_s15 + $0x420] ss:$8 sps:$4 sm:$0xff]  }
 0x792   : > { %5872 = vmatprep.subr.bf16.mxu1 %v7717_v54  ;;  %v7762_v54 = vld [vmem:[%s8802_s15 + $0x414] ss:$8 sps:$4 sm:$0xff]  }
 0x794   : > { %5832 = vmatpush2.bf16.msra.mxu0 %v7712_v55  ;;  %v7765_v55 = vld [vmem:[%s8802_s15 + $0x514] ss:$8 sps:$4 sm:$0xff]  }
 0x795   : > { %5873 = vmatpush2.bf16.msra.mxu1 %v7715_v58  ;;  %5833 = vmatprep.subr.bf16.mxu0 %v7720_v59  ;;  %v7763_v58 = vld [vmem:[%s8802_s15 + $0x510] ss:$8 sps:$4 sm:$0xff]   ;;  %v7768_v59 = vld [vmem:[%s8802_s15 + $0x404] ss:$8 sps:$4 sm:$0xff]  }
 0x796   : > { %5874 = vmatprep.subr.bf16.mxu1 %v7723_v62  ;;  %v7766_v62 = vld [vmem:[%s8802_s15 + $0x400] ss:$8 sps:$4 sm:$0xff]  }
 0x798   : > { %5834 = vmatpush2.bf16.msra.mxu0 %v7718_v50  ;;  %v7769_v50 = vld [vmem:[%s8802_s15 + $0x500] ss:$8 sps:$4 sm:$0xff]  }
 0x799   : > { %5875 = vmatpush2.bf16.msra.mxu1 %v7721_v1  ;;  %5885 = vmatprep.subr.bf16.mxu0 %v7726_v29  ;;  %v7777_v1 = vld [vmem:[%s8802_s15 + $0x5f4] ss:$8 sps:$4 sm:$0xff]   ;;  %v7772_v29 = vld [vmem:[%s8802_s15 + $0x4f0] ss:$8 sps:$4 sm:$0xff]  }
 0x79a   : > { %5926 = vmatprep.subr.bf16.mxu1 %v7729_v3  ;;  %v7780_v3 = vld [vmem:[%s8802_s15 + $0x4e4] ss:$8 sps:$4 sm:$0xff]  }
 0x79b   : > { %v9479_v12 = vpop.f32.mrf.mxu0  ;;  %5836 = vmatmul.mubr.bf16.vlgmr.msra.gmra.mxu0 %v4161_v5  ;;  %v7778_v5 = vld [vmem:[%s8802_s15 + $0x4e0] ss:$8 sps:$4 sm:$0xff]  }
 0x79c   : > { %v9483_v14 = vpop.f32.mrf.mxu1  ;;  %5877 = vmatmul.mubr.bf16.vlgmr.msra.gmra.mxu1 %v4163_v9  ;;  %5886 = vmatpush1.bf16.msra.mxu0 %v7724_v4  ;;  %v7783_v4 = vld [vmem:[%s8802_s15 + $0x5e4] ss:$8 sps:$4 sm:$0xff]   ;;  %v7789_v9 = vld [vmem:[%s8802_s15 + $0x5d4] ss:$8 sps:$4 sm:$0xff]  }
 0x79d   : > { %5927 = vmatpush1.bf16.msra.mxu1 %v7727_v41  ;;  %v4013_v16 = vpop.f32.mrf.mxu0  ;;  %5887 = vmatprep.subr.bf16.mxu0 %v7732_v8  ;;  %v7781_v41 = vld [vmem:[%s8802_s15 + $0x5e0] ss:$8 sps:$4 sm:$0xff]   ;;  %v7786_v8 = vld [vmem:[%s8802_s15 + $0x4d4] ss:$8 sps:$4 sm:$0xff]  }
 0x79e   : > { %v4014_v19 = vadd.f32 %v4013_v16, %v2492_v10  ;;  %v4054_v42 = vpop.f32.mrf.mxu1  ;;  %5928 = vmatprep.subr.bf16.mxu1 %v7735_v11  ;;  %v7784_v10 = vld [vmem:[%s8802_s15 + $0x4d0] ss:$8 sps:$4 sm:$0xff]   ;;  %v7790_v16 = vld [vmem:[%s8802_s15 + $0x4c0] ss:$8 sps:$4 sm:$0xff]  }
 0x79f   : > { %v4055_v22 = vadd.f32 %v4054_v42, %v2500_v13  ;;  %v4015_v47 = vpop.f32.mrf.mxu0  ;;  %v7787_v11 = vld [vmem:[%s8802_s15 + $0x5d0] ss:$8 sps:$4 sm:$0xff]   ;;  %v7792_v13 = vld [vmem:[%s8802_s15 + $0x4c4] ss:$8 sps:$4 sm:$0xff]  }
 0x7a0   : > { %v4150_v56 = vmax.f32 %v4014_v19, 0.0  ;;  %v4056_v23 = vpop.f32.mrf.mxu1  ;;  %5888 = vmatpush1.bf16.msra.mxu0 %v7730_v15  ;;  %v7795_v15 = vld [vmem:[%s8802_s15 + $0x5c4] ss:$8 sps:$4 sm:$0xff]   ;;  %v7801_v19 = vld [vmem:[%s8802_s15 + $0x5b4] ss:$8 sps:$4 sm:$0xff]  }
 0x7a1   : > { %v4152_v25 = vmax.f32 %v4055_v22, 0.0  ;;  %5929 = vmatpush1.bf16.msra.mxu1 %v7733_v17  ;;  %v4016_v26 = vpop.f32.mrf.mxu0  ;;  %5889 = vmatprep.subr.bf16.mxu0 %v7738_v18  ;;  %v7793_v17 = vld [vmem:[%s8802_s15 + $0x5c0] ss:$8 sps:$4 sm:$0xff]   ;;  %v7798_v18 = vld [vmem:[%s8802_s15 + $0x4b4] ss:$8 sps:$4 sm:$0xff]   ;;  %v2488_v23 = vrot.slane %v9472_v30, %v8940_v48 }
 0x7a2   : > { %v4166_v28 = vpack.c.bf16 %v4150_v56, %v4150_v56  ;;  %v4057_v31 = vpop.f32.mrf.mxu1  ;;  %5930 = vmatprep.subr.bf16.mxu1 %v7741_v20  ;;  %v7796_v42 = vld [vmem:[%s8802_s15 + $0x4b0] ss:$8 sps:$4 sm:$0xff]   ;;  %v7804_v22 = vld [vmem:[%s8802_s15 + $0x4a4] ss:$8 sps:$4 sm:$0xff]   ;;  %v7802_v56 = vld [vmem:[%s8802_s15 + $0x4a0] ss:$8 sps:$4 sm:$0xff]   ;;  %v2496_v26 = vrot.slane %v9472_v30, %v8933_v45 }
 0x7a3   : > { %v4168_v34 = vpack.c.bf16 %v4152_v25, %v4152_v25  ;;  %v7799_v20 = vld [vmem:[%s8802_s15 + $0x5b0] ss:$8 sps:$4 sm:$0xff]   ;;  %v7807_v47 = vld [vmem:[%s8802_s15 + $0x5a4] ss:$8 sps:$4 sm:$0xff]   ;;  %v7810_v25 = vld [vmem:[%s8802_s15 + $0x494] ss:$8 sps:$4 sm:$0xff]   ;;  %v4012_v31 = vadd.f32 %v9479_v12, %v2488_v23 }
 0x7a4   : > { %5890 = vmatpush1.bf16.msra.mxu0 %v7736_v24  ;;  %5917 = vmatprep.mubr.bf16.mxu0 %v4166_v28  ;;  %v7805_v24 = vld [vmem:[%s8802_s15 + $0x5a0] ss:$8 sps:$4 sm:$0xff]   ;;  %v7808_v28 = vld [vmem:[%s8802_s15 + $0x490] ss:$8 sps:$4 sm:$0xff]   ;;  %v7822_v12 = vld [vmem:[%s8802_s15 + $0x674] ss:$8 sps:$4 sm:$0xff]  }
 0x7a5   : > { %5931 = vmatpush1.bf16.msra.mxu1 %v7739_v27  ;;  %5958 = vmatprep.mubr.bf16.mxu1 %v4168_v34  ;;  %v7813_v27 = vld [vmem:[%s8802_s15 + $0x594] ss:$8 sps:$4 sm:$0xff]   ;;  %v4053_v34 = vadd.f32 %v9483_v14, %v2496_v26  ;;  %v7814_v45 = vld [vmem:[%s8802_s15 + $0x480] ss:$8 sps:$4 sm:$0xff]   ;;  %v7823_v14 = vld [vmem:[%s8802_s15 + $0x770] ss:$8 sps:$4 sm:$0xff]  }
 0x7a6   : > { %5891 = vmatprep.subr.bf16.mxu0 %v7744_v32  ;;  %5932 = vmatprep.subr.bf16.mxu1 %v7747_v33  ;;  %v7811_v32 = vld [vmem:[%s8802_s15 + $0x590] ss:$8 sps:$4 sm:$0xff]   ;;  %v7816_v33 = vld [vmem:[%s8802_s15 + $0x484] ss:$8 sps:$4 sm:$0xff]   ;;  %v7853_v23 = vld [vmem:[%s8802_s15 + $0x720] ss:$8 sps:$4 sm:$0xff]  }
 0x7a7   : > { %v7856_v26 = vld [vmem:[%s8802_s15 + $0x610] ss:$8 sps:$4 sm:$0xff]  }
 0x7a8   : > { %5892 = vmatpush1.bf16.msra.mxu0 %v7742_v35  ;;  %v7819_v35 = vld [vmem:[%s8802_s15 + $0x584] ss:$8 sps:$4 sm:$0xff]  }
 0x7a9   : > { %5933 = vmatpush1.bf16.msra.mxu1 %v7745_v36  ;;  %5893 = vmatprep.subr.bf16.mxu0 %v7750_v37  ;;  %v4149_v36 = vmax.f32 %v4012_v31, 0.0  ;;  %v7817_v37 = vld [vmem:[%s8802_s15 + $0x580] ss:$8 sps:$4 sm:$0xff]   ;;  %v7867_v31 = vld [vmem:[%s8802_s15 + $0x704] ss:$8 sps:$4 sm:$0xff]  }
 0x7aa   : > { %5934 = vmatprep.subr.bf16.mxu1 %v7753_v38  ;;  %v4151_v38 = vmax.f32 %v4053_v34, 0.0  ;;  %v7870_v34 = vld [vmem:[%s8802_s15 + $0x6f4] ss:$8 sps:$4 sm:$0xff]  }
 0x7ac   : > { %5894 = vmatpush1.bf16.msra.mxu0 %v7748_v40  ;;  %v7825_v40 = vld [vmem:[%s8802_s15 + $0x774] ss:$8 sps:$4 sm:$0xff]  }
 0x7ad   : > { %5935 = vmatpush1.bf16.msra.mxu1 %v7751_v43  ;;  %5895 = vmatprep.subr.bf16.mxu0 %v7756_v46  ;;  %v7820_v43 = vld [vmem:[%s8802_s15 + $0x670] ss:$8 sps:$4 sm:$0xff]   ;;  %v4165_v46 = vpack.c.bf16 %v4149_v36, %v4149_v36 }
 0x7ae   : > { %5936 = vmatprep.subr.bf16.mxu1 %v7759_v49  ;;  %v7828_v49 = vld [vmem:[%s8802_s15 + $0x664] ss:$8 sps:$4 sm:$0xff]   ;;  %v7871_v36 = vld [vmem:[%s8802_s15 + $0x7f0] ss:$8 sps:$4 sm:$0xff]  }
 0x7b0   : > { %5896 = vmatpush1.bf16.msra.mxu0 %v7754_v51  ;;  %v4167_v51 = vpack.c.bf16 %v4151_v38, %v4151_v38  ;;  %v7874_v38 = vld [vmem:[%s8802_s15 + $0x6e0] ss:$8 sps:$4 sm:$0xff]  }
 0x7b1   : > { %5937 = vmatpush1.bf16.msra.mxu1 %v7757_v52  ;;  %5897 = vmatprep.subr.bf16.mxu0 %v7762_v54  ;;  %v2508_v52 = vrot.slane %v9472_v30, %v8955_v7  ;;  %v7831_v54 = vld [vmem:[%s8802_s15 + $0x764] ss:$8 sps:$4 sm:$0xff]   ;;  %v7834_v7 = vld [vmem:[%s8802_s15 + $0x654] ss:$8 sps:$4 sm:$0xff]  }
 0x7b2   : > { %5938 = vmatprep.subr.bf16.mxu1 %v7765_v55 }
 0x7b4   : > { %5898 = vmatpush1.bf16.msra.mxu0 %v7760_v57  ;;  %v2516_v57 = vrot.slane %v9472_v30, %v2483_v21 }
 0x7b5   : > { %5939 = vmatpush1.bf16.msra.mxu1 %v7763_v58  ;;  %5899 = vmatprep.subr.bf16.mxu0 %v7768_v59  ;;  %v7826_v59 = vld [vmem:[%s8802_s15 + $0x660] ss:$8 sps:$4 sm:$0xff]  }
 0x7b6   : > { %5940 = vmatprep.subr.bf16.mxu1 %v7771_v61 }
 0x7b8   : > { %5900 = vmatpush1.bf16.msra.mxu0 %v7766_v62  ;;  %v7829_v62 = vld [vmem:[%s8802_s15 + $0x760] ss:$8 sps:$4 sm:$0xff]  }
 0x7b9   : > { %5941 = vmatpush1.bf16.msra.mxu1 %v7769_v50  ;;  %5901 = vmatprep.subr.bf16.mxu0 %v7774_v63 }
 0x7ba   : > { %5942 = vmatprep.subr.bf16.mxu1 %v7777_v1  ;;  %v7837_v1 = vld [vmem:[%s8802_s15 + $0x754] ss:$8 sps:$4 sm:$0xff]  }
 0x7bc   : > { %5902 = vmatpush2.bf16.msra.mxu0 %v7772_v29 }
 0x7bd   : > { %5943 = vmatpush2.bf16.msra.mxu1 %v7775_v2  ;;  %5903 = vmatprep.subr.bf16.mxu0 %v7780_v3 }
 0x7be   : > { %5944 = vmatprep.subr.bf16.mxu1 %v7783_v4  ;;  %v7832_v4 = vld [vmem:[%s8802_s15 + $0x650] ss:$8 sps:$4 sm:$0xff]  }
 0x7c0   : > { %5904 = vmatpush2.bf16.msra.mxu0 %v7778_v5 }
 0x7c1   : > { %5945 = vmatpush2.bf16.msra.mxu1 %v7781_v41  ;;  %5905 = vmatprep.subr.bf16.mxu0 %v7786_v8  ;;  %v7835_v8 = vld [vmem:[%s8802_s15 + $0x750] ss:$8 sps:$4 sm:$0xff]  }
 0x7c2   : > { %5946 = vmatprep.subr.bf16.mxu1 %v7789_v9 }
 0x7c4   : > { %5906 = vmatpush2.bf16.msra.mxu0 %v7784_v10 }
 0x7c5   : > { %5947 = vmatpush2.bf16.msra.mxu1 %v7787_v11  ;;  %5907 = vmatprep.subr.bf16.mxu0 %v7792_v13  ;;  %v7840_v11 = vld [vmem:[%s8802_s15 + $0x644] ss:$8 sps:$4 sm:$0xff]  }
 0x7c6   : > { %5948 = vmatprep.subr.bf16.mxu1 %v7795_v15  ;;  %v7843_v13 = vld [vmem:[%s8802_s15 + $0x744] ss:$8 sps:$4 sm:$0xff]  }
 0x7c8   : > { %5908 = vmatpush2.bf16.msra.mxu0 %v7790_v16  ;;  %v7838_v16 = vld [vmem:[%s8802_s15 + $0x640] ss:$8 sps:$4 sm:$0xff]  }
 0x7c9   : > { %5949 = vmatpush2.bf16.msra.mxu1 %v7793_v17  ;;  %5909 = vmatprep.subr.bf16.mxu0 %v7798_v18  ;;  %v7841_v17 = vld [vmem:[%s8802_s15 + $0x740] ss:$8 sps:$4 sm:$0xff]   ;;  %v7846_v18 = vld [vmem:[%s8802_s15 + $0x634] ss:$8 sps:$4 sm:$0xff]  }
 0x7ca   : > { %5950 = vmatprep.subr.bf16.mxu1 %v7801_v19  ;;  %v7849_v19 = vld [vmem:[%s8802_s15 + $0x734] ss:$8 sps:$4 sm:$0xff]  }
 0x7cc   : > { %5910 = vmatpush2.bf16.msra.mxu0 %v7796_v42  ;;  %v7844_v42 = vld [vmem:[%s8802_s15 + $0x630] ss:$8 sps:$4 sm:$0xff]  }
 0x7cd   : > { %5951 = vmatpush2.bf16.msra.mxu1 %v7799_v20  ;;  %5911 = vmatprep.subr.bf16.mxu0 %v7804_v22  ;;  %v7847_v20 = vld [vmem:[%s8802_s15 + $0x730] ss:$8 sps:$4 sm:$0xff]   ;;  %v7852_v22 = vld [vmem:[%s8802_s15 + $0x624] ss:$8 sps:$4 sm:$0xff]  }
 0x7ce   : > { %5952 = vmatprep.subr.bf16.mxu1 %v7807_v47  ;;  %v7855_v47 = vld [vmem:[%s8802_s15 + $0x724] ss:$8 sps:$4 sm:$0xff]  }
 0x7d0   : > { %5912 = vmatpush2.bf16.msra.mxu0 %v7802_v56  ;;  %v7850_v56 = vld [vmem:[%s8802_s15 + $0x620] ss:$8 sps:$4 sm:$0xff]  }
 0x7d1   : > { %5953 = vmatpush2.bf16.msra.mxu1 %v7805_v24  ;;  %5913 = vmatprep.subr.bf16.mxu0 %v7810_v25  ;;  %v7858_v24 = vld [vmem:[%s8802_s15 + $0x614] ss:$8 sps:$4 sm:$0xff]  }
 0x7d2   : > { %5954 = vmatprep.subr.bf16.mxu1 %v7813_v27  ;;  %v7861_v25 = vld [vmem:[%s8802_s15 + $0x714] ss:$8 sps:$4 sm:$0xff]   ;;  %v7859_v27 = vld [vmem:[%s8802_s15 + $0x710] ss:$8 sps:$4 sm:$0xff]  }
 0x7d4   : > { %5914 = vmatpush2.bf16.msra.mxu0 %v7808_v28  ;;  %v7864_v28 = vld [vmem:[%s8802_s15 + $0x604] ss:$8 sps:$4 sm:$0xff]  }
 0x7d5   : > { %5955 = vmatpush2.bf16.msra.mxu1 %v7811_v32  ;;  %5915 = vmatprep.subr.bf16.mxu0 %v7816_v33  ;;  %v7862_v32 = vld [vmem:[%s8802_s15 + $0x600] ss:$8 sps:$4 sm:$0xff]  }
 0x7d6   : > { %5956 = vmatprep.subr.bf16.mxu1 %v7819_v35  ;;  %v7865_v33 = vld [vmem:[%s8802_s15 + $0x700] ss:$8 sps:$4 sm:$0xff]   ;;  %v7873_v35 = vld [vmem:[%s8802_s15 + $0x7f4] ss:$8 sps:$4 sm:$0xff]  }
 0x7d8   : > { %5916 = vmatpush2.bf16.msra.mxu0 %v7814_v45  ;;  %v7868_v45 = vld [vmem:[%s8802_s15 + $0x6f0] ss:$8 sps:$4 sm:$0xff]  }
 0x7d9   : > { %5957 = vmatpush2.bf16.msra.mxu1 %v7817_v37  ;;  %5967 = vmatprep.subr.bf16.mxu0 %v7822_v12  ;;  %v7876_v37 = vld [vmem:[%s8802_s15 + $0x6e4] ss:$8 sps:$4 sm:$0xff]  }
 0x7da   : > { %6008 = vmatprep.subr.bf16.mxu1 %v7825_v40  ;;  %v7879_v12 = vld [vmem:[%s8802_s15 + $0x7e4] ss:$8 sps:$4 sm:$0xff]   ;;  %v7877_v40 = vld [vmem:[%s8802_s15 + $0x7e0] ss:$8 sps:$4 sm:$0xff]  }
 0x7db   : > { %v9557_v55 = vpop.f32.mrf.mxu0  ;;  %5918 = vmatmul.mubr.bf16.vlgmr.msra.gmra.mxu0 %v4165_v46  ;;  %v7885_v46 = vld [vmem:[%s8802_s15 + $0x7d4] ss:$8 sps:$4 sm:$0xff]  }
 0x7dc   : > { %v9562_v58 = vpop.f32.mrf.mxu1  ;;  %5959 = vmatmul.mubr.bf16.vlgmr.msra.gmra.mxu1 %v4167_v51  ;;  %5968 = vmatpush1.bf16.msra.mxu0 %v7820_v43  ;;  %v7882_v43 = vld [vmem:[%s8802_s15 + $0x6d4] ss:$8 sps:$4 sm:$0xff]   ;;  %v7888_v51 = vld [vmem:[%s8802_s15 + $0x6c4] ss:$8 sps:$4 sm:$0xff]  }
 0x7dd   : > { %6009 = vmatpush1.bf16.msra.mxu1 %v7823_v14  ;;  %v4095_v61 = vpop.f32.mrf.mxu0  ;;  %5969 = vmatprep.subr.bf16.mxu0 %v7828_v49  ;;  %v7880_v14 = vld [vmem:[%s8802_s15 + $0x6d0] ss:$8 sps:$4 sm:$0xff]  }
 0x7de   : > { %v4096_v50 = vadd.f32 %v4095_v61, %v2508_v52  ;;  %v4136_v63 = vpop.f32.mrf.mxu1  ;;  %6010 = vmatprep.subr.bf16.mxu1 %v7831_v54  ;;  %v7883_v49 = vld [vmem:[%s8802_s15 + $0x7d0] ss:$8 sps:$4 sm:$0xff]   ;;  %v7891_v52 = vld [vmem:[%s8802_s15 + $0x7c4] ss:$8 sps:$4 sm:$0xff]   ;;  %v7886_v54 = vld [vmem:[%s8802_s15 + $0x6c0] ss:$8 sps:$4 sm:$0xff]  }
 0x7df   : > { %v4137_v29 = vadd.f32 %v4136_v63, %v2516_v57  ;;  %v4097_v21 = vpop.f32.mrf.mxu0  ;;  %v7889_v57 = vld [vmem:[%s8802_s15 + $0x7c0] ss:$8 sps:$4 sm:$0xff]   ;;  %v7897_v61 = vld [vmem:[%s8802_s15 + $0x7b4] ss:$8 sps:$4 sm:$0xff]   ;;  %v7903_v63 = vld [vmem:[%s8802_s15 + $0x7a4] ss:$8 sps:$4 sm:$0xff]  }
 0x7e0   : > { %v4154_v2 = vmax.f32 %v4096_v50, 0.0  ;;  %v4138_v3 = vpop.f32.mrf.mxu1  ;;  %5970 = vmatpush1.bf16.msra.mxu0 %v7826_v59  ;;  %v7894_v59 = vld [vmem:[%s8802_s15 + $0x6b4] ss:$8 sps:$4 sm:$0xff]   ;;  %v7900_v50 = vld [vmem:[%s8802_s15 + $0x6a4] ss:$8 sps:$4 sm:$0xff]  }
 0x7e1   : > { %v4156_v5 = vmax.f32 %v4137_v29, 0.0  ;;  %6011 = vmatpush1.bf16.msra.mxu1 %v7829_v62  ;;  %v4098_v41 = vpop.f32.mrf.mxu0  ;;  %5971 = vmatprep.subr.bf16.mxu0 %v7834_v7  ;;  %v7892_v62 = vld [vmem:[%s8802_s15 + $0x6b0] ss:$8 sps:$4 sm:$0xff]   ;;  %v2504_v29 = vrot.slane %v9472_v30, %v8952_v6  ;;  %v7901_v21 = vld [vmem:[%s8802_s15 + $0x7a0] ss:$8 sps:$4 sm:$0xff]   ;;  %v2512_v3 = vrot.slane %v9472_v30, %v2479_v39 }
 0x7e2   : > { %v4170_v9 = vpack.c.bf16 %v4154_v2, %v4154_v2  ;;  %v4139_v10 = vpop.f32.mrf.mxu1  ;;  %6012 = vmatprep.subr.bf16.mxu1 %v7837_v1  ;;  %v7895_v7 = vld [vmem:[%s8802_s15 + $0x7b0] ss:$8 sps:$4 sm:$0xff]   ;;  %v7898_v1 = vld [vmem:[%s8802_s15 + $0x6a0] ss:$8 sps:$4 sm:$0xff]   ;;  %v7906_v2 = vld [vmem:[%s8802_s15 + $0x694] ss:$8 sps:$4 sm:$0xff]  }
 0x7e3   : > { %v4172_v15 = vpack.c.bf16 %v4156_v5, %v4156_v5  ;;  %v7904_v5 = vld [vmem:[%s8802_s15 + $0x690] ss:$8 sps:$4 sm:$0xff]   ;;  %v4094_v41 = vadd.f32 %v9557_v55, %v2504_v29  ;;  %v7915_v10 = vld [vmem:[%s8802_s15 + $0x784] ss:$8 sps:$4 sm:$0xff]   ;;  %v7913_v39 = vld [vmem:[%s8802_s15 + $0x780] ss:$8 sps:$4 sm:$0xff]  }
 0x7e4   : > { %5972 = vmatpush1.bf16.msra.mxu0 %v7832_v4  ;;  %5999 = vmatprep.mubr.bf16.mxu0 %v4170_v9  ;;  %v7909_v4 = vld [vmem:[%s8802_s15 + $0x794] ss:$8 sps:$4 sm:$0xff]   ;;  %v7907_v6 = vld [vmem:[%s8802_s15 + $0x790] ss:$8 sps:$4 sm:$0xff]   ;;  %v4135_v9 = vadd.f32 %v9562_v58, %v2512_v3  ;;  %v4429_v30 = vld [vmem:[%s9758_s13] sm:$0x3] }
 0x7e5   : > { %6013 = vmatpush1.bf16.msra.mxu1 %v7835_v8  ;;  %6040 = vmatprep.mubr.bf16.mxu1 %v4172_v15  ;;  %v7912_v8 = vld [vmem:[%s8802_s15 + $0x684] ss:$8 sps:$4 sm:$0xff]   ;;  %v4434_v55 = vrot.slane %v4429_v30, %v8940_v48  ;;  %v4438_v58 = vrot.slane %v4429_v30, %v8946_v53 }
 0x7e6   : > { %5973 = vmatprep.subr.bf16.mxu0 %v7840_v11  ;;  %6014 = vmatprep.subr.bf16.mxu1 %v7843_v13  ;;  %v4153_v11 = vmax.f32 %v4094_v41, 0.0  ;;  %v4155_v13 = vmax.f32 %v4135_v9, 0.0 }
 0x7e8   : > { %5974 = vmatpush1.bf16.msra.mxu0 %v7838_v16  ;;  %v4169_v15 = vpack.c.bf16 %v4153_v11, %v4153_v11  ;;  %v4171_v16 = vpack.c.bf16 %v4155_v13, %v4155_v13 }
 0x7e9   : > { %6015 = vmatpush1.bf16.msra.mxu1 %v7841_v17  ;;  %5975 = vmatprep.subr.bf16.mxu0 %v7846_v18 }
 0x7ea   : > { %6016 = vmatprep.subr.bf16.mxu1 %v7849_v19 }
 0x7ec   : > { %5976 = vmatpush1.bf16.msra.mxu0 %v7844_v42 }
 0x7ed   : > { %6017 = vmatpush1.bf16.msra.mxu1 %v7847_v20  ;;  %5977 = vmatprep.subr.bf16.mxu0 %v7852_v22 }
 0x7ee   : > { %6018 = vmatprep.subr.bf16.mxu1 %v7855_v47 }
 0x7f0   : > { %5978 = vmatpush1.bf16.msra.mxu0 %v7850_v56 }
 0x7f1   : > { %6019 = vmatpush1.bf16.msra.mxu1 %v7853_v23  ;;  %5979 = vmatprep.subr.bf16.mxu0 %v7858_v24 }
 0x7f2   : > { %6020 = vmatprep.subr.bf16.mxu1 %v7861_v25 }
 0x7f4   : > { %5980 = vmatpush1.bf16.msra.mxu0 %v7856_v26 }
 0x7f5   : > { %6021 = vmatpush1.bf16.msra.mxu1 %v7859_v27  ;;  %5981 = vmatprep.subr.bf16.mxu0 %v7864_v28 }
 0x7f6   : > { %6022 = vmatprep.subr.bf16.mxu1 %v7867_v31 }
 0x7f8   : > { %5982 = vmatpush1.bf16.msra.mxu0 %v7862_v32 }
 0x7f9   : > { %6023 = vmatpush1.bf16.msra.mxu1 %v7865_v33  ;;  %5983 = vmatprep.subr.bf16.mxu0 %v7870_v34 }
 0x7fa   : > { %6024 = vmatprep.subr.bf16.mxu1 %v7873_v35 }
 0x7fc   : > { %5984 = vmatpush2.bf16.msra.mxu0 %v7868_v45 }
 0x7fd   : > { %6025 = vmatpush2.bf16.msra.mxu1 %v7871_v36  ;;  %5985 = vmatprep.subr.bf16.mxu0 %v7876_v37 }
 0x7fe   : > { %6026 = vmatprep.subr.bf16.mxu1 %v7879_v12 }
 0x800   : > { %5986 = vmatpush2.bf16.msra.mxu0 %v7874_v38 }
 0x801   : > { %6027 = vmatpush2.bf16.msra.mxu1 %v7877_v40  ;;  %5987 = vmatprep.subr.bf16.mxu0 %v7882_v43 }
 0x802   : > { %6028 = vmatprep.subr.bf16.mxu1 %v7885_v46 }
 0x804   : > { %5988 = vmatpush2.bf16.msra.mxu0 %v7880_v14 }
 0x805   : > { %6029 = vmatpush2.bf16.msra.mxu1 %v7883_v49  ;;  %5989 = vmatprep.subr.bf16.mxu0 %v7888_v51 }
 0x806   : > { %6030 = vmatprep.subr.bf16.mxu1 %v7891_v52 }
 0x808   : > { %5990 = vmatpush2.bf16.msra.mxu0 %v7886_v54 }
 0x809   : > { %6031 = vmatpush2.bf16.msra.mxu1 %v7889_v57  ;;  %5991 = vmatprep.subr.bf16.mxu0 %v7894_v59 }
 0x80a   : > { %6032 = vmatprep.subr.bf16.mxu1 %v7897_v61 }
 0x80c   : > { %5992 = vmatpush2.bf16.msra.mxu0 %v7892_v62 }
 0x80d   : > { %6033 = vmatpush2.bf16.msra.mxu1 %v7895_v7  ;;  %5993 = vmatprep.subr.bf16.mxu0 %v7900_v50 }
 0x80e   : > { %6034 = vmatprep.subr.bf16.mxu1 %v7903_v63 }
 0x810   : > { %5994 = vmatpush2.bf16.msra.mxu0 %v7898_v1 }
 0x811   : > { %6035 = vmatpush2.bf16.msra.mxu1 %v7901_v21  ;;  %5995 = vmatprep.subr.bf16.mxu0 %v7906_v2 }
 0x812   : > { %6036 = vmatprep.subr.bf16.mxu1 %v7909_v4 }
 0x814   : > { %5996 = vmatpush2.bf16.msra.mxu0 %v7904_v5 }
 0x815   : > { %6037 = vmatpush2.bf16.msra.mxu1 %v7907_v6  ;;  %5997 = vmatprep.subr.bf16.mxu0 %v7912_v8 }
 0x816   : > { %6038 = vmatprep.subr.bf16.mxu1 %v7915_v10 }
 0x818   : > { %5998 = vmatpush2.bf16.msra.mxu0 %v7910_v44 }
 0x819   : > { %6039 = vmatpush2.bf16.msra.mxu1 %v7913_v39 }
 0x81b   : > { %v5755_v17 = vpop.f32.mrf.mxu0  ;;  %6000 = vmatmul.mubr.bf16.vlgmr.msra.gmra.mxu0 %v4169_v15 }
 0x81c   : > { %v5756_v18 = vadd.f32 %v5755_v17, %v4434_v55  ;;  %v5796_v19 = vpop.f32.mrf.mxu1  ;;  %6041 = vmatmul.mubr.bf16.vlgmr.msra.gmra.mxu1 %v4171_v16  ;;  %v6051_v17 = vld [vmem:[%s9759_s29] sm:$0x3] }
 0x81d   : > { %v5757_v42 = vpop.f32.mrf.mxu0 }
 0x81e   : > { %v5797_v20 = vadd.f32 %v5796_v19, %v5756_v18  ;;  %v5758_v22 = vadd.f32 %v5757_v42, %v4438_v58  ;;  %v5798_v47 = vpop.f32.mrf.mxu1  ;;  %v6075_v42 = vrot.slane %v6051_v17, %v8940_v48 }
 0x81f   : > { %v5759_v56 = vpop.f32.mrf.mxu0 }
 0x820   : > { %v5799_v23 = vadd.f32 %v5798_v47, %v5758_v22  ;;  %v5800_v24 = vpop.f32.mrf.mxu1 }
 0x821   : > { %v5760_v25 = vpop.f32.mrf.mxu0 }
 0x822   : > { %v5801_v26 = vpop.f32.mrf.mxu1 }
 0x85b   : > { %v5837_v27 = vpop.f32.mrf.mxu0 }
 0x85c   : > { %v5838_v28 = vadd.f32 %v5837_v27, %v5797_v20  ;;  %v5878_v31 = vpop.f32.mrf.mxu1  ;;  %v6079_v20 = vrot.slane %v6051_v17, %v8946_v53 }
 0x85d   : > { %v5839_v32 = vpop.f32.mrf.mxu0 }
 0x85e   : > { %v5879_v33 = vadd.f32 %v5878_v31, %v5838_v28  ;;  %v5840_v34 = vadd.f32 %v5839_v32, %v5799_v23  ;;  %v5880_v35 = vpop.f32.mrf.mxu1 }
 0x85f   : > { %v5841_v45 = vpop.f32.mrf.mxu0 }
 0x860   : > { %v5881_v36 = vadd.f32 %v5880_v35, %v5840_v34  ;;  %v5882_v37 = vpop.f32.mrf.mxu1 }
 0x861   : > { %v5842_v12 = vpop.f32.mrf.mxu0 }
 0x862   : > { %v5883_v38 = vpop.f32.mrf.mxu1 }
 0x89b   : > { %v5919_v40 = vpop.f32.mrf.mxu0 }
 0x89c   : > { %v5960_v43 = vpop.f32.mrf.mxu1  ;;  %v5920_v57 = vadd.f32 %v5919_v40, %v5879_v33 }
 0x89d   : > { %v5921_v46 = vpop.f32.mrf.mxu0 }
 0x89e   : > { %v5962_v14 = vpop.f32.mrf.mxu1  ;;  %v5922_v59 = vadd.f32 %v5921_v46, %v5881_v36  ;;  %v5961_v61 = vadd.f32 %v5960_v43, %v5920_v57 }
 0x89f   : > { %v5923_v49 = vpop.f32.mrf.mxu0 }
 0x8a0   : > { %v5964_v51 = vpop.f32.mrf.mxu1  ;;  %v5963_v7 = vadd.f32 %v5962_v14, %v5922_v59 }
 0x8a1   : > { %v5924_v52 = vpop.f32.mrf.mxu0 }
 0x8a2   : > { %v5965_v54 = vpop.f32.mrf.mxu1 }
 0x8db   : > { %v6001_v62 = vpop.f32.mrf.mxu0 }
 0x8dc   : > { %v6002_v50 = vadd.f32 %v6001_v62, %v5961_v61  ;;  %v6042_v63 = vpop.f32.mrf.mxu1 }
 0x8dd   : > { %v6003_v1 = vpop.f32.mrf.mxu0 }
 0x8de   : > { %v6043_v29 = vadd.f32 %v6042_v63, %v6002_v50  ;;  %v6004_v21 = vadd.f32 %v6003_v1, %v5963_v7  ;;  %v6044_v2 = vpop.f32.mrf.mxu1 }
 0x8df   : > { %v6005_v3 = vpop.f32.mrf.mxu0 }
 0x8e0   : > { %v6049_v4 = vadd.f32 %v6043_v29, %v9089_v60  ;;  %v6045_v5 = vadd.f32 %v6044_v2, %v6004_v21  ;;  %v6046_v41 = vpop.f32.mrf.mxu1 }
 0x8e1   : > { %v6006_v6 = vpop.f32.mrf.mxu0 }
 0x8e2   : > { %v6050_v8 = vadd.f32 %v6045_v5, %v9091_v0  ;;  %v6047_v9 = vpop.f32.mrf.mxu1  ;;  %v6057_v44 = vmul.f32 %v6049_v4, %v6049_v4  ;;  %v6052_v0 = vld [vmem:[%s824_s25] sm:$0x3] }
 0x8e3   : > { %v6088_v47 = vrot.slane %v6052_v0, %v8940_v48  ;;  %v6092_v56 = vrot.slane %v6052_v0, %v8946_v53 }
 0x8e4   : > { %v6053_v10 = vadd.f32 %v6050_v8, %v6049_v4  ;;  %v6058_v11 = vmul.f32 %v6050_v8, %v6050_v8 }
 0x8e6   : > { %6054 = vadd.xlane.f32.xlu0 %v6053_v10  ;;  %v6059_v39 = vadd.f32 %v6058_v11, %v6057_v44 }
 0x8e8   : > { %6060 = vadd.xlane.f32.xlu1 %v6059_v39 }
 0x96f   : > { %v6055_v30 = vpop.xlane.xlu0 %6054 }
 0x970   : > { %v6056_v13 = vmul.f32 0.00390625, %v6055_v30 }
 0x971   : > { %v6061_v55 = vpop.xlane.xlu1 %6060 }
 0x972   : > { %v6062_v15 = vmul.f32 0.00390625, %v6061_v55  ;;  %v6063_v16 = vmul.f32 %v6056_v13, %v6056_v13  ;;  %v6065_v18 = vsub.f32 %v6049_v4, %v6056_v13  ;;  %v6066_v19 = vsub.f32 %v6050_v8, %v6056_v13 }
 0x974   : > { %v6064_v60 = vsub.f32 %v6062_v15, %v6063_v16 }
 0x976   : > { %v6067_v58 = vadd.f32 1e-05, %v6064_v60 }
 0x978   : > { %7926 = vrsqrt.f32 %v6067_v58 }
 0x985   : > { %v7927_v22 = vpop.eup %7926 }
 0x986   : > { %v6069_v23 = vmul.f32 %v7927_v22, %v6065_v18  ;;  %v6070_v24 = vmul.f32 %v7927_v22, %v6066_v19 }
 0x988   : > { %v6082_v25 = vmul.f32 %v6075_v42, %v6069_v23  ;;  %v6083_v26 = vmul.f32 %v6079_v20, %v6070_v24  ;;  %6102 = sbr.rel (%p7142_p6) target bundleno = 2449 (0x991), region = 136 }
 0x98a   : > { %v6095_v27 = vadd.f32 %v6088_v47, %v6082_v25  ;;  %v6096_v28 = vadd.f32 %v6092_v56, %v6083_v26 }
 0x98c   : > { %6097 = vst [vmem:[#allocation2] sm:$0xff] %v6095_v27  ;;  %6098 = vst [vmem:[#allocation2 + $0x8] sm:$0xff] %v6096_v28 }
 0x98d   : > { %v6103_v31 = vld [vmem:[#allocation4] sm:$0xff]  ;;  %v6104_v32 = vld [vmem:[#allocation4 + $0x8] sm:$0xff] }
 0x98e   : > { %v6105_v33 = vadd.f32 %v6103_v31, %v6095_v27  ;;  %v6106_v34 = vadd.f32 %v6104_v32, %v6096_v28 }
 0x990   : > { %6107 = vst [vmem:[%s8823_s14] sm:$0xff] %v6105_v33  ;;  %6108 = vst [vmem:[%s8823_s14 + $0x8] sm:$0xff] %v6106_v34 }
 0x991 PF: > { %s43_s20 = sadd.s32 1, %s8382_s20   ;;  %s9761_s11 = sld [smem:[#allocation31_spill]] }
 0x992   : > { %p40_p10 = scmp.ge.s32.totalorder %s43_s20, 10   ;;  %s9762_s15 = sld [smem:[#allocation37_spill]] }
 0x993   : > { %s9763_s17 = sld [smem:[#allocation34_spill]]  ;;  %s9766_s29 = smov %s8358_s30 }
 0x994   : > { %s9764_s2 = sld [smem:[#allocation35_spill]]  ;;  %s9768_s16 = smov %s8374_s18 }
 0x995   : > { %s9765_s19 = sld [smem:[#allocation36_spill]] }
 0x996   :  { %42 = sbr.rel (!%p40_p10) target bundleno = 29 (0x1d), region = 263 }
 0x997   : > { %s9767_s30 = smov %s9761_s11 }
 0x99a   : > { %s9769_s18 = smov %s9764_s2 }
 0x99b   :  { %6130 = vsyncpa [#allocation5], 1 }
 0x99c   :  { %6132 = vsyncpa [#allocation5 + $0x1], 1 }
 0x99d   :  { %6133 = vsyncpa [#allocation7], 1 }
 0x99e   :  { %6135 = vsyncpa [#allocation7 + $0x1], 1 }
 0x99f   :  { %6136 = vsyncpa [#allocation10], 1 }
 0x9a0   :  { %6138 = vsyncpa [#allocation10 + $0x1], 1 }
 0x9a1   :  { %6139 = vsyncpa [#allocation13], 1 }
 0x9a2   :  { %6141 = vsyncpa [#allocation13 + $0x1], 1 }
 0x9a3   :  { %6142 = vsyncpa [#allocation16], 1 }
 0x9a4   :  { %6144 = vsyncpa [#allocation16 + $0x1], 1 }
 0x9a5   :  { %6145 = vsyncpa [#allocation19], 1 }
 0x9a6   :  { %6147 = vsyncpa [#allocation19 + $0x1], 1 }
 0x9a7   :  { %6148 = vsyncpa [#allocation22], 1 }
 0x9a8   :  { %6150 = vsyncpa [#allocation22 + $0x1], 1 }

</bundles_post_ra>
